<compile_context>
chip_gen: v7x
topology: tpu7x:2x2x1
jax: 0.10.0
libtpu: 0.0.40
codegen_flags: <defaults>
</compile_context>

<pallas_src>
import functools

import numpy as np

import jax
import jax.numpy as jnp
from jax.experimental import pallas as pl
from jax.experimental.pallas import tpu as pltpu

_LN_EPS = 1e-5
_VMEM_LIMIT = 32 * 1024 * 1024  # ceiling that is safe on v5e/v6e and v7x (64 MiB phys)


# ----------------------------------------------------------------------------
# In-kernel math helpers
# ----------------------------------------------------------------------------
def _erf_approx(x):
    # Abramowitz & Stegun 7.1.26 polynomial erf; exp / reciprocal run on the EUP.
    a1, a2, a3, a4, a5 = 0.254829592, -0.284496736, 1.421413741, -1.453152027, 1.061405429
    p = 0.3275911
    ax = jnp.abs(x)
    t = pl.reciprocal(1.0 + p * ax, approx=True)          # EUP, frees the VALU
    poly = ((((a5 * t + a4) * t + a3) * t + a2) * t + a1) * t
    y = 1.0 - poly * jnp.exp(-ax * ax)
    return jnp.where(x >= 0, y, -y)


def _gelu_exact(x):
    # erf-based ("exact") GELU matching torch.nn.GELU() default.
    return 0.5 * x * (1.0 + _erf_approx(x * 0.7071067811865475))


# ----------------------------------------------------------------------------
# Kernel 1: fused LN1 + windowed multi-head attention + projection
# (input/output layout: (B, H, W, C); one (1, ws, W, C) row strip per step)
# ----------------------------------------------------------------------------
def _window_attn_kernel(x_ref, g1_ref, b1_ref, wqkv_ref, bqkv_ref, rpb_ref,
                        wo_ref, bo_ref, *rest, num_heads, scale, eps, has_mask):
    if has_mask:
        mask_ref, o_ref = rest
    else:
        (o_ref,) = rest

    _, ws, W, C = x_ref.shape
    nwin = W // ws
    N = ws * ws
    hd = C // num_heads

    x = x_ref[0].astype(jnp.float32)                       # (ws, W, C) row strip
    # In-kernel window partition (replaces the wrapper-side HBM transposes).
    xw = jnp.concatenate(
        [x[:, w * ws:(w + 1) * ws, :].reshape(N, C) for w in range(nwin)], axis=0)

    # LayerNorm1 (per-token; commutes with cyclic shift and window partition)
    mean = jnp.mean(xw, axis=-1, keepdims=True)
    var = jnp.mean(jnp.square(xw - mean), axis=-1, keepdims=True)
    xn = (xw - mean) * jax.lax.rsqrt(var + eps) * g1_ref[...] + b1_ref[...]

    # Fused QKV projection: one (nwin*N, C) @ (C, 3C) bf16 MXU matmul, f32 acc.
    qkv = jnp.dot(xn.astype(jnp.bfloat16), wqkv_ref[...],
                  preferred_element_type=jnp.float32) + bqkv_ref[...]

    rpb = rpb_ref[...]                                      # (nh, N, N) f32
    if has_mask:
        mask = mask_ref[...]                                # (nwin, N, N) f32

    heads = []
    for h in range(num_heads):                              # few heads; static slices
        qh = (qkv[:, h * hd:(h + 1) * hd] * scale).astype(jnp.bfloat16)
        kh = qkv[:, C + h * hd:C + (h + 1) * hd].astype(jnp.bfloat16)
        vh = qkv[:, 2 * C + h * hd:2 * C + (h + 1) * hd].astype(jnp.bfloat16)
        qh = qh.reshape(nwin, N, hd)
        kh = kh.reshape(nwin, N, hd)
        vh = vh.reshape(nwin, N, hd)
        s = jnp.einsum('wnd,wmd->wnm', qh, kh, preferred_element_type=jnp.float32)
        s = s + rpb[h][None, :, :]
        if has_mask:
            s = s + mask
        s = s - jnp.max(s, axis=-1, keepdims=True)
        p = jnp.exp(s)
        p = p * pl.reciprocal(jnp.sum(p, axis=-1, keepdims=True), approx=True)
        heads.append(jnp.einsum('wnm,wmd->wnd', p.astype(jnp.bfloat16), vh,
                                preferred_element_type=jnp.float32))

    attn = jnp.concatenate(heads, axis=-1).reshape(nwin * N, C)
    out = jnp.dot(attn.astype(jnp.bfloat16), wo_ref[...],
                  preferred_element_type=jnp.float32) + bo_ref[...]

    # In-kernel window reverse back to the (ws, W, C) row strip.
    strip = jnp.concatenate(
        [out[w * N:(w + 1) * N, :].reshape(ws, ws, C) for w in range(nwin)], axis=1)
    o_ref[0] = strip.astype(o_ref.dtype)


# ----------------------------------------------------------------------------
# Kernel 2: residual + LN2 + MLP (fc1 -> GELU -> fc2) + residual
# ----------------------------------------------------------------------------
def _mlp_residual_kernel(x_ref, y_ref, g2_ref, b2_ref, w1_ref, bb1_ref,
                         w2_ref, bb2_ref, o_ref, *, eps):
    z = x_ref[...].astype(jnp.float32) + y_ref[...].astype(jnp.float32)   # residual 1
    mean = jnp.mean(z, axis=-1, keepdims=True)
    var = jnp.mean(jnp.square(z - mean), axis=-1, keepdims=True)
    zn = (z - mean) * jax.lax.rsqrt(var + eps) * g2_ref[...] + b2_ref[...]
    h = jnp.dot(zn.astype(jnp.bfloat16), w1_ref[...],
                preferred_element_type=jnp.float32) + bb1_ref[...]
    h = _gelu_exact(h)
    out = z + jnp.dot(h.astype(jnp.bfloat16), w2_ref[...],
                      preferred_element_type=jnp.float32) + bb2_ref[...]   # residual 2
    o_ref[...] = out.astype(o_ref.dtype)


# ----------------------------------------------------------------------------
# Tiling helper
# ----------------------------------------------------------------------------
def _row_tile(n_rows, cap=1024):
    # Largest multiple-of-8 divisor <= cap that still leaves >= 2 grid steps
    # (v7x has 2 TensorCores; a single-step 'parallel' grid idles one of them).
    target = min(cap, max(8, n_rows // 2))
    target -= target % 8
    for t in range(target, 7, -8):
        if n_rows % t == 0:
            return t
    return n_rows


# ----------------------------------------------------------------------------
# pallas_call wrappers
# ----------------------------------------------------------------------------
def _window_attention_call(x_img, mask, pp, *, ws, num_heads, scale, eps):
    B, H, W, C = x_img.shape
    nwin = W // ws
    N = ws * ws
    grid = (B, H // ws)
    has_mask = mask is not None

    c2 = lambda b, r: (0, 0)
    c3 = lambda b, r: (0, 0, 0)
    strip_spec = pl.BlockSpec((1, ws, W, C), lambda b, r: (b, r, 0, 0))
    in_specs = [
        strip_spec,                                                    # tokens (pre-LN)
        pl.BlockSpec((1, C), c2), pl.BlockSpec((1, C), c2),            # LN1 gamma/beta
        pl.BlockSpec((C, 3 * C), c2), pl.BlockSpec((1, 3 * C), c2),    # fused Wqkv, bqkv
        pl.BlockSpec((num_heads, N, N), c3),                           # rel. pos. bias
        pl.BlockSpec((C, C), c2), pl.BlockSpec((1, C), c2),            # Wproj, bproj
    ]
    args = [x_img, pp['ln1_g'], pp['ln1_b'], pp['wqkv'], pp['bqkv'], pp['rpb'],
            pp['wo'], pp['bo']]
    if has_mask:
        in_specs.append(pl.BlockSpec((nwin, N, N), lambda b, r: (r, 0, 0)))
        args.append(mask)

    tokens = B * H * W
    flops = tokens * (8 * C * C + 4 * N * C)
    bytes_accessed = (8 * tokens * C + 8 * C * C + 4 * num_heads * N * N
                      + (4 * (H // ws) * nwin * N * N if has_mask else 0))

    kernel = functools.partial(_window_attn_kernel, num_heads=num_heads,
                               scale=scale, eps=eps, has_mask=has_mask)
    return pl.pallas_call(
        kernel,
        out_shape=jax.ShapeDtypeStruct((B, H, W, C), x_img.dtype),
        grid_spec=pltpu.PrefetchScalarGridSpec(
            num_scalar_prefetch=0, grid=grid,
            in_specs=in_specs, out_specs=strip_spec),
        compiler_params=pltpu.CompilerParams(
            dimension_semantics=("parallel", "parallel"),
            vmem_limit_bytes=_VMEM_LIMIT),
        cost_estimate=pl.CostEstimate(
            flops=int(flops),
            transcendentals=int(tokens * num_heads * N),
            bytes_accessed=int(bytes_accessed)),
    )(*args)


def _mlp_residual_call(shortcut, attn_out, pp, *, eps):
    R, C = shortcut.shape
    hidden = pp['w1'].shape[1]
    T = _row_tile(R)
    grid = (R // T,)
    row = lambda i: (i, 0)
    c2 = lambda i: (0, 0)
    in_specs = [
        pl.BlockSpec((T, C), row), pl.BlockSpec((T, C), row),
        pl.BlockSpec((1, C), c2), pl.BlockSpec((1, C), c2),
        pl.BlockSpec((C, hidden), c2), pl.BlockSpec((1, hidden), c2),
        pl.BlockSpec((hidden, C), c2), pl.BlockSpec((1, C), c2),
    ]
    out_spec = pl.BlockSpec((T, C), row)
    return pl.pallas_call(
        functools.partial(_mlp_residual_kernel, eps=eps),
        out_shape=jax.ShapeDtypeStruct((R, C), shortcut.dtype),
        grid_spec=pltpu.PrefetchScalarGridSpec(
            num_scalar_prefetch=0, grid=grid,
            in_specs=in_specs, out_specs=out_spec),
        compiler_params=pltpu.CompilerParams(
            dimension_semantics=("parallel",),
            vmem_limit_bytes=_VMEM_LIMIT),
        cost_estimate=pl.CostEstimate(
            flops=int(4 * R * C * hidden),
            transcendentals=int(2 * R * hidden),
            bytes_accessed=int(4 * 3 * R * C + 2 * 2 * C * hidden + 4 * (hidden + 3 * C))),
    )(shortcut, attn_out, pp['ln2_g'], pp['ln2_b'], pp['w1'], pp['b1'],
      pp['w2'], pp['b2'])


# ----------------------------------------------------------------------------
# Static tables + parameter re-layout (PyTorch layout -> kernel layout)
# ----------------------------------------------------------------------------
def _relative_position_index_np(ws):
    coords = np.stack(np.meshgrid(np.arange(ws), np.arange(ws), indexing="ij"))
    cf = coords.reshape(2, -1)
    rel = (cf[:, :, None] - cf[:, None, :]).transpose(1, 2, 0).astype(np.int64)
    rel[:, :, 0] += ws - 1
    rel[:, :, 1] += ws - 1
    rel[:, :, 0] *= 2 * ws - 1
    return rel.sum(-1)                                        # (N, N)


def _attn_mask_np(H, W, ws, ss):
    img = np.zeros((H, W), np.float32)
    slices = (slice(0, -ws), slice(-ws, -ss), slice(-ss, None))
    cnt = 0
    for hs in slices:
        for wsl in slices:
            img[hs, wsl] = cnt
            cnt += 1
    mw = img.reshape(H // ws, ws, W // ws, ws).transpose(0, 2, 1, 3).reshape(-1, ws * ws)
    am = mw[:, None, :] - mw[:, :, None]
    return np.where(am != 0, -100.0, 0.0).astype(np.float32)  # (nW, N, N) row-major windows


def _prep_block_params(p, num_heads, ws):
    # TODO(synk): if min(input_resolution) <= window_size, PyTorch rebuilds the rpb table
    # for the shrunken window; here the original table is re-indexed for the smaller ws.
    C = p['ln1_g'].shape[0]
    N = ws * ws
    rpi = _relative_position_index_np(ws)
    rpb = p['rpb_table'][rpi.reshape(-1)].reshape(N, N, num_heads)
    return {
        'ln1_g': p['ln1_g'].reshape(1, C).astype(jnp.float32),
        'ln1_b': p['ln1_b'].reshape(1, C).astype(jnp.float32),
        # x @ qkv_w.T : keep PyTorch's head interleaving (columns = [q|k|v] x [head, hd])
        'wqkv': p['qkv_w'].T.astype(jnp.bfloat16),            # (C, 3C), bf16 MXU operand
        'bqkv': p['qkv_b'].reshape(1, 3 * C).astype(jnp.float32),
        'rpb': jnp.transpose(rpb, (2, 0, 1)).astype(jnp.float32),   # (nh, N, N)
        'wo': p['proj_w'].T.astype(jnp.bfloat16),             # (C, C)
        'bo': p['proj_b'].reshape(1, C).astype(jnp.float32),
        'ln2_g': p['ln2_g'].reshape(1, C).astype(jnp.float32),
        'ln2_b': p['ln2_b'].reshape(1, C).astype(jnp.float32),
        'w1': p['fc1_w'].T.astype(jnp.bfloat16),
        'b1': p['fc1_b'].reshape(1, -1).astype(jnp.float32),
        'w2': p['fc2_w'].T.astype(jnp.bfloat16),
        'b2': p['fc2_b'].reshape(1, C).astype(jnp.float32),
    }


# ----------------------------------------------------------------------------
# SwinTransformerBlock / BasicLayer forward (Pallas path)
# ----------------------------------------------------------------------------
def swin_block_forward(x, p, x_size, *, num_heads, window_size, shift_size,
                       input_resolution, eps=_LN_EPS):
    H, W = x_size
    B, L, C = x.shape
    ws, ss = window_size, shift_size
    if min(input_resolution) <= ws:            # same adjustment as the PyTorch block
        ss = 0
        ws = min(input_resolution)
    hd = C // num_heads
    scale = hd ** -0.5
    pp = _prep_block_params(p, num_heads, ws)

    xs = x.reshape(B, H, W, C)                 # free reshape; activation stays (B,H,W,C)
    if ss > 0:
        xs = jnp.roll(xs, shift=(-ss, -ss), axis=(1, 2))
        mask = jnp.asarray(_attn_mask_np(H, W, ws, ss))
    else:
        mask = None                            # static specialization: no zero-mask DMA

    attn = _window_attention_call(xs, mask, pp, ws=ws, num_heads=num_heads,
                                  scale=scale, eps=eps)

    # Residuals / LN2 / MLP are per-token => they commute with the cyclic shift,
    # so run them in the shifted frame and un-roll only once at the end.
    out = _mlp_residual_call(xs.reshape(B * H * W, C),
                             attn.reshape(B * H * W, C), pp, eps=eps)
    out = out.reshape(B, H, W, C)
    if ss > 0:
        out = jnp.roll(out, shift=(ss, ss), axis=(1, 2))
    return out.reshape(B, L, C)


def basic_layer_forward(x, block_params, x_size, *, num_heads, window_size,
                        input_resolution, eps=_LN_EPS):
    for i, p in enumerate(block_params):
        shift = 0 if i % 2 == 0 else window_size // 2
        x = swin_block_forward(x, p, x_size, num_heads=num_heads,
                               window_size=window_size, shift_size=shift,
                               input_resolution=input_resolution, eps=eps)
    # TODO(synk): downsample is None in the default BasicLayer config; nothing to apply.
    return x


# ----------------------------------------------------------------------------
# Pure-JAX f32 reference (mirrors the PyTorch module op-for-op)
# ----------------------------------------------------------------------------
_HI = jax.lax.Precision.HIGHEST


def _ref_layernorm(x, g, b, eps=_LN_EPS):
    mean = jnp.mean(x, axis=-1, keepdims=True)
    var = jnp.mean(jnp.square(x - mean), axis=-1, keepdims=True)
    return (x - mean) / jnp.sqrt(var + eps) * g + b


def _ref_window_partition(x, ws):
    B, H, W, C = x.shape
    x = x.reshape(B, H // ws, ws, W // ws, ws, C)
    return jnp.transpose(x, (0, 1, 3, 2, 4, 5)).reshape(-1, ws, ws, C)


def _ref_window_reverse(wins, ws, H, W):
    B = wins.shape[0] // ((H // ws) * (W // ws))
    x = wins.reshape(B, H // ws, W // ws, ws, ws, -1)
    return jnp.transpose(x, (0, 1, 3, 2, 4, 5)).reshape(B, H, W, -1)


def _ref_window_attention(xw, p, num_heads, ws, mask):
    B_, N, C = xw.shape
    hd = C // num_heads
    scale = hd ** -0.5
    qkv = jnp.dot(xw, p['qkv_w'].T, precision=_HI) + p['qkv_b']
    qkv = qkv.reshape(B_, N, 3, num_heads, hd).transpose(2, 0, 3, 1, 4)
    q, k, v = qkv[0] * scale, qkv[1], qkv[2]
    attn = jnp.einsum('bhnd,bhmd->bhnm', q, k, precision=_HI)
    rpi = _relative_position_index_np(ws)
    rpb = p['rpb_table'][rpi.reshape(-1)].reshape(N, N, num_heads).transpose(2, 0, 1)
    attn = attn + rpb[None]
    if mask is not None:
        nW = mask.shape[0]
        attn = attn.reshape(B_ // nW, nW, num_heads, N, N) + mask[None, :, None]
        attn = attn.reshape(-1, num_heads, N, N)
    attn = jax.nn.softmax(attn, axis=-1)
    out = jnp.einsum('bhnm,bhmd->bhnd', attn, v, precision=_HI)
    out = out.transpose(0, 2, 1, 3).reshape(B_, N, C)
    return jnp.dot(out, p['proj_w'].T, precision=_HI) + p['proj_b']


def _ref_mlp(x, p):
    h = jnp.dot(x, p['fc1_w'].T, precision=_HI) + p['fc1_b']
    h = jax.nn.gelu(h, approximate=False)
    return jnp.dot(h, p['fc2_w'].T, precision=_HI) + p['fc2_b']


def _ref_swin_block(x, p, x_size, *, num_heads, window_size, shift_size,
                    input_resolution, eps=_LN_EPS):
    H, W = x_size
    B, L, C = x.shape
    ws, ss = window_size, shift_size
    if min(input_resolution) <= ws:
        ss = 0
        ws = min(input_resolution)
    shortcut = x
    xx = _ref_layernorm(x, p['ln1_g'], p['ln1_b'], eps).reshape(B, H, W, C)
    if ss > 0:
        xx = jnp.roll(xx, shift=(-ss, -ss), axis=(1, 2))
    xw = _ref_window_partition(xx, ws).reshape(-1, ws * ws, C)
    mask = jnp.asarray(_attn_mask_np(H, W, ws, ss)) if ss > 0 else None
    aw = _ref_window_attention(xw, p, num_heads, ws, mask).reshape(-1, ws, ws, C)
    xx = _ref_window_reverse(aw, ws, H, W)
    if ss > 0:
        xx = jnp.roll(xx, shift=(ss, ss), axis=(1, 2))
    x = shortcut + xx.reshape(B, L, C)
    return x + _ref_mlp(_ref_layernorm(x, p['ln2_g'], p['ln2_b'], eps), p)


def _ref_basic_layer(x, block_params, x_size, *, num_heads, window_size,
                     input_resolution):
    for i, p in enumerate(block_params):
        shift = 0 if i % 2 == 0 else window_size // 2
        x = _ref_swin_block(x, p, x_size, num_heads=num_heads,
                            window_size=window_size, shift_size=shift,
                            input_resolution=input_resolution)
    return x


# ----------------------------------------------------------------------------
# Self-test
# ----------------------------------------------------------------------------
if __name__ == "__main__":
    B, dim = 2, 32
    H = W = 16
    depth, num_heads, window_size = 2, 2, 8     # block 0: no shift, block 1: shifted
    mlp_ratio = 4.0
    L = H * W
    hidden = int(dim * mlp_ratio)

    key = jax.random.PRNGKey(0)
    keys = jax.random.split(key, depth + 1)
    x = jax.random.normal(keys[0], (B, L, dim), dtype=jnp.float32)

    blocks = []
    for i in range(depth):
        bk = jax.random.split(keys[i + 1], 12)
        blocks.append({
            'ln1_g': 1.0 + 0.1 * jax.random.normal(bk[0], (dim,), jnp.float32),
            'ln1_b': 0.05 * jax.random.normal(bk[1], (dim,), jnp.float32),
            'qkv_w': 0.1 * jax.random.normal(bk[2], (3 * dim, dim), jnp.float32),
            'qkv_b': 0.02 * jax.random.normal(bk[3], (3 * dim,), jnp.float32),
            'rpb_table': 0.02 * jax.random.normal(
                bk[4], ((2 * window_size - 1) ** 2, num_heads), jnp.float32),
            'proj_w': 0.1 * jax.random.normal(bk[5], (dim, dim), jnp.float32),
            'proj_b': 0.02 * jax.random.normal(bk[6], (dim,), jnp.float32),
            'ln2_g': 1.0 + 0.1 * jax.random.normal(bk[7], (dim,), jnp.float32),
            'ln2_b': 0.05 * jax.random.normal(bk[8], (dim,), jnp.float32),
            'fc1_w': 0.1 * jax.random.normal(bk[9], (hidden, dim), jnp.float32),
            'fc1_b': 0.02 * jax.random.normal(bk[10], (hidden,), jnp.float32),
            'fc2_w': 0.1 * jax.random.normal(bk[11], (dim, hidden), jnp.float32),
            'fc2_b': jnp.zeros((dim,), jnp.float32),
        })

    fwd = jax.jit(functools.partial(basic_layer_forward, x_size=(H, W),
                                    num_heads=num_heads, window_size=window_size,
                                    input_resolution=(H, W)))
    out = jax.block_until_ready(fwd(x, blocks))

    ref = _ref_basic_layer(x, blocks, (H, W), num_heads=num_heads,
                           window_size=window_size, input_resolution=(H, W))
    err = float(jnp.max(jnp.abs(out - ref)))
    mean_err = float(jnp.mean(jnp.abs(out - ref)))

    assert out.shape == (B, L, dim), out.shape
    # Tolerance covers bf16 MXU operands (f32 accumulation), approx EUP reciprocals in
    # softmax/GELU and the 1.5e-7 polynomial erf, accumulated across 2 stacked blocks
    # (output magnitude ~O(1-4)); real layout/semantics bugs show up as O(0.1+) errors.
    assert err < 5e-2, f"max abs error vs reference: {err}"
    assert mean_err < 1e-2, f"mean abs error vs reference: {mean_err}"
    print("KERNEL_OK")
</pallas_src>

<mosaic_0001>
module attributes {stable_mosaic.version = 11 : i64} {
  func.func @_window_attn_kernel(%arg0: i32, %arg1: i32, %arg2: memref<1x8x16x32xf32, #tpu.memory_space<vmem>>, %arg3: memref<1x32xf32, #tpu.memory_space<vmem>>, %arg4: memref<1x32xf32, #tpu.memory_space<vmem>>, %arg5: memref<32x96xbf16, #tpu.memory_space<vmem>>, %arg6: memref<1x96xf32, #tpu.memory_space<vmem>>, %arg7: memref<2x64x64xf32, #tpu.memory_space<vmem>>, %arg8: memref<32x32xbf16, #tpu.memory_space<vmem>>, %arg9: memref<1x32xf32, #tpu.memory_space<vmem>>, %arg10: memref<1x8x16x32xf32, #tpu.memory_space<vmem>>) attributes {dimension_semantics = [#tpu.dimension_semantics<parallel>, #tpu.dimension_semantics<parallel>], iteration_bounds = array<i64: 2, 2>, scalar_prefetch = 0 : i64, scratch_operands = 0 : i64, tpu.core_type = #tpu.core_type<tc>, window_params = [{transform_indices = @transform_0, window_bounds = array<i64: 1, 8, 16, 32>}, {pipeline_mode = #tpu.pipeline_mode<synchronous>, transform_indices = @transform_1, window_bounds = array<i64: 1, 32>}, {pipeline_mode = #tpu.pipeline_mode<synchronous>, transform_indices = @transform_2, window_bounds = array<i64: 1, 32>}, {pipeline_mode = #tpu.pipeline_mode<synchronous>, transform_indices = @transform_3, window_bounds = array<i64: 32, 96>}, {pipeline_mode = #tpu.pipeline_mode<synchronous>, transform_indices = @transform_4, window_bounds = array<i64: 1, 96>}, {pipeline_mode = #tpu.pipeline_mode<synchronous>, transform_indices = @transform_5, window_bounds = array<i64: 2, 64, 64>}, {pipeline_mode = #tpu.pipeline_mode<synchronous>, transform_indices = @transform_6, window_bounds = array<i64: 32, 32>}, {pipeline_mode = #tpu.pipeline_mode<synchronous>, transform_indices = @transform_7, window_bounds = array<i64: 1, 32>}, {transform_indices = @transform_8, window_bounds = array<i64: 1, 8, 16, 32>}]} {
    %c0 = arith.constant 0 : index
    %c0_0 = arith.constant 0 : index
    %c0_1 = arith.constant 0 : index
    %c0_2 = arith.constant 0 : index
    %0 = vector.load %arg2[%c0, %c0_0, %c0_1, %c0_2] : memref<1x8x16x32xf32, #tpu.memory_space<vmem>>, vector<1x8x16x32xf32>
    %1 = vector.shape_cast %0 : vector<1x8x16x32xf32> to vector<8x16x32xf32>
    %2 = vector.extract_strided_slice %1 {offsets = [0, 0, 0], sizes = [8, 8, 32], strides = [1, 1, 1]} : vector<8x16x32xf32> to vector<8x8x32xf32>
    %3 = vector.shape_cast %2 : vector<8x8x32xf32> to vector<64x32xf32>
    %4 = vector.extract_strided_slice %1 {offsets = [0, 8, 0], sizes = [8, 8, 32], strides = [1, 1, 1]} : vector<8x16x32xf32> to vector<8x8x32xf32>
    %5 = vector.shape_cast %4 : vector<8x8x32xf32> to vector<64x32xf32>
    %6 = tpu.concatenate %3, %5 in 0 : vector<64x32xf32>, vector<64x32xf32> -> vector<128x32xf32>
    %cst = arith.constant dense<0.000000e+00> : vector<128xf32>
    %7 = vector.multi_reduction <add>, %6, %cst [1] : vector<128x32xf32> to vector<128xf32>
    %8 = vector.shape_cast %7 : vector<128xf32> to vector<128x1xf32>
    %cst_3 = arith.constant 3.200000e+01 : f32
    %9 = vector.broadcast %cst_3 : f32 to vector<128x1xf32>
    %10 = arith.divf %8, %9 : vector<128x1xf32>
    %11 = vector.broadcast %10 : vector<128x1xf32> to vector<128x32xf32>
    %12 = arith.subf %6, %11 : vector<128x32xf32>
    %13 = arith.mulf %12, %12 : vector<128x32xf32>
    %cst_4 = arith.constant dense<0.000000e+00> : vector<128xf32>
    %14 = vector.multi_reduction <add>, %13, %cst_4 [1] : vector<128x32xf32> to vector<128xf32>
    %15 = vector.shape_cast %14 : vector<128xf32> to vector<128x1xf32>
    %cst_5 = arith.constant 3.200000e+01 : f32
    %16 = vector.broadcast %cst_5 : f32 to vector<128x1xf32>
    %17 = arith.divf %15, %16 : vector<128x1xf32>
    %18 = vector.broadcast %10 : vector<128x1xf32> to vector<128x32xf32>
    %19 = arith.subf %6, %18 : vector<128x32xf32>
    %cst_6 = arith.constant 9.99999974E-6 : f32
    %20 = vector.broadcast %cst_6 : f32 to vector<128x1xf32>
    %21 = arith.addf %17, %20 : vector<128x1xf32>
    %22 = math.rsqrt %21 : vector<128x1xf32>
    %23 = vector.broadcast %22 : vector<128x1xf32> to vector<128x32xf32>
    %24 = arith.mulf %19, %23 : vector<128x32xf32>
    %c0_7 = arith.constant 0 : index
    %c0_8 = arith.constant 0 : index
    %25 = vector.load %arg3[%c0_7, %c0_8] : memref<1x32xf32, #tpu.memory_space<vmem>>, vector<1x32xf32>
    %26 = vector.broadcast %25 : vector<1x32xf32> to vector<128x32xf32>
    %27 = arith.mulf %24, %26 : vector<128x32xf32>
    %c0_9 = arith.constant 0 : index
    %c0_10 = arith.constant 0 : index
    %28 = vector.load %arg4[%c0_9, %c0_10] : memref<1x32xf32, #tpu.memory_space<vmem>>, vector<1x32xf32>
    %29 = vector.broadcast %28 : vector<1x32xf32> to vector<128x32xf32>
    %30 = arith.addf %27, %29 : vector<128x32xf32>
    %31 = arith.truncf %30 : vector<128x32xf32> to vector<128x32xbf16>
    %c0_11 = arith.constant 0 : index
    %c0_12 = arith.constant 0 : index
    %32 = vector.load %arg5[%c0_11, %c0_12] : memref<32x96xbf16, #tpu.memory_space<vmem>>, vector<32x96xbf16>
    %cst_13 = arith.constant dense<0.000000e+00> : vector<128x96xf32>
    %33 = tpu.matmul %31, %32, %cst_13 {dimension_numbers = #tpu.dot_dimension_numbers<[1], [0], [0], [1], [0, 0, 1, 1], [], []>} : vector<128x32xbf16>, vector<32x96xbf16>, vector<128x96xf32> -> vector<128x96xf32>
    %c0_14 = arith.constant 0 : index
    %c0_15 = arith.constant 0 : index
    %34 = vector.load %arg6[%c0_14, %c0_15] : memref<1x96xf32, #tpu.memory_space<vmem>>, vector<1x96xf32>
    %35 = vector.broadcast %34 : vector<1x96xf32> to vector<128x96xf32>
    %36 = arith.addf %33, %35 : vector<128x96xf32>
    %c0_16 = arith.constant 0 : index
    %c0_17 = arith.constant 0 : index
    %c0_18 = arith.constant 0 : index
    %37 = vector.load %arg7[%c0_16, %c0_17, %c0_18] : memref<2x64x64xf32, #tpu.memory_space<vmem>>, vector<2x64x64xf32>
    %38 = vector.extract_strided_slice %36 {offsets = [0, 0], sizes = [128, 16], strides = [1, 1]} : vector<128x96xf32> to vector<128x16xf32>
    %cst_19 = arith.constant 2.500000e-01 : f32
    %39 = vector.broadcast %cst_19 : f32 to vector<128x16xf32>
    %40 = arith.mulf %38, %39 : vector<128x16xf32>
    %41 = arith.truncf %40 : vector<128x16xf32> to vector<128x16xbf16>
    %42 = vector.extract_strided_slice %36 {offsets = [0, 32], sizes = [128, 16], strides = [1, 1]} : vector<128x96xf32> to vector<128x16xf32>
    %43 = arith.truncf %42 : vector<128x16xf32> to vector<128x16xbf16>
    %44 = vector.extract_strided_slice %36 {offsets = [0, 64], sizes = [128, 16], strides = [1, 1]} : vector<128x96xf32> to vector<128x16xf32>
    %45 = arith.truncf %44 : vector<128x16xf32> to vector<128x16xbf16>
    %46 = vector.shape_cast %41 : vector<128x16xbf16> to vector<2x64x16xbf16>
    %47 = vector.shape_cast %43 : vector<128x16xbf16> to vector<2x64x16xbf16>
    %48 = vector.shape_cast %45 : vector<128x16xbf16> to vector<2x64x16xbf16>
    "tpu.trace_start"() <{level = 10 : i32, message = "wnd,wmd->wnm"}> : () -> ()
    %cst_20 = arith.constant dense<0.000000e+00> : vector<2x64x64xf32>
    %49 = tpu.matmul %46, %47, %cst_20 {dimension_numbers = #tpu.dot_dimension_numbers<[2], [2], [1], [1], [0, 0, 0, 1, 1, 1], [0], [0]>} : vector<2x64x16xbf16>, vector<2x64x16xbf16>, vector<2x64x64xf32> -> vector<2x64x64xf32>
    "tpu.trace_stop"() : () -> ()
    %50 = vector.extract_strided_slice %37 {offsets = [0, 0, 0], sizes = [1, 64, 64], strides = [1, 1, 1]} : vector<2x64x64xf32> to vector<1x64x64xf32>
    %51 = vector.shape_cast %50 : vector<1x64x64xf32> to vector<64x64xf32>
    %52 = vector.shape_cast %51 : vector<64x64xf32> to vector<1x64x64xf32>
    %53 = vector.broadcast %52 : vector<1x64x64xf32> to vector<2x64x64xf32>
    %54 = arith.addf %49, %53 : vector<2x64x64xf32>
    %cst_21 = arith.constant dense<0xFF800000> : vector<2x64xf32>
    %55 = vector.multi_reduction <maximumf>, %54, %cst_21 [2] : vector<2x64x64xf32> to vector<2x64xf32>
    %56 = vector.shape_cast %55 : vector<2x64xf32> to vector<2x64x1xf32>
    %57 = vector.broadcast %56 : vector<2x64x1xf32> to vector<2x64x64xf32>
    %58 = arith.subf %54, %57 : vector<2x64x64xf32>
    %59 = math.exp %58 : vector<2x64x64xf32>
    %cst_22 = arith.constant dense<0.000000e+00> : vector<2x64xf32>
    %60 = vector.multi_reduction <add>, %59, %cst_22 [2] : vector<2x64x64xf32> to vector<2x64xf32>
    %61 = vector.shape_cast %60 : vector<2x64xf32> to vector<2x64x1xf32>
    %62 = tpu.reciprocal %61 {approx = true} : vector<2x64x1xf32> -> vector<2x64x1xf32>
    %63 = vector.broadcast %62 : vector<2x64x1xf32> to vector<2x64x64xf32>
    %64 = arith.mulf %59, %63 : vector<2x64x64xf32>
    %65 = arith.truncf %64 : vector<2x64x64xf32> to vector<2x64x64xbf16>
    "tpu.trace_start"() <{level = 10 : i32, message = "wnm,wmd->wnd"}> : () -> ()
    %cst_23 = arith.constant dense<0.000000e+00> : vector<2x64x16xf32>
    %66 = tpu.matmul %65, %48, %cst_23 {dimension_numbers = #tpu.dot_dimension_numbers<[2], [1], [1], [2], [0, 0, 0, 1, 1, 2], [0], [0]>} : vector<2x64x64xbf16>, vector<2x64x16xbf16>, vector<2x64x16xf32> -> vector<2x64x16xf32>
    "tpu.trace_stop"() : () -> ()
    %67 = vector.extract_strided_slice %36 {offsets = [0, 16], sizes = [128, 16], strides = [1, 1]} : vector<128x96xf32> to vector<128x16xf32>
    %cst_24 = arith.constant 2.500000e-01 : f32
    %68 = vector.broadcast %cst_24 : f32 to vector<128x16xf32>
    %69 = arith.mulf %67, %68 : vector<128x16xf32>
    %70 = arith.truncf %69 : vector<128x16xf32> to vector<128x16xbf16>
    %71 = vector.extract_strided_slice %36 {offsets = [0, 48], sizes = [128, 16], strides = [1, 1]} : vector<128x96xf32> to vector<128x16xf32>
    %72 = arith.truncf %71 : vector<128x16xf32> to vector<128x16xbf16>
    %73 = vector.extract_strided_slice %36 {offsets = [0, 80], sizes = [128, 16], strides = [1, 1]} : vector<128x96xf32> to vector<128x16xf32>
    %74 = arith.truncf %73 : vector<128x16xf32> to vector<128x16xbf16>
    %75 = vector.shape_cast %70 : vector<128x16xbf16> to vector<2x64x16xbf16>
    %76 = vector.shape_cast %72 : vector<128x16xbf16> to vector<2x64x16xbf16>
    %77 = vector.shape_cast %74 : vector<128x16xbf16> to vector<2x64x16xbf16>
    "tpu.trace_start"() <{level = 10 : i32, message = "wnd,wmd->wnm"}> : () -> ()
    %cst_25 = arith.constant dense<0.000000e+00> : vector<2x64x64xf32>
    %78 = tpu.matmul %75, %76, %cst_25 {dimension_numbers = #tpu.dot_dimension_numbers<[2], [2], [1], [1], [0, 0, 0, 1, 1, 1], [0], [0]>} : vector<2x64x16xbf16>, vector<2x64x16xbf16>, vector<2x64x64xf32> -> vector<2x64x64xf32>
    "tpu.trace_stop"() : () -> ()
    %79 = vector.extract_strided_slice %37 {offsets = [1, 0, 0], sizes = [1, 64, 64], strides = [1, 1, 1]} : vector<2x64x64xf32> to vector<1x64x64xf32>
    %80 = vector.shape_cast %79 : vector<1x64x64xf32> to vector<64x64xf32>
    %81 = vector.shape_cast %80 : vector<64x64xf32> to vector<1x64x64xf32>
    %82 = vector.broadcast %81 : vector<1x64x64xf32> to vector<2x64x64xf32>
    %83 = arith.addf %78, %82 : vector<2x64x64xf32>
    %cst_26 = arith.constant dense<0xFF800000> : vector<2x64xf32>
    %84 = vector.multi_reduction <maximumf>, %83, %cst_26 [2] : vector<2x64x64xf32> to vector<2x64xf32>
    %85 = vector.shape_cast %84 : vector<2x64xf32> to vector<2x64x1xf32>
    %86 = vector.broadcast %85 : vector<2x64x1xf32> to vector<2x64x64xf32>
    %87 = arith.subf %83, %86 : vector<2x64x64xf32>
    %88 = math.exp %87 : vector<2x64x64xf32>
    %cst_27 = arith.constant dense<0.000000e+00> : vector<2x64xf32>
    %89 = vector.multi_reduction <add>, %88, %cst_27 [2] : vector<2x64x64xf32> to vector<2x64xf32>
    %90 = vector.shape_cast %89 : vector<2x64xf32> to vector<2x64x1xf32>
    %91 = tpu.reciprocal %90 {approx = true} : vector<2x64x1xf32> -> vector<2x64x1xf32>
    %92 = vector.broadcast %91 : vector<2x64x1xf32> to vector<2x64x64xf32>
    %93 = arith.mulf %88, %92 : vector<2x64x64xf32>
    %94 = arith.truncf %93 : vector<2x64x64xf32> to vector<2x64x64xbf16>
    "tpu.trace_start"() <{level = 10 : i32, message = "wnm,wmd->wnd"}> : () -> ()
    %cst_28 = arith.constant dense<0.000000e+00> : vector<2x64x16xf32>
    %95 = tpu.matmul %94, %77, %cst_28 {dimension_numbers = #tpu.dot_dimension_numbers<[2], [1], [1], [2], [0, 0, 0, 1, 1, 2], [0], [0]>} : vector<2x64x64xbf16>, vector<2x64x16xbf16>, vector<2x64x16xf32> -> vector<2x64x16xf32>
    "tpu.trace_stop"() : () -> ()
    %96 = tpu.concatenate %66, %95 in 2 : vector<2x64x16xf32>, vector<2x64x16xf32> -> vector<2x64x32xf32>
    %97 = vector.shape_cast %96 : vector<2x64x32xf32> to vector<128x32xf32>
    %98 = arith.truncf %97 : vector<128x32xf32> to vector<128x32xbf16>
    %c0_29 = arith.constant 0 : index
    %c0_30 = arith.constant 0 : index
    %99 = vector.load %arg8[%c0_29, %c0_30] : memref<32x32xbf16, #tpu.memory_space<vmem>>, vector<32x32xbf16>
    %cst_31 = arith.constant dense<0.000000e+00> : vector<128x32xf32>
    %100 = tpu.matmul %98, %99, %cst_31 {dimension_numbers = #tpu.dot_dimension_numbers<[1], [0], [0], [1], [0, 0, 1, 1], [], []>} : vector<128x32xbf16>, vector<32x32xbf16>, vector<128x32xf32> -> vector<128x32xf32>
    %c0_32 = arith.constant 0 : index
    %c0_33 = arith.constant 0 : index
    %101 = vector.load %arg9[%c0_32, %c0_33] : memref<1x32xf32, #tpu.memory_space<vmem>>, vector<1x32xf32>
    %102 = vector.broadcast %101 : vector<1x32xf32> to vector<128x32xf32>
    %103 = arith.addf %100, %102 : vector<128x32xf32>
    %104 = vector.extract_strided_slice %103 {offsets = [0, 0], sizes = [64, 32], strides = [1, 1]} : vector<128x32xf32> to vector<64x32xf32>
    %105 = vector.shape_cast %104 : vector<64x32xf32> to vector<8x8x32xf32>
    %106 = vector.extract_strided_slice %103 {offsets = [64, 0], sizes = [64, 32], strides = [1, 1]} : vector<128x32xf32> to vector<64x32xf32>
    %107 = vector.shape_cast %106 : vector<64x32xf32> to vector<8x8x32xf32>
    %108 = tpu.concatenate %105, %107 in 1 : vector<8x8x32xf32>, vector<8x8x32xf32> -> vector<8x16x32xf32>
    %c0_34 = arith.constant 0 : index
    %c0_35 = arith.constant 0 : index
    %c0_36 = arith.constant 0 : index
    %c0_37 = arith.constant 0 : index
    %109 = vector.load %arg10[%c0_34, %c0_35, %c0_36, %c0_37] : memref<1x8x16x32xf32, #tpu.memory_space<vmem>>, vector<1x8x16x32xf32>
    %110 = vector.shape_cast %109 : vector<1x8x16x32xf32> to vector<8x16x32xf32>
    %111 = vector.shape_cast %108 : vector<8x16x32xf32> to vector<1x8x16x32xf32>
    tpu.vector_store %arg10[%c0_34, %c0_35, %c0_36, %c0_37], %111 {strides = array<i32>} : memref<1x8x16x32xf32, #tpu.memory_space<vmem>>, vector<1x8x16x32xf32>,
    return
  }
  func.func @transform_0(%arg0: i32, %arg1: i32) -> (i32, i32, i32, i32) {
    %c0_i32 = arith.constant 0 : i32
    %c0_i32_0 = arith.constant 0 : i32
    %c0_i32_1 = arith.constant 0 : i32
    return %arg0, %arg1, %c0_i32, %c0_i32_0 : i32, i32, i32, i32
  }
  func.func @transform_1(%arg0: i32, %arg1: i32) -> (i32, i32) {
    %c0_i32 = arith.constant 0 : i32
    %c0_i32_0 = arith.constant 0 : i32
    %c0_i32_1 = arith.constant 0 : i32
    return %c0_i32, %c0_i32_0 : i32, i32
  }
  func.func @transform_2(%arg0: i32, %arg1: i32) -> (i32, i32) {
    %c0_i32 = arith.constant 0 : i32
    %c0_i32_0 = arith.constant 0 : i32
    %c0_i32_1 = arith.constant 0 : i32
    return %c0_i32, %c0_i32_0 : i32, i32
  }
  func.func @transform_3(%arg0: i32, %arg1: i32) -> (i32, i32) {
    %c0_i32 = arith.constant 0 : i32
    %c0_i32_0 = arith.constant 0 : i32
    %c0_i32_1 = arith.constant 0 : i32
    return %c0_i32, %c0_i32_0 : i32, i32
  }
  func.func @transform_4(%arg0: i32, %arg1: i32) -> (i32, i32) {
    %c0_i32 = arith.constant 0 : i32
    %c0_i32_0 = arith.constant 0 : i32
    %c0_i32_1 = arith.constant 0 : i32
    return %c0_i32, %c0_i32_0 : i32, i32
  }
  func.func @transform_5(%arg0: i32, %arg1: i32) -> (i32, i32, i32) {
    %c0_i32 = arith.constant 0 : i32
    %c0_i32_0 = arith.constant 0 : i32
    %c0_i32_1 = arith.constant 0 : i32
    %c0_i32_2 = arith.constant 0 : i32
    return %c0_i32, %c0_i32_0, %c0_i32_1 : i32, i32, i32
  }
  func.func @transform_6(%arg0: i32, %arg1: i32) -> (i32, i32) {
    %c0_i32 = arith.constant 0 : i32
    %c0_i32_0 = arith.constant 0 : i32
    %c0_i32_1 = arith.constant 0 : i32
    return %c0_i32, %c0_i32_0 : i32, i32
  }
  func.func @transform_7(%arg0: i32, %arg1: i32) -> (i32, i32) {
    %c0_i32 = arith.constant 0 : i32
    %c0_i32_0 = arith.constant 0 : i32
    %c0_i32_1 = arith.constant 0 : i32
    return %c0_i32, %c0_i32_0 : i32, i32
  }
  func.func @transform_8(%arg0: i32, %arg1: i32) -> (i32, i32, i32, i32) {
    %c0_i32 = arith.constant 0 : i32
    %c0_i32_0 = arith.constant 0 : i32
    %c0_i32_1 = arith.constant 0 : i32
    return %arg0, %arg1, %c0_i32, %c0_i32_0 : i32, i32, i32, i32
  }
}

module attributes {stable_mosaic.version = 11 : i64} {
  func.func @_mlp_residual_kernel(%arg0: i32, %arg1: memref<256x32xf32, #tpu.memory_space<vmem>>, %arg2: memref<256x32xf32, #tpu.memory_space<vmem>>, %arg3: memref<1x32xf32, #tpu.memory_space<vmem>>, %arg4: memref<1x32xf32, #tpu.memory_space<vmem>>, %arg5: memref<32x128xbf16, #tpu.memory_space<vmem>>, %arg6: memref<1x128xf32, #tpu.memory_space<vmem>>, %arg7: memref<128x32xbf16, #tpu.memory_space<vmem>>, %arg8: memref<1x32xf32, #tpu.memory_space<vmem>>, %arg9: memref<256x32xf32, #tpu.memory_space<vmem>>) attributes {dimension_semantics = [#tpu.dimension_semantics<parallel>], iteration_bounds = array<i64: 2>, scalar_prefetch = 0 : i64, scratch_operands = 0 : i64, tpu.core_type = #tpu.core_type<tc>, window_params = [{transform_indices = @transform_0, window_bounds = array<i64: 256, 32>}, {transform_indices = @transform_1, window_bounds = array<i64: 256, 32>}, {pipeline_mode = #tpu.pipeline_mode<synchronous>, transform_indices = @transform_2, window_bounds = array<i64: 1, 32>}, {pipeline_mode = #tpu.pipeline_mode<synchronous>, transform_indices = @transform_3, window_bounds = array<i64: 1, 32>}, {pipeline_mode = #tpu.pipeline_mode<synchronous>, transform_indices = @transform_4, window_bounds = array<i64: 32, 128>}, {pipeline_mode = #tpu.pipeline_mode<synchronous>, transform_indices = @transform_5, window_bounds = array<i64: 1, 128>}, {pipeline_mode = #tpu.pipeline_mode<synchronous>, transform_indices = @transform_6, window_bounds = array<i64: 128, 32>}, {pipeline_mode = #tpu.pipeline_mode<synchronous>, transform_indices = @transform_7, window_bounds = array<i64: 1, 32>}, {transform_indices = @transform_8, window_bounds = array<i64: 256, 32>}]} {
    %c0 = arith.constant 0 : index
    %c0_0 = arith.constant 0 : index
    %0 = vector.load %arg1[%c0, %c0_0] : memref<256x32xf32, #tpu.memory_space<vmem>>, vector<256x32xf32>
    %c0_1 = arith.constant 0 : index
    %c0_2 = arith.constant 0 : index
    %1 = vector.load %arg2[%c0_1, %c0_2] : memref<256x32xf32, #tpu.memory_space<vmem>>, vector<256x32xf32>
    %2 = arith.addf %0, %1 : vector<256x32xf32>
    %cst = arith.constant dense<0.000000e+00> : vector<256xf32>
    %3 = vector.multi_reduction <add>, %2, %cst [1] : vector<256x32xf32> to vector<256xf32>
    %4 = vector.shape_cast %3 : vector<256xf32> to vector<256x1xf32>
    %cst_3 = arith.constant 3.200000e+01 : f32
    %5 = vector.broadcast %cst_3 : f32 to vector<256x1xf32>
    %6 = arith.divf %4, %5 : vector<256x1xf32>
    %7 = vector.broadcast %6 : vector<256x1xf32> to vector<256x32xf32>
    %8 = arith.subf %2, %7 : vector<256x32xf32>
    %9 = arith.mulf %8, %8 : vector<256x32xf32>
    %cst_4 = arith.constant dense<0.000000e+00> : vector<256xf32>
    %10 = vector.multi_reduction <add>, %9, %cst_4 [1] : vector<256x32xf32> to vector<256xf32>
    %11 = vector.shape_cast %10 : vector<256xf32> to vector<256x1xf32>
    %cst_5 = arith.constant 3.200000e+01 : f32
    %12 = vector.broadcast %cst_5 : f32 to vector<256x1xf32>
    %13 = arith.divf %11, %12 : vector<256x1xf32>
    %14 = vector.broadcast %6 : vector<256x1xf32> to vector<256x32xf32>
    %15 = arith.subf %2, %14 : vector<256x32xf32>
    %cst_6 = arith.constant 9.99999974E-6 : f32
    %16 = vector.broadcast %cst_6 : f32 to vector<256x1xf32>
    %17 = arith.addf %13, %16 : vector<256x1xf32>
    %18 = math.rsqrt %17 : vector<256x1xf32>
    %19 = vector.broadcast %18 : vector<256x1xf32> to vector<256x32xf32>
    %20 = arith.mulf %15, %19 : vector<256x32xf32>
    %c0_7 = arith.constant 0 : index
    %c0_8 = arith.constant 0 : index
    %21 = vector.load %arg3[%c0_7, %c0_8] : memref<1x32xf32, #tpu.memory_space<vmem>>, vector<1x32xf32>
    %22 = vector.broadcast %21 : vector<1x32xf32> to vector<256x32xf32>
    %23 = arith.mulf %20, %22 : vector<256x32xf32>
    %c0_9 = arith.constant 0 : index
    %c0_10 = arith.constant 0 : index
    %24 = vector.load %arg4[%c0_9, %c0_10] : memref<1x32xf32, #tpu.memory_space<vmem>>, vector<1x32xf32>
    %25 = vector.broadcast %24 : vector<1x32xf32> to vector<256x32xf32>
    %26 = arith.addf %23, %25 : vector<256x32xf32>
    %27 = arith.truncf %26 : vector<256x32xf32> to vector<256x32xbf16>
    %c0_11 = arith.constant 0 : index
    %c0_12 = arith.constant 0 : index
    %28 = vector.load %arg5[%c0_11, %c0_12] : memref<32x128xbf16, #tpu.memory_space<vmem>>, vector<32x128xbf16>
    %cst_13 = arith.constant dense<0.000000e+00> : vector<256x128xf32>
    %29 = tpu.matmul %27, %28, %cst_13 {dimension_numbers = #tpu.dot_dimension_numbers<[1], [0], [0], [1], [0, 0, 1, 1], [], []>} : vector<256x32xbf16>, vector<32x128xbf16>, vector<256x128xf32> -> vector<256x128xf32>
    %c0_14 = arith.constant 0 : index
    %c0_15 = arith.constant 0 : index
    %30 = vector.load %arg6[%c0_14, %c0_15] : memref<1x128xf32, #tpu.memory_space<vmem>>, vector<1x128xf32>
    %31 = vector.broadcast %30 : vector<1x128xf32> to vector<256x128xf32>
    %32 = arith.addf %29, %31 : vector<256x128xf32>
    %cst_16 = arith.constant 5.000000e-01 : f32
    %33 = vector.broadcast %cst_16 : f32 to vector<256x128xf32>
    %34 = arith.mulf %33, %32 : vector<256x128xf32>
    %cst_17 = arith.constant 0.707106769 : f32
    %35 = vector.broadcast %cst_17 : f32 to vector<256x128xf32>
    %36 = arith.mulf %32, %35 : vector<256x128xf32>
    %37 = math.absf %36 : vector<256x128xf32>
    %cst_18 = arith.constant 0.327591091 : f32
    %38 = vector.broadcast %cst_18 : f32 to vector<256x128xf32>
    %39 = arith.mulf %38, %37 : vector<256x128xf32>
    %cst_19 = arith.constant 1.000000e+00 : f32
    %40 = vector.broadcast %cst_19 : f32 to vector<256x128xf32>
    %41 = arith.addf %40, %39 : vector<256x128xf32>
    %42 = tpu.reciprocal %41 {approx = true} : vector<256x128xf32> -> vector<256x128xf32>
    %cst_20 = arith.constant 1.06140542 : f32
    %43 = vector.broadcast %cst_20 : f32 to vector<256x128xf32>
    %44 = arith.mulf %43, %42 : vector<256x128xf32>
    %cst_21 = arith.constant -1.45315206 : f32
    %45 = vector.broadcast %cst_21 : f32 to vector<256x128xf32>
    %46 = arith.addf %44, %45 : vector<256x128xf32>
    %47 = arith.mulf %46, %42 : vector<256x128xf32>
    %cst_22 = arith.constant 1.42141378 : f32
    %48 = vector.broadcast %cst_22 : f32 to vector<256x128xf32>
    %49 = arith.addf %47, %48 : vector<256x128xf32>
    %50 = arith.mulf %49, %42 : vector<256x128xf32>
    %cst_23 = arith.constant -0.284496725 : f32
    %51 = vector.broadcast %cst_23 : f32 to vector<256x128xf32>
    %52 = arith.addf %50, %51 : vector<256x128xf32>
    %53 = arith.mulf %52, %42 : vector<256x128xf32>
    %cst_24 = arith.constant 0.254829586 : f32
    %54 = vector.broadcast %cst_24 : f32 to vector<256x128xf32>
    %55 = arith.addf %53, %54 : vector<256x128xf32>
    %56 = arith.mulf %55, %42 : vector<256x128xf32>
    %cst_25 = arith.constant 0.000000e+00 : f32
    %57 = vector.broadcast %cst_25 : f32 to vector<256x128xf32>
    %58 = arith.subf %57, %37 : vector<256x128xf32>
    %59 = arith.mulf %58, %37 : vector<256x128xf32>
    %60 = math.exp %59 : vector<256x128xf32>
    %61 = arith.mulf %56, %60 : vector<256x128xf32>
    %cst_26 = arith.constant 1.000000e+00 : f32
    %62 = vector.broadcast %cst_26 : f32 to vector<256x128xf32>
    %63 = arith.subf %62, %61 : vector<256x128xf32>
    %cst_27 = arith.constant 0.000000e+00 : f32
    %64 = vector.broadcast %cst_27 : f32 to vector<256x128xf32>
    %65 = arith.cmpf oge, %36, %64 : vector<256x128xf32>
    %cst_28 = arith.constant 0.000000e+00 : f32
    %66 = vector.broadcast %cst_28 : f32 to vector<256x128xf32>
    %67 = arith.subf %66, %63 : vector<256x128xf32>
    %68 = arith.select %65, %63, %67 : vector<256x128xi1>, vector<256x128xf32>
    %cst_29 = arith.constant 1.000000e+00 : f32
    %69 = vector.broadcast %cst_29 : f32 to vector<256x128xf32>
    %70 = arith.addf %69, %68 : vector<256x128xf32>
    %71 = arith.mulf %34, %70 : vector<256x128xf32>
    %72 = arith.truncf %71 : vector<256x128xf32> to vector<256x128xbf16>
    %c0_30 = arith.constant 0 : index
    %c0_31 = arith.constant 0 : index
    %73 = vector.load %arg7[%c0_30, %c0_31] : memref<128x32xbf16, #tpu.memory_space<vmem>>, vector<128x32xbf16>
    %cst_32 = arith.constant dense<0.000000e+00> : vector<256x32xf32>
    %74 = tpu.matmul %72, %73, %cst_32 {dimension_numbers = #tpu.dot_dimension_numbers<[1], [0], [0], [1], [0, 0, 1, 1], [], []>} : vector<256x128xbf16>, vector<128x32xbf16>, vector<256x32xf32> -> vector<256x32xf32>
    %75 = arith.addf %2, %74 : vector<256x32xf32>
    %c0_33 = arith.constant 0 : index
    %c0_34 = arith.constant 0 : index
    %76 = vector.load %arg8[%c0_33, %c0_34] : memref<1x32xf32, #tpu.memory_space<vmem>>, vector<1x32xf32>
    %77 = vector.broadcast %76 : vector<1x32xf32> to vector<256x32xf32>
    %78 = arith.addf %75, %77 : vector<256x32xf32>
    %c0_35 = arith.constant 0 : index
    %c0_36 = arith.constant 0 : index
    %79 = vector.load %arg9[%c0_35, %c0_36] : memref<256x32xf32, #tpu.memory_space<vmem>>, vector<256x32xf32>
    tpu.vector_store %arg9[%c0_35, %c0_36], %78 {strides = array<i32>} : memref<256x32xf32, #tpu.memory_space<vmem>>, vector<256x32xf32>,
    return
  }
  func.func @transform_0(%arg0: i32) -> (i32, i32) {
    %c0_i32 = arith.constant 0 : i32
    %c0_i32_0 = arith.constant 0 : i32
    return %arg0, %c0_i32 : i32, i32
  }
  func.func @transform_1(%arg0: i32) -> (i32, i32) {
    %c0_i32 = arith.constant 0 : i32
    %c0_i32_0 = arith.constant 0 : i32
    return %arg0, %c0_i32 : i32, i32
  }
  func.func @transform_2(%arg0: i32) -> (i32, i32) {
    %c0_i32 = arith.constant 0 : i32
    %c0_i32_0 = arith.constant 0 : i32
    %c0_i32_1 = arith.constant 0 : i32
    return %c0_i32, %c0_i32_0 : i32, i32
  }
  func.func @transform_3(%arg0: i32) -> (i32, i32) {
    %c0_i32 = arith.constant 0 : i32
    %c0_i32_0 = arith.constant 0 : i32
    %c0_i32_1 = arith.constant 0 : i32
    return %c0_i32, %c0_i32_0 : i32, i32
  }
  func.func @transform_4(%arg0: i32) -> (i32, i32) {
    %c0_i32 = arith.constant 0 : i32
    %c0_i32_0 = arith.constant 0 : i32
    %c0_i32_1 = arith.constant 0 : i32
    return %c0_i32, %c0_i32_0 : i32, i32
  }
  func.func @transform_5(%arg0: i32) -> (i32, i32) {
    %c0_i32 = arith.constant 0 : i32
    %c0_i32_0 = arith.constant 0 : i32
    %c0_i32_1 = arith.constant 0 : i32
    return %c0_i32, %c0_i32_0 : i32, i32
  }
  func.func @transform_6(%arg0: i32) -> (i32, i32) {
    %c0_i32 = arith.constant 0 : i32
    %c0_i32_0 = arith.constant 0 : i32
    %c0_i32_1 = arith.constant 0 : i32
    return %c0_i32, %c0_i32_0 : i32, i32
  }
  func.func @transform_7(%arg0: i32) -> (i32, i32) {
    %c0_i32 = arith.constant 0 : i32
    %c0_i32_0 = arith.constant 0 : i32
    %c0_i32_1 = arith.constant 0 : i32
    return %c0_i32, %c0_i32_0 : i32, i32
  }
  func.func @transform_8(%arg0: i32) -> (i32, i32) {
    %c0_i32 = arith.constant 0 : i32
    %c0_i32_0 = arith.constant 0 : i32
    return %arg0, %c0_i32 : i32, i32
  }
}

module attributes {stable_mosaic.version = 11 : i64} {
  func.func @_window_attn_kernel(%arg0: i32, %arg1: i32, %arg2: memref<1x8x16x32xf32, #tpu.memory_space<vmem>>, %arg3: memref<1x32xf32, #tpu.memory_space<vmem>>, %arg4: memref<1x32xf32, #tpu.memory_space<vmem>>, %arg5: memref<32x96xbf16, #tpu.memory_space<vmem>>, %arg6: memref<1x96xf32, #tpu.memory_space<vmem>>, %arg7: memref<2x64x64xf32, #tpu.memory_space<vmem>>, %arg8: memref<32x32xbf16, #tpu.memory_space<vmem>>, %arg9: memref<1x32xf32, #tpu.memory_space<vmem>>, %arg10: memref<2x64x64xf32, #tpu.memory_space<vmem>>, %arg11: memref<1x8x16x32xf32, #tpu.memory_space<vmem>>) attributes {dimension_semantics = [#tpu.dimension_semantics<parallel>, #tpu.dimension_semantics<parallel>], iteration_bounds = array<i64: 2, 2>, scalar_prefetch = 0 : i64, scratch_operands = 0 : i64, tpu.core_type = #tpu.core_type<tc>, window_params = [{transform_indices = @transform_0, window_bounds = array<i64: 1, 8, 16, 32>}, {pipeline_mode = #tpu.pipeline_mode<synchronous>, transform_indices = @transform_1, window_bounds = array<i64: 1, 32>}, {pipeline_mode = #tpu.pipeline_mode<synchronous>, transform_indices = @transform_2, window_bounds = array<i64: 1, 32>}, {pipeline_mode = #tpu.pipeline_mode<synchronous>, transform_indices = @transform_3, window_bounds = array<i64: 32, 96>}, {pipeline_mode = #tpu.pipeline_mode<synchronous>, transform_indices = @transform_4, window_bounds = array<i64: 1, 96>}, {pipeline_mode = #tpu.pipeline_mode<synchronous>, transform_indices = @transform_5, window_bounds = array<i64: 2, 64, 64>}, {pipeline_mode = #tpu.pipeline_mode<synchronous>, transform_indices = @transform_6, window_bounds = array<i64: 32, 32>}, {pipeline_mode = #tpu.pipeline_mode<synchronous>, transform_indices = @transform_7, window_bounds = array<i64: 1, 32>}, {transform_indices = @transform_8, window_bounds = array<i64: 2, 64, 64>}, {transform_indices = @transform_9, window_bounds = array<i64: 1, 8, 16, 32>}]} {
    %c0 = arith.constant 0 : index
    %c0_0 = arith.constant 0 : index
    %c0_1 = arith.constant 0 : index
    %c0_2 = arith.constant 0 : index
    %0 = vector.load %arg2[%c0, %c0_0, %c0_1, %c0_2] : memref<1x8x16x32xf32, #tpu.memory_space<vmem>>, vector<1x8x16x32xf32>
    %1 = vector.shape_cast %0 : vector<1x8x16x32xf32> to vector<8x16x32xf32>
    %2 = vector.extract_strided_slice %1 {offsets = [0, 0, 0], sizes = [8, 8, 32], strides = [1, 1, 1]} : vector<8x16x32xf32> to vector<8x8x32xf32>
    %3 = vector.shape_cast %2 : vector<8x8x32xf32> to vector<64x32xf32>
    %4 = vector.extract_strided_slice %1 {offsets = [0, 8, 0], sizes = [8, 8, 32], strides = [1, 1, 1]} : vector<8x16x32xf32> to vector<8x8x32xf32>
    %5 = vector.shape_cast %4 : vector<8x8x32xf32> to vector<64x32xf32>
    %6 = tpu.concatenate %3, %5 in 0 : vector<64x32xf32>, vector<64x32xf32> -> vector<128x32xf32>
    %cst = arith.constant dense<0.000000e+00> : vector<128xf32>
    %7 = vector.multi_reduction <add>, %6, %cst [1] : vector<128x32xf32> to vector<128xf32>
    %8 = vector.shape_cast %7 : vector<128xf32> to vector<128x1xf32>
    %cst_3 = arith.constant 3.200000e+01 : f32
    %9 = vector.broadcast %cst_3 : f32 to vector<128x1xf32>
    %10 = arith.divf %8, %9 : vector<128x1xf32>
    %11 = vector.broadcast %10 : vector<128x1xf32> to vector<128x32xf32>
    %12 = arith.subf %6, %11 : vector<128x32xf32>
    %13 = arith.mulf %12, %12 : vector<128x32xf32>
    %cst_4 = arith.constant dense<0.000000e+00> : vector<128xf32>
    %14 = vector.multi_reduction <add>, %13, %cst_4 [1] : vector<128x32xf32> to vector<128xf32>
    %15 = vector.shape_cast %14 : vector<128xf32> to vector<128x1xf32>
    %cst_5 = arith.constant 3.200000e+01 : f32
    %16 = vector.broadcast %cst_5 : f32 to vector<128x1xf32>
    %17 = arith.divf %15, %16 : vector<128x1xf32>
    %18 = vector.broadcast %10 : vector<128x1xf32> to vector<128x32xf32>
    %19 = arith.subf %6, %18 : vector<128x32xf32>
    %cst_6 = arith.constant 9.99999974E-6 : f32
    %20 = vector.broadcast %cst_6 : f32 to vector<128x1xf32>
    %21 = arith.addf %17, %20 : vector<128x1xf32>
    %22 = math.rsqrt %21 : vector<128x1xf32>
    %23 = vector.broadcast %22 : vector<128x1xf32> to vector<128x32xf32>
    %24 = arith.mulf %19, %23 : vector<128x32xf32>
    %c0_7 = arith.constant 0 : index
    %c0_8 = arith.constant 0 : index
    %25 = vector.load %arg3[%c0_7, %c0_8] : memref<1x32xf32, #tpu.memory_space<vmem>>, vector<1x32xf32>
    %26 = vector.broadcast %25 : vector<1x32xf32> to vector<128x32xf32>
    %27 = arith.mulf %24, %26 : vector<128x32xf32>
    %c0_9 = arith.constant 0 : index
    %c0_10 = arith.constant 0 : index
    %28 = vector.load %arg4[%c0_9, %c0_10] : memref<1x32xf32, #tpu.memory_space<vmem>>, vector<1x32xf32>
    %29 = vector.broadcast %28 : vector<1x32xf32> to vector<128x32xf32>
    %30 = arith.addf %27, %29 : vector<128x32xf32>
    %31 = arith.truncf %30 : vector<128x32xf32> to vector<128x32xbf16>
    %c0_11 = arith.constant 0 : index
    %c0_12 = arith.constant 0 : index
    %32 = vector.load %arg5[%c0_11, %c0_12] : memref<32x96xbf16, #tpu.memory_space<vmem>>, vector<32x96xbf16>
    %cst_13 = arith.constant dense<0.000000e+00> : vector<128x96xf32>
    %33 = tpu.matmul %31, %32, %cst_13 {dimension_numbers = #tpu.dot_dimension_numbers<[1], [0], [0], [1], [0, 0, 1, 1], [], []>} : vector<128x32xbf16>, vector<32x96xbf16>, vector<128x96xf32> -> vector<128x96xf32>
    %c0_14 = arith.constant 0 : index
    %c0_15 = arith.constant 0 : index
    %34 = vector.load %arg6[%c0_14, %c0_15] : memref<1x96xf32, #tpu.memory_space<vmem>>, vector<1x96xf32>
    %35 = vector.broadcast %34 : vector<1x96xf32> to vector<128x96xf32>
    %36 = arith.addf %33, %35 : vector<128x96xf32>
    %c0_16 = arith.constant 0 : index
    %c0_17 = arith.constant 0 : index
    %c0_18 = arith.constant 0 : index
    %37 = vector.load %arg7[%c0_16, %c0_17, %c0_18] : memref<2x64x64xf32, #tpu.memory_space<vmem>>, vector<2x64x64xf32>
    %c0_19 = arith.constant 0 : index
    %c0_20 = arith.constant 0 : index
    %c0_21 = arith.constant 0 : index
    %38 = vector.load %arg10[%c0_19, %c0_20, %c0_21] : memref<2x64x64xf32, #tpu.memory_space<vmem>>, vector<2x64x64xf32>
    %39 = vector.extract_strided_slice %36 {offsets = [0, 0], sizes = [128, 16], strides = [1, 1]} : vector<128x96xf32> to vector<128x16xf32>
    %cst_22 = arith.constant 2.500000e-01 : f32
    %40 = vector.broadcast %cst_22 : f32 to vector<128x16xf32>
    %41 = arith.mulf %39, %40 : vector<128x16xf32>
    %42 = arith.truncf %41 : vector<128x16xf32> to vector<128x16xbf16>
    %43 = vector.extract_strided_slice %36 {offsets = [0, 32], sizes = [128, 16], strides = [1, 1]} : vector<128x96xf32> to vector<128x16xf32>
    %44 = arith.truncf %43 : vector<128x16xf32> to vector<128x16xbf16>
    %45 = vector.extract_strided_slice %36 {offsets = [0, 64], sizes = [128, 16], strides = [1, 1]} : vector<128x96xf32> to vector<128x16xf32>
    %46 = arith.truncf %45 : vector<128x16xf32> to vector<128x16xbf16>
    %47 = vector.shape_cast %42 : vector<128x16xbf16> to vector<2x64x16xbf16>
    %48 = vector.shape_cast %44 : vector<128x16xbf16> to vector<2x64x16xbf16>
    %49 = vector.shape_cast %46 : vector<128x16xbf16> to vector<2x64x16xbf16>
    "tpu.trace_start"() <{level = 10 : i32, message = "wnd,wmd->wnm"}> : () -> ()
    %cst_23 = arith.constant dense<0.000000e+00> : vector<2x64x64xf32>
    %50 = tpu.matmul %47, %48, %cst_23 {dimension_numbers = #tpu.dot_dimension_numbers<[2], [2], [1], [1], [0, 0, 0, 1, 1, 1], [0], [0]>} : vector<2x64x16xbf16>, vector<2x64x16xbf16>, vector<2x64x64xf32> -> vector<2x64x64xf32>
    "tpu.trace_stop"() : () -> ()
    %51 = vector.extract_strided_slice %37 {offsets = [0, 0, 0], sizes = [1, 64, 64], strides = [1, 1, 1]} : vector<2x64x64xf32> to vector<1x64x64xf32>
    %52 = vector.shape_cast %51 : vector<1x64x64xf32> to vector<64x64xf32>
    %53 = vector.shape_cast %52 : vector<64x64xf32> to vector<1x64x64xf32>
    %54 = vector.broadcast %53 : vector<1x64x64xf32> to vector<2x64x64xf32>
    %55 = arith.addf %50, %54 : vector<2x64x64xf32>
    %56 = arith.addf %55, %38 : vector<2x64x64xf32>
    %cst_24 = arith.constant dense<0xFF800000> : vector<2x64xf32>
    %57 = vector.multi_reduction <maximumf>, %56, %cst_24 [2] : vector<2x64x64xf32> to vector<2x64xf32>
    %58 = vector.shape_cast %57 : vector<2x64xf32> to vector<2x64x1xf32>
    %59 = vector.broadcast %58 : vector<2x64x1xf32> to vector<2x64x64xf32>
    %60 = arith.subf %56, %59 : vector<2x64x64xf32>
    %61 = math.exp %60 : vector<2x64x64xf32>
    %cst_25 = arith.constant dense<0.000000e+00> : vector<2x64xf32>
    %62 = vector.multi_reduction <add>, %61, %cst_25 [2] : vector<2x64x64xf32> to vector<2x64xf32>
    %63 = vector.shape_cast %62 : vector<2x64xf32> to vector<2x64x1xf32>
    %64 = tpu.reciprocal %63 {approx = true} : vector<2x64x1xf32> -> vector<2x64x1xf32>
    %65 = vector.broadcast %64 : vector<2x64x1xf32> to vector<2x64x64xf32>
    %66 = arith.mulf %61, %65 : vector<2x64x64xf32>
    %67 = arith.truncf %66 : vector<2x64x64xf32> to vector<2x64x64xbf16>
    "tpu.trace_start"() <{level = 10 : i32, message = "wnm,wmd->wnd"}> : () -> ()
    %cst_26 = arith.constant dense<0.000000e+00> : vector<2x64x16xf32>
    %68 = tpu.matmul %67, %49, %cst_26 {dimension_numbers = #tpu.dot_dimension_numbers<[2], [1], [1], [2], [0, 0, 0, 1, 1, 2], [0], [0]>} : vector<2x64x64xbf16>, vector<2x64x16xbf16>, vector<2x64x16xf32> -> vector<2x64x16xf32>
    "tpu.trace_stop"() : () -> ()
    %69 = vector.extract_strided_slice %36 {offsets = [0, 16], sizes = [128, 16], strides = [1, 1]} : vector<128x96xf32> to vector<128x16xf32>
    %cst_27 = arith.constant 2.500000e-01 : f32
    %70 = vector.broadcast %cst_27 : f32 to vector<128x16xf32>
    %71 = arith.mulf %69, %70 : vector<128x16xf32>
    %72 = arith.truncf %71 : vector<128x16xf32> to vector<128x16xbf16>
    %73 = vector.extract_strided_slice %36 {offsets = [0, 48], sizes = [128, 16], strides = [1, 1]} : vector<128x96xf32> to vector<128x16xf32>
    %74 = arith.truncf %73 : vector<128x16xf32> to vector<128x16xbf16>
    %75 = vector.extract_strided_slice %36 {offsets = [0, 80], sizes = [128, 16], strides = [1, 1]} : vector<128x96xf32> to vector<128x16xf32>
    %76 = arith.truncf %75 : vector<128x16xf32> to vector<128x16xbf16>
    %77 = vector.shape_cast %72 : vector<128x16xbf16> to vector<2x64x16xbf16>
    %78 = vector.shape_cast %74 : vector<128x16xbf16> to vector<2x64x16xbf16>
    %79 = vector.shape_cast %76 : vector<128x16xbf16> to vector<2x64x16xbf16>
    "tpu.trace_start"() <{level = 10 : i32, message = "wnd,wmd->wnm"}> : () -> ()
    %cst_28 = arith.constant dense<0.000000e+00> : vector<2x64x64xf32>
    %80 = tpu.matmul %77, %78, %cst_28 {dimension_numbers = #tpu.dot_dimension_numbers<[2], [2], [1], [1], [0, 0, 0, 1, 1, 1], [0], [0]>} : vector<2x64x16xbf16>, vector<2x64x16xbf16>, vector<2x64x64xf32> -> vector<2x64x64xf32>
    "tpu.trace_stop"() : () -> ()
    %81 = vector.extract_strided_slice %37 {offsets = [1, 0, 0], sizes = [1, 64, 64], strides = [1, 1, 1]} : vector<2x64x64xf32> to vector<1x64x64xf32>
    %82 = vector.shape_cast %81 : vector<1x64x64xf32> to vector<64x64xf32>
    %83 = vector.shape_cast %82 : vector<64x64xf32> to vector<1x64x64xf32>
    %84 = vector.broadcast %83 : vector<1x64x64xf32> to vector<2x64x64xf32>
    %85 = arith.addf %80, %84 : vector<2x64x64xf32>
    %86 = arith.addf %85, %38 : vector<2x64x64xf32>
    %cst_29 = arith.constant dense<0xFF800000> : vector<2x64xf32>
    %87 = vector.multi_reduction <maximumf>, %86, %cst_29 [2] : vector<2x64x64xf32> to vector<2x64xf32>
    %88 = vector.shape_cast %87 : vector<2x64xf32> to vector<2x64x1xf32>
    %89 = vector.broadcast %88 : vector<2x64x1xf32> to vector<2x64x64xf32>
    %90 = arith.subf %86, %89 : vector<2x64x64xf32>
    %91 = math.exp %90 : vector<2x64x64xf32>
    %cst_30 = arith.constant dense<0.000000e+00> : vector<2x64xf32>
    %92 = vector.multi_reduction <add>, %91, %cst_30 [2] : vector<2x64x64xf32> to vector<2x64xf32>
    %93 = vector.shape_cast %92 : vector<2x64xf32> to vector<2x64x1xf32>
    %94 = tpu.reciprocal %93 {approx = true} : vector<2x64x1xf32> -> vector<2x64x1xf32>
    %95 = vector.broadcast %94 : vector<2x64x1xf32> to vector<2x64x64xf32>
    %96 = arith.mulf %91, %95 : vector<2x64x64xf32>
    %97 = arith.truncf %96 : vector<2x64x64xf32> to vector<2x64x64xbf16>
    "tpu.trace_start"() <{level = 10 : i32, message = "wnm,wmd->wnd"}> : () -> ()
    %cst_31 = arith.constant dense<0.000000e+00> : vector<2x64x16xf32>
    %98 = tpu.matmul %97, %79, %cst_31 {dimension_numbers = #tpu.dot_dimension_numbers<[2], [1], [1], [2], [0, 0, 0, 1, 1, 2], [0], [0]>} : vector<2x64x64xbf16>, vector<2x64x16xbf16>, vector<2x64x16xf32> -> vector<2x64x16xf32>
    "tpu.trace_stop"() : () -> ()
    %99 = tpu.concatenate %68, %98 in 2 : vector<2x64x16xf32>, vector<2x64x16xf32> -> vector<2x64x32xf32>
    %100 = vector.shape_cast %99 : vector<2x64x32xf32> to vector<128x32xf32>
    %101 = arith.truncf %100 : vector<128x32xf32> to vector<128x32xbf16>
    %c0_32 = arith.constant 0 : index
    %c0_33 = arith.constant 0 : index
    %102 = vector.load %arg8[%c0_32, %c0_33] : memref<32x32xbf16, #tpu.memory_space<vmem>>, vector<32x32xbf16>
    %cst_34 = arith.constant dense<0.000000e+00> : vector<128x32xf32>
    %103 = tpu.matmul %101, %102, %cst_34 {dimension_numbers = #tpu.dot_dimension_numbers<[1], [0], [0], [1], [0, 0, 1, 1], [], []>} : vector<128x32xbf16>, vector<32x32xbf16>, vector<128x32xf32> -> vector<128x32xf32>
    %c0_35 = arith.constant 0 : index
    %c0_36 = arith.constant 0 : index
    %104 = vector.load %arg9[%c0_35, %c0_36] : memref<1x32xf32, #tpu.memory_space<vmem>>, vector<1x32xf32>
    %105 = vector.broadcast %104 : vector<1x32xf32> to vector<128x32xf32>
    %106 = arith.addf %103, %105 : vector<128x32xf32>
    %107 = vector.extract_strided_slice %106 {offsets = [0, 0], sizes = [64, 32], strides = [1, 1]} : vector<128x32xf32> to vector<64x32xf32>
    %108 = vector.shape_cast %107 : vector<64x32xf32> to vector<8x8x32xf32>
    %109 = vector.extract_strided_slice %106 {offsets = [64, 0], sizes = [64, 32], strides = [1, 1]} : vector<128x32xf32> to vector<64x32xf32>
    %110 = vector.shape_cast %109 : vector<64x32xf32> to vector<8x8x32xf32>
    %111 = tpu.concatenate %108, %110 in 1 : vector<8x8x32xf32>, vector<8x8x32xf32> -> vector<8x16x32xf32>
    %c0_37 = arith.constant 0 : index
    %c0_38 = arith.constant 0 : index
    %c0_39 = arith.constant 0 : index
    %c0_40 = arith.constant 0 : index
    %112 = vector.load %arg11[%c0_37, %c0_38, %c0_39, %c0_40] : memref<1x8x16x32xf32, #tpu.memory_space<vmem>>, vector<1x8x16x32xf32>
    %113 = vector.shape_cast %112 : vector<1x8x16x32xf32> to vector<8x16x32xf32>
    %114 = vector.shape_cast %111 : vector<8x16x32xf32> to vector<1x8x16x32xf32>
    tpu.vector_store %arg11[%c0_37, %c0_38, %c0_39, %c0_40], %114 {strides = array<i32>} : memref<1x8x16x32xf32, #tpu.memory_space<vmem>>, vector<1x8x16x32xf32>,
    return
  }
  func.func @transform_0(%arg0: i32, %arg1: i32) -> (i32, i32, i32, i32) {
    %c0_i32 = arith.constant 0 : i32
    %c0_i32_0 = arith.constant 0 : i32
    %c0_i32_1 = arith.constant 0 : i32
    return %arg0, %arg1, %c0_i32, %c0_i32_0 : i32, i32, i32, i32
  }
  func.func @transform_1(%arg0: i32, %arg1: i32) -> (i32, i32) {
    %c0_i32 = arith.constant 0 : i32
    %c0_i32_0 = arith.constant 0 : i32
    %c0_i32_1 = arith.constant 0 : i32
    return %c0_i32, %c0_i32_0 : i32, i32
  }
  func.func @transform_2(%arg0: i32, %arg1: i32) -> (i32, i32) {
    %c0_i32 = arith.constant 0 : i32
    %c0_i32_0 = arith.constant 0 : i32
    %c0_i32_1 = arith.constant 0 : i32
    return %c0_i32, %c0_i32_0 : i32, i32
  }
  func.func @transform_3(%arg0: i32, %arg1: i32) -> (i32, i32) {
    %c0_i32 = arith.constant 0 : i32
    %c0_i32_0 = arith.constant 0 : i32
    %c0_i32_1 = arith.constant 0 : i32
    return %c0_i32, %c0_i32_0 : i32, i32
  }
  func.func @transform_4(%arg0: i32, %arg1: i32) -> (i32, i32) {
    %c0_i32 = arith.constant 0 : i32
    %c0_i32_0 = arith.constant 0 : i32
    %c0_i32_1 = arith.constant 0 : i32
    return %c0_i32, %c0_i32_0 : i32, i32
  }
  func.func @transform_5(%arg0: i32, %arg1: i32) -> (i32, i32, i32) {
    %c0_i32 = arith.constant 0 : i32
    %c0_i32_0 = arith.constant 0 : i32
    %c0_i32_1 = arith.constant 0 : i32
    %c0_i32_2 = arith.constant 0 : i32
    return %c0_i32, %c0_i32_0, %c0_i32_1 : i32, i32, i32
  }
  func.func @transform_6(%arg0: i32, %arg1: i32) -> (i32, i32) {
    %c0_i32 = arith.constant 0 : i32
    %c0_i32_0 = arith.constant 0 : i32
    %c0_i32_1 = arith.constant 0 : i32
    return %c0_i32, %c0_i32_0 : i32, i32
  }
  func.func @transform_7(%arg0: i32, %arg1: i32) -> (i32, i32) {
    %c0_i32 = arith.constant 0 : i32
    %c0_i32_0 = arith.constant 0 : i32
    %c0_i32_1 = arith.constant 0 : i32
    return %c0_i32, %c0_i32_0 : i32, i32
  }
  func.func @transform_8(%arg0: i32, %arg1: i32) -> (i32, i32, i32) {
    %c0_i32 = arith.constant 0 : i32
    %c0_i32_0 = arith.constant 0 : i32
    %c0_i32_1 = arith.constant 0 : i32
    return %arg1, %c0_i32, %c0_i32_0 : i32, i32, i32
  }
  func.func @transform_9(%arg0: i32, %arg1: i32) -> (i32, i32, i32, i32) {
    %c0_i32 = arith.constant 0 : i32
    %c0_i32_0 = arith.constant 0 : i32
    %c0_i32_1 = arith.constant 0 : i32
    return %arg0, %arg1, %c0_i32, %c0_i32_0 : i32, i32, i32, i32
  }
}

</mosaic_0001>

<bundles_post_ra>
// kernel: basic_layer_forward.4
= control target key start
LH: loop header
LB: loop body
LE: loop exit
PB: predicated region body
PF: predicated region fallthrough
CT: control target
= control target key end

     0   :  { %s2996_s27 = smov 0   ;;  %s2998_s28 = smov 0   ;;  %s3965_s0 = inlined_call_operand.vmem [shape: f32[2,16,16,32], index: 0, kind: input, shape index: {}]   ;;  %s3966_s1 = inlined_call_operand.vmem [shape: f32[1,32], index: 1, kind: input, shape index: {}]   ;;  %s3967_s2 = inlined_call_operand.vmem [shape: f32[1,32], index: 2, kind: input, shape index: {}]   ;;  %s3968_s3 = inlined_call_operand.vmem [shape: bf16[32,96], index: 3, kind: input, shape index: {}]   ;;  %s3969_s4 = inlined_call_operand.vmem [shape: f32[1,96], index: 4, kind: input, shape index: {}]   ;;  %s3970_s5 = inlined_call_operand.vmem [shape: f32[2,64,64], index: 5, kind: input, shape index: {}]   ;;  %s3971_s6 = inlined_call_operand.vmem [shape: bf16[32,32], index: 6, kind: input, shape index: {}]   ;;  %s3972_s7 = inlined_call_operand.vmem [shape: f32[1,32], index: 7, kind: input, shape index: {}]   ;;  %s3973_s8 = inlined_call_operand.vmem [shape: f32[2,16,16,32], index: 8, kind: output, shape index: {}]  }
   0x1   :  { %s3000_s29 = smov 0   ;;  %s3002_s30 = smov 0  }
   0x2   :  { %s3004_s9 = smov 0  }
   0x3 LB: > { %s27_s10 = sadd.s32 1, %s2935_s29  ;;  %s30_s11 = sadd.s32 1, %s2939_s30  ;;  %s2943_s9 = sphi %s3004_s9, %s18_s9   ;;  %s2939_s30 = sphi %s3002_s30, %s3977_s30   ;;  %s2935_s29 = sphi %s3000_s29, %s3976_s29   ;;  %s2931_s28 = sphi %s2998_s28, %s3975_s28   ;;  %s2927_s27 = sphi %s2996_s27, %s3974_s27  }
   0x4   : > { %p28_p0 = scmp.ge.s32.totalorder %s27_s10, 2  ;;  %p2320_p1 = scmp.ge.s32.totalorder %s2943_s9, 1 }
   0x5   : > { %p284_p2 = scmp.lt.s32.totalorder %s2943_s9, 5 }
   0x6   : > { %s3979_s10 = smov (%p28_p0, %s27_s10), 0  ;;  %s3981_s11 = smov (!%p28_p0, %s30_s11), %s2939_s30 }
   0x7   : > { %p285_p3 = pnand %p2320_p1, %p284_p2  ;;  %p32_p4 = scmp.ge.s32.totalorder %s3981_s11, 2 }
   0x8   : > { %s2321_s12 = sshll.u32 (!%p285_p3), %s2927_s27, 3  ;;  %p329_p5 = scmp.lt.s32.totalorder (!%p285_p3), %s2931_s28, 1  ;;  %vm367_vm0 = vcmask (!%p285_p3), 261120   ;;  %vm835_vm1 = vcmask (!%p285_p3), 130048   ;;  %vm1026_vm2 = vcmask (!%p285_p3), 523264  }
   0x9   : > { %s3983_s11 = smov (%p32_p4, %s3981_s11), 0  ;;  %288 = sbr.rel (%p285_p3) target bundleno = 2632 (0xa48), region = 52 }
   0xa   : > { %p331_p6 = scmp.lt.s32.totalorder (!%p285_p3), %s2321_s12, 15  ;;  %s2947_s17 = smov (!%p285_p3), 80  }
   0xb   : > { %s2948_s20 = smov (!%p285_p3), 112   ;;  %s2949_s21 = smov (!%p285_p3), 48  }
   0xc   : > { %s2950_s26 = smov (!%p285_p3), 16  }
  0x10   : > { %s3985_s28 = smov (!%p329_p5, %s2931_s28), 1  ;;  %s3987_s12 = smov (!%p331_p6, %s2321_s12), 15 }
  0x11   : > { %s2323_s13 = sshll.u32 %s3985_s28, 5  ;;  %s2322_s14 = sshll.u32 %s3987_s12, 1 }
  0x12   : > { %s3026_s15 = sadd.s32 %s2323_s13, %s2322_s14  ;;  %s2945_s13 = smov 96  }
  0x13   : > { %s2324_s16 = sshll.u32 %s3026_s15, 3  ;;  %s2946_s14 = smov 64  }
  0x14   : > { %s3034_s19 = scalar_lea.vmem %s3965_s0, %s2324_s16 }
  0x15   : > { %v351_v0 = vld [vmem:[%s3034_s19] sm:$0xff]  ;;  %v353_v2 = vld [vmem:[%s3034_s19 + $0x10] sm:$0xff]  ;;  %v3059_v16 = vld [vmem:[%s3034_s19 + $0x8] sm:$0xff] }
  0x16   : > { %v355_v1 = vld [vmem:[%s3034_s19 + $0x20] sm:$0xff]  ;;  %v368_v3 = vsel %vm367_vm0, %v351_v0, 0.0  ;;  %v357_v5 = vld [vmem:[%s3034_s19 + $0x30] sm:$0xff]  ;;  %v371_v6 = vsel %vm367_vm0, %v353_v2, 0.0  ;;  %v3062_v17 = vld [vmem:[%s3034_s19 + $0x18] sm:$0xff]  ;;  %v392_v18 = vsel %vm367_vm0, %v3059_v16, 0.0 }
  0x17   : > { %v374_v4 = vsel %vm367_vm0, %v355_v1, 0.0  ;;  %369 = vadd.xlane.f32.xlu0 %v368_v3  ;;  %v377_v7 = vsel %vm367_vm0, %v357_v5, 0.0  ;;  %v359_v8 = vld [vmem:[%s3034_s19 + $0x40] sm:$0xff]  ;;  %v361_v9 = vld [vmem:[%s3034_s19 + $0x50] sm:$0xff]  ;;  %v395_v19 = vsel %vm367_vm0, %v3062_v17, 0.0  ;;  %v3069_v20 = vld [vmem:[%s3034_s19 + $0x28] sm:$0xff] }
  0x18   : > { %375 = vadd.xlane.f32.xlu1 %v374_v4  ;;  %v380_v10 = vsel %vm367_vm0, %v359_v8, 0.0  ;;  %v383_v11 = vsel %vm367_vm0, %v361_v9, 0.0  ;;  %v3049_v12 = vld [vmem:[%s3034_s19 + $0x60] sm:$0xff]  ;;  %v3052_v13 = vld [vmem:[%s3034_s19 + $0x70] sm:$0xff]  ;;  %v3072_v21 = vld [vmem:[%s3034_s19 + $0x38] sm:$0xff]  ;;  %v398_v22 = vsel %vm367_vm0, %v3069_v20, 0.0 }
  0x19   : > { %v386_v14 = vsel %vm367_vm0, %v3049_v12, 0.0  ;;  %v389_v15 = vsel %vm367_vm0, %v3052_v13, 0.0  ;;  %v401_v23 = vsel %vm367_vm0, %v3072_v21, 0.0  ;;  %v3079_v24 = vld [vmem:[%s3034_s19 + $0x48] sm:$0xff]  ;;  %v3082_v25 = vld [vmem:[%s3034_s19 + $0x58] sm:$0xff] }
  0x1a   : > { %v404_v26 = vsel %vm367_vm0, %v3079_v24, 0.0  ;;  %v407_v27 = vsel %vm367_vm0, %v3082_v25, 0.0  ;;  %v3089_v28 = vld [vmem:[%s3034_s19 + $0x68] sm:$0xff]  ;;  %v3092_v29 = vld [vmem:[%s3034_s19 + $0x78] sm:$0xff] }
  0x1b   : > { %372 = vadd.xlane.f32.xlu0 %v371_v6  ;;  %v410_v30 = vsel %vm367_vm0, %v3089_v28, 0.0  ;;  %v413_v31 = vsel %vm367_vm0, %v3092_v29, 0.0 }
  0x1c   : > { %378 = vadd.xlane.f32.xlu1 %v377_v7 }
  0x1f   : > { %381 = vadd.xlane.f32.xlu0 %v380_v10 }
  0x20   : > { %384 = vadd.xlane.f32.xlu1 %v383_v11 }
  0x23   : > { %387 = vadd.xlane.f32.xlu0 %v386_v14 }
  0x24   : > { %390 = vadd.xlane.f32.xlu1 %v389_v15 }
  0x27   : > { %393 = vadd.xlane.f32.xlu0 %v392_v18 }
  0x28   : > { %396 = vadd.xlane.f32.xlu1 %v395_v19 }
  0x2b   : > { %399 = vadd.xlane.f32.xlu0 %v398_v22 }
  0x2c   : > { %402 = vadd.xlane.f32.xlu1 %v401_v23 }
  0x2f   : > { %405 = vadd.xlane.f32.xlu0 %v404_v26 }
  0x30   : > { %408 = vadd.xlane.f32.xlu1 %v407_v27 }
  0x33   : > { %411 = vadd.xlane.f32.xlu0 %v410_v30 }
  0x34   : > { %414 = vadd.xlane.f32.xlu1 %v413_v31 }
  0xa4   : > { %v370_v32 = vpop.xlane.xlu0 %369 }
  0xa5   : > { %v376_v33 = vpop.xlane.xlu1 %375  ;;  %v417_v34 = vmul.f32 0.03125, %v370_v32 }
  0xa6   : > { %v419_v35 = vmul.f32 0.03125, %v376_v33 }
  0xa7   : > { %v3098_v36 = vsub.f32 %v351_v0, %v417_v34 }
  0xa8   : > { %v3100_v37 = vsub.f32 %v355_v1, %v419_v35  ;;  %v373_v38 = vpop.xlane.xlu0 %372 }
  0xa9   : > { %v379_v39 = vpop.xlane.xlu1 %378  ;;  %v418_v40 = vmul.f32 0.03125, %v373_v38  ;;  %v449_v42 = vmul.f32 %v3098_v36, %v3098_v36 }
  0xaa   : > { %v420_v41 = vmul.f32 0.03125, %v379_v39  ;;  %v451_v43 = vmul.f32 %v3100_v37, %v3100_v37 }
  0xab   : > { %v3106_v44 = vsub.f32 %v353_v2, %v418_v40  ;;  %v465_v46 = vsel %vm367_vm0, %v449_v42, 0.0 }
  0xac   : > { %v3108_v45 = vsub.f32 %v357_v5, %v420_v41  ;;  %466 = vadd.xlane.f32.xlu0 %v465_v46  ;;  %v382_v47 = vpop.xlane.xlu0 %381  ;;  %v471_v49 = vsel %vm367_vm0, %v451_v43, 0.0 }
  0xad   : > { %v385_v48 = vpop.xlane.xlu1 %384  ;;  %v421_v50 = vmul.f32 0.03125, %v382_v47  ;;  %v450_v52 = vmul.f32 %v3106_v44, %v3106_v44 }
  0xae   : > { %v422_v51 = vmul.f32 0.03125, %v385_v48  ;;  %v452_v53 = vmul.f32 %v3108_v45, %v3108_v45 }
  0xaf   : > { %v3116_v54 = vsub.f32 %v359_v8, %v421_v50  ;;  %v468_v56 = vsel %vm367_vm0, %v450_v52, 0.0 }
  0xb0   : > { %v3118_v55 = vsub.f32 %v361_v9, %v422_v51  ;;  %472 = vadd.xlane.f32.xlu0 %v471_v49  ;;  %469 = vadd.xlane.f32.xlu1 %v468_v56  ;;  %v388_v57 = vpop.xlane.xlu0 %387  ;;  %v474_v59 = vsel %vm367_vm0, %v452_v53, 0.0  ;;  %v2742_v53 = vld [vmem:[%s3968_s3 + $0x8] sm:$0xff]  }
  0xb1   : > { %v391_v58 = vpop.xlane.xlu1 %390  ;;  %v423_v60 = vmul.f32 0.03125, %v388_v57  ;;  %v453_v62 = vmul.f32 %v3116_v54, %v3116_v54 }
  0xb2   : > { %v424_v61 = vmul.f32 0.03125, %v391_v58  ;;  %v454_v63 = vmul.f32 %v3118_v55, %v3118_v55 }
  0xb3   : > { %v3127_v0 = vsub.f32 %v3049_v12, %v423_v60  ;;  %v477_v2 = vsel %vm367_vm0, %v453_v62, 0.0 }
  0xb4   : > { %v3130_v1 = vsub.f32 %v3052_v13, %v424_v61  ;;  %475 = vadd.xlane.f32.xlu1 %v474_v59  ;;  %478 = vadd.xlane.f32.xlu0 %v477_v2  ;;  %v394_v3 = vpop.xlane.xlu0 %393  ;;  %v480_v5 = vsel %vm367_vm0, %v454_v63, 0.0 }
  0xb5   : > { %v397_v4 = vpop.xlane.xlu1 %396  ;;  %v425_v6 = vmul.f32 0.03125, %v394_v3  ;;  %v455_v8 = vmul.f32 %v3127_v0, %v3127_v0 }
  0xb6   : > { %v426_v7 = vmul.f32 0.03125, %v397_v4  ;;  %v456_v9 = vmul.f32 %v3130_v1, %v3130_v1 }
  0xb7   : > { %v3139_v10 = vsub.f32 %v3059_v16, %v425_v6  ;;  %v483_v12 = vsel %vm367_vm0, %v455_v8, 0.0 }
  0xb8   : > { %v3142_v11 = vsub.f32 %v3062_v17, %v426_v7  ;;  %481 = vadd.xlane.f32.xlu1 %v480_v5  ;;  %484 = vadd.xlane.f32.xlu0 %v483_v12  ;;  %v400_v13 = vpop.xlane.xlu0 %399  ;;  %v486_v15 = vsel %vm367_vm0, %v456_v9, 0.0 }
  0xb9   : > { %v403_v14 = vpop.xlane.xlu1 %402  ;;  %v427_v18 = vmul.f32 0.03125, %v400_v13  ;;  %v457_v22 = vmul.f32 %v3139_v10, %v3139_v10 }
  0xba   : > { %v428_v19 = vmul.f32 0.03125, %v403_v14  ;;  %v458_v16 = vmul.f32 %v3142_v11, %v3142_v11 }
  0xbb   : > { %v3151_v23 = vsub.f32 %v3069_v20, %v427_v18  ;;  %v489_v26 = vsel %vm367_vm0, %v457_v22, 0.0 }
  0xbc   : > { %v3154_v17 = vsub.f32 %v3072_v21, %v428_v19  ;;  %487 = vadd.xlane.f32.xlu1 %v486_v15  ;;  %490 = vadd.xlane.f32.xlu0 %v489_v26  ;;  %v406_v27 = vpop.xlane.xlu0 %405  ;;  %v492_v31 = vsel %vm367_vm0, %v458_v16, 0.0 }
  0xbd   : > { %v409_v30 = vpop.xlane.xlu1 %408  ;;  %v429_v32 = vmul.f32 0.03125, %v406_v27  ;;  %v459_v34 = vmul.f32 %v3151_v23, %v3151_v23 }
  0xbe   : > { %v430_v33 = vmul.f32 0.03125, %v409_v30  ;;  %v460_v20 = vmul.f32 %v3154_v17, %v3154_v17 }
  0xbf   : > { %v3163_v35 = vsub.f32 %v3079_v24, %v429_v32  ;;  %v495_v38 = vsel %vm367_vm0, %v459_v34, 0.0 }
  0xc0   : > { %v3166_v21 = vsub.f32 %v3082_v25, %v430_v33  ;;  %493 = vadd.xlane.f32.xlu1 %v492_v31  ;;  %496 = vadd.xlane.f32.xlu0 %v495_v38  ;;  %v412_v39 = vpop.xlane.xlu0 %411  ;;  %v498_v41 = vsel %vm367_vm0, %v460_v20, 0.0  ;;  %v3198_v31 = vld [vmem:[%s3966_s1] ss:$0 sm:$0xff] }
  0xc1   : > { %v415_v40 = vpop.xlane.xlu1 %414  ;;  %v431_v42 = vmul.f32 0.03125, %v412_v39  ;;  %v461_v46 = vmul.f32 %v3163_v35, %v3163_v35 }
  0xc2   : > { %v432_v43 = vmul.f32 0.03125, %v415_v40  ;;  %v462_v24 = vmul.f32 %v3166_v21, %v3166_v21 }
  0xc3   : > { %v3175_v47 = vsub.f32 %v3089_v28, %v431_v42  ;;  %v501_v48 = vsel %vm367_vm0, %v461_v46, 0.0 }
  0xc4   : > { %v3178_v25 = vsub.f32 %v3092_v29, %v432_v43  ;;  %499 = vadd.xlane.f32.xlu1 %v498_v41  ;;  %502 = vadd.xlane.f32.xlu0 %v501_v48  ;;  %v504_v49 = vsel %vm367_vm0, %v462_v24, 0.0  ;;  %v2741_v29 = vld [vmem:[%s3968_s3] sm:$0xff]  }
  0xc5   : > { %v463_v50 = vmul.f32 %v3175_v47, %v3175_v47  ;;  %2471 = vmatprep.subr.bf16.mxu0 %v2741_v29  ;;  %v3205_v43 = vld [vmem:[%s3967_s2] ss:$0 sm:$0xff] }
  0xc6   : > { %v464_v51 = vmul.f32 %v3178_v25, %v3178_v25  ;;  %2472 = vmatpush3.bf16.msra.mxu0 %v2741_v29 }
  0xc7   : > { %v507_v52 = vsel %vm367_vm0, %v463_v50, 0.0  ;;  %2473 = vmatprep.subr.bf16.mxu0 %v2742_v53 }
  0xc8   : > { %505 = vadd.xlane.f32.xlu1 %v504_v49  ;;  %508 = vadd.xlane.f32.xlu0 %v507_v52  ;;  %v510_v28 = vsel %vm367_vm0, %v464_v51, 0.0 }
  0xca   : > { %2474 = vmatpush3.bf16.msra.mxu0 %v2742_v53 }
  0xcc   : > { %511 = vadd.xlane.f32.xlu1 %v510_v28 }
 0x139   : > { %v467_v56 = vpop.xlane.xlu0 %466 }
 0x13a   : > { %v513_v57 = vmul.f32 0.03125, %v467_v56 }
 0x13c   : > { %v529_v58 = vadd.f32 1e-05, %v513_v57 }
 0x13d   : > { %v470_v59 = vpop.xlane.xlu1 %469  ;;  %v473_v60 = vpop.xlane.xlu0 %472 }
 0x13e   : > { %2745 = vrsqrt.f32 %v529_v58  ;;  %v514_v61 = vmul.f32 0.03125, %v470_v59  ;;  %v515_v62 = vmul.f32 0.03125, %v473_v60 }
 0x140   : > { %v530_v63 = vadd.f32 1e-05, %v514_v61  ;;  %v531_v2 = vadd.f32 1e-05, %v515_v62 }
 0x141   : > { %v476_v3 = vpop.xlane.xlu1 %475  ;;  %v479_v4 = vpop.xlane.xlu0 %478 }
 0x142   : > { %2747 = vrsqrt.f32 %v530_v63  ;;  %v516_v5 = vmul.f32 0.03125, %v476_v3  ;;  %v517_v6 = vmul.f32 0.03125, %v479_v4 }
 0x143   : > { %2749 = vrsqrt.f32 %v531_v2 }
 0x144   : > { %v532_v7 = vadd.f32 1e-05, %v516_v5  ;;  %v533_v8 = vadd.f32 1e-05, %v517_v6 }
 0x145   : > { %v482_v9 = vpop.xlane.xlu1 %481  ;;  %v485_v12 = vpop.xlane.xlu0 %484 }
 0x146   : > { %2751 = vrsqrt.f32 %v532_v7  ;;  %v518_v13 = vmul.f32 0.03125, %v482_v9  ;;  %v519_v14 = vmul.f32 0.03125, %v485_v12 }
 0x147   : > { %2753 = vrsqrt.f32 %v533_v8 }
 0x148   : > { %v2746_v15 = vpop.eup %2745  ;;  %v534_v18 = vadd.f32 1e-05, %v518_v13  ;;  %v535_v19 = vadd.f32 1e-05, %v519_v14 }
 0x149   : > { %v488_v22 = vpop.xlane.xlu1 %487  ;;  %v491_v16 = vpop.xlane.xlu0 %490  ;;  %v561_v26 = vmul.f32 %v2746_v15, %v3098_v36 }
 0x14a   : > { %2755 = vrsqrt.f32 %v534_v18  ;;  %v520_v27 = vmul.f32 0.03125, %v488_v22  ;;  %v521_v30 = vmul.f32 0.03125, %v491_v16 }
 0x14b   : > { %2757 = vrsqrt.f32 %v535_v19  ;;  %v584_v41 = vmul.f32 %v3198_v31, %v561_v26 }
 0x14c   : > { %v2748_v32 = vpop.eup %2747  ;;  %v536_v33 = vadd.f32 1e-05, %v520_v27  ;;  %v537_v34 = vadd.f32 1e-05, %v521_v30 }
 0x14d   : > { %v2750_v20 = vpop.eup %2749  ;;  %v494_v38 = vpop.xlane.xlu1 %493  ;;  %v562_v40 = vmul.f32 %v2748_v32, %v3106_v44  ;;  %v607_v28 = vadd.f32 %v3205_v43, %v584_v41 }
 0x14e   : > { %v497_v39 = vpop.xlane.xlu0 %496  ;;  %2759 = vrsqrt.f32 %v536_v33  ;;  %v522_v36 = vmul.f32 0.03125, %v494_v38  ;;  %v563_v46 = vmul.f32 %v2750_v20, %v3100_v37 }
 0x14f   : > { %v523_v42 = vmul.f32 0.03125, %v497_v39  ;;  %2761 = vrsqrt.f32 %v537_v34  ;;  %v585_v24 = vmul.f32 %v3198_v31, %v562_v40 }
 0x150   : > { %v2752_v48 = vpop.eup %2751  ;;  %v538_v49 = vadd.f32 1e-05, %v522_v36  ;;  %v586_v56 = vmul.f32 %v3198_v31, %v563_v46 }
 0x151   : > { %v539_v50 = vadd.f32 1e-05, %v523_v42  ;;  %v2754_v51 = vpop.eup %2753  ;;  %v500_v44 = vpop.xlane.xlu1 %499  ;;  %v608_v29 = vadd.f32 %v3205_v43, %v585_v24  ;;  %v564_v53 = vmul.f32 %v2752_v48, %v3108_v45 }
 0x152   : > { %v503_v52 = vpop.xlane.xlu0 %502  ;;  %2763 = vrsqrt.f32 %v538_v49  ;;  %v524_v57 = vmul.f32 0.03125, %v500_v44  ;;  %v565_v60 = vmul.f32 %v2754_v51, %v3116_v54  ;;  %v609_v45 = vadd.f32 %v3205_v43, %v586_v56 }
 0x153   : > { %v525_v37 = vmul.f32 0.03125, %v503_v52  ;;  %2765 = vrsqrt.f32 %v539_v50  ;;  %v623_v58 = vpack.c.bf16 %v608_v29, %v607_v28  ;;  %v587_v59 = vmul.f32 %v3198_v31, %v564_v53 }
 0x154   : > { %v2756_v61 = vpop.eup %2755  ;;  %v540_v62 = vadd.f32 1e-05, %v524_v57  ;;  %v588_v7 = vmul.f32 %v3198_v31, %v565_v60 }
 0x155   : > { %v541_v63 = vadd.f32 1e-05, %v525_v37  ;;  %v2758_v2 = vpop.eup %2757  ;;  %v506_v3 = vpop.xlane.xlu1 %505  ;;  %2475 = vmatprep.mubr.msk.bf16.mxu0 %vm367_vm0, %v623_v58  ;;  %v610_v5 = vadd.f32 %v3205_v43, %v587_v59  ;;  %v566_v6 = vmul.f32 %v2756_v61, %v3118_v55 }
 0x156   : > { %v509_v4 = vpop.xlane.xlu0 %508  ;;  %2767 = vrsqrt.f32 %v540_v62  ;;  %v526_v8 = vmul.f32 0.03125, %v506_v3  ;;  %v567_v54 = vmul.f32 %v2758_v2, %v3127_v0  ;;  %v611_v55 = vadd.f32 %v3205_v43, %v588_v7 }
 0x157   : > { %v527_v9 = vmul.f32 0.03125, %v509_v4  ;;  %2769 = vrsqrt.f32 %v541_v63  ;;  %v624_v12 = vpack.c.bf16 %v610_v5, %v609_v45  ;;  %v589_v13 = vmul.f32 %v3198_v31, %v566_v6  ;;  %v3263_v4 = vld [vmem:[%s3969_s4] ss:$0 sm:$0xff] }
 0x158   : > { %v2760_v14 = vpop.eup %2759  ;;  %v542_v15 = vadd.f32 1e-05, %v526_v8  ;;  %v590_v27 = vmul.f32 %v3198_v31, %v567_v54 }
 0x159   : > { %v543_v18 = vadd.f32 1e-05, %v527_v9  ;;  %v2762_v19 = vpop.eup %2761  ;;  %v512_v22 = vpop.xlane.xlu1 %511  ;;  %2476 = vmatmul.mubr.msk.bf16.vlgmr.msra.gmra.mrb[0].mxu0 %vm367_vm0, %v624_v12  ;;  %v612_v16 = vadd.f32 %v3205_v43, %v589_v13  ;;  %v568_v26 = vmul.f32 %v2760_v14, %v3130_v1 }
 0x15a   : > { %2771 = vrsqrt.f32 %v542_v15  ;;  %v528_v0 = vmul.f32 0.03125, %v512_v22  ;;  %v569_v30 = vmul.f32 %v2762_v19, %v3139_v10  ;;  %v613_v39 = vadd.f32 %v3205_v43, %v590_v27 }
 0x15b   : > { %2773 = vrsqrt.f32 %v543_v18  ;;  %v625_v32 = vpack.c.bf16 %v612_v16, %v611_v55  ;;  %v591_v33 = vmul.f32 %v3198_v31, %v568_v26 }
 0x15c   : > { %v2764_v34 = vpop.eup %2763  ;;  %v544_v20 = vadd.f32 1e-05, %v528_v0  ;;  %v592_v41 = vmul.f32 %v3198_v31, %v569_v30 }
 0x15d   : > { %v2766_v38 = vpop.eup %2765  ;;  %2479 = vmatprep.mubr.msk.bf16.mxu0 %vm367_vm0, %v625_v32  ;;  %v614_v40 = vadd.f32 %v3205_v43, %v591_v33  ;;  %v570_v1 = vmul.f32 %v2764_v34, %v3142_v11 }
 0x15e   : > { %2775 = vrsqrt.f32 %v544_v20  ;;  %v571_v10 = vmul.f32 %v2766_v38, %v3151_v23  ;;  %v615_v48 = vadd.f32 %v3205_v43, %v592_v41 }
 0x15f   : > { %v626_v36 = vpack.c.bf16 %v614_v40, %v613_v39  ;;  %v593_v42 = vmul.f32 %v3198_v31, %v570_v1 }
 0x160   : > { %v2768_v46 = vpop.eup %2767  ;;  %v594_v11 = vmul.f32 %v3198_v31, %v571_v10 }
 0x161   : > { %v2770_v24 = vpop.eup %2769  ;;  %2480 = vmatmul.mubr.msk.bf16.gmra.mrb[4].mxu0 %vm367_vm0, %v626_v36  ;;  %v616_v49 = vadd.f32 %v3205_v43, %v593_v42  ;;  %v572_v50 = vmul.f32 %v2768_v46, %v3154_v17 }
 0x162   : > { %v573_v51 = vmul.f32 %v2770_v24, %v3163_v35  ;;  %v617_v29 = vadd.f32 %v3205_v43, %v594_v11 }
 0x163   : > { %v627_v44 = vpack.c.bf16 %v616_v49, %v615_v48  ;;  %v595_v23 = vmul.f32 %v3198_v31, %v572_v50 }
 0x164   : > { %v2772_v52 = vpop.eup %2771  ;;  %v596_v57 = vmul.f32 %v3198_v31, %v573_v51 }
 0x165   : > { %v2774_v28 = vpop.eup %2773  ;;  %2483 = vmatprep.mubr.msk.bf16.mxu0 %vm367_vm0, %v627_v44  ;;  %v618_v53 = vadd.f32 %v3205_v43, %v595_v23  ;;  %v574_v56 = vmul.f32 %v2772_v52, %v3166_v21 }
 0x166   : > { %v575_v17 = vmul.f32 %v2774_v28, %v3175_v47  ;;  %v619_v59 = vadd.f32 %v3205_v43, %v596_v57 }
 0x167   : > { %v628_v37 = vpack.c.bf16 %v618_v53, %v617_v29  ;;  %v597_v35 = vmul.f32 %v3198_v31, %v574_v56 }
 0x168   : > { %v2776_v58 = vpop.eup %2775  ;;  %v598_v62 = vmul.f32 %v3198_v31, %v575_v17 }
 0x169   : > { %2484 = vmatmul.mubr.msk.bf16.gmra.mrb[8].mxu0 %vm367_vm0, %v628_v37  ;;  %v620_v60 = vadd.f32 %v3205_v43, %v597_v35  ;;  %v576_v61 = vmul.f32 %v2776_v58, %v3178_v25 }
 0x16a   : > { %v621_v47 = vadd.f32 %v3205_v43, %v598_v62 }
 0x16b   : > { %v629_v63 = vpack.c.bf16 %v620_v60, %v619_v59  ;;  %v599_v21 = vmul.f32 %v3198_v31, %v576_v61 }
 0x16d   : > { %2487 = vmatprep.mubr.msk.bf16.mxu0 %vm367_vm0, %v629_v63  ;;  %v622_v2 = vadd.f32 %v3205_v43, %v599_v21 }
 0x16f   : > { %v630_v3 = vpack.c.bf16 %v622_v2, %v621_v47 }
 0x171   : > { %2488 = vmatmul.mubr.msk.bf16.gmra.mrb[12].mxu0 %vm367_vm0, %v630_v3 }
 0x22c   : > { %v2477_v25 = vpop.f32.mrb[0].mxu0 }
 0x22d   : > { %v721_v45 = vadd.f32 %v2477_v25, %v3263_v4  ;;  %v712_v5 = vpop.f32.mrb[1].mxu0 }
 0x22e   : > { %v713_v31 = vadd.f32 %v3263_v4, %v712_v5  ;;  %v2478_v6 = vpop.f32.mrb[2].mxu0 }
 0x22f   : > { %v724_v7 = vadd.f32 %v2478_v6, %v3263_v4  ;;  %v715_v8 = vpop.f32.mrb[3].mxu0  ;;  %v793_v9 = vmul.f32 0.25, %v721_v45 }
 0x230   : > { %v716_v43 = vadd.f32 %v3263_v4, %v715_v8  ;;  %v791_v13 = vmul.f32 0.25, %v713_v31 }
 0x231   : > { %v794_v54 = vmul.f32 0.25, %v724_v7  ;;  %v3269_v12 = vpack.c.bf16 %v724_v7, %v721_v45 }
 0x232   : > { %v792_v14 = vmul.f32 0.25, %v716_v43  ;;  %v3271_v15 = vpack.c.bf16 %v716_v43, %v713_v31 }
 0x233   : > { %v3273_v18 = vpack.c.bf16 %v794_v54, %v793_v9  ;;  %829 = vrot.lane.b32.xlu1 %v3269_v12, %s2945_s13 }
 0x234   : > { %827 = vrot.lane.b32.xlu0 %v3271_v15, %s2945_s13  ;;  %v2481_v19 = vpop.f32.mrb[4].mxu0  ;;  %v3279_v22 = vpack.c.bf16 %v792_v14, %v791_v13 }
 0x235   : > { %v737_v55 = vadd.f32 %v2481_v19, %v3263_v4  ;;  %v728_v16 = vpop.f32.mrb[5].mxu0 }
 0x236   : > { %v729_v26 = vadd.f32 %v3263_v4, %v728_v16  ;;  %v2482_v27 = vpop.f32.mrb[6].mxu0  ;;  %2499 = vmatprep.mubr.msk.bf16.mxu1 %vm835_vm1, %v3279_v22 }
 0x237   : > { %v740_v0 = vadd.f32 %v2482_v27, %v3263_v4  ;;  %v731_v30 = vpop.f32.mrb[7].mxu0  ;;  %v797_v33 = vmul.f32 0.25, %v737_v55 }
 0x238   : > { %v732_v32 = vadd.f32 %v3263_v4, %v731_v30  ;;  %v795_v38 = vmul.f32 0.25, %v729_v26 }
 0x239   : > { %v798_v34 = vmul.f32 0.25, %v740_v0  ;;  %v3287_v20 = vpack.c.bf16 %v740_v0, %v737_v55 }
 0x23a   : > { %v796_v39 = vmul.f32 0.25, %v732_v32  ;;  %v3289_v40 = vpack.c.bf16 %v732_v32, %v729_v26 }
 0x23b   : > { %v3291_v1 = vpack.c.bf16 %v798_v34, %v797_v33  ;;  %833 = vrot.lane.b32.xlu0 %v3287_v20, %s2945_s13 }
 0x23c   : > { %v3295_v41 = vpack.c.bf16 %v796_v39, %v795_v38  ;;  %831 = vrot.lane.b32.xlu1 %v3289_v40, %s2945_s13  ;;  %v2485_v10 = vpop.f32.mrb[8].mxu0 }
 0x23d   : > { %v753_v36 = vadd.f32 %v2485_v10, %v3263_v4  ;;  %v744_v42 = vpop.f32.mrb[9].mxu0 }
 0x23e   : > { %v745_v46 = vadd.f32 %v3263_v4, %v744_v42  ;;  %v2486_v24 = vpop.f32.mrb[10].mxu0 }
 0x23f   : > { %v756_v48 = vadd.f32 %v2486_v24, %v3263_v4  ;;  %v747_v49 = vpop.f32.mrb[11].mxu0  ;;  %v801_v11 = vmul.f32 0.25, %v753_v36 }
 0x240   : > { %v748_v50 = vadd.f32 %v3263_v4, %v747_v49  ;;  %v799_v23 = vmul.f32 0.25, %v745_v46 }
 0x241   : > { %v802_v51 = vmul.f32 0.25, %v756_v48  ;;  %v3303_v44 = vpack.c.bf16 %v756_v48, %v753_v36 }
 0x242   : > { %v800_v52 = vmul.f32 0.25, %v748_v50  ;;  %v3305_v28 = vpack.c.bf16 %v748_v50, %v745_v46 }
 0x243   : > { %v3307_v29 = vpack.c.bf16 %v802_v51, %v801_v11  ;;  %v777_v11 = vld [vmem:[%s3970_s5 + $0x10] sm:$0xff] }
 0x244   : > { %v3309_v53 = vpack.c.bf16 %v800_v52, %v799_v23  ;;  %929 = vrot.lane.b32.xlu1 %v3305_v28, %s2945_s13  ;;  %v2489_v56 = vpop.f32.mrb[12].mxu0  ;;  %v775_v23 = vld [vmem:[%s3970_s5] sm:$0xff] }
 0x245   : > { %v769_v57 = vadd.f32 %v2489_v56, %v3263_v4  ;;  %v760_v17 = vpop.f32.mrb[13].mxu0 }
 0x246   : > { %v761_v37 = vadd.f32 %v3263_v4, %v760_v17  ;;  %v2490_v35 = vpop.f32.mrb[14].mxu0  ;;  %2515 = vmatprep.mubr.msk.bf16.mxu0 %vm835_vm1, %v3309_v53 }
 0x247   : > { %v772_v58 = vadd.f32 %v2490_v35, %v3263_v4  ;;  %v763_v59 = vpop.f32.mrb[15].mxu0  ;;  %v805_v61 = vmul.f32 0.25, %v769_v57 }
 0x248   : > { %v764_v60 = vadd.f32 %v3263_v4, %v763_v59  ;;  %931 = vrot.lane.b32.xlu1 %v3303_v44, %s2945_s13  ;;  %v803_v21 = vmul.f32 0.25, %v761_v37  ;;  %v778_v59 = vld [vmem:[%s3970_s5 + $0x18] sm:$0xff] }
 0x249   : > { %v806_v62 = vmul.f32 0.25, %v772_v58  ;;  %v3321_v63 = vpack.c.bf16 %v772_v58, %v769_v57  ;;  %v776_v57 = vld [vmem:[%s3970_s5 + $0x8] sm:$0xff] }
 0x24a   : > { %v804_v47 = vmul.f32 0.25, %v764_v60  ;;  %v3323_v2 = vpack.c.bf16 %v764_v60, %v761_v37 }
 0x24b   : > { %v3325_v3 = vpack.c.bf16 %v806_v62, %v805_v61 }
 0x24c   : > { %v3327_v25 = vpack.c.bf16 %v804_v47, %v803_v21  ;;  %935 = vrot.lane.b32.xlu1 %v3321_v63, %s2945_s13  ;;  %933 = vrot.lane.b32.xlu0 %v3323_v2, %s2945_s13  ;;  %v781_v47 = vld [vmem:[%s3970_s5 + $0x30] sm:$0xff] }
 0x250   : > { %1213 = vrot.lane.b32.xlu1 %v3269_v12, %s2946_s14  ;;  %1211 = vrot.lane.b32.xlu0 %v3271_v15, %s2946_s14 }
 0x254   : > { %1217 = vrot.lane.b32.xlu1 %v3287_v20, %s2946_s14  ;;  %1215 = vrot.lane.b32.xlu0 %v3289_v40, %s2946_s14 }
 0x258   : > { %1403 = vrot.lane.b32.xlu1 %v3269_v12, %s2947_s17  ;;  %1300 = vrot.lane.b32.xlu0 %v3305_v28, %s2946_s14 }
 0x25c   : > { %1510 = vrot.lane.b32.xlu1 %v3305_v28, %s2947_s17  ;;  %1302 = vrot.lane.b32.xlu0 %v3303_v44, %s2946_s14 }
 0x260   : > { %1407 = vrot.lane.b32.xlu1 %v3287_v20, %s2947_s17  ;;  %1401 = vrot.lane.b32.xlu0 %v3271_v15, %s2947_s17 }
 0x264   : > { %1512 = vrot.lane.b32.xlu1 %v3303_v44, %s2947_s17  ;;  %1306 = vrot.lane.b32.xlu0 %v3321_v63, %s2946_s14 }
 0x268   : > { %1304 = vrot.lane.b32.xlu1 %v3323_v2, %s2946_s14  ;;  %1405 = vrot.lane.b32.xlu0 %v3289_v40, %s2947_s17  ;;  %s3916_s14 = scalar_lea.vmem %s3973_s8, %s2324_s16 }
 0x2a5   : > { %v830_v5 = vpop.permute.xlu1 %829 }
 0x2a6   : > { %v828_v4 = vpop.permute.xlu0 %827  ;;  %v852_v31 = vsel %vm835_vm1, %v830_v5, 0 }
 0x2a7   : > { %2639 = vmatprep.subr.msk.bf16.mxu1 %vm835_vm1, %v828_v4  ;;  %v849_v45 = vsel %vm835_vm1, %v828_v4, 0 }
 0x2a8   : > { %2492 = vmatpush3.bf16.xpose.msra.mxu1 %v849_v45  ;;  %v782_v45 = vld [vmem:[%s3970_s5 + $0x38] sm:$0xff] }
 0x2a9   : > { %2640 = vmatprep.subr.msk.bf16.mxu1 %vm835_vm1, %v830_v5 }
 0x2ad   : > { %v834_v9 = vpop.permute.xlu0 %833 }
 0x2ae   : > { %v832_v6 = vpop.permute.xlu1 %831  ;;  %v858_v14 = vsel %vm835_vm1, %v834_v9, 0 }
 0x2af   : > { %v855_v8 = vsel %vm835_vm1, %v832_v6, 0 }
 0x2b0   : > { %2494 = vmatpush3.bf16.xpose.msra.mxu1 %v852_v31 }
 0x2b1   : > { %2641 = vmatprep.subr.msk.bf16.mxu1 %vm835_vm1, %v832_v6  ;;  %v780_v6 = vld [vmem:[%s3970_s5 + $0x28] sm:$0xff] }
 0x2b6   : > { %v930_v7 = vpop.permute.xlu1 %929 }
 0x2b7   : > { %2643 = vmatprep.subr.msk.bf16.mxu0 %vm835_vm1, %v930_v7  ;;  %v950_v43 = vsel %vm835_vm1, %v930_v7, 0 }
 0x2b8   : > { %2496 = vmatpush3.bf16.xpose.msra.mxu1 %v855_v8  ;;  %2508 = vmatpush3.bf16.xpose.msra.mxu0 %v950_v43 }
 0x2b9   : > { %2642 = vmatprep.subr.msk.bf16.mxu1 %vm835_vm1, %v834_v9 }
 0x2ba   : > { %v932_v54 = vpop.permute.xlu1 %931 }
 0x2bb   : > { %2644 = vmatprep.subr.msk.bf16.mxu0 %vm835_vm1, %v932_v54  ;;  %v953_v19 = vsel %vm835_vm1, %v932_v54, 0  ;;  %v779_v54 = vld [vmem:[%s3970_s5 + $0x20] sm:$0xff] }
 0x2be   : > { %v934_v13 = vpop.permute.xlu0 %933  ;;  %v936_v55 = vpop.permute.xlu1 %935 }
 0x2bf   : > { %v956_v27 = vsel %vm835_vm1, %v934_v13, 0  ;;  %v959_v34 = vsel %vm835_vm1, %v936_v55, 0 }
 0x2c0   : > { %2498 = vmatpush3.bf16.xpose.msra.mxu1 %v858_v14  ;;  %2510 = vmatpush3.bf16.xpose.msra.mxu0 %v953_v19 }
 0x2c1   : > { %2645 = vmatprep.subr.msk.bf16.mxu0 %vm835_vm1, %v934_v13 }
 0x2c2   : > { %v1212_v16 = vpop.permute.xlu0 %1211  ;;  %v1214_v0 = vpop.permute.xlu1 %1213 }
 0x2c6   : > { %v1216_v26 = vpop.permute.xlu0 %1215  ;;  %v1218_v32 = vpop.permute.xlu1 %1217 }
 0x2c7   : > { %2500 = vmatmul.mubr.msk.bf16.vlgmr.msra.gmra.mrb[0].mxu1 %vm835_vm1, %v3273_v18 }
 0x2c8   : > { %2503 = vmatprep.mubr.msk.bf16.mxu1 %vm835_vm1, %v3295_v41  ;;  %2512 = vmatpush3.bf16.xpose.msra.mxu0 %v956_v27 }
 0x2c9   : > { %2646 = vmatprep.subr.msk.bf16.mxu0 %vm835_vm1, %v936_v55 }
 0x2ca   : > { %v3372_v30 = vpop.permute.xlu0 %1300  ;;  %v1404_v10 = vpop.permute.xlu1 %1403 }
 0x2cb   : > { %v1425_v42 = vsel %vm835_vm1, %v1404_v10, 0 }
 0x2ce   : > { %v3374_v33 = vpop.permute.xlu0 %1302  ;;  %v3390_v24 = vpop.permute.xlu1 %1510 }
 0x2cf   : > { %2504 = vmatmul.mubr.msk.bf16.gmra.mrb[4].mxu1 %vm835_vm1, %v3291_v1 }
 0x2d0   : > { %2514 = vmatpush3.bf16.xpose.msra.mxu0 %v959_v34 }
 0x2d1   : > { %2523 = vmatprep.subr.bf16.mxu0 %v1212_v16 }
 0x2d2   : > { %v1402_v38 = vpop.permute.xlu0 %1401  ;;  %v1408_v49 = vpop.permute.xlu1 %1407 }
 0x2d3   : > { %v1422_v39 = vsel %vm835_vm1, %v1402_v38, 0  ;;  %2647 = vmatprep.subr.msk.bf16.mxu1 %vm835_vm1, %v1402_v38  ;;  %v1431_v50 = vsel %vm835_vm1, %v1408_v49, 0 }
 0x2d4   : > { %2556 = vmatpush3.bf16.xpose.msra.mxu1 %v1422_v39 }
 0x2d5   : > { %2648 = vmatprep.subr.msk.bf16.mxu1 %vm835_vm1, %v1404_v10 }
 0x2d6   : > { %v3382_v36 = vpop.permute.xlu0 %1306 }
 0x2d7   : > { %2516 = vmatmul.mubr.msk.bf16.vlgmr.msra.gmra.mrb[16].mxu0 %vm835_vm1, %v3307_v29 }
 0x2d8   : > { %2519 = vmatprep.mubr.msk.bf16.mxu0 %vm835_vm1, %v3327_v25  ;;  %2524 = vmatpush3.bf16.msra.mxu0 %v1212_v16 }
 0x2d9   : > { %2525 = vmatprep.subr.bf16.mxu0 %v1214_v0 }
 0x2da   : > { %v1406_v46 = vpop.permute.xlu0 %1405 }
 0x2db   : > { %v1428_v48 = vsel %vm835_vm1, %v1406_v46, 0 }
 0x2dc   : > { %2526 = vmatpush3.bf16.msra.mxu0 %v1214_v0  ;;  %2558 = vmatpush3.bf16.xpose.msra.mxu1 %v1425_v42 }
 0x2dd   : > { %2527 = vmatprep.subr.bf16.mxu0 %v1216_v26  ;;  %2649 = vmatprep.subr.msk.bf16.mxu1 %vm835_vm1, %v1406_v46 }
 0x2df   : > { %2520 = vmatmul.mubr.msk.bf16.gmra.mrb[20].mxu0 %vm835_vm1, %v3325_v3 }
 0x2e0   : > { %2528 = vmatpush3.bf16.msra.mxu0 %v1216_v26 }
 0x2e1   : > { %2529 = vmatprep.subr.bf16.mxu0 %v1218_v32 }
 0x2e4   : > { %2530 = vmatpush3.bf16.msra.mxu0 %v1218_v32  ;;  %2560 = vmatpush3.bf16.xpose.msra.mxu1 %v1428_v48 }
 0x2e5   : > { %2539 = vmatprep.subr.bf16.mxu0 %v3372_v30  ;;  %2650 = vmatprep.subr.msk.bf16.mxu1 %vm835_vm1, %v1408_v49 }
 0x2ec   : > { %2562 = vmatpush3.bf16.xpose.msra.mxu1 %v1431_v50 }
 0x39a   : > { %v2501_v51 = vpop.f32.mrb[0].mxu1 }
 0x39b   : > { %v3404_v52 = vadd.f32 %v2501_v51, %v777_v11  ;;  %v894_v56 = vpop.f32.mrb[1].mxu1 }
 0x39c   : > { %v2502_v17 = vpop.f32.mrb[2].mxu1  ;;  %v3409_v37 = vadd.f32 %v894_v56, %v775_v23 }
 0x39d   : > { %v897_v35 = vpop.f32.mrb[3].mxu1  ;;  %v1033_v58 = vsel %vm1026_vm2, %v3404_v52, -inf  ;;  %v3420_v62 = vadd.f32 %v2502_v17, %v778_v59 }
 0x39e   : > { %v3416_v60 = vadd.f32 %v897_v35, %v776_v57  ;;  %1034 = vmax.xlane.f32.xlu0 %v1033_v58  ;;  %v1027_v21 = vsel %vm1026_vm2, %v3409_v37, -inf }
 0x39f   : > { %v1036_v9 = vsel %vm1026_vm2, %v3420_v62, -inf }
 0x3a0   : > { %v1030_v61 = vsel %vm1026_vm2, %v3416_v60, -inf }
 0x3a1   : > { %1031 = vmax.xlane.f32.xlu1 %v1030_v61 }
 0x3a2   : > { %v2505_v4 = vpop.f32.mrb[4].mxu1  ;;  %1028 = vmax.xlane.f32.xlu0 %v1027_v21 }
 0x3a3   : > { %v910_v5 = vpop.f32.mrb[5].mxu1  ;;  %v3433_v7 = vadd.f32 %v2505_v4, %v781_v47  ;;  %v3490_v4 = vpop.permute.xlu1 %1512 }
 0x3a4   : > { %v2506_v31 = vpop.f32.mrb[6].mxu1  ;;  %v3446_v19 = vadd.f32 %v910_v5, %v779_v54 }
 0x3a5   : > { %v3435_v8 = vadd.f32 %v2506_v31, %v782_v45  ;;  %v913_v43 = vpop.f32.mrb[7].mxu1  ;;  %v1045_v55 = vsel %vm1026_vm2, %v3433_v7, -inf }
 0x3a6   : > { %1037 = vmax.xlane.f32.xlu0 %v1036_v9  ;;  %v3442_v13 = vadd.f32 %v913_v43, %v780_v6  ;;  %v1039_v39 = vsel %vm1026_vm2, %v3446_v19, -inf }
 0x3a7   : > { %v1048_v14 = vsel %vm1026_vm2, %v3435_v8, -inf }
 0x3a8   : > { %1049 = vmax.xlane.f32.xlu1 %v1048_v14  ;;  %v1042_v27 = vsel %vm1026_vm2, %v3442_v13, -inf }
 0x3aa   : > { %1046 = vmax.xlane.f32.xlu0 %v1045_v55  ;;  %v2517_v16 = vpop.f32.mrb[16].mxu0 }
 0x3ab   : > { %v995_v26 = vpop.f32.mrb[17].mxu0  ;;  %v3452_v32 = vadd.f32 %v2517_v16, %v777_v11 }
 0x3ac   : > { %1043 = vmax.xlane.f32.xlu1 %v1042_v27  ;;  %v2518_v0 = vpop.f32.mrb[18].mxu0  ;;  %v3462_v46 = vadd.f32 %v995_v26, %v775_v23 }
 0x3ad   : > { %v3454_v34 = vadd.f32 %v2518_v0, %v778_v59  ;;  %v998_v38 = vpop.f32.mrb[19].mxu0  ;;  %v1057_v48 = vsel %vm1026_vm2, %v3452_v32, -inf }
 0x3ae   : > { %1040 = vmax.xlane.f32.xlu0 %v1039_v39  ;;  %v3458_v10 = vadd.f32 %v998_v38, %v776_v57  ;;  %v1051_v23 = vsel %vm1026_vm2, %v3462_v46, -inf }
 0x3af   : > { %v1060_v42 = vsel %vm1026_vm2, %v3454_v34, -inf }
 0x3b0   : > { %1061 = vmax.xlane.f32.xlu1 %v1060_v42  ;;  %v1054_v11 = vsel %vm1026_vm2, %v3458_v10, -inf }
 0x3b2   : > { %1058 = vmax.xlane.f32.xlu0 %v1057_v48  ;;  %v2521_v49 = vpop.f32.mrb[20].mxu0 }
 0x3b3   : > { %v1011_v50 = vpop.f32.mrb[21].mxu0  ;;  %v3468_v56 = vadd.f32 %v2521_v49, %v781_v47 }
 0x3b4   : > { %v2522_v51 = vpop.f32.mrb[22].mxu0  ;;  %1055 = vmax.xlane.f32.xlu1 %v1054_v11  ;;  %v3476_v58 = vadd.f32 %v1011_v50, %v779_v54 }
 0x3b5   : > { %v3470_v57 = vadd.f32 %v2522_v51, %v782_v45  ;;  %v1014_v17 = vpop.f32.mrb[23].mxu0  ;;  %v1069_v59 = vsel %vm1026_vm2, %v3468_v56, -inf  ;;  %v3492_v45 = vpop.permute.xlu1 %1304 }
 0x3b6   : > { %v3474_v35 = vadd.f32 %v1014_v17, %v780_v6  ;;  %1052 = vmax.xlane.f32.xlu0 %v1051_v23  ;;  %v1063_v61 = vsel %vm1026_vm2, %v3476_v58, -inf }
 0x3b7   : > { %v1072_v21 = vsel %vm1026_vm2, %v3470_v57, -inf }
 0x3b8   : > { %v1066_v47 = vsel %vm1026_vm2, %v3474_v35, -inf }
 0x3ba   : > { %1070 = vmax.xlane.f32.xlu0 %v1069_v59 }
 0x3be   : > { %1064 = vmax.xlane.f32.xlu0 %v1063_v61 }
 0x3c5   : > { %1395 = vrot.lane.b32.xlu1 %v3273_v18, %s2948_s20 }
 0x3d4   : > { %1393 = vrot.lane.b32.xlu0 %v3279_v22, %s2948_s20 }
 0x3e9   : > { %1073 = vmax.xlane.f32.xlu1 %v1072_v21 }
 0x3ed   : > { %1067 = vmax.xlane.f32.xlu1 %v1066_v47 }
 0x42b   : > { %v1035_v5 = vpop.xlane.xlu0 %1034 }
 0x42c   : > { %v1077_v31 = vsub.f32 %v3404_v52, %v1035_v5 }
 0x42e   : > { %v1095_v6 = vmul.f32 1.442695, %v1077_v31  ;;  %v1032_v18 = vpop.xlane.xlu1 %1031 }
 0x42f   : > { %v1029_v43 = vpop.xlane.xlu0 %1028  ;;  %v1076_v9 = vsub.f32 %v3416_v60, %v1032_v18 }
 0x430   : > { %2777 = vpow2.f32 %v1095_v6  ;;  %v1075_v22 = vsub.f32 %v3409_v37, %v1029_v43 }
 0x431   : > { %v1093_v26 = vmul.f32 1.442695, %v1076_v9 }
 0x432   : > { %v1091_v54 = vmul.f32 1.442695, %v1075_v22 }
 0x433   : > { %v1038_v14 = vpop.xlane.xlu0 %1037 }
 0x434   : > { %2779 = vpow2.f32 %v1091_v54  ;;  %v1078_v55 = vsub.f32 %v3420_v62, %v1038_v14 }
 0x435   : > { %v1050_v16 = vpop.xlane.xlu1 %1049 }
 0x436   : > { %v1097_v27 = vmul.f32 1.442695, %v1078_v55  ;;  %v1082_v39 = vsub.f32 %v3435_v8, %v1050_v16 }
 0x437   : > { %v1047_v0 = vpop.xlane.xlu0 %1046 }
 0x438   : > { %2781 = vpow2.f32 %v1097_v27  ;;  %v1081_v52 = vsub.f32 %v3433_v7, %v1047_v0  ;;  %v1105_v50 = vmul.f32 1.442695, %v1082_v39 }
 0x439   : > { %2783 = vpow2.f32 %v1093_v26  ;;  %v1044_v42 = vpop.xlane.xlu1 %1043 }
 0x43a   : > { %v3499_v38 = vpop.eup %2777  ;;  %v1103_v37 = vmul.f32 1.442695, %v1081_v52  ;;  %v1080_v7 = vsub.f32 %v3442_v13, %v1044_v42 }
 0x43b   : > { %v1041_v60 = vpop.xlane.xlu0 %1040  ;;  %v1129_v48 = vsel %vm1026_vm2, %v3499_v38, 0.0 }
 0x43c   : > { %v1079_v62 = vsub.f32 %v3446_v19, %v1041_v60  ;;  %1130 = vadd.xlane.f32.xlu0 %v1129_v48  ;;  %2785 = vpow2.f32 %v1103_v37  ;;  %v1101_v59 = vmul.f32 1.442695, %v1080_v7 }
 0x43d   : > { %v1062_v17 = vpop.xlane.xlu1 %1061 }
 0x43e   : > { %v3505_v49 = vpop.eup %2779  ;;  %v1099_v11 = vmul.f32 1.442695, %v1079_v62  ;;  %v1086_v5 = vsub.f32 %v3454_v34, %v1062_v17 }
 0x43f   : > { %v1059_v51 = vpop.xlane.xlu0 %1058  ;;  %v1123_v8 = vsel %vm1026_vm2, %v3505_v49, 0.0 }
 0x440   : > { %2787 = vpow2.f32 %v1099_v11  ;;  %1124 = vadd.xlane.f32.xlu0 %v1123_v8  ;;  %v1085_v19 = vsub.f32 %v3452_v32, %v1059_v51  ;;  %v1113_v54 = vmul.f32 1.442695, %v1086_v5 }
 0x441   : > { %2789 = vpow2.f32 %v1105_v50  ;;  %v1056_v18 = vpop.xlane.xlu1 %1055 }
 0x442   : > { %v3510_v23 = vpop.eup %2781  ;;  %2791 = vpow2.f32 %v1101_v59  ;;  %v1111_v31 = vmul.f32 1.442695, %v1085_v19 }
 0x443   : > { %v1053_v61 = vpop.xlane.xlu0 %1052  ;;  %v1132_v21 = vsel %vm1026_vm2, %v3510_v23, 0.0  ;;  %v3515_v47 = vpop.eup %2783 }
 0x444   : > { %v1083_v13 = vsub.f32 %v3462_v46, %v1053_v61  ;;  %1133 = vadd.xlane.f32.xlu1 %v1132_v21  ;;  %v1126_v22 = vsel %vm1026_vm2, %v3515_v47, 0.0  ;;  %v1084_v46 = vsub.f32 %v3458_v10, %v1056_v18 }
 0x445   : > { %v1396_v10 = vpop.permute.xlu1 %1395 }
 0x446   : > { %v1107_v6 = vmul.f32 1.442695, %v1083_v13  ;;  %v3521_v32 = vpop.eup %2785  ;;  %v1109_v26 = vmul.f32 1.442695, %v1084_v46 }
 0x447   : > { %v1071_v43 = vpop.xlane.xlu0 %1070  ;;  %v1141_v34 = vsel %vm1026_vm2, %v3521_v32, 0.0 }
 0x448   : > { %2793 = vpow2.f32 %v1107_v6  ;;  %1127 = vadd.xlane.f32.xlu1 %v1126_v22  ;;  %v1089_v51 = vsub.f32 %v3468_v56, %v1071_v43 }
 0x449   : > { %2795 = vpow2.f32 %v1111_v31 }
 0x44a   : > { %v3523_v9 = vpop.eup %2787  ;;  %2797 = vpow2.f32 %v1113_v54  ;;  %v1119_v17 = vmul.f32 1.442695, %v1089_v51 }
 0x44b   : > { %v1065_v14 = vpop.xlane.xlu0 %1064  ;;  %v1135_v55 = vsel %vm1026_vm2, %v3523_v9, 0.0  ;;  %v3530_v16 = vpop.eup %2789  ;;  %2799 = vpow2.f32 %v1109_v26 }
 0x44c   : > { %1142 = vadd.xlane.f32.xlu1 %v1141_v34  ;;  %1136 = vadd.xlane.f32.xlu0 %v1135_v55  ;;  %v1144_v0 = vsel %vm1026_vm2, %v3530_v16, 0.0  ;;  %v3534_v52 = vpop.eup %2791  ;;  %v1087_v59 = vsub.f32 %v3476_v58, %v1065_v14  ;;  %2801 = vpow2.f32 %v1119_v17 }
 0x44d   : > { %v1138_v37 = vsel %vm1026_vm2, %v3534_v52, 0.0 }
 0x44e   : > { %v1115_v19 = vmul.f32 1.442695, %v1087_v59 }
 0x44f   : > { %v1394_v27 = vpop.permute.xlu0 %1393 }
 0x450   : > { %1145 = vadd.xlane.f32.xlu1 %v1144_v0  ;;  %2563 = vmatprep.mubr.msk.bf16.mxu1 %vm835_vm1, %v1394_v27  ;;  %2803 = vpow2.f32 %v1115_v19 }
 0x451   : > { %2564 = vmatmul.mubr.msk.bf16.vlgmr.msra.gmra.mrb[8].mxu1 %vm835_vm1, %v1396_v10 }
 0x452   : > { %v3538_v39 = vpop.eup %2793 }
 0x453   : > { %v1147_v42 = vsel %vm1026_vm2, %v3538_v39, 0.0  ;;  %v3544_v60 = vpop.eup %2795 }
 0x454   : > { %1139 = vadd.xlane.f32.xlu1 %v1138_v37  ;;  %1148 = vadd.xlane.f32.xlu0 %v1147_v42  ;;  %v1153_v48 = vsel %vm1026_vm2, %v3544_v60, 0.0  ;;  %v3548_v62 = vpop.eup %2797 }
 0x455   : > { %v1156_v50 = vsel %vm1026_vm2, %v3548_v62, 0.0  ;;  %v3552_v7 = vpop.eup %2799 }
 0x456   : > { %v1150_v11 = vsel %vm1026_vm2, %v3552_v7, 0.0  ;;  %v3564_v6 = vpop.eup %2801 }
 0x458   : > { %1154 = vadd.xlane.f32.xlu1 %v1153_v48 }
 0x45a   : > { %v3568_v56 = vpop.eup %2803 }
 0x45b   : > { %v1159_v58 = vsel %vm1026_vm2, %v3568_v56, 0.0 }
 0x45c   : > { %1157 = vadd.xlane.f32.xlu1 %v1156_v50 }
 0x460   : > { %1151 = vadd.xlane.f32.xlu1 %v1150_v11 }
 0x46a   : > { %1514 = vrot.lane.b32.xlu0 %v3323_v2, %s2947_s17 }
 0x471   : > { %1397 = vrot.lane.b32.xlu1 %v3295_v41, %s2948_s20  ;;  %v1165_v41 = vsel %vm1026_vm2, %v3564_v6, 0.0 }
 0x476   : > { %v1074_v8 = vpop.xlane.xlu1 %1073 }
 0x477   : > { %v1090_v61 = vsub.f32 %v3470_v57, %v1074_v8 }
 0x479   : > { %v1121_v13 = vmul.f32 1.442695, %v1090_v61 }
 0x47a   : > { %v1068_v21 = vpop.xlane.xlu1 %1067 }
 0x47b   : > { %v1088_v5 = vsub.f32 %v3474_v35, %v1068_v21  ;;  %2805 = vpow2.f32 %v1121_v13 }
 0x47d   : > { %v1117_v31 = vmul.f32 1.442695, %v1088_v5 }
 0x47f   : > { %2807 = vpow2.f32 %v1117_v31 }
 0x485   : > { %v3572_v57 = vpop.eup %2805 }
 0x486   : > { %v1168_v35 = vsel %vm1026_vm2, %v3572_v57, 0.0 }
 0x489   : > { %1166 = vadd.xlane.f32.xlu0 %v1165_v41  ;;  %v3576_v18 = vpop.eup %2807 }
 0x48a   : > { %v1162_v43 = vsel %vm1026_vm2, %v3576_v18, 0.0 }
 0x48d   : > { %1160 = vadd.xlane.f32.xlu0 %v1159_v58 }
 0x491   : > { %1169 = vadd.xlane.f32.xlu0 %v1168_v35 }
 0x495   : > { %1163 = vadd.xlane.f32.xlu1 %v1162_v43 }
 0x4a6   : > { %1516 = vrot.lane.b32.xlu1 %v3321_v63, %s2947_s17 }
 0x4a7   : > { %1399 = vrot.lane.b32.xlu0 %v3291_v1, %s2948_s20 }
 0x4aa   : > { %1504 = vrot.lane.b32.xlu1 %v3307_v29, %s2948_s20 }
 0x4ab   : > { %1502 = vrot.lane.b32.xlu0 %v3309_v53, %s2948_s20 }
 0x4ae   : > { %1508 = vrot.lane.b32.xlu1 %v3325_v3, %s2948_s20 }
 0x4af   : > { %1506 = vrot.lane.b32.xlu0 %v3327_v25, %s2948_s20 }
 0x4c9   : > { %v1131_v22 = vpop.xlane.xlu0 %1130 }
 0x4cd   : > { %v1125_v54 = vpop.xlane.xlu0 %1124 }
 0x4d1   : > { %v1134_v46 = vpop.xlane.xlu1 %1133 }
 0x4d2   : > { %2809 = vrcp.f32 %v1134_v46  ;;  %v3637_v46 = vld [vmem:[%s3970_s5 + $0x50] sm:$0xff] }
 0x4d3   : > { %2811 = vrcp.f32 %v1125_v54 }
 0x4d4   : > { %2813 = vrcp.f32 %v1131_v22 }
 0x4d5   : > { %v1128_v14 = vpop.xlane.xlu1 %1127 }
 0x4d6   : > { %2815 = vrcp.f32 %v1128_v14 }
 0x4d9   : > { %v1143_v1 = vpop.xlane.xlu1 %1142  ;;  %v1137_v29 = vpop.xlane.xlu0 %1136 }
 0x4dc   : > { %v2810_v34 = vpop.eup %2809 }
 0x4dd   : > { %v1146_v55 = vpop.xlane.xlu1 %1145  ;;  %v2812_v26 = vpop.eup %2811  ;;  %v1190_v3 = vmul.f32 %v2810_v34, %v3510_v23 }
 0x4de   : > { %v2814_v53 = vpop.eup %2813  ;;  %2817 = vrcp.f32 %v1146_v55  ;;  %v1187_v0 = vmul.f32 %v2812_v26, %v3505_v49 }
 0x4df   : > { %2819 = vrcp.f32 %v1137_v29  ;;  %v1189_v37 = vmul.f32 %v2814_v53, %v3499_v38 }
 0x4e0   : > { %v2816_v27 = vpop.eup %2815  ;;  %2821 = vrcp.f32 %v1143_v1  ;;  %v3642_v1 = vld [vmem:[%s3970_s5 + $0x48] sm:$0xff] }
 0x4e1   : > { %v1140_v25 = vpop.xlane.xlu1 %1139  ;;  %v1188_v10 = vmul.f32 %v2816_v27, %v3515_v47  ;;  %v1204_v48 = vpack.c.bf16 %v1190_v3, %v1189_v37  ;;  %v1149_v11 = vpop.xlane.xlu0 %1148 }
 0x4e2   : > { %2823 = vrcp.f32 %v1140_v25 }
 0x4e3   : > { %v1203_v42 = vpack.c.bf16 %v1188_v10, %v1187_v0  ;;  %v3653_v0 = vld [vmem:[%s3970_s5 + $0x58] sm:$0xff] }
 0x4e5   : > { %v1155_v50 = vpop.xlane.xlu1 %1154  ;;  %2531 = vmatprep.mubr.msk.bf16.mxu0 %vm1026_vm2, %v1203_v42 }
 0x4e6   : > { %2532 = vmatmul.mubr.msk.bf16.vlgmr.msra.gmra.mrb[24].mxu0 %vm1026_vm2, %v1204_v48 }
 0x4e7   : > { %2540 = vmatpush3.bf16.msra.mxu0 %v3372_v30 }
 0x4e8   : > { %2541 = vmatprep.subr.bf16.mxu0 %v3374_v33  ;;  %v2818_v23 = vpop.eup %2817 }
 0x4e9   : > { %v1158_v51 = vpop.xlane.xlu1 %1157  ;;  %v2820_v49 = vpop.eup %2819  ;;  %v1194_v47 = vmul.f32 %v2818_v23, %v3530_v16 }
 0x4ea   : > { %v2822_v8 = vpop.eup %2821  ;;  %2825 = vrcp.f32 %v1158_v51  ;;  %v1191_v30 = vmul.f32 %v2820_v49, %v3523_v9 }
 0x4eb   : > { %2542 = vmatpush3.bf16.msra.mxu0 %v3374_v33  ;;  %2827 = vrcp.f32 %v1149_v11  ;;  %v1193_v19 = vmul.f32 %v2822_v8, %v3521_v32 }
 0x4ec   : > { %v2824_v38 = vpop.eup %2823  ;;  %2543 = vmatprep.subr.bf16.mxu0 %v3492_v45  ;;  %2829 = vrcp.f32 %v1155_v50 }
 0x4ed   : > { %v1152_v17 = vpop.xlane.xlu1 %1151  ;;  %v1192_v59 = vmul.f32 %v2824_v38, %v3534_v52  ;;  %v1206_v33 = vpack.c.bf16 %v1194_v47, %v1193_v19 }
 0x4ee   : > { %2831 = vrcp.f32 %v1152_v17 }
 0x4ef   : > { %2544 = vmatpush3.bf16.msra.mxu0 %v3492_v45  ;;  %v1205_v61 = vpack.c.bf16 %v1192_v59, %v1191_v30 }
 0x4f0   : > { %2545 = vmatprep.subr.bf16.mxu0 %v3382_v36 }
 0x4f1   : > { %v1398_v21 = vpop.permute.xlu1 %1397  ;;  %2535 = vmatprep.mubr.msk.bf16.mxu0 %vm1026_vm2, %v1205_v61 }
 0x4f2   : > { %2536 = vmatmul.mubr.msk.bf16.gmra.mrb[28].mxu0 %vm1026_vm2, %v1206_v33  ;;  %2567 = vmatprep.mubr.msk.bf16.mxu1 %vm835_vm1, %v1398_v21 }
 0x4f3   : > { %2546 = vmatpush3.bf16.msra.mxu0 %v3382_v36  ;;  %v1531_v36 = vsel %vm835_vm1, %v3390_v24, 0 }
 0x4f4   : > { %2651 = vmatprep.subr.msk.bf16.mxu0 %vm835_vm1, %v3390_v24  ;;  %v2826_v9 = vpop.eup %2825 }
 0x4f5   : > { %v2828_v32 = vpop.eup %2827  ;;  %v1198_v52 = vmul.f32 %v2826_v9, %v3548_v62  ;;  %v1515_v62 = vpop.permute.xlu0 %1514 }
 0x4f6   : > { %v2830_v16 = vpop.eup %2829  ;;  %v1195_v13 = vmul.f32 %v2828_v32, %v3538_v39  ;;  %v1534_v39 = vsel %vm835_vm1, %v3490_v4, 0 }
 0x4f7   : > { %v1197_v31 = vmul.f32 %v2830_v16, %v3544_v60  ;;  %v1537_v60 = vsel %vm835_vm1, %v1515_v62, 0 }
 0x4f8   : > { %v2832_v45 = vpop.eup %2831 }
 0x4f9   : > { %v1196_v5 = vmul.f32 %v2832_v45, %v3552_v7  ;;  %v1208_v58 = vpack.c.bf16 %v1198_v52, %v1197_v31 }
 0x4fb   : > { %v1207_v41 = vpack.c.bf16 %v1196_v5, %v1195_v13 }
 0x4fd   : > { %2547 = vmatprep.mubr.msk.bf16.mxu0 %vm1026_vm2, %v1207_v41 }
 0x4fe   : > { %2548 = vmatmul.mubr.msk.bf16.vlgmr.msra.gmra.mrb[32].mxu0 %vm1026_vm2, %v1208_v58 }
 0x4ff   : > { %2572 = vmatpush3.bf16.xpose.msra.mxu0 %v1531_v36 }
 0x500   : > { %2652 = vmatprep.subr.msk.bf16.mxu0 %vm835_vm1, %v3490_v4  ;;  %v3632_v4 = vld [vmem:[%s3970_s5 + $0x40] sm:$0xff] }
 0x507   : > { %2574 = vmatpush3.bf16.xpose.msra.mxu0 %v1534_v39 }
 0x508   : > { %2653 = vmatprep.subr.msk.bf16.mxu0 %vm835_vm1, %v1515_v62 }
 0x50f   : > { %2576 = vmatpush3.bf16.xpose.msra.mxu0 %v1537_v60 }
 0x516   : > { %v1167_v7 = vpop.xlane.xlu0 %1166 }
 0x51a   : > { %v1161_v35 = vpop.xlane.xlu0 %1160 }
 0x51e   : > { %v1170_v43 = vpop.xlane.xlu0 %1169 }
 0x51f   : > { %2833 = vrcp.f32 %v1170_v43 }
 0x520   : > { %2835 = vrcp.f32 %v1161_v35 }
 0x521   : > { %2837 = vrcp.f32 %v1167_v7 }
 0x522   : > { %v1164_v24 = vpop.xlane.xlu1 %1163  ;;  %v1400_v22 = vpop.permute.xlu0 %1399 }
 0x523   : > { %2839 = vrcp.f32 %v1164_v24  ;;  %2568 = vmatmul.mubr.msk.bf16.gmra.mrb[12].mxu1 %vm835_vm1, %v1400_v22  ;;  %v787_v22 = vld [vmem:[%s3970_s5 + $0x60] sm:$0xff] }
 0x524   : > { %v2565_v54 = vpop.f32.mrb[8].mxu1 }
 0x525   : > { %v1467_v14 = vpop.f32.mrb[9].mxu1  ;;  %v1476_v27 = vadd.f32 %v2565_v54, %v3637_v46 }
 0x526   : > { %v1468_v34 = vadd.f32 %v1467_v14, %v3632_v4  ;;  %v1517_v29 = vpop.permute.xlu1 %1516  ;;  %v2566_v55 = vpop.f32.mrb[10].mxu1 }
 0x527   : > { %v1540_v26 = vsel %vm835_vm1, %v1517_v29, 0  ;;  %v1470_v53 = vpop.f32.mrb[11].mxu1  ;;  %2654 = vmatprep.subr.msk.bf16.mxu0 %vm835_vm1, %v1517_v29  ;;  %v1479_v50 = vadd.f32 %v2566_v55, %v3653_v0  ;;  %v1613_v23 = vsel %vm1026_vm2, %v1476_v27, -inf  ;;  %v1503_v59 = vpop.permute.xlu0 %1502  ;;  %v789_v29 = vld [vmem:[%s3970_s5 + $0x70] sm:$0xff] }
 0x528   : > { %v1471_v3 = vadd.f32 %v1470_v53, %v3642_v1  ;;  %2578 = vmatpush3.bf16.xpose.msra.mxu0 %v1540_v26  ;;  %v1607_v25 = vsel %vm1026_vm2, %v1468_v34, -inf }
 0x529   : > { %1608 = vmax.xlane.f32.xlu0 %v1607_v25  ;;  %v2834_v10 = vpop.eup %2833  ;;  %v1616_v47 = vsel %vm1026_vm2, %v1479_v50, -inf }
 0x52a   : > { %v1610_v37 = vsel %vm1026_vm2, %v1471_v3, -inf  ;;  %v2836_v42 = vpop.eup %2835  ;;  %v1202_v51 = vmul.f32 %v2834_v10, %v3572_v57  ;;  %v1505_v19 = vpop.permute.xlu1 %1504 }
 0x52b   : > { %1611 = vmax.xlane.f32.xlu1 %v1610_v37  ;;  %v2838_v48 = vpop.eup %2837  ;;  %v1199_v49 = vmul.f32 %v2836_v42, %v3568_v56  ;;  %v1507_v57 = vpop.permute.xlu0 %1506 }
 0x52c   : > { %v1201_v38 = vmul.f32 %v2838_v48, %v3564_v6 }
 0x52d   : > { %v2840_v11 = vpop.eup %2839  ;;  %1614 = vmax.xlane.f32.xlu0 %v1613_v23 }
 0x52e   : > { %v1200_v8 = vmul.f32 %v2840_v11, %v3576_v18  ;;  %v1210_v30 = vpack.c.bf16 %v1202_v51, %v1201_v38  ;;  %v1509_v56 = vpop.permute.xlu1 %1508 }
 0x530   : > { %v1209_v17 = vpack.c.bf16 %v1200_v8, %v1199_v49 }
 0x531   : > { %1617 = vmax.xlane.f32.xlu0 %v1616_v47 }
 0x532   : > { %2551 = vmatprep.mubr.msk.bf16.mxu0 %vm1026_vm2, %v1209_v17 }
 0x533   : > { %2552 = vmatmul.mubr.msk.bf16.gmra.mrb[36].mxu0 %vm1026_vm2, %v1210_v30 }
 0x534   : > { %2579 = vmatprep.mubr.msk.bf16.mxu0 %vm835_vm1, %v1503_v59 }
 0x53b   : > { %2580 = vmatmul.mubr.msk.bf16.vlgmr.msra.gmra.mrb[40].mxu0 %vm835_vm1, %v1505_v19 }
 0x53c   : > { %2583 = vmatprep.mubr.msk.bf16.mxu0 %vm835_vm1, %v1507_v57 }
 0x543   : > { %2584 = vmatmul.mubr.msk.bf16.gmra.mrb[44].mxu0 %vm835_vm1, %v1509_v56 }
 0x5b6   : > { %v1609_v31 = vpop.xlane.xlu0 %1608 }
 0x5b7   : > { %v1655_v60 = vsub.f32 %v1468_v34, %v1609_v31  ;;  %v788_v34 = vld [vmem:[%s3970_s5 + $0x68] sm:$0xff] }
 0x5b8   : > { %v1612_v62 = vpop.xlane.xlu1 %1611 }
 0x5b9   : > { %v3669_v6 = vpop.f32.mrb[24].mxu0  ;;  %v1656_v35 = vsub.f32 %v1471_v3, %v1612_v62  ;;  %v1671_v24 = vmul.f32 1.442695, %v1655_v60 }
 0x5ba   : > { %v3671_v18 = vpop.f32.mrb[25].mxu0  ;;  %v1615_v41 = vpop.xlane.xlu0 %1614 }
 0x5bb   : > { %v3673_v61 = vpop.f32.mrb[26].mxu0  ;;  %v1657_v36 = vsub.f32 %v1476_v27, %v1615_v41  ;;  %v1673_v14 = vmul.f32 1.442695, %v1656_v35  ;;  %v790_v27 = vld [vmem:[%s3970_s5 + $0x78] sm:$0xff] }
 0x5bc   : > { %v3675_v33 = vpop.f32.mrb[27].mxu0 }
 0x5bd   : > { %v1675_v7 = vmul.f32 1.442695, %v1657_v36 }
 0x5be   : > { %v1618_v58 = vpop.xlane.xlu0 %1617 }
 0x5bf   : > { %v1658_v39 = vsub.f32 %v1479_v50, %v1618_v58  ;;  %2841 = vpow2.f32 %v1675_v7 }
 0x5c1   : > { %v1677_v43 = vmul.f32 1.442695, %v1658_v39 }
 0x5c3   : > { %2843 = vpow2.f32 %v1677_v43 }
 0x5c4   : > { %2845 = vpow2.f32 %v1671_v24 }
 0x5c5   : > { %v3677_v21 = vpop.f32.mrb[28].mxu0  ;;  %2847 = vpow2.f32 %v1673_v14 }
 0x5c6   : > { %v3679_v9 = vpop.f32.mrb[29].mxu0 }
 0x5c7   : > { %v3681_v32 = vpop.f32.mrb[30].mxu0 }
 0x5c8   : > { %v3683_v16 = vpop.f32.mrb[31].mxu0 }
 0x5c9   : > { %v3711_v23 = vpop.eup %2841 }
 0x5ca   : > { %v1709_v49 = vsel %vm1026_vm2, %v3711_v23, 0.0 }
 0x5cd   : > { %v3714_v51 = vpop.eup %2843 }
 0x5ce   : > { %v3718_v8 = vpop.eup %2845  ;;  %v1712_v38 = vsel %vm1026_vm2, %v3714_v51, 0.0 }
 0x5cf   : > { %v3722_v47 = vpop.eup %2847  ;;  %v1703_v30 = vsel %vm1026_vm2, %v3718_v8, 0.0 }
 0x5d0   : > { %v1706_v57 = vsel %vm1026_vm2, %v3722_v47, 0.0 }
 0x5d1   : > { %v3685_v45 = vpop.f32.mrb[32].mxu0 }
 0x5d2   : > { %v3687_v52 = vpop.f32.mrb[33].mxu0 }
 0x5d3   : > { %v3689_v13 = vpop.f32.mrb[34].mxu0 }
 0x5d4   : > { %v3691_v5 = vpop.f32.mrb[35].mxu0 }
 0x5f6   : > { %v2569_v54 = vpop.f32.mrb[12].mxu1 }
 0x5f7   : > { %v1483_v55 = vpop.f32.mrb[13].mxu1  ;;  %v3705_v25 = vadd.f32 %v2569_v54, %v789_v29 }
 0x5f8   : > { %v1484_v26 = vadd.f32 %v1483_v55, %v787_v22  ;;  %v2570_v53 = vpop.f32.mrb[14].mxu1 }
 0x5f9   : > { %v1486_v3 = vpop.f32.mrb[15].mxu1  ;;  %v1495_v42 = vadd.f32 %v2570_v53, %v790_v27  ;;  %v1625_v50 = vsel %vm1026_vm2, %v3705_v25, -inf }
 0x5fa   : > { %v1487_v10 = vadd.f32 %v1486_v3, %v788_v34  ;;  %v1619_v37 = vsel %vm1026_vm2, %v1484_v26, -inf }
 0x5fb   : > { %1620 = vmax.xlane.f32.xlu0 %v1619_v37  ;;  %v1628_v11 = vsel %vm1026_vm2, %v1495_v42, -inf }
 0x5fc   : > { %v1622_v48 = vsel %vm1026_vm2, %v1487_v10, -inf }
 0x5fd   : > { %1623 = vmax.xlane.f32.xlu1 %v1622_v48 }
 0x5ff   : > { %1626 = vmax.xlane.f32.xlu0 %v1625_v50 }
 0x601   : > { %1629 = vmax.xlane.f32.xlu1 %v1628_v11 }
 0x603   : > { %1710 = vadd.xlane.f32.xlu0 %v1709_v49 }
 0x605   : > { %1713 = vadd.xlane.f32.xlu1 %v1712_v38 }
 0x606   : > { %v3724_v17 = vpop.f32.mrb[36].mxu0 }
 0x607   : > { %v3728_v59 = vpop.f32.mrb[37].mxu0  ;;  %1704 = vadd.xlane.f32.xlu0 %v1703_v30 }
 0x608   : > { %v3730_v19 = vpop.f32.mrb[38].mxu0 }
 0x609   : > { %v3734_v56 = vpop.f32.mrb[39].mxu0  ;;  %1707 = vadd.xlane.f32.xlu1 %v1706_v57 }
 0x60e   : > { %v2581_v31 = vpop.f32.mrb[40].mxu0 }
 0x60f   : > { %v1576_v41 = vpop.f32.mrb[41].mxu0 }
 0x610   : > { %v2582_v58 = vpop.f32.mrb[42].mxu0 }
 0x611   : > { %v1579_v36 = vpop.f32.mrb[43].mxu0 }
 0x616   : > { %v2585_v39 = vpop.f32.mrb[44].mxu0 }
 0x617   : > { %v3736_v62 = vadd.f32 %v2585_v39, %v789_v29  ;;  %v1592_v60 = vpop.f32.mrb[45].mxu0 }
 0x618   : > { %v3738_v7 = vadd.f32 %v1592_v60, %v787_v22  ;;  %v2586_v35 = vpop.f32.mrb[46].mxu0 }
 0x619   : > { %v3740_v43 = vadd.f32 %v2586_v35, %v790_v27  ;;  %v1595_v24 = vpop.f32.mrb[47].mxu0 }
 0x61a   : > { %v3742_v54 = vadd.f32 %v1595_v24, %v788_v34 }
 0x688   : > { %v1621_v14 = vpop.xlane.xlu0 %1620 }
 0x689   : > { %v1659_v55 = vsub.f32 %v1484_v26, %v1621_v14 }
 0x68a   : > { %v1624_v53 = vpop.xlane.xlu1 %1623 }
 0x68b   : > { %v1679_v3 = vmul.f32 1.442695, %v1659_v55  ;;  %v1660_v37 = vsub.f32 %v1487_v10, %v1624_v53  ;;  %v1585_v10 = vadd.f32 %v2581_v31, %v3637_v46  ;;  %v1580_v31 = vadd.f32 %v1579_v36, %v3642_v1 }
 0x68c   : > { %v1627_v48 = vpop.xlane.xlu0 %1626 }
 0x68d   : > { %2849 = vpow2.f32 %v1679_v3  ;;  %v1681_v50 = vmul.f32 1.442695, %v1660_v37  ;;  %v1661_v26 = vsub.f32 %v3705_v25, %v1627_v48  ;;  %v1577_v25 = vadd.f32 %v1576_v41, %v3632_v4 }
 0x68e   : > { %v1630_v11 = vpop.xlane.xlu1 %1629  ;;  %v1637_v14 = vsel %vm1026_vm2, %v1585_v10, -inf  ;;  %v1634_v1 = vsel %vm1026_vm2, %v1580_v31, -inf }
 0x68f   : > { %2851 = vpow2.f32 %v1681_v50  ;;  %v1662_v49 = vsub.f32 %v1495_v42, %v1630_v11  ;;  %v1588_v42 = vadd.f32 %v2582_v58, %v3653_v0  ;;  %v1683_v35 = vmul.f32 1.442695, %v1661_v26 }
 0x690   : > { %v1711_v29 = vpop.xlane.xlu0 %1710  ;;  %v1631_v3 = vsel %vm1026_vm2, %v1577_v25, -inf  ;;  %v1643_v11 = vsel %vm1026_vm2, %v3738_v7, -inf }
 0x691   : > { %2853 = vrcp.f32 %v1711_v29  ;;  %v1685_v38 = vmul.f32 1.442695, %v1662_v49  ;;  %v1640_v55 = vsel %vm1026_vm2, %v1588_v42, -inf  ;;  %v1652_v29 = vsel %vm1026_vm2, %v3740_v43, -inf }
 0x692   : > { %v1714_v22 = vpop.xlane.xlu1 %1713  ;;  %v1646_v49 = vsel %vm1026_vm2, %v3742_v54, -inf }
 0x693   : > { %2855 = vrcp.f32 %v1714_v22 }
 0x694   : > { %v1705_v27 = vpop.xlane.xlu0 %1704 }
 0x695   : > { %2857 = vrcp.f32 %v1705_v27 }
 0x696   : > { %v1708_v34 = vpop.xlane.xlu1 %1707 }
 0x697   : > { %v3744_v30 = vpop.eup %2849  ;;  %2859 = vrcp.f32 %v1708_v34 }
 0x698   : > { %v1715_v57 = vsel %vm1026_vm2, %v3744_v30, 0.0  ;;  %2861 = vpow2.f32 %v1685_v38 }
 0x699   : > { %v3750_v39 = vpop.eup %2851  ;;  %1716 = vadd.xlane.f32.xlu0 %v1715_v57  ;;  %2863 = vpow2.f32 %v1683_v35 }
 0x69a   : > { %v1718_v60 = vsel %vm1026_vm2, %v3750_v39, 0.0 }
 0x69b   : > { %1719 = vadd.xlane.f32.xlu1 %v1718_v60  ;;  %v2854_v24 = vpop.eup %2853 }
 0x69c   : > { %v3760_v0 = vmul.f32 %v2854_v24, %v3711_v23  ;;  %v1649_v23 = vsel %vm1026_vm2, %v3736_v62, -inf }
 0x69d   : > { %1638 = vmax.xlane.f32.xlu0 %v1637_v14  ;;  %v2856_v46 = vpop.eup %2855 }
 0x69e   : > { %v3763_v58 = vmul.f32 %v2856_v46, %v3714_v51 }
 0x69f   : > { %v2858_v53 = vpop.eup %2857  ;;  %1641 = vmax.xlane.f32.xlu1 %v1640_v55 }
 0x6a0   : > { %v1784_v41 = vpack.c.bf16 %v3763_v58, %v3760_v0  ;;  %v1767_v36 = vmul.f32 %v2858_v53, %v3718_v8 }
 0x6a1   : > { %v2860_v4 = vpop.eup %2859  ;;  %1632 = vmax.xlane.f32.xlu0 %v1631_v3 }
 0x6a2   : > { %v1768_v37 = vmul.f32 %v2860_v4, %v3722_v47  ;;  %v3771_v48 = vpop.eup %2861 }
 0x6a3   : > { %1635 = vmax.xlane.f32.xlu1 %v1634_v1  ;;  %v1724_v50 = vsel %vm1026_vm2, %v3771_v48, 0.0  ;;  %v3780_v8 = vpop.eup %2863 }
 0x6a4   : > { %v1783_v51 = vpack.c.bf16 %v1768_v37, %v1767_v36  ;;  %v1721_v47 = vsel %vm1026_vm2, %v3780_v8, 0.0 }
 0x6a5   : > { %1650 = vmax.xlane.f32.xlu0 %v1649_v23 }
 0x6a6   : > { %2595 = vmatprep.mubr.msk.bf16.mxu1 %vm1026_vm2, %v1783_v51 }
 0x6a7   : > { %1725 = vadd.xlane.f32.xlu1 %v1724_v50 }
 0x6a9   : > { %1644 = vmax.xlane.f32.xlu0 %v1643_v11 }
 0x6ad   : > { %1722 = vadd.xlane.f32.xlu0 %v1721_v47 }
 0x6b8   : > { %1793 = vrot.lane.b32.xlu1 %v3269_v12, %s2949_s21 }
 0x6c3   : > { %1791 = vrot.lane.b32.xlu0 %v3271_v15, %s2949_s21 }
 0x6c7   : > { %1795 = vrot.lane.b32.xlu0 %v3289_v40, %s2949_s21 }
 0x6cb   : > { %1797 = vrot.lane.b32.xlu0 %v3287_v20, %s2949_s21 }
 0x6dc   : > { %1653 = vmax.xlane.f32.xlu1 %v1652_v29 }
 0x6e0   : > { %1647 = vmax.xlane.f32.xlu1 %v1646_v49 }
 0x6f1   : > { %1880 = vrot.lane.b32.xlu1 %v3305_v28, %s2949_s21 }
 0x6f5   : > { %1882 = vrot.lane.b32.xlu1 %v3303_v44, %s2949_s21 }
 0x726   : > { %v1717_v12 = vpop.xlane.xlu0 %1716 }
 0x728   : > { %v1720_v15 = vpop.xlane.xlu1 %1719 }
 0x72a   : > { %v1639_v40 = vpop.xlane.xlu0 %1638 }
 0x72b   : > { %v1665_v22 = vsub.f32 %v1585_v10, %v1639_v40 }
 0x72c   : > { %v1642_v27 = vpop.xlane.xlu1 %1641 }
 0x72d   : > { %v1691_v20 = vmul.f32 1.442695, %v1665_v22  ;;  %v1666_v38 = vsub.f32 %v1588_v42, %v1642_v27 }
 0x72e   : > { %v1633_v34 = vpop.xlane.xlu0 %1632 }
 0x72f   : > { %2865 = vpow2.f32 %v1691_v20  ;;  %v1663_v26 = vsub.f32 %v1577_v25, %v1633_v34  ;;  %v1693_v60 = vmul.f32 1.442695, %v1666_v38 }
 0x730   : > { %v1636_v57 = vpop.xlane.xlu1 %1635 }
 0x731   : > { %v1687_v35 = vmul.f32 1.442695, %v1663_v26  ;;  %v1664_v24 = vsub.f32 %v1580_v31, %v1636_v57 }
 0x732   : > { %v1651_v14 = vpop.xlane.xlu0 %1650 }
 0x733   : > { %2867 = vpow2.f32 %v1687_v35  ;;  %v1669_v28 = vsub.f32 %v3736_v62, %v1651_v14  ;;  %v1689_v44 = vmul.f32 1.442695, %v1664_v24 }
 0x734   : > { %2869 = vpow2.f32 %v1693_v60  ;;  %v1726_v25 = vpop.xlane.xlu1 %1725 }
 0x735   : > { %v1699_v46 = vmul.f32 1.442695, %v1669_v28 }
 0x736   : > { %v1645_v55 = vpop.xlane.xlu0 %1644 }
 0x737   : > { %2871 = vpow2.f32 %v1699_v46  ;;  %v1667_v10 = vsub.f32 %v3738_v7, %v1645_v55 }
 0x738   : > { %2873 = vpow2.f32 %v1689_v44  ;;  %v1794_v7 = vpop.permute.xlu1 %1793 }
 0x739   : > { %v3802_v53 = vpop.eup %2865  ;;  %v1695_v42 = vmul.f32 1.442695, %v1667_v10 }
 0x73a   : > { %v1723_v3 = vpop.xlane.xlu0 %1722  ;;  %v1733_v31 = vsel %vm1026_vm2, %v3802_v53, 0.0 }
 0x73b   : > { %2875 = vpow2.f32 %v1695_v42  ;;  %1734 = vadd.xlane.f32.xlu1 %v1733_v31 }
 0x73c   : > { %2877 = vrcp.f32 %v1720_v15 }
 0x73d   : > { %v3806_v4 = vpop.eup %2867  ;;  %2879 = vrcp.f32 %v1717_v12 }
 0x73e   : > { %v1792_v62 = vpop.permute.xlu0 %1791  ;;  %v1727_v1 = vsel %vm1026_vm2, %v3806_v4, 0.0  ;;  %v3810_v36 = vpop.eup %2869  ;;  %2881 = vrcp.f32 %v1723_v3 }
 0x73f   : > { %1728 = vadd.xlane.f32.xlu1 %v1727_v1  ;;  %2587 = vmatprep.subr.bf16.mxu1 %v1792_v62  ;;  %v1736_v51 = vsel %vm1026_vm2, %v3810_v36, 0.0  ;;  %2883 = vrcp.f32 %v1726_v25 }
 0x740   : > { %2588 = vmatpush3.bf16.msra.mxu1 %v1792_v62 }
 0x741   : > { %v3812_v37 = vpop.eup %2871  ;;  %2589 = vmatprep.subr.bf16.mxu1 %v1794_v7 }
 0x742   : > { %v1796_v23 = vpop.permute.xlu0 %1795  ;;  %v1745_v50 = vsel %vm1026_vm2, %v3812_v37, 0.0  ;;  %v3818_v11 = vpop.eup %2873 }
 0x743   : > { %1737 = vadd.xlane.f32.xlu1 %v1736_v51  ;;  %1746 = vadd.xlane.f32.xlu0 %v1745_v50  ;;  %v1730_v29 = vsel %vm1026_vm2, %v3818_v11, 0.0 }
 0x744   : > { %2590 = vmatpush3.bf16.msra.mxu1 %v1794_v7 }
 0x745   : > { %v3820_v47 = vpop.eup %2875  ;;  %2591 = vmatprep.subr.bf16.mxu1 %v1796_v23 }
 0x746   : > { %v1739_v49 = vsel %vm1026_vm2, %v3820_v47, 0.0  ;;  %v2878_v12 = vpop.eup %2877  ;;  %v1798_v15 = vpop.permute.xlu0 %1797 }
 0x747   : > { %1731 = vadd.xlane.f32.xlu1 %v1730_v29  ;;  %1740 = vadd.xlane.f32.xlu0 %v1739_v49  ;;  %v2880_v40 = vpop.eup %2879  ;;  %v1772_v22 = vmul.f32 %v2878_v12, %v3750_v39 }
 0x748   : > { %2592 = vmatpush3.bf16.msra.mxu1 %v1796_v23  ;;  %v1771_v27 = vmul.f32 %v2880_v40, %v3744_v30  ;;  %v2882_v20 = vpop.eup %2881 }
 0x749   : > { %2593 = vmatprep.subr.bf16.mxu1 %v1798_v15  ;;  %v2884_v34 = vpop.eup %2883  ;;  %v1773_v26 = vmul.f32 %v2882_v20, %v3780_v8 }
 0x74a   : > { %v1785_v38 = vpack.c.bf16 %v1772_v22, %v1771_v27  ;;  %v1774_v57 = vmul.f32 %v2884_v34, %v3771_v48 }
 0x74c   : > { %2594 = vmatpush3.bf16.msra.mxu1 %v1798_v15  ;;  %v1786_v60 = vpack.c.bf16 %v1774_v57, %v1773_v26 }
 0x74f   : > { %2596 = vmatmul.mubr.msk.bf16.vlgmr.msra.gmra.mrb[16].mxu1 %vm1026_vm2, %v1784_v41 }
 0x750   : > { %2599 = vmatprep.mubr.msk.bf16.mxu1 %vm1026_vm2, %v1785_v38 }
 0x757   : > { %2600 = vmatmul.mubr.msk.bf16.gmra.mrb[20].mxu1 %vm1026_vm2, %v1786_v60 }
 0x769   : > { %v1654_v39 = vpop.xlane.xlu1 %1653 }
 0x76a   : > { %v1670_v30 = vsub.f32 %v3740_v43, %v1654_v39 }
 0x76c   : > { %v1701_v35 = vmul.f32 1.442695, %v1670_v30 }
 0x76d   : > { %v1648_v24 = vpop.xlane.xlu1 %1647 }
 0x76e   : > { %2885 = vpow2.f32 %v1701_v35  ;;  %v1668_v0 = vsub.f32 %v3742_v54, %v1648_v24  ;;  %v2743_v54 = vld [vmem:[%s3971_s6] sm:$0xff]  }
 0x76f   : > { %2619 = vmatprep.subr.bf16.mxu1 %v2743_v54 }
 0x770   : > { %v1697_v58 = vmul.f32 1.442695, %v1668_v0  ;;  %2620 = vmatpush3.bf16.msra.mxu1 %v2743_v54 }
 0x771   : > { %v1881_v41 = vpop.permute.xlu1 %1880 }
 0x772   : > { %2887 = vpow2.f32 %v1697_v58  ;;  %2603 = vmatprep.subr.bf16.mxu0 %v1881_v41 }
 0x773   : > { %2604 = vmatpush3.bf16.msra.mxu0 %v1881_v41 }
 0x775   : > { %v1883_v14 = vpop.permute.xlu1 %1882 }
 0x776   : > { %2605 = vmatprep.subr.bf16.mxu0 %v1883_v14 }
 0x777   : > { %2606 = vmatpush3.bf16.msra.mxu0 %v1883_v14 }
 0x778   : > { %v2886_v48 = vpop.eup %2885 }
 0x779   : > { %v1748_v8 = vsel %vm1026_vm2, %v2886_v48, 0.0 }
 0x77a   : > { %1749 = vadd.xlane.f32.xlu0 %v1748_v8 }
 0x77c   : > { %v2888_v28 = vpop.eup %2887 }
 0x77d   : > { %v1742_v43 = vsel %vm1026_vm2, %v2888_v28, 0.0 }
 0x77e   : > { %1743 = vadd.xlane.f32.xlu1 %v1742_v43 }
 0x78f   : > { %1886 = vrot.lane.b32.xlu1 %v3321_v63, %s2949_s21 }
 0x790   : > { %1884 = vrot.lane.b32.xlu0 %v3323_v2, %s2949_s21 }
 0x7c8   : > { %v1735_v44 = vpop.xlane.xlu1 %1734 }
 0x7cc   : > { %v1729_v46 = vpop.xlane.xlu1 %1728 }
 0x7cd   : > { %2889 = vrcp.f32 %v1729_v46 }
 0x7d0   : > { %v1738_v55 = vpop.xlane.xlu1 %1737  ;;  %v1747_v2 = vpop.xlane.xlu0 %1746 }
 0x7d4   : > { %v1732_v10 = vpop.xlane.xlu1 %1731  ;;  %v1741_v62 = vpop.xlane.xlu0 %1740 }
 0x7d5   : > { %2891 = vrcp.f32 %v1732_v10 }
 0x7d6   : > { %2893 = vrcp.f32 %v1738_v55 }
 0x7d7   : > { %v2890_v42 = vpop.eup %2889  ;;  %2895 = vrcp.f32 %v1735_v44 }
 0x7d8   : > { %v1775_v3 = vmul.f32 %v2890_v42, %v3806_v4 }
 0x7df   : > { %v2892_v25 = vpop.eup %2891 }
 0x7e0   : > { %v1776_v63 = vmul.f32 %v2892_v25, %v3818_v11  ;;  %v2894_v7 = vpop.eup %2893 }
 0x7e1   : > { %v2896_v50 = vpop.eup %2895  ;;  %v1778_v4 = vmul.f32 %v2894_v7, %v3810_v36 }
 0x7e2   : > { %v1787_v31 = vpack.c.bf16 %v1776_v63, %v1775_v3  ;;  %v1777_v29 = vmul.f32 %v2896_v50, %v3802_v53  ;;  %v2744_v53 = vld [vmem:[%s3971_s6 + $0x8] sm:$0xff]  }
 0x7e3   : > { %2621 = vmatprep.subr.bf16.mxu1 %v2744_v53 }
 0x7e4   : > { %2611 = vmatprep.mubr.msk.bf16.mxu0 %vm1026_vm2, %v1787_v31  ;;  %v1788_v49 = vpack.c.bf16 %v1778_v4, %v1777_v29  ;;  %2622 = vmatpush3.bf16.msra.mxu1 %v2744_v53 }
 0x807   : > { %v1750_v1 = vpop.xlane.xlu0 %1749 }
 0x808   : > { %2897 = vrcp.f32 %v1750_v1 }
 0x809   : > { %2899 = vrcp.f32 %v1741_v62 }
 0x80a   : > { %2901 = vrcp.f32 %v1747_v2 }
 0x80b   : > { %v1744_v23 = vpop.xlane.xlu1 %1743  ;;  %v1885_v51 = vpop.permute.xlu0 %1884 }
 0x80c   : > { %2903 = vrcp.f32 %v1744_v23  ;;  %2607 = vmatprep.subr.bf16.mxu0 %v1885_v51 }
 0x80d   : > { %2608 = vmatpush3.bf16.msra.mxu0 %v1885_v51 }
 0x80f   : > { %v1887_v11 = vpop.permute.xlu1 %1886 }
 0x810   : > { %2609 = vmatprep.subr.bf16.mxu0 %v1887_v11 }
 0x811   : > { %2610 = vmatpush3.bf16.msra.mxu0 %v1887_v11 }
 0x812   : > { %v2898_v12 = vpop.eup %2897 }
 0x813   : > { %v2900_v15 = vpop.eup %2899  ;;  %v1782_v27 = vmul.f32 %v2898_v12, %v2886_v48 }
 0x814   : > { %2612 = vmatmul.mubr.msk.bf16.vlgmr.msra.gmra.mrb[48].mxu0 %vm1026_vm2, %v1788_v49  ;;  %v2902_v40 = vpop.eup %2901  ;;  %v1779_v20 = vmul.f32 %v2900_v15, %v3820_v47 }
 0x815   : > { %v1781_v34 = vmul.f32 %v2902_v40, %v3812_v37 }
 0x816   : > { %v2904_v22 = vpop.eup %2903 }
 0x817   : > { %v1780_v38 = vmul.f32 %v2904_v22, %v2888_v28  ;;  %v1790_v36 = vpack.c.bf16 %v1782_v27, %v1781_v34 }
 0x819   : > { %v1789_v26 = vpack.c.bf16 %v1780_v38, %v1779_v20 }
 0x81b   : > { %2615 = vmatprep.mubr.msk.bf16.mxu0 %vm1026_vm2, %v1789_v26 }
 0x81c   : > { %2616 = vmatmul.mubr.msk.bf16.gmra.mrb[52].mxu0 %vm1026_vm2, %v1790_v36 }
 0x822   : > { %v2597_v57 = vpop.f32.mrb[16].mxu1 }
 0x823   : > { %v1849_v60 = vpop.f32.mrb[17].mxu1 }
 0x824   : > { %v2598_v39 = vpop.f32.mrb[18].mxu1 }
 0x825   : > { %v2706_v30 = vpack.i.bf16 %v2598_v39, %v2597_v57  ;;  %v1852_v47 = vpop.f32.mrb[19].mxu1 }
 0x826   : > { %v2701_v35 = vpack.i.bf16 %v1852_v47, %v1849_v60 }
 0x827   : > { %2707 = vrot.lane.b32.xlu1 %v2706_v30, %s2950_s26 }
 0x828   : > { %2702 = vrot.lane.b32.xlu0 %v2701_v35, %s2950_s26 }
 0x82a   : > { %v2601_v37 = vpop.f32.mrb[20].mxu1 }
 0x82b   : > { %v1865_v24 = vpop.f32.mrb[21].mxu1 }
 0x82c   : > { %v2602_v0 = vpop.f32.mrb[22].mxu1 }
 0x82d   : > { %v2716_v58 = vpack.i.bf16 %v2602_v0, %v2601_v37  ;;  %v1868_v41 = vpop.f32.mrb[23].mxu1 }
 0x82e   : > { %v2711_v14 = vpack.i.bf16 %v1868_v41, %v1865_v24 }
 0x82f   : > { %2717 = vrot.lane.b32.xlu1 %v2716_v58, %s2950_s26 }
 0x830   : > { %2712 = vrot.lane.b32.xlu0 %v2711_v14, %s2950_s26 }
 0x899   : > { %v2708_v48 = vpop.permute.xlu1 %2707 }
 0x89a   : > { %v2710_v8 = vunpack.i.h.bf16 %v2708_v48  ;;  %v2709_v28 = vunpack.i.l.bf16 %v2708_v48  ;;  %v2703_v43 = vpop.permute.xlu0 %2702  ;;  %v2374_v48 = vld [vmem:[%s3972_s7] ss:$0 sm:$0xff] }
 0x89b   : > { %v2705_v54 = vunpack.i.h.bf16 %v2703_v43  ;;  %v2704_v44 = vunpack.i.l.bf16 %v2703_v43 }
 0x89c   : > { %v2036_v46 = vsel %vm835_vm1, %v3673_v61, %v2710_v8  ;;  %v2035_v55 = vsel %vm835_vm1, %v3669_v6, %v2709_v28 }
 0x89d   : > { %v2050_v10 = vpack.c.bf16 %v2036_v46, %v2035_v55  ;;  %v2034_v42 = vsel %vm835_vm1, %v3675_v33, %v2705_v54  ;;  %v2033_v25 = vsel %vm835_vm1, %v3671_v18, %v2704_v44 }
 0x89e   : > { %v2049_v3 = vpack.c.bf16 %v2034_v42, %v2033_v25 }
 0x8a0   : > { %2623 = vmatprep.mubr.msk.bf16.mxu1 %vm367_vm0, %v2049_v3 }
 0x8a1   : > { %v2718_v63 = vpop.permute.xlu1 %2717  ;;  %2624 = vmatmul.mubr.msk.bf16.vlgmr.msra.gmra.mrb[24].mxu1 %vm367_vm0, %v2050_v10 }
 0x8a2   : > { %v2720_v31 = vunpack.i.h.bf16 %v2718_v63  ;;  %v2719_v2 = vunpack.i.l.bf16 %v2718_v63  ;;  %v2713_v62 = vpop.permute.xlu0 %2712 }
 0x8a3   : > { %v2715_v61 = vunpack.i.h.bf16 %v2713_v62  ;;  %v2714_v1 = vunpack.i.l.bf16 %v2713_v62 }
 0x8a4   : > { %v2040_v6 = vsel %vm835_vm1, %v3681_v32, %v2720_v31  ;;  %v2039_v33 = vsel %vm835_vm1, %v3677_v21, %v2719_v2 }
 0x8a5   : > { %v2052_v7 = vpack.c.bf16 %v2040_v6, %v2039_v33  ;;  %v2038_v18 = vsel %vm835_vm1, %v3683_v16, %v2715_v61  ;;  %v2037_v23 = vsel %vm835_vm1, %v3679_v9, %v2714_v1 }
 0x8a6   : > { %v2051_v51 = vpack.c.bf16 %v2038_v18, %v2037_v23 }
 0x8a8   : > { %2627 = vmatprep.mubr.msk.bf16.mxu1 %vm367_vm0, %v2051_v51 }
 0x8a9   : > { %2628 = vmatmul.mubr.msk.bf16.gmra.mrb[28].mxu1 %vm367_vm0, %v2052_v7 }
 0x8e7   : > { %v2613_v50 = vpop.f32.mrb[48].mxu0 }
 0x8e8   : > { %v1938_v4 = vpop.f32.mrb[49].mxu0 }
 0x8e9   : > { %v2614_v11 = vpop.f32.mrb[50].mxu0 }
 0x8ea   : > { %v2726_v29 = vpack.i.bf16 %v2614_v11, %v2613_v50  ;;  %v1941_v32 = vpop.f32.mrb[51].mxu0 }
 0x8eb   : > { %v2721_v49 = vpack.i.bf16 %v1941_v32, %v1938_v4 }
 0x8ec   : > { %2727 = vrot.lane.b32.xlu1 %v2726_v29, %s2950_s26 }
 0x8ed   : > { %2722 = vrot.lane.b32.xlu0 %v2721_v49, %s2950_s26 }
 0x8ef   : > { %v2617_v21 = vpop.f32.mrb[52].mxu0 }
 0x8f0   : > { %v1954_v16 = vpop.f32.mrb[53].mxu0 }
 0x8f1   : > { %v2618_v12 = vpop.f32.mrb[54].mxu0 }
 0x8f2   : > { %v2736_v15 = vpack.i.bf16 %v2618_v12, %v2617_v21  ;;  %v1957_v9 = vpop.f32.mrb[55].mxu0 }
 0x8f3   : > { %v2731_v40 = vpack.i.bf16 %v1957_v9, %v1954_v16 }
 0x8f4   : > { %2737 = vrot.lane.b32.xlu1 %v2736_v15, %s2950_s26 }
 0x8f5   : > { %2732 = vrot.lane.b32.xlu0 %v2731_v40, %s2950_s26 }
 0x95e   : > { %v2728_v22 = vpop.permute.xlu1 %2727 }
 0x95f   : > { %v2730_v27 = vunpack.i.h.bf16 %v2728_v22  ;;  %v2729_v20 = vunpack.i.l.bf16 %v2728_v22  ;;  %v2723_v38 = vpop.permute.xlu0 %2722 }
 0x960   : > { %v2725_v34 = vunpack.i.h.bf16 %v2723_v38  ;;  %v2724_v26 = vunpack.i.l.bf16 %v2723_v38 }
 0x961   : > { %v2044_v36 = vsel %vm835_vm1, %v3689_v13, %v2730_v27  ;;  %v2043_v53 = vsel %vm835_vm1, %v3685_v45, %v2729_v20 }
 0x962   : > { %v2054_v57 = vpack.c.bf16 %v2044_v36, %v2043_v53  ;;  %v2042_v60 = vsel %vm835_vm1, %v3691_v5, %v2725_v34  ;;  %v2041_v39 = vsel %vm835_vm1, %v3687_v52, %v2724_v26 }
 0x963   : > { %v2053_v30 = vpack.c.bf16 %v2042_v60, %v2041_v39 }
 0x965   : > { %2631 = vmatprep.mubr.msk.bf16.mxu1 %vm367_vm0, %v2053_v30 }
 0x966   : > { %v2738_v47 = vpop.permute.xlu1 %2737  ;;  %2632 = vmatmul.mubr.msk.bf16.gmra.mrb[32].mxu1 %vm367_vm0, %v2054_v57 }
 0x967   : > { %v2740_v35 = vunpack.i.h.bf16 %v2738_v47  ;;  %v2739_v37 = vunpack.i.l.bf16 %v2738_v47  ;;  %v2733_v13 = vpop.permute.xlu0 %2732 }
 0x968   : > { %v2735_v24 = vunpack.i.h.bf16 %v2733_v13  ;;  %v2734_v0 = vunpack.i.l.bf16 %v2733_v13 }
 0x969   : > { %v2048_v45 = vsel %vm835_vm1, %v3730_v19, %v2740_v35  ;;  %v2047_v5 = vsel %vm835_vm1, %v3724_v17, %v2739_v37 }
 0x96a   : > { %v2056_v58 = vpack.c.bf16 %v2048_v45, %v2047_v5  ;;  %v2046_v52 = vsel %vm835_vm1, %v3734_v56, %v2735_v24  ;;  %v2045_v41 = vsel %vm835_vm1, %v3728_v59, %v2734_v0 }
 0x96b   : > { %v2055_v14 = vpack.c.bf16 %v2046_v52, %v2045_v41 }
 0x96d   : > { %2635 = vmatprep.mubr.msk.bf16.mxu1 %vm367_vm0, %v2055_v14 }
 0x96e   : > { %2636 = vmatmul.mubr.msk.bf16.gmra.mrb[36].mxu1 %vm367_vm0, %v2056_v58 }
 0x974   : > { %v2625_v17 = vpop.f32.mrb[24].mxu1 }
 0x975   : > { %v2147_v59 = vadd.f32 %v2625_v17, %v2374_v48  ;;  %v2138_v19 = vpop.f32.mrb[25].mxu1 }
 0x976   : > { %v2139_v56 = vadd.f32 %v2374_v48, %v2138_v19  ;;  %v2626_v8 = vpop.f32.mrb[26].mxu1 }
 0x977   : > { %2205 = vst.msk [vmem:[%s3916_s14 + $0x20] sm:$0xff] %vm367_vm0, %v2147_v59  ;;  %v2150_v28 = vadd.f32 %v2626_v8, %v2374_v48  ;;  %v2141_v43 = vpop.f32.mrb[27].mxu1 }
 0x978   : > { %2201 = vst.msk [vmem:[%s3916_s14] sm:$0xff] %vm367_vm0, %v2139_v56  ;;  %v2142_v54 = vadd.f32 %v2374_v48, %v2141_v43 }
 0x979   : > { %2207 = vst.msk [vmem:[%s3916_s14 + $0x30] sm:$0xff] %vm367_vm0, %v2150_v28 }
 0x97a   : > { %2203 = vst.msk [vmem:[%s3916_s14 + $0x10] sm:$0xff] %vm367_vm0, %v2142_v54 }
 0x97c   : > { %v2629_v44 = vpop.f32.mrb[28].mxu1 }
 0x97d   : > { %v2163_v46 = vadd.f32 %v2629_v44, %v2374_v48  ;;  %v2154_v55 = vpop.f32.mrb[29].mxu1 }
 0x97e   : > { %v2155_v10 = vadd.f32 %v2374_v48, %v2154_v55  ;;  %v2630_v42 = vpop.f32.mrb[30].mxu1 }
 0x97f   : > { %2213 = vst.msk [vmem:[%s3916_s14 + $0x60] sm:$0xff] %vm367_vm0, %v2163_v46  ;;  %v2166_v25 = vadd.f32 %v2630_v42, %v2374_v48  ;;  %v2157_v3 = vpop.f32.mrb[31].mxu1 }
 0x980   : > { %2209 = vst.msk [vmem:[%s3916_s14 + $0x40] sm:$0xff] %vm367_vm0, %v2155_v10  ;;  %v2158_v63 = vadd.f32 %v2374_v48, %v2157_v3 }
 0x981   : > { %2215 = vst.msk [vmem:[%s3916_s14 + $0x70] sm:$0xff] %vm367_vm0, %v2166_v25 }
 0x982   : > { %2211 = vst.msk [vmem:[%s3916_s14 + $0x50] sm:$0xff] %vm367_vm0, %v2158_v63 }
 0xa39   : > { %v2633_v31 = vpop.f32.mrb[32].mxu1 }
 0xa3a   : > { %v2179_v2 = vadd.f32 %v2633_v31, %v2374_v48  ;;  %v2170_v62 = vpop.f32.mrb[33].mxu1 }
 0xa3b   : > { %v2171_v61 = vadd.f32 %v2374_v48, %v2170_v62  ;;  %v2634_v1 = vpop.f32.mrb[34].mxu1 }
 0xa3c   : > { %2206 = vst.msk [vmem:[%s3916_s14 + $0x28] sm:$0xff] %vm367_vm0, %v2179_v2  ;;  %v2182_v6 = vadd.f32 %v2634_v1, %v2374_v48  ;;  %v2173_v33 = vpop.f32.mrb[35].mxu1 }
 0xa3d   : > { %2202 = vst.msk [vmem:[%s3916_s14 + $0x8] sm:$0xff] %vm367_vm0, %v2171_v61  ;;  %v2174_v7 = vadd.f32 %v2374_v48, %v2173_v33 }
 0xa3e   : > { %2208 = vst.msk [vmem:[%s3916_s14 + $0x38] sm:$0xff] %vm367_vm0, %v2182_v6 }
 0xa3f   : > { %2204 = vst.msk [vmem:[%s3916_s14 + $0x18] sm:$0xff] %vm367_vm0, %v2174_v7 }
 0xa41   : > { %v2637_v18 = vpop.f32.mrb[36].mxu1 }
 0xa42   : > { %v2195_v23 = vadd.f32 %v2637_v18, %v2374_v48  ;;  %v2186_v51 = vpop.f32.mrb[37].mxu1 }
 0xa43   : > { %v2187_v50 = vadd.f32 %v2374_v48, %v2186_v51  ;;  %v2638_v4 = vpop.f32.mrb[38].mxu1 }
 0xa44   : > { %2214 = vst.msk [vmem:[%s3916_s14 + $0x68] sm:$0xff] %vm367_vm0, %v2195_v23  ;;  %v2198_v11 = vadd.f32 %v2638_v4, %v2374_v48  ;;  %v2189_v29 = vpop.f32.mrb[39].mxu1 }
 0xa45   : > { %2210 = vst.msk [vmem:[%s3916_s14 + $0x48] sm:$0xff] %vm367_vm0, %v2187_v50  ;;  %v2190_v32 = vadd.f32 %v2374_v48, %v2189_v29 }
 0xa46   : > { %2216 = vst.msk [vmem:[%s3916_s14 + $0x78] sm:$0xff] %vm367_vm0, %v2198_v11 }
 0xa47   : > { %2212 = vst.msk [vmem:[%s3916_s14 + $0x58] sm:$0xff] %vm367_vm0, %v2190_v32 }
 0xa48 PF: > { %s18_s9 = sadd.s32 1, %s2943_s9   ;;  %s3974_s27 = smov %s2935_s29 }
 0xa49   : > { %p15_p7 = scmp.ge.s32.totalorder %s18_s9, 6   ;;  %s3975_s28 = smov %s2939_s30 }
 0xa4a   : > { %s3976_s29 = smov %s3979_s10  ;;  %s3977_s30 = smov %s3983_s11 }
 0xa4b   :  { %17 = sbr.rel (!%p15_p7) target bundleno = 3 (0x3), region = 82 }

// kernel: basic_layer_forward.5
= control target key start
LH: loop header
LB: loop body
LE: loop exit
PB: predicated region body
PF: predicated region fallthrough
CT: control target
= control target key end

     0   :  { %s2865_s27 = smov 0   ;;  %s4475_s0 = inlined_call_operand.vmem [shape: f32[512,32], index: 0, kind: input, shape index: {}]   ;;  %s4476_s1 = inlined_call_operand.vmem [shape: f32[512,32], index: 1, kind: input, shape index: {}]   ;;  %s4477_s2 = inlined_call_operand.vmem [shape: f32[1,32], index: 2, kind: input, shape index: {}]   ;;  %s4478_s3 = inlined_call_operand.vmem [shape: f32[1,32], index: 3, kind: input, shape index: {}]   ;;  %s4479_s4 = inlined_call_operand.vmem [shape: bf16[32,128], index: 4, kind: input, shape index: {}]   ;;  %s4480_s5 = inlined_call_operand.vmem [shape: f32[1,128], index: 5, kind: input, shape index: {}]   ;;  %s4481_s6 = inlined_call_operand.vmem [shape: bf16[128,32], index: 6, kind: input, shape index: {}]   ;;  %s4482_s7 = inlined_call_operand.vmem [shape: f32[1,32], index: 7, kind: input, shape index: {}]   ;;  %s4483_s8 = inlined_call_operand.vmem [shape: f32[512,32], index: 8, kind: output, shape index: {}]  }
   0x1 LB: > { %s2416_s28 = sadd.s32 4294967295, %s2818_s27   ;;  %p2420_p0 = scmp.ge.s32.totalorder %s2818_s27, 1  ;;  %s2818_s27 = sphi %s2865_s27, %s18_s27  }
   0x2   : > { %p274_p1 = scmp.lt.s32.totalorder %s2818_s27, 3 }
   0x4   : > { %p275_p2 = pnand %p2420_p0, %p274_p1 }
   0x6   : > { %278 = sbr.rel (%p275_p2) target bundleno = 1053 (0x41d), region = 52 }
   0xd   : > { %s2421_s29 = sshll.u32 %s2416_s28, 5  ;;  %vm428_vm0 = vcmask 261120  }
   0xe   : > { %p314_p3 = scmp.lt.s32.totalorder %s2421_s29, 63 }
  0x10   : > { %s4635_s29 = smov (!%p314_p3, %s2421_s29), 63 }
  0x11   : > { %s2873_s30 = sshll.u32 %s4635_s29, 3 }
  0x12   : > { %s2879_s11 = scalar_lea.vmem %s4475_s0, %s2873_s30  ;;  %s2885_s14 = scalar_lea.vmem %s4476_s1, %s2873_s30 }
  0x13   : > { %v332_v0 = vld [vmem:[%s2879_s11] sm:$0xff]  ;;  %v334_v2 = vld [vmem:[%s2879_s11 + $0x10] sm:$0xff]  ;;  %v333_v5 = vld [vmem:[%s2879_s11 + $0x8] sm:$0xff]  ;;  %s4343_s28 = scalar_lea.vmem %s4483_s8, %s2873_s30 }
  0x14   : > { %v364_v1 = vld [vmem:[%s2885_s14] sm:$0xff]  ;;  %v366_v4 = vld [vmem:[%s2885_s14 + $0x10] sm:$0xff]  ;;  %v365_v6 = vld [vmem:[%s2885_s14 + $0x8] sm:$0xff] }
  0x15   : > { %v2890_v3 = vadd.f32 %v364_v1, %v332_v0  ;;  %v2895_v7 = vadd.f32 %v366_v4, %v334_v2  ;;  %v2897_v8 = vadd.f32 %v365_v6, %v333_v5  ;;  %v335_v9 = vld [vmem:[%s2879_s11 + $0x18] sm:$0xff]  ;;  %v336_v11 = vld [vmem:[%s2879_s11 + $0x20] sm:$0xff]  ;;  %v337_v15 = vld [vmem:[%s2879_s11 + $0x28] sm:$0xff] }
  0x16   : > { %v367_v10 = vld [vmem:[%s2885_s14 + $0x18] sm:$0xff]  ;;  %v368_v14 = vld [vmem:[%s2885_s14 + $0x20] sm:$0xff]  ;;  %v369_v16 = vld [vmem:[%s2885_s14 + $0x28] sm:$0xff] }
  0x17   : > { %4526 = vst [vmem:[#allocation2_spill] sm:$0xff] %v2890_v3  ;;  %4527 = vst [vmem:[#allocation3_spill] sm:$0xff] %v2895_v7  ;;  %v429_v12 = vsel %vm428_vm0, %v2890_v3, 0.0  ;;  %v2904_v13 = vadd.f32 %v367_v10, %v335_v9  ;;  %v435_v17 = vsel %vm428_vm0, %v2895_v7, 0.0  ;;  %v432_v18 = vsel %vm428_vm0, %v2897_v8, 0.0  ;;  %v338_v22 = vld [vmem:[%s2879_s11 + $0x30] sm:$0xff] }
  0x18   : > { %4528 = vst [vmem:[#allocation4_spill] sm:$0xff] %v2897_v8  ;;  %430 = vadd.xlane.f32.xlu0 %v429_v12  ;;  %436 = vadd.xlane.f32.xlu1 %v435_v17  ;;  %v2913_v19 = vadd.f32 %v368_v14, %v336_v11  ;;  %v2917_v21 = vadd.f32 %v369_v16, %v337_v15  ;;  %v370_v23 = vld [vmem:[%s2885_s14 + $0x30] sm:$0xff]  ;;  %v339_v24 = vld [vmem:[%s2879_s11 + $0x38] sm:$0xff]  ;;  %v340_v30 = vld [vmem:[%s2879_s11 + $0x40] sm:$0xff] }
  0x19   : > { %4529 = vst [vmem:[#allocation5_spill] sm:$0xff] %v2904_v13  ;;  %v438_v20 = vsel %vm428_vm0, %v2904_v13, 0.0  ;;  %v371_v25 = vld [vmem:[%s2885_s14 + $0x38] sm:$0xff]  ;;  %v2925_v27 = vadd.f32 %v370_v23, %v338_v22  ;;  %v372_v31 = vld [vmem:[%s2885_s14 + $0x40] sm:$0xff]  ;;  %v341_v32 = vld [vmem:[%s2879_s11 + $0x48] sm:$0xff] }
  0x1a   : > { %4530 = vst [vmem:[#allocation6_spill] sm:$0xff] %v2913_v19  ;;  %4531 = vst [vmem:[#allocation7_spill] sm:$0xff] %v2917_v21  ;;  %v441_v26 = vsel %vm428_vm0, %v2913_v19, 0.0  ;;  %v444_v28 = vsel %vm428_vm0, %v2917_v21, 0.0  ;;  %v2929_v29 = vadd.f32 %v371_v25, %v339_v24  ;;  %v373_v33 = vld [vmem:[%s2885_s14 + $0x48] sm:$0xff]  ;;  %v2937_v35 = vadd.f32 %v372_v31, %v340_v30  ;;  %v342_v38 = vld [vmem:[%s2879_s11 + $0x50] sm:$0xff] }
  0x1b   : > { %4532 = vst [vmem:[#allocation8_spill] sm:$0xff] %v2925_v27  ;;  %v447_v34 = vsel %vm428_vm0, %v2925_v27, 0.0  ;;  %v2941_v37 = vadd.f32 %v373_v33, %v341_v32  ;;  %v374_v39 = vld [vmem:[%s2885_s14 + $0x50] sm:$0xff]  ;;  %v343_v40 = vld [vmem:[%s2879_s11 + $0x58] sm:$0xff]  ;;  %v344_v46 = vld [vmem:[%s2879_s11 + $0x60] sm:$0xff] }
  0x1c   : > { %433 = vadd.xlane.f32.xlu0 %v432_v18  ;;  %439 = vadd.xlane.f32.xlu1 %v438_v20  ;;  %4533 = vst [vmem:[#allocation9_spill] sm:$0xff] %v2929_v29  ;;  %4534 = vst [vmem:[#allocation10_spill] sm:$0xff] %v2937_v35  ;;  %v450_v36 = vsel %vm428_vm0, %v2929_v29, 0.0  ;;  %v375_v41 = vld [vmem:[%s2885_s14 + $0x58] sm:$0xff]  ;;  %v453_v42 = vsel %vm428_vm0, %v2937_v35, 0.0  ;;  %v2949_v43 = vadd.f32 %v374_v39, %v342_v38  ;;  %v376_v47 = vld [vmem:[%s2885_s14 + $0x60] sm:$0xff] }
  0x1d   : > { %4535 = vst [vmem:[#allocation11_spill] sm:$0xff] %v2941_v37  ;;  %v456_v44 = vsel %vm428_vm0, %v2941_v37, 0.0  ;;  %v2953_v45 = vadd.f32 %v375_v41, %v343_v40  ;;  %v345_v48 = vld [vmem:[%s2879_s11 + $0x68] sm:$0xff]  ;;  %v2961_v51 = vadd.f32 %v376_v47, %v344_v46  ;;  %v346_v54 = vld [vmem:[%s2879_s11 + $0x70] sm:$0xff]  ;;  %v347_v56 = vld [vmem:[%s2879_s11 + $0x78] sm:$0xff] }
  0x1e   : > { %4536 = vst [vmem:[#allocation12_spill] sm:$0xff] %v2949_v43  ;;  %v377_v49 = vld [vmem:[%s2885_s14 + $0x68] sm:$0xff]  ;;  %v459_v50 = vsel %vm428_vm0, %v2949_v43, 0.0  ;;  %v378_v55 = vld [vmem:[%s2885_s14 + $0x70] sm:$0xff]  ;;  %v379_v57 = vld [vmem:[%s2885_s14 + $0x78] sm:$0xff] }
  0x1f   : > { %4537 = vst [vmem:[#allocation13_spill] sm:$0xff] %v2953_v45  ;;  %4538 = vst [vmem:[#allocation14_spill] sm:$0xff] %v2961_v51  ;;  %v462_v52 = vsel %vm428_vm0, %v2953_v45, 0.0  ;;  %v2965_v53 = vadd.f32 %v377_v49, %v345_v48  ;;  %v465_v58 = vsel %vm428_vm0, %v2961_v51, 0.0  ;;  %v2973_v59 = vadd.f32 %v378_v55, %v346_v54  ;;  %v348_v62 = vld [vmem:[%s2879_s11 + $0x80] sm:$0xff]  ;;  %v349_v0 = vld [vmem:[%s2879_s11 + $0x88] sm:$0xff] }
  0x20   : > { %442 = vadd.xlane.f32.xlu0 %v441_v26  ;;  %445 = vadd.xlane.f32.xlu1 %v444_v28  ;;  %v2977_v61 = vadd.f32 %v379_v57, %v347_v56  ;;  %v380_v63 = vld [vmem:[%s2885_s14 + $0x80] sm:$0xff]  ;;  %v381_v1 = vld [vmem:[%s2885_s14 + $0x88] sm:$0xff]  ;;  %v350_v9 = vld [vmem:[%s2879_s11 + $0x90] sm:$0xff] }
  0x21   : > { %4539 = vst [vmem:[#allocation15_spill] sm:$0xff] %v2965_v53  ;;  %4540 = vst [vmem:[#allocation16_spill] sm:$0xff] %v2973_v59  ;;  %v468_v60 = vsel %vm428_vm0, %v2965_v53, 0.0  ;;  %v471_v2 = vsel %vm428_vm0, %v2973_v59, 0.0  ;;  %v2985_v4 = vadd.f32 %v380_v63, %v348_v62  ;;  %v2989_v6 = vadd.f32 %v381_v1, %v349_v0  ;;  %v382_v10 = vld [vmem:[%s2885_s14 + $0x90] sm:$0xff]  ;;  %v351_v11 = vld [vmem:[%s2879_s11 + $0x98] sm:$0xff] }
  0x22   : > { %4541 = vst [vmem:[#allocation17_spill] sm:$0xff] %v2977_v61  ;;  %v474_v5 = vsel %vm428_vm0, %v2977_v61, 0.0  ;;  %v383_v12 = vld [vmem:[%s2885_s14 + $0x98] sm:$0xff]  ;;  %v2997_v15 = vadd.f32 %v382_v10, %v350_v9  ;;  %v352_v18 = vld [vmem:[%s2879_s11 + $0xa0] sm:$0xff]  ;;  %v353_v22 = vld [vmem:[%s2879_s11 + $0xa8] sm:$0xff] }
  0x23   : > { %4542 = vst [vmem:[#allocation18_spill] sm:$0xff] %v2985_v4  ;;  %4543 = vst [vmem:[#allocation19_spill] sm:$0xff] %v2989_v6  ;;  %v477_v14 = vsel %vm428_vm0, %v2985_v4, 0.0  ;;  %v480_v16 = vsel %vm428_vm0, %v2989_v6, 0.0  ;;  %v3001_v17 = vadd.f32 %v383_v12, %v351_v11  ;;  %v384_v20 = vld [vmem:[%s2885_s14 + $0xa0] sm:$0xff]  ;;  %v385_v23 = vld [vmem:[%s2885_s14 + $0xa8] sm:$0xff] }
  0x24   : > { %448 = vadd.xlane.f32.xlu0 %v447_v34  ;;  %451 = vadd.xlane.f32.xlu1 %v450_v36  ;;  %4544 = vst [vmem:[#allocation20_spill] sm:$0xff] %v2997_v15  ;;  %v483_v24 = vsel %vm428_vm0, %v2997_v15, 0.0  ;;  %v3009_v25 = vadd.f32 %v384_v20, %v352_v18  ;;  %v3013_v28 = vadd.f32 %v385_v23, %v353_v22  ;;  %v354_v30 = vld [vmem:[%s2879_s11 + $0xb0] sm:$0xff]  ;;  %v355_v32 = vld [vmem:[%s2879_s11 + $0xb8] sm:$0xff]  ;;  %v356_v40 = vld [vmem:[%s2879_s11 + $0xc0] sm:$0xff] }
  0x25   : > { %4545 = vst [vmem:[#allocation21_spill] sm:$0xff] %v3001_v17  ;;  %v486_v26 = vsel %vm428_vm0, %v3001_v17, 0.0  ;;  %v386_v31 = vld [vmem:[%s2885_s14 + $0xb0] sm:$0xff]  ;;  %v387_v33 = vld [vmem:[%s2885_s14 + $0xb8] sm:$0xff]  ;;  %v388_v41 = vld [vmem:[%s2885_s14 + $0xc0] sm:$0xff] }
  0x26   : > { %4546 = vst [vmem:[#allocation22_spill] sm:$0xff] %v3009_v25  ;;  %4547 = vst [vmem:[#allocation23_spill] sm:$0xff] %v3013_v28  ;;  %v489_v34 = vsel %vm428_vm0, %v3009_v25, 0.0  ;;  %v3021_v36 = vadd.f32 %v386_v31, %v354_v30  ;;  %v492_v38 = vsel %vm428_vm0, %v3013_v28, 0.0  ;;  %v3025_v39 = vadd.f32 %v387_v33, %v355_v32  ;;  %v359_v54 = vld [vmem:[%s2879_s11 + $0xd8] sm:$0xff]  ;;  %v360_v62 = vld [vmem:[%s2879_s11 + $0xe0] sm:$0xff] }
  0x27   : > { %v3033_v47 = vadd.f32 %v388_v41, %v356_v40  ;;  %v391_v55 = vld [vmem:[%s2885_s14 + $0xd8] sm:$0xff]  ;;  %v392_v63 = vld [vmem:[%s2885_s14 + $0xe0] sm:$0xff]  ;;  %v361_v0 = vld [vmem:[%s2879_s11 + $0xe8] sm:$0xff] }
  0x28   : > { %454 = vadd.xlane.f32.xlu0 %v453_v42  ;;  %457 = vadd.xlane.f32.xlu1 %v456_v44  ;;  %4548 = vst [vmem:[#allocation24_spill] sm:$0xff] %v3021_v36  ;;  %4549 = vst [vmem:[#allocation25_spill] sm:$0xff] %v3025_v39  ;;  %v357_v42 = vld [vmem:[%s2879_s11 + $0xc8] sm:$0xff]  ;;  %v495_v46 = vsel %vm428_vm0, %v3021_v36, 0.0  ;;  %v498_v48 = vsel %vm428_vm0, %v3025_v39, 0.0  ;;  %v362_v11 = vld [vmem:[%s2879_s11 + $0xf0] sm:$0xff] }
  0x29   : > { %v389_v44 = vld [vmem:[%s2885_s14 + $0xc8] sm:$0xff]  ;;  %4550 = vst [vmem:[#allocation26_spill] sm:$0xff] %v3033_v47  ;;  %v501_v56 = vsel %vm428_vm0, %v3033_v47, 0.0  ;;  %v394_v12 = vld [vmem:[%s2885_s14 + $0xf0] sm:$0xff] }
  0x2a   : > { %v3037_v49 = vadd.f32 %v389_v44, %v357_v42  ;;  %v393_v1 = vld [vmem:[%s2885_s14 + $0xe8] sm:$0xff]  ;;  %v3069_v20 = vadd.f32 %v394_v12, %v362_v11 }
  0x2b   : > { %v3061_v10 = vadd.f32 %v393_v1, %v361_v0 }
  0x2c   : > { %460 = vadd.xlane.f32.xlu0 %v459_v50  ;;  %463 = vadd.xlane.f32.xlu1 %v462_v52  ;;  %4551 = vst [vmem:[#allocation27_spill] sm:$0xff] %v3037_v49  ;;  %v358_v50 = vld [vmem:[%s2879_s11 + $0xd0] sm:$0xff]  ;;  %4556 = vst [vmem:[#allocation32_spill] sm:$0xff] %v3069_v20 }
  0x2d   : > { %v390_v52 = vld [vmem:[%s2885_s14 + $0xd0] sm:$0xff]  ;;  %4555 = vst [vmem:[#allocation31_spill] sm:$0xff] %v3061_v10  ;;  %v516_v22 = vsel %vm428_vm0, %v3061_v10, 0.0 }
  0x2e   : > { %v3045_v57 = vadd.f32 %v390_v52, %v358_v50 }
  0x30   : > { %466 = vadd.xlane.f32.xlu0 %v465_v58  ;;  %469 = vadd.xlane.f32.xlu1 %v468_v60  ;;  %4552 = vst [vmem:[#allocation28_spill] sm:$0xff] %v3045_v57  ;;  %v504_v58 = vsel %vm428_vm0, %v3037_v49, 0.0  ;;  %v3049_v60 = vadd.f32 %v391_v55, %v359_v54 }
  0x32   : > { %4553 = vst [vmem:[#allocation29_spill] sm:$0xff] %v3049_v60  ;;  %v510_v9 = vsel %vm428_vm0, %v3049_v60, 0.0 }
  0x34   : > { %472 = vadd.xlane.f32.xlu0 %v471_v2  ;;  %475 = vadd.xlane.f32.xlu1 %v474_v5  ;;  %v507_v2 = vsel %vm428_vm0, %v3045_v57, 0.0  ;;  %v3057_v5 = vadd.f32 %v392_v63, %v360_v62 }
  0x36   : > { %4554 = vst [vmem:[#allocation30_spill] sm:$0xff] %v3057_v5  ;;  %v513_v18 = vsel %vm428_vm0, %v3057_v5, 0.0 }
  0x38   : > { %478 = vadd.xlane.f32.xlu0 %v477_v14  ;;  %481 = vadd.xlane.f32.xlu1 %v480_v16  ;;  %v363_v14 = vld [vmem:[%s2879_s11 + $0xf8] sm:$0xff] }
  0x39   : > { %v395_v16 = vld [vmem:[%s2885_s14 + $0xf8] sm:$0xff] }
  0x3a   : > { %v3073_v23 = vadd.f32 %v395_v16, %v363_v14 }
  0x3c   : > { %484 = vadd.xlane.f32.xlu0 %v483_v24  ;;  %487 = vadd.xlane.f32.xlu1 %v486_v26  ;;  %4557 = vst [vmem:[#allocation33_spill] sm:$0xff] %v3073_v23  ;;  %v519_v24 = vsel %vm428_vm0, %v3069_v20, 0.0  ;;  %v522_v26 = vsel %vm428_vm0, %v3073_v23, 0.0 }
  0x40   : > { %490 = vadd.xlane.f32.xlu0 %v489_v34  ;;  %493 = vadd.xlane.f32.xlu1 %v492_v38 }
  0x44   : > { %496 = vadd.xlane.f32.xlu0 %v495_v46  ;;  %499 = vadd.xlane.f32.xlu1 %v498_v48 }
  0x48   : > { %502 = vadd.xlane.f32.xlu0 %v501_v56  ;;  %505 = vadd.xlane.f32.xlu1 %v504_v58 }
  0x4c   : > { %508 = vadd.xlane.f32.xlu0 %v507_v2  ;;  %511 = vadd.xlane.f32.xlu1 %v510_v9 }
  0x50   : > { %514 = vadd.xlane.f32.xlu0 %v513_v18  ;;  %517 = vadd.xlane.f32.xlu1 %v516_v22 }
  0x54   : > { %520 = vadd.xlane.f32.xlu0 %v519_v24  ;;  %523 = vadd.xlane.f32.xlu1 %v522_v26 }
  0xa5   : > { %v431_v30 = vpop.xlane.xlu0 %430  ;;  %v437_v32 = vpop.xlane.xlu1 %436 }
  0xa6   : > { %v526_v31 = vmul.f32 0.03125, %v431_v30  ;;  %v528_v33 = vmul.f32 0.03125, %v437_v32 }
  0xa8   : > { %v3080_v34 = vsub.f32 %v2890_v3, %v526_v31  ;;  %v3083_v38 = vsub.f32 %v2895_v7, %v528_v33 }
  0xa9   : > { %v434_v40 = vpop.xlane.xlu0 %433  ;;  %v440_v42 = vpop.xlane.xlu1 %439 }
  0xaa   : > { %v527_v41 = vmul.f32 0.03125, %v434_v40  ;;  %v590_v44 = vmul.f32 %v3080_v34, %v3080_v34  ;;  %v529_v46 = vmul.f32 0.03125, %v440_v42  ;;  %v592_v48 = vmul.f32 %v3083_v38, %v3083_v38 }
  0xac   : > { %v3090_v50 = vsub.f32 %v2897_v8, %v527_v41  ;;  %v622_v52 = vsel %vm428_vm0, %v590_v44, 0.0  ;;  %v3094_v54 = vsub.f32 %v2904_v13, %v529_v46  ;;  %v628_v62 = vsel %vm428_vm0, %v592_v48, 0.0 }
  0xad   : > { %623 = vadd.xlane.f32.xlu0 %v622_v52  ;;  %v443_v55 = vpop.xlane.xlu0 %442  ;;  %v446_v58 = vpop.xlane.xlu1 %445 }
  0xae   : > { %v530_v56 = vmul.f32 0.03125, %v443_v55  ;;  %v591_v63 = vmul.f32 %v3090_v50, %v3090_v50  ;;  %v531_v0 = vmul.f32 0.03125, %v446_v58  ;;  %v593_v1 = vmul.f32 %v3094_v54, %v3094_v54 }
  0xb0   : > { %v3102_v2 = vsub.f32 %v2913_v19, %v530_v56  ;;  %v625_v9 = vsel %vm428_vm0, %v591_v63, 0.0  ;;  %v3106_v11 = vsub.f32 %v2917_v21, %v531_v0  ;;  %v631_v18 = vsel %vm428_vm0, %v593_v1, 0.0 }
  0xb1   : > { %629 = vadd.xlane.f32.xlu0 %v628_v62  ;;  %626 = vadd.xlane.f32.xlu1 %v625_v9  ;;  %v449_v12 = vpop.xlane.xlu0 %448  ;;  %v452_v16 = vpop.xlane.xlu1 %451 }
  0xb2   : > { %v532_v14 = vmul.f32 0.03125, %v449_v12  ;;  %v594_v22 = vmul.f32 %v3102_v2, %v3102_v2  ;;  %v533_v24 = vmul.f32 0.03125, %v452_v16  ;;  %v595_v26 = vmul.f32 %v3106_v11, %v3106_v11 }
  0xb4   : > { %v3114_v30 = vsub.f32 %v2925_v27, %v532_v14  ;;  %v634_v31 = vsel %vm428_vm0, %v594_v22, 0.0  ;;  %v3118_v32 = vsub.f32 %v2929_v29, %v533_v24  ;;  %v637_v42 = vsel %vm428_vm0, %v595_v26, 0.0 }
  0xb5   : > { %632 = vadd.xlane.f32.xlu1 %v631_v18  ;;  %635 = vadd.xlane.f32.xlu0 %v634_v31  ;;  %v455_v33 = vpop.xlane.xlu0 %454  ;;  %v458_v41 = vpop.xlane.xlu1 %457 }
  0xb6   : > { %v534_v40 = vmul.f32 0.03125, %v455_v33  ;;  %v596_v44 = vmul.f32 %v3114_v30, %v3114_v30  ;;  %v535_v46 = vmul.f32 0.03125, %v458_v41  ;;  %v597_v48 = vmul.f32 %v3118_v32, %v3118_v32 }
  0xb8   : > { %v3126_v52 = vsub.f32 %v2937_v35, %v534_v40  ;;  %v640_v55 = vsel %vm428_vm0, %v596_v44, 0.0  ;;  %v3130_v56 = vsub.f32 %v2941_v37, %v535_v46  ;;  %v643_v0 = vsel %vm428_vm0, %v597_v48, 0.0 }
  0xb9   : > { %638 = vadd.xlane.f32.xlu1 %v637_v42  ;;  %641 = vadd.xlane.f32.xlu0 %v640_v55  ;;  %v461_v58 = vpop.xlane.xlu0 %460  ;;  %v464_v63 = vpop.xlane.xlu1 %463 }
  0xba   : > { %v536_v62 = vmul.f32 0.03125, %v461_v58  ;;  %v598_v1 = vmul.f32 %v3126_v52, %v3126_v52  ;;  %v537_v9 = vmul.f32 0.03125, %v464_v63  ;;  %v599_v12 = vmul.f32 %v3130_v56, %v3130_v56 }
  0xbc   : > { %v3138_v14 = vsub.f32 %v2949_v43, %v536_v62  ;;  %v646_v16 = vsel %vm428_vm0, %v598_v1, 0.0  ;;  %v3142_v18 = vsub.f32 %v2953_v45, %v537_v9  ;;  %v649_v31 = vsel %vm428_vm0, %v599_v12, 0.0 }
  0xbd   : > { %644 = vadd.xlane.f32.xlu1 %v643_v0  ;;  %647 = vadd.xlane.f32.xlu0 %v646_v16  ;;  %v467_v22 = vpop.xlane.xlu0 %466  ;;  %v470_v26 = vpop.xlane.xlu1 %469 }
  0xbe   : > { %v538_v24 = vmul.f32 0.03125, %v467_v22  ;;  %v600_v33 = vmul.f32 %v3138_v14, %v3138_v14  ;;  %v539_v40 = vmul.f32 0.03125, %v470_v26  ;;  %v601_v41 = vmul.f32 %v3142_v18, %v3142_v18 }
  0xc0   : > { %v3150_v42 = vsub.f32 %v2961_v51, %v538_v24  ;;  %v652_v44 = vsel %vm428_vm0, %v600_v33, 0.0  ;;  %v3154_v46 = vsub.f32 %v2965_v53, %v539_v40  ;;  %v655_v62 = vsel %vm428_vm0, %v601_v41, 0.0 }
  0xc1   : > { %650 = vadd.xlane.f32.xlu1 %v649_v31  ;;  %653 = vadd.xlane.f32.xlu0 %v652_v44  ;;  %v473_v48 = vpop.xlane.xlu0 %472  ;;  %v476_v58 = vpop.xlane.xlu1 %475 }
  0xc2   : > { %v540_v55 = vmul.f32 0.03125, %v473_v48  ;;  %v602_v63 = vmul.f32 %v3150_v42, %v3150_v42  ;;  %v541_v0 = vmul.f32 0.03125, %v476_v58  ;;  %v603_v1 = vmul.f32 %v3154_v46, %v3154_v46 }
  0xc4   : > { %v3162_v9 = vsub.f32 %v2973_v59, %v540_v55  ;;  %v658_v12 = vsel %vm428_vm0, %v602_v63, 0.0  ;;  %v3166_v16 = vsub.f32 %v2977_v61, %v541_v0  ;;  %v661_v31 = vsel %vm428_vm0, %v603_v1, 0.0 }
  0xc5   : > { %656 = vadd.xlane.f32.xlu1 %v655_v62  ;;  %659 = vadd.xlane.f32.xlu0 %v658_v12  ;;  %v479_v22 = vpop.xlane.xlu0 %478  ;;  %v482_v26 = vpop.xlane.xlu1 %481 }
  0xc6   : > { %v542_v24 = vmul.f32 0.03125, %v479_v22  ;;  %v604_v33 = vmul.f32 %v3162_v9, %v3162_v9  ;;  %v543_v40 = vmul.f32 0.03125, %v482_v26  ;;  %v605_v41 = vmul.f32 %v3166_v16, %v3166_v16 }
  0xc8   : > { %v3174_v44 = vsub.f32 %v2985_v4, %v542_v24  ;;  %v664_v48 = vsel %vm428_vm0, %v604_v33, 0.0  ;;  %v3178_v55 = vsub.f32 %v2989_v6, %v543_v40  ;;  %v667_v0 = vsel %vm428_vm0, %v605_v41, 0.0 }
  0xc9   : > { %662 = vadd.xlane.f32.xlu1 %v661_v31  ;;  %665 = vadd.xlane.f32.xlu0 %v664_v48  ;;  %v485_v58 = vpop.xlane.xlu0 %484  ;;  %v488_v63 = vpop.xlane.xlu1 %487 }
  0xca   : > { %v544_v62 = vmul.f32 0.03125, %v485_v58  ;;  %v606_v1 = vmul.f32 %v3174_v44, %v3174_v44  ;;  %v545_v12 = vmul.f32 0.03125, %v488_v63  ;;  %v607_v22 = vmul.f32 %v3178_v55, %v3178_v55 }
  0xcc   : > { %v3186_v24 = vsub.f32 %v2997_v15, %v544_v62  ;;  %v670_v26 = vsel %vm428_vm0, %v606_v1, 0.0  ;;  %v3190_v31 = vsub.f32 %v3001_v17, %v545_v12  ;;  %v673_v48 = vsel %vm428_vm0, %v607_v22, 0.0  ;;  %v2609_v22 = vld [vmem:[%s4479_s4] sm:$0xff]  }
  0xcd   : > { %668 = vadd.xlane.f32.xlu1 %v667_v0  ;;  %671 = vadd.xlane.f32.xlu0 %v670_v26  ;;  %v491_v33 = vpop.xlane.xlu0 %490  ;;  %v494_v41 = vpop.xlane.xlu1 %493 }
  0xce   : > { %v546_v40 = vmul.f32 0.03125, %v491_v33  ;;  %v608_v58 = vmul.f32 %v3186_v24, %v3186_v24  ;;  %v547_v63 = vmul.f32 0.03125, %v494_v41  ;;  %v609_v62 = vmul.f32 %v3190_v31, %v3190_v31  ;;  %2501 = vmatprep.subr.bf16.mxu0 %v2609_v22 }
  0xcf   : > { %2502 = vmatpush3.bf16.msra.mxu0 %v2609_v22 }
  0xd0   : > { %v3198_v6 = vsub.f32 %v3009_v25, %v546_v40  ;;  %v676_v1 = vsel %vm428_vm0, %v608_v58, 0.0  ;;  %v3202_v0 = vsub.f32 %v3013_v28, %v547_v63  ;;  %v679_v41 = vsel %vm428_vm0, %v609_v62, 0.0 }
  0xd1   : > { %674 = vadd.xlane.f32.xlu1 %v673_v48  ;;  %677 = vadd.xlane.f32.xlu0 %v676_v1  ;;  %v497_v12 = vpop.xlane.xlu0 %496  ;;  %v500_v33 = vpop.xlane.xlu1 %499 }
  0xd2   : > { %v548_v26 = vmul.f32 0.03125, %v497_v12  ;;  %v610_v40 = vmul.f32 %v3198_v6, %v3198_v6  ;;  %v549_v25 = vmul.f32 0.03125, %v500_v33  ;;  %v611_v58 = vmul.f32 %v3202_v0, %v3202_v0  ;;  %v2610_v12 = vld [vmem:[%s4479_s4 + $0x8] sm:$0xff]  }
  0xd3   : > { %2503 = vmatprep.subr.bf16.mxu0 %v2610_v12 }
  0xd4   : > { %v3213_v48 = vsub.f32 %v3021_v36, %v548_v26  ;;  %v682_v63 = vsel %vm428_vm0, %v610_v40, 0.0  ;;  %v3217_v1 = vsub.f32 %v3025_v39, %v549_v25  ;;  %v685_v17 = vsel %vm428_vm0, %v611_v58, 0.0  ;;  %2504 = vmatpush3.bf16.msra.mxu0 %v2610_v12 }
  0xd5   : > { %680 = vadd.xlane.f32.xlu1 %v679_v41  ;;  %683 = vadd.xlane.f32.xlu0 %v682_v63  ;;  %v503_v62 = vpop.xlane.xlu0 %502  ;;  %v506_v28 = vpop.xlane.xlu1 %505 }
  0xd6   : > { %v550_v33 = vmul.f32 0.03125, %v503_v62  ;;  %v612_v26 = vmul.f32 %v3213_v48, %v3213_v48  ;;  %v551_v36 = vmul.f32 0.03125, %v506_v28  ;;  %v613_v22 = vmul.f32 %v3217_v1, %v3217_v1 }
  0xd8   : > { %v3228_v25 = vsub.f32 %v3033_v47, %v550_v33  ;;  %v688_v41 = vsel %vm428_vm0, %v612_v26, 0.0  ;;  %v3232_v40 = vsub.f32 %v3037_v49, %v551_v36  ;;  %v691_v28 = vsel %vm428_vm0, %v613_v22, 0.0 }
  0xd9   : > { %686 = vadd.xlane.f32.xlu1 %v685_v17  ;;  %689 = vadd.xlane.f32.xlu0 %v688_v41  ;;  %v509_v58 = vpop.xlane.xlu0 %508  ;;  %v512_v62 = vpop.xlane.xlu1 %511 }
  0xda   : > { %v552_v63 = vmul.f32 0.03125, %v509_v58  ;;  %v614_v39 = vmul.f32 %v3228_v25, %v3228_v25  ;;  %v553_v4 = vmul.f32 0.03125, %v512_v62  ;;  %v615_v33 = vmul.f32 %v3232_v40, %v3232_v40 }
  0xdc   : > { %v3240_v26 = vsub.f32 %v3045_v57, %v552_v63  ;;  %v694_v36 = vsel %vm428_vm0, %v614_v39, 0.0  ;;  %v3244_v17 = vsub.f32 %v3049_v60, %v553_v4  ;;  %v697_v58 = vsel %vm428_vm0, %v615_v33, 0.0 }
  0xdd   : > { %692 = vadd.xlane.f32.xlu1 %v691_v28  ;;  %695 = vadd.xlane.f32.xlu0 %v694_v36  ;;  %v515_v12 = vpop.xlane.xlu0 %514  ;;  %v518_v22 = vpop.xlane.xlu1 %517 }
  0xde   : > { %v554_v41 = vmul.f32 0.03125, %v515_v12  ;;  %v616_v62 = vmul.f32 %v3240_v26, %v3240_v26  ;;  %v555_v49 = vmul.f32 0.03125, %v518_v22  ;;  %v617_v63 = vmul.f32 %v3244_v17, %v3244_v17 }
  0xe0   : > { %v3252_v47 = vsub.f32 %v3057_v5, %v554_v41  ;;  %v700_v4 = vsel %vm428_vm0, %v616_v62, 0.0  ;;  %v3256_v39 = vsub.f32 %v3061_v10, %v555_v49  ;;  %v703_v12 = vsel %vm428_vm0, %v617_v63, 0.0 }
  0xe1   : > { %698 = vadd.xlane.f32.xlu1 %v697_v58  ;;  %701 = vadd.xlane.f32.xlu0 %v700_v4  ;;  %v521_v28 = vpop.xlane.xlu0 %520  ;;  %v524_v33 = vpop.xlane.xlu1 %523 }
  0xe2   : > { %v556_v36 = vmul.f32 0.03125, %v521_v28  ;;  %v618_v22 = vmul.f32 %v3252_v47, %v3252_v47  ;;  %v557_v60 = vmul.f32 0.03125, %v524_v33  ;;  %v619_v41 = vmul.f32 %v3256_v39, %v3256_v39 }
  0xe4   : > { %v3264_v5 = vsub.f32 %v3069_v20, %v556_v36  ;;  %v706_v49 = vsel %vm428_vm0, %v618_v22, 0.0  ;;  %v3268_v58 = vsub.f32 %v3073_v23, %v557_v60  ;;  %v709_v62 = vsel %vm428_vm0, %v619_v41, 0.0 }
  0xe5   : > { %704 = vadd.xlane.f32.xlu1 %v703_v12  ;;  %707 = vadd.xlane.f32.xlu0 %v706_v49 }
  0xe6   : > { %v620_v63 = vmul.f32 %v3264_v5, %v3264_v5  ;;  %v621_v4 = vmul.f32 %v3268_v58, %v3268_v58 }
  0xe8   : > { %v712_v28 = vsel %vm428_vm0, %v620_v63, 0.0  ;;  %v715_v36 = vsel %vm428_vm0, %v621_v4, 0.0 }
  0xe9   : > { %710 = vadd.xlane.f32.xlu1 %v709_v62  ;;  %713 = vadd.xlane.f32.xlu0 %v712_v28 }
  0xed   : > { %716 = vadd.xlane.f32.xlu1 %v715_v36 }
 0x13a   : > { %v624_v33 = vpop.xlane.xlu0 %623 }
 0x13b   : > { %v718_v60 = vmul.f32 0.03125, %v624_v33 }
 0x13d   : > { %v750_v22 = vadd.f32 1e-05, %v718_v60 }
 0x13e   : > { %v627_v12 = vpop.xlane.xlu1 %626  ;;  %v630_v49 = vpop.xlane.xlu0 %629 }
 0x13f   : > { %2619 = vrsqrt.f32 %v750_v22  ;;  %v719_v41 = vmul.f32 0.03125, %v627_v12  ;;  %v720_v10 = vmul.f32 0.03125, %v630_v49 }
 0x141   : > { %v751_v23 = vadd.f32 1e-05, %v719_v41  ;;  %v752_v20 = vadd.f32 1e-05, %v720_v10 }
 0x142   : > { %v633_v57 = vpop.xlane.xlu1 %632  ;;  %v636_v15 = vpop.xlane.xlu0 %635 }
 0x143   : > { %2621 = vrsqrt.f32 %v751_v23  ;;  %v721_v53 = vmul.f32 0.03125, %v633_v57  ;;  %v722_v63 = vmul.f32 0.03125, %v636_v15 }
 0x144   : > { %2623 = vrsqrt.f32 %v752_v20 }
 0x145   : > { %v753_v62 = vadd.f32 1e-05, %v721_v53  ;;  %v754_v28 = vadd.f32 1e-05, %v722_v63  ;;  %v3281_v53 = vld [vmem:[%s4477_s2] ss:$0 sm:$0xff] }
 0x146   : > { %v639_v4 = vpop.xlane.xlu1 %638  ;;  %v642_v36 = vpop.xlane.xlu0 %641 }
 0x147   : > { %2625 = vrsqrt.f32 %v753_v62  ;;  %v723_v33 = vmul.f32 0.03125, %v639_v4  ;;  %v724_v60 = vmul.f32 0.03125, %v642_v36 }
 0x148   : > { %2627 = vrsqrt.f32 %v754_v28 }
 0x149   : > { %v2620_v61 = vpop.eup %2619  ;;  %v755_v22 = vadd.f32 1e-05, %v723_v33  ;;  %v756_v12 = vadd.f32 1e-05, %v724_v60 }
 0x14a   : > { %v645_v49 = vpop.xlane.xlu1 %644  ;;  %v648_v41 = vpop.xlane.xlu0 %647  ;;  %v814_v10 = vmul.f32 %v2620_v61, %v3080_v34 }
 0x14b   : > { %2629 = vrsqrt.f32 %v755_v22  ;;  %v725_v23 = vmul.f32 0.03125, %v645_v49  ;;  %v726_v57 = vmul.f32 0.03125, %v648_v41  ;;  %v3289_v22 = vld [vmem:[%s4478_s3] ss:$0 sm:$0xff] }
 0x14c   : > { %2631 = vrsqrt.f32 %v756_v12  ;;  %v853_v33 = vmul.f32 %v3281_v53, %v814_v10 }
 0x14d   : > { %v2622_v15 = vpop.eup %2621  ;;  %v757_v20 = vadd.f32 1e-05, %v725_v23  ;;  %v758_v63 = vadd.f32 1e-05, %v726_v57 }
 0x14e   : > { %v2624_v62 = vpop.eup %2623  ;;  %v651_v28 = vpop.xlane.xlu1 %650  ;;  %v815_v36 = vmul.f32 %v2622_v15, %v3090_v50 }
 0x14f   : > { %v654_v4 = vpop.xlane.xlu0 %653  ;;  %v816_v61 = vmul.f32 %v2624_v62, %v3083_v38  ;;  %2633 = vrsqrt.f32 %v757_v20  ;;  %v727_v34 = vmul.f32 0.03125, %v651_v28  ;;  %v892_v38 = vadd.f32 %v3289_v22, %v853_v33 }
 0x150   : > { %v728_v60 = vmul.f32 0.03125, %v654_v4  ;;  %2635 = vrsqrt.f32 %v758_v63  ;;  %v854_v12 = vmul.f32 %v3281_v53, %v815_v36 }
 0x151   : > { %v2626_v49 = vpop.eup %2625  ;;  %v759_v41 = vadd.f32 1e-05, %v727_v34  ;;  %v855_v62 = vmul.f32 %v3281_v53, %v816_v61 }
 0x152   : > { %v760_v23 = vadd.f32 1e-05, %v728_v60  ;;  %v2628_v57 = vpop.eup %2627  ;;  %v817_v50 = vmul.f32 %v2626_v49, %v3094_v54  ;;  %v657_v10 = vpop.xlane.xlu1 %656  ;;  %v893_v20 = vadd.f32 %v3289_v22, %v854_v12 }
 0x153   : > { %v660_v15 = vpop.xlane.xlu0 %659  ;;  %v818_v28 = vmul.f32 %v2628_v57, %v3102_v2  ;;  %2637 = vrsqrt.f32 %v759_v41  ;;  %v729_v63 = vmul.f32 0.03125, %v657_v10  ;;  %v894_v61 = vadd.f32 %v3289_v22, %v855_v62 }
 0x154   : > { %v730_v4 = vmul.f32 0.03125, %v660_v15  ;;  %2639 = vrsqrt.f32 %v760_v23  ;;  %v924_v36 = vpack.c.bf16 %v893_v20, %v892_v38  ;;  %v856_v34 = vmul.f32 %v3281_v53, %v817_v50 }
 0x155   : > { %v2630_v60 = vpop.eup %2629  ;;  %v761_v51 = vadd.f32 1e-05, %v729_v63  ;;  %v857_v41 = vmul.f32 %v3281_v53, %v818_v28 }
 0x156   : > { %v762_v54 = vadd.f32 1e-05, %v730_v4  ;;  %v2632_v49 = vpop.eup %2631  ;;  %v819_v59 = vmul.f32 %v2630_v60, %v3106_v11  ;;  %v663_v33 = vpop.xlane.xlu1 %662  ;;  %2505 = vmatprep.mubr.msk.bf16.mxu0 %vm428_vm0, %v924_v36  ;;  %v895_v2 = vadd.f32 %v3289_v22, %v856_v34 }
 0x157   : > { %v666_v12 = vpop.xlane.xlu0 %665  ;;  %v820_v23 = vmul.f32 %v2632_v49, %v3114_v30  ;;  %2641 = vrsqrt.f32 %v761_v51  ;;  %v731_v57 = vmul.f32 0.03125, %v663_v33  ;;  %v896_v28 = vadd.f32 %v3289_v22, %v857_v41 }
 0x158   : > { %v732_v50 = vmul.f32 0.03125, %v666_v12  ;;  %2643 = vrsqrt.f32 %v762_v54  ;;  %v925_v10 = vpack.c.bf16 %v895_v2, %v894_v61  ;;  %v858_v15 = vmul.f32 %v3281_v53, %v819_v59 }
 0x159   : > { %v2634_v11 = vpop.eup %2633  ;;  %v763_v38 = vadd.f32 1e-05, %v731_v57  ;;  %v859_v30 = vmul.f32 %v3281_v53, %v820_v23 }
 0x15a   : > { %v764_v20 = vadd.f32 1e-05, %v732_v50  ;;  %v2636_v63 = vpop.eup %2635  ;;  %v821_v4 = vmul.f32 %v2634_v11, %v3118_v32  ;;  %v669_v62 = vpop.xlane.xlu1 %668  ;;  %2506 = vmatmul.mubr.msk.bf16.vlgmr.msra.gmra.mrb[0].mxu0 %vm428_vm0, %v925_v10  ;;  %v897_v51 = vadd.f32 %v3289_v22, %v858_v15 }
 0x15b   : > { %v672_v36 = vpop.xlane.xlu0 %671  ;;  %v822_v34 = vmul.f32 %v2636_v63, %v3126_v52  ;;  %2645 = vrsqrt.f32 %v763_v38  ;;  %v733_v59 = vmul.f32 0.03125, %v669_v62  ;;  %v898_v23 = vadd.f32 %v3289_v22, %v859_v30 }
 0x15c   : > { %v734_v60 = vmul.f32 0.03125, %v672_v36  ;;  %2647 = vrsqrt.f32 %v764_v20  ;;  %v926_v54 = vpack.c.bf16 %v897_v51, %v896_v28  ;;  %v860_v49 = vmul.f32 %v3281_v53, %v821_v4 }
 0x15d   : > { %v2638_v32 = vpop.eup %2637  ;;  %v765_v33 = vadd.f32 1e-05, %v733_v59  ;;  %v861_v50 = vmul.f32 %v3281_v53, %v822_v34 }
 0x15e   : > { %v766_v12 = vadd.f32 1e-05, %v734_v60  ;;  %v2640_v61 = vpop.eup %2639  ;;  %v823_v2 = vmul.f32 %v2638_v32, %v3130_v56  ;;  %v675_v41 = vpop.xlane.xlu1 %674  ;;  %2509 = vmatprep.mubr.msk.bf16.mxu0 %vm428_vm0, %v926_v54  ;;  %v899_v52 = vadd.f32 %v3289_v22, %v860_v49 }
 0x15f   : > { %v678_v57 = vpop.xlane.xlu0 %677  ;;  %v824_v10 = vmul.f32 %v2640_v61, %v3138_v14  ;;  %2649 = vrsqrt.f32 %v765_v33  ;;  %v735_v15 = vmul.f32 0.03125, %v675_v41  ;;  %v900_v30 = vadd.f32 %v3289_v22, %v861_v50 }
 0x160   : > { %v736_v11 = vmul.f32 0.03125, %v678_v57  ;;  %2651 = vrsqrt.f32 %v766_v12  ;;  %v927_v38 = vpack.c.bf16 %v899_v52, %v898_v23  ;;  %v862_v20 = vmul.f32 %v3281_v53, %v823_v2 }
 0x161   : > { %v2642_v56 = vpop.eup %2641  ;;  %v767_v63 = vadd.f32 1e-05, %v735_v15  ;;  %v863_v34 = vmul.f32 %v3281_v53, %v824_v10 }
 0x162   : > { %v768_v4 = vadd.f32 1e-05, %v736_v11  ;;  %v2644_v62 = vpop.eup %2643  ;;  %v825_v36 = vmul.f32 %v2642_v56, %v3142_v18  ;;  %v681_v28 = vpop.xlane.xlu1 %680  ;;  %2510 = vmatmul.mubr.msk.bf16.gmra.mrb[4].mxu0 %vm428_vm0, %v927_v38  ;;  %v901_v14 = vadd.f32 %v3289_v22, %v862_v20 }
 0x163   : > { %v684_v51 = vpop.xlane.xlu0 %683  ;;  %v826_v59 = vmul.f32 %v2644_v62, %v3150_v42  ;;  %2653 = vrsqrt.f32 %v767_v63  ;;  %v737_v60 = vmul.f32 0.03125, %v681_v28  ;;  %v902_v23 = vadd.f32 %v3289_v22, %v863_v34 }
 0x164   : > { %v738_v54 = vmul.f32 0.03125, %v684_v51  ;;  %2655 = vrsqrt.f32 %v768_v4  ;;  %v928_v49 = vpack.c.bf16 %v901_v14, %v900_v30  ;;  %v864_v32 = vmul.f32 %v3281_v53, %v825_v36 }
 0x165   : > { %v2646_v18 = vpop.eup %2645  ;;  %v769_v33 = vadd.f32 1e-05, %v737_v60  ;;  %v865_v52 = vmul.f32 %v3281_v53, %v826_v59 }
 0x166   : > { %v770_v12 = vadd.f32 1e-05, %v738_v54  ;;  %v2648_v61 = vpop.eup %2647  ;;  %v827_v2 = vmul.f32 %v2646_v18, %v3154_v46  ;;  %v687_v41 = vpop.xlane.xlu1 %686  ;;  %2513 = vmatprep.mubr.msk.bf16.mxu0 %vm428_vm0, %v928_v49  ;;  %v903_v42 = vadd.f32 %v3289_v22, %v864_v32 }
 0x167   : > { %v690_v57 = vpop.xlane.xlu0 %689  ;;  %v828_v50 = vmul.f32 %v2648_v61, %v3162_v9  ;;  %2657 = vrsqrt.f32 %v769_v33  ;;  %v739_v10 = vmul.f32 0.03125, %v687_v41  ;;  %v904_v28 = vadd.f32 %v3289_v22, %v865_v52 }
 0x168   : > { %v740_v15 = vmul.f32 0.03125, %v690_v57  ;;  %2659 = vrsqrt.f32 %v770_v12  ;;  %v929_v11 = vpack.c.bf16 %v903_v42, %v902_v23  ;;  %v866_v38 = vmul.f32 %v3281_v53, %v827_v2 }
 0x169   : > { %v2650_v46 = vpop.eup %2649  ;;  %v771_v20 = vadd.f32 1e-05, %v739_v10  ;;  %v867_v51 = vmul.f32 %v3281_v53, %v828_v50 }
 0x16a   : > { %v772_v56 = vadd.f32 1e-05, %v740_v15  ;;  %v2652_v63 = vpop.eup %2651  ;;  %v829_v4 = vmul.f32 %v2650_v46, %v3166_v16  ;;  %v693_v62 = vpop.xlane.xlu1 %692  ;;  %2514 = vmatmul.mubr.msk.bf16.gmra.mrb[8].mxu0 %vm428_vm0, %v929_v11  ;;  %v905_v9 = vadd.f32 %v3289_v22, %v866_v38 }
 0x16b   : > { %v696_v36 = vpop.xlane.xlu0 %695  ;;  %v830_v30 = vmul.f32 %v2652_v63, %v3174_v44  ;;  %2661 = vrsqrt.f32 %v771_v20  ;;  %v741_v14 = vmul.f32 0.03125, %v693_v62  ;;  %v906_v61 = vadd.f32 %v3289_v22, %v867_v51 }
 0x16c   : > { %v742_v34 = vmul.f32 0.03125, %v696_v36  ;;  %2663 = vrsqrt.f32 %v772_v56  ;;  %v930_v59 = vpack.c.bf16 %v905_v9, %v904_v28  ;;  %v868_v60 = vmul.f32 %v3281_v53, %v829_v4 }
 0x16d   : > { %v2654_v16 = vpop.eup %2653  ;;  %v773_v54 = vadd.f32 1e-05, %v741_v14  ;;  %v869_v2 = vmul.f32 %v3281_v53, %v830_v30 }
 0x16e   : > { %v774_v49 = vadd.f32 1e-05, %v742_v34  ;;  %v2656_v32 = vpop.eup %2655  ;;  %v831_v18 = vmul.f32 %v2654_v16, %v3178_v55  ;;  %v699_v33 = vpop.xlane.xlu1 %698  ;;  %2517 = vmatprep.mubr.msk.bf16.mxu0 %vm428_vm0, %v930_v59  ;;  %v907_v44 = vadd.f32 %v3289_v22, %v868_v60 }
 0x16f   : > { %v702_v12 = vpop.xlane.xlu0 %701  ;;  %v832_v41 = vmul.f32 %v2656_v32, %v3186_v24  ;;  %2665 = vrsqrt.f32 %v773_v54  ;;  %v743_v57 = vmul.f32 0.03125, %v699_v33  ;;  %v908_v20 = vadd.f32 %v3289_v22, %v869_v2 }
 0x170   : > { %v744_v23 = vmul.f32 0.03125, %v702_v12  ;;  %2667 = vrsqrt.f32 %v774_v49  ;;  %v931_v42 = vpack.c.bf16 %v907_v44, %v906_v61  ;;  %v870_v52 = vmul.f32 %v3281_v53, %v831_v18 }
 0x171   : > { %v2658_v55 = vpop.eup %2657  ;;  %v775_v50 = vadd.f32 1e-05, %v743_v57  ;;  %v871_v56 = vmul.f32 %v3281_v53, %v832_v41 }
 0x172   : > { %v776_v10 = vadd.f32 1e-05, %v744_v23  ;;  %v2660_v15 = vpop.eup %2659  ;;  %v833_v11 = vmul.f32 %v2658_v55, %v3190_v31  ;;  %v705_v38 = vpop.xlane.xlu1 %704  ;;  %2518 = vmatmul.mubr.msk.bf16.gmra.mrb[12].mxu0 %vm428_vm0, %v931_v42  ;;  %v909_v24 = vadd.f32 %v3289_v22, %v870_v52 }
 0x173   : > { %v708_v46 = vpop.xlane.xlu0 %707  ;;  %v834_v63 = vmul.f32 %v2660_v15, %v3198_v6  ;;  %2669 = vrsqrt.f32 %v775_v50  ;;  %v745_v4 = vmul.f32 0.03125, %v705_v38  ;;  %v910_v60 = vadd.f32 %v3289_v22, %v871_v56 }
 0x174   : > { %v746_v62 = vmul.f32 0.03125, %v708_v46  ;;  %2671 = vrsqrt.f32 %v776_v10  ;;  %v932_v36 = vpack.c.bf16 %v909_v24, %v908_v20  ;;  %v872_v28 = vmul.f32 %v3281_v53, %v833_v11 }
 0x175   : > { %v2662_v31 = vpop.eup %2661  ;;  %v777_v9 = vadd.f32 1e-05, %v745_v4  ;;  %v873_v16 = vmul.f32 %v3281_v53, %v834_v63 }
 0x176   : > { %v778_v51 = vadd.f32 1e-05, %v746_v62  ;;  %v2664_v30 = vpop.eup %2663  ;;  %v835_v14 = vmul.f32 %v2662_v31, %v3202_v0  ;;  %v711_v34 = vpop.xlane.xlu1 %710  ;;  %2521 = vmatprep.mubr.msk.bf16.mxu0 %vm428_vm0, %v932_v36  ;;  %v911_v6 = vadd.f32 %v3289_v22, %v872_v28 }
 0x177   : > { %v714_v59 = vpop.xlane.xlu0 %713  ;;  %v836_v54 = vmul.f32 %v2664_v30, %v3213_v48  ;;  %2673 = vrsqrt.f32 %v777_v9  ;;  %v747_v49 = vmul.f32 0.03125, %v711_v34  ;;  %v912_v57 = vadd.f32 %v3289_v22, %v873_v16 }
 0x178   : > { %v748_v32 = vmul.f32 0.03125, %v714_v59  ;;  %2675 = vrsqrt.f32 %v778_v51  ;;  %v933_v18 = vpack.c.bf16 %v911_v6, %v910_v60  ;;  %v874_v33 = vmul.f32 %v3281_v53, %v835_v14 }
 0x179   : > { %v2666_v0 = vpop.eup %2665  ;;  %v779_v12 = vadd.f32 1e-05, %v747_v49  ;;  %v875_v23 = vmul.f32 %v3281_v53, %v836_v54 }
 0x17a   : > { %v780_v61 = vadd.f32 1e-05, %v748_v32  ;;  %v2668_v44 = vpop.eup %2667  ;;  %v837_v2 = vmul.f32 %v2666_v0, %v3217_v1  ;;  %v717_v41 = vpop.xlane.xlu1 %716  ;;  %2522 = vmatmul.mubr.msk.bf16.gmra.mrb[16].mxu0 %vm428_vm0, %v933_v18  ;;  %v913_v48 = vadd.f32 %v3289_v22, %v874_v33 }
 0x17b   : > { %v838_v42 = vmul.f32 %v2668_v44, %v3228_v25  ;;  %2677 = vrsqrt.f32 %v779_v12  ;;  %v749_v52 = vmul.f32 0.03125, %v717_v41  ;;  %v914_v38 = vadd.f32 %v3289_v22, %v875_v23  ;;  %v2615_v44 = vld [vmem:[%s4481_s6 + $0x20] sm:$0xff]  }
 0x17c   : > { %2679 = vrsqrt.f32 %v780_v61  ;;  %v934_v55 = vpack.c.bf16 %v913_v48, %v912_v57  ;;  %v876_v50 = vmul.f32 %v3281_v53, %v837_v2  ;;  %v2614_v61 = vld [vmem:[%s4481_s6 + $0x18] sm:$0xff]   ;;  %v3417_v2 = vld [vmem:[%s4480_s5] ss:$0 sm:$0xff] }
 0x17d   : > { %v2670_v10 = vpop.eup %2669  ;;  %v781_v15 = vadd.f32 1e-05, %v749_v52  ;;  %v877_v20 = vmul.f32 %v3281_v53, %v838_v42 }
 0x17e   : > { %v2672_v1 = vpop.eup %2671  ;;  %v839_v11 = vmul.f32 %v2670_v10, %v3232_v40  ;;  %2525 = vmatprep.mubr.msk.bf16.mxu0 %vm428_vm0, %v934_v55  ;;  %v915_v46 = vadd.f32 %v3289_v22, %v876_v50  ;;  %v2616_v10 = vld [vmem:[%s4481_s6 + $0x28] sm:$0xff]  }
 0x17f   : > { %v840_v25 = vmul.f32 %v2672_v1, %v3240_v26  ;;  %2681 = vrsqrt.f32 %v781_v15  ;;  %v916_v40 = vadd.f32 %v3289_v22, %v877_v20 }
 0x180   : > { %v935_v24 = vpack.c.bf16 %v915_v46, %v914_v38  ;;  %v878_v56 = vmul.f32 %v3281_v53, %v839_v11 }
 0x181   : > { %v2674_v63 = vpop.eup %2673  ;;  %v879_v28 = vmul.f32 %v3281_v53, %v840_v25 }
 0x182   : > { %v2676_v4 = vpop.eup %2675  ;;  %v841_v62 = vmul.f32 %v2674_v63, %v3244_v17  ;;  %2526 = vmatmul.mubr.msk.bf16.gmra.mrb[20].mxu0 %vm428_vm0, %v935_v24  ;;  %v917_v36 = vadd.f32 %v3289_v22, %v878_v56 }
 0x183   : > { %v842_v31 = vmul.f32 %v2676_v4, %v3252_v47  ;;  %v918_v17 = vadd.f32 %v3289_v22, %v879_v28 }
 0x184   : > { %v936_v9 = vpack.c.bf16 %v917_v36, %v916_v40  ;;  %v880_v26 = vmul.f32 %v3281_v53, %v841_v62 }
 0x185   : > { %v2678_v51 = vpop.eup %2677  ;;  %v881_v59 = vmul.f32 %v3281_v53, %v842_v31 }
 0x186   : > { %v2680_v30 = vpop.eup %2679  ;;  %v843_v14 = vmul.f32 %v2678_v51, %v3256_v39  ;;  %2529 = vmatprep.mubr.msk.bf16.mxu0 %vm428_vm0, %v936_v9  ;;  %v919_v34 = vadd.f32 %v3289_v22, %v880_v26 }
 0x187   : > { %v844_v60 = vmul.f32 %v2680_v30, %v3264_v5  ;;  %v920_v39 = vadd.f32 %v3289_v22, %v881_v59 }
 0x188   : > { %v937_v6 = vpack.c.bf16 %v919_v34, %v918_v17  ;;  %v882_v47 = vmul.f32 %v3281_v53, %v843_v14  ;;  %v2617_v17 = vld [vmem:[%s4481_s6 + $0x30] sm:$0xff]  }
 0x189   : > { %v2682_v16 = vpop.eup %2681  ;;  %v883_v32 = vmul.f32 %v3281_v53, %v844_v60 }
 0x18a   : > { %v845_v54 = vmul.f32 %v2682_v16, %v3268_v58  ;;  %2530 = vmatmul.mubr.msk.bf16.gmra.mrb[24].mxu0 %vm428_vm0, %v937_v6  ;;  %v921_v49 = vadd.f32 %v3289_v22, %v882_v47  ;;  %v2611_v58 = vld [vmem:[%s4481_s6] sm:$0xff]  }
 0x18b   : > { %v922_v5 = vadd.f32 %v3289_v22, %v883_v32  ;;  %2537 = vmatprep.subr.bf16.mxu0 %v2611_v58  ;;  %2585 = vmatprep.subr.bf16.mxu1 %v2611_v58 }
 0x18c   : > { %v938_v18 = vpack.c.bf16 %v921_v49, %v920_v39  ;;  %v884_v33 = vmul.f32 %v3281_v53, %v845_v54  ;;  %2538 = vmatpush3.bf16.msra.mxu0 %v2611_v58  ;;  %2593 = vmatpush3.bf16.msra.mxu1 %v2611_v58  ;;  %v2612_v53 = vld [vmem:[%s4481_s6 + $0x8] sm:$0xff]  }
 0x18d   : > { %2539 = vmatprep.subr.bf16.mxu0 %v2612_v53  ;;  %2586 = vmatprep.subr.bf16.mxu1 %v2612_v53 }
 0x18e   : > { %2533 = vmatprep.mubr.msk.bf16.mxu0 %vm428_vm0, %v938_v18  ;;  %v923_v0 = vadd.f32 %v3289_v22, %v884_v33  ;;  %v2613_v22 = vld [vmem:[%s4481_s6 + $0x10] sm:$0xff]  }
 0x190   : > { %v939_v12 = vpack.c.bf16 %v923_v0, %v922_v5  ;;  %2540 = vmatpush3.bf16.msra.mxu0 %v2612_v53  ;;  %2594 = vmatpush3.bf16.msra.mxu1 %v2612_v53 }
 0x191   : > { %2541 = vmatprep.subr.bf16.mxu0 %v2613_v22  ;;  %2587 = vmatprep.subr.bf16.mxu1 %v2613_v22 }
 0x192   : > { %2534 = vmatmul.mubr.msk.bf16.gmra.mrb[28].mxu0 %vm428_vm0, %v939_v12 }
 0x194   : > { %2542 = vmatpush3.bf16.msra.mxu0 %v2613_v22  ;;  %2595 = vmatpush3.bf16.msra.mxu1 %v2613_v22 }
 0x195   : > { %2543 = vmatprep.subr.bf16.mxu0 %v2614_v61  ;;  %2588 = vmatprep.subr.bf16.mxu1 %v2614_v61 }
 0x198   : > { %2544 = vmatpush3.bf16.msra.mxu0 %v2614_v61  ;;  %2596 = vmatpush3.bf16.msra.mxu1 %v2614_v61 }
 0x199   : > { %2545 = vmatprep.subr.bf16.mxu0 %v2615_v44  ;;  %2589 = vmatprep.subr.bf16.mxu1 %v2615_v44 }
 0x19c   : > { %2546 = vmatpush3.bf16.msra.mxu0 %v2615_v44  ;;  %2597 = vmatpush3.bf16.msra.mxu1 %v2615_v44 }
 0x19d   : > { %2547 = vmatprep.subr.bf16.mxu0 %v2616_v10  ;;  %2590 = vmatprep.subr.bf16.mxu1 %v2616_v10 }
 0x1a0   : > { %2548 = vmatpush3.bf16.msra.mxu0 %v2616_v10  ;;  %2598 = vmatpush3.bf16.msra.mxu1 %v2616_v10 }
 0x1a1   : > { %2549 = vmatprep.subr.bf16.mxu0 %v2617_v17  ;;  %2591 = vmatprep.subr.bf16.mxu1 %v2617_v17 }
 0x1a4   : > { %2550 = vmatpush3.bf16.msra.mxu0 %v2617_v17  ;;  %2599 = vmatpush3.bf16.msra.mxu1 %v2617_v17 }
 0x22d   : > { %v2507_v41 = vpop.f32.mrb[0].mxu0 }
 0x22e   : > { %v1054_v57 = vadd.f32 %v2507_v41, %v3417_v2  ;;  %v1045_v48 = vpop.f32.mrb[1].mxu0 }
 0x22f   : > { %v3421_v23 = vadd.f32 %v3417_v2, %v1045_v48  ;;  %v2508_v42 = vpop.f32.mrb[2].mxu0 }
 0x230   : > { %v3423_v52 = vmul.f32 0.70710677, %v1054_v57  ;;  %v3426_v55 = vadd.f32 %v2508_v42, %v3417_v2  ;;  %v1048_v50 = vpop.f32.mrb[3].mxu0  ;;  %v3481_v41 = vmul.f32 0.5, %v1054_v57 }
 0x231   : > { %v3432_v15 = vmul.f32 0.70710677, %v3421_v23  ;;  %v3435_v1 = vadd.f32 %v3417_v2, %v1048_v50  ;;  %v3485_v10 = vmul.f32 0.5, %v3421_v23 }
 0x232   : > { %v1238_v11 = vand.u32 2147483647, %v3423_v52  ;;  %v3439_v38 = vmul.f32 0.70710677, %v3426_v55  ;;  %v3491_v57 = vmul.f32 0.5, %v3426_v55  ;;  %vm1846_vm1 = vcmp.ge.f32.partialorder %v3423_v52, 0.0 }
 0x233   : > { %v1236_v46 = vand.u32 2147483647, %v3432_v15  ;;  %v3443_v20 = vmul.f32 0.70710677, %v3435_v1  ;;  %vm1844_vm3 = vcmp.ge.f32.partialorder %v3432_v15, 0.0 }
 0x234   : > { %v1270_v25 = vmul.f32 0.3275911, %v1238_v11  ;;  %v1239_v24 = vand.u32 2147483647, %v3439_v38  ;;  %v1654_v60 = vsub.f32 0.0, %v1238_v11  ;;  %vm1847_vm2 = vcmp.ge.f32.partialorder %v3439_v38, 0.0 }
 0x235   : > { %v1268_v56 = vmul.f32 0.3275911, %v1236_v46  ;;  %v1237_v63 = vand.u32 2147483647, %v3443_v20  ;;  %v2511_v40 = vpop.f32.mrb[4].mxu0  ;;  %v1652_v6 = vsub.f32 0.0, %v1236_v46 }
 0x236   : > { %v1302_v4 = vadd.f32 1.0, %v1270_v25  ;;  %v1271_v62 = vmul.f32 0.3275911, %v1239_v24  ;;  %v1061_v31 = vpop.f32.mrb[5].mxu0  ;;  %v3448_v14 = vadd.f32 %v2511_v40, %v3417_v2  ;;  %v1655_v49 = vsub.f32 0.0, %v1239_v24 }
 0x237   : > { %v1300_v36 = vadd.f32 1.0, %v1268_v56  ;;  %v1269_v28 = vmul.f32 0.3275911, %v1237_v63  ;;  %v2512_v26 = vpop.f32.mrb[6].mxu0  ;;  %v1686_v5 = vmul.f32 %v1654_v60, %v1238_v11  ;;  %v1684_v0 = vmul.f32 %v1652_v6, %v1236_v46 }
 0x238   : > { %2683 = vrcp.f32 %v1302_v4  ;;  %v1303_v9 = vadd.f32 1.0, %v1271_v62  ;;  %v1064_v51 = vpop.f32.mrb[7].mxu0  ;;  %v3454_v34 = vadd.f32 %v2512_v26, %v3417_v2  ;;  %v3457_v59 = vmul.f32 0.70710677, %v3448_v14 }
 0x239   : > { %2685 = vrcp.f32 %v1300_v36  ;;  %v1301_v30 = vadd.f32 1.0, %v1269_v28  ;;  %v3475_v22 = vadd.f32 %v3417_v2, %v1061_v31  ;;  %v1687_v42 = vmul.f32 %v1655_v49, %v1239_v24 }
 0x23a   : > { %2687 = vrcp.f32 %v1303_v9  ;;  %v3460_v47 = vmul.f32 0.70710677, %v3454_v34  ;;  %v3463_v54 = vand.u32 2147483647, %v3457_v59  ;;  %v1653_v50 = vsub.f32 0.0, %v1237_v63 }
 0x23b   : > { %2689 = vrcp.f32 %v1301_v30  ;;  %4558 = vst [vmem:[#allocation34_spill] sm:$0xff] %v3475_v22  ;;  %v1720_v56 = vmul.f32 1.442695, %v1686_v5  ;;  %v1716_v4 = vmul.f32 1.442695, %v1684_v0  ;;  %v3506_v55 = vadd.f32 %v3417_v2, %v1064_v51 }
 0x23c   : > { %v3466_v32 = vand.u32 2147483647, %v3460_v47  ;;  %v1274_v33 = vmul.f32 0.3275911, %v3463_v54  ;;  %v3494_v36 = vmul.f32 0.70710677, %v3475_v22  ;;  %v1685_v9 = vmul.f32 %v1653_v50, %v1237_v63 }
 0x23d   : > { %v2515_v16 = vpop.f32.mrb[8].mxu0  ;;  %v1722_v31 = vmul.f32 1.442695, %v1687_v42  ;;  %4560 = vst [vmem:[#allocation36_spill] sm:$0xff] %v3506_v55  ;;  %v3515_v0 = vmul.f32 0.5, %v3435_v1  ;;  %vm1845_vm4 = vcmp.ge.f32.partialorder %v3443_v20, 0.0 }
 0x23e   : > { %v1077_v39 = vpop.f32.mrb[9].mxu0  ;;  %v1275_v12 = vmul.f32 0.3275911, %v3466_v32  ;;  %v1306_v53 = vadd.f32 1.0, %v1274_v33  ;;  %4559 = vst [vmem:[#allocation35_spill] sm:$0xff] %v3494_v36  ;;  %v3509_v60 = vadd.f32 %v2515_v16, %v3417_v2  ;;  %vm1850_vm5 = vcmp.ge.f32.partialorder %v3457_v59, 0.0 }
 0x23f   : > { %v3468_v18 = vpop.f32.mrb[10].mxu0  ;;  %v3532_v1 = vadd.f32 %v3417_v2, %v1077_v39  ;;  %vm1851_vm6 = vcmp.ge.f32.partialorder %v3460_v47, 0.0 }
 0x240   : > { %v3477_v61 = vpop.f32.mrb[11].mxu0  ;;  %2691 = vrcp.f32 %v1306_v53  ;;  %v1307_v46 = vadd.f32 1.0, %v1275_v12  ;;  %v3518_v12 = vand.u32 2147483647, %v3494_v36  ;;  %v3525_v42 = vmul.f32 0.70710677, %v3509_v60 }
 0x241   : > { %v3547_v39 = vmul.f32 0.70710677, %v3532_v1 }
 0x242   : > { %v3472_v58 = vpop.eup %2683  ;;  %2693 = vrcp.f32 %v1307_v46  ;;  %v3529_v46 = vmul.f32 0.70710677, %v3506_v55  ;;  %vm1854_vm7 = vcmp.ge.f32.partialorder %v3525_v42, 0.0 }
 0x243   : > { %v3479_v44 = vpop.eup %2685  ;;  %v1366_v48 = vmul.f32 1.0614054, %v3472_v58  ;;  %2695 = vpow2.f32 %v1720_v56  ;;  %vm1852_vm8 = vcmp.ge.f32.partialorder %v3547_v39, 0.0 }
 0x244   : > { %v1364_v11 = vmul.f32 1.0614054, %v3479_v44  ;;  %v3488_v62 = vpop.eup %2687  ;;  %4561 = vst [vmem:[#allocation37_spill] sm:$0xff] %v3529_v46  ;;  %2697 = vpow2.f32 %v1722_v31  ;;  %v1658_v31 = vsub.f32 0.0, %v3463_v54 }
 0x245   : > { %v1398_v25 = vadd.f32 -1.4531521, %v1366_v48  ;;  %v3496_v24 = vpop.f32.mrb[12].mxu0  ;;  %v1367_v28 = vmul.f32 1.0614054, %v3488_v62  ;;  %v3502_v30 = vpop.eup %2689  ;;  %2699 = vpow2.f32 %v1716_v4  ;;  %v3566_v4 = vmul.f32 0.5, %v3448_v14 }
 0x246   : > { %v1396_v40 = vadd.f32 -1.4531521, %v1364_v11  ;;  %v3500_v26 = vpop.f32.mrb[13].mxu0  ;;  %v1365_v5 = vmul.f32 1.0614054, %v3502_v30  ;;  %v1690_v8 = vmul.f32 %v1658_v31, %v3463_v54 }
 0x247   : > { %v1430_v23 = vmul.f32 %v3472_v58, %v1398_v25  ;;  %v3511_v6 = vpop.f32.mrb[14].mxu0  ;;  %v1399_v33 = vadd.f32 -1.4531521, %v1367_v28  ;;  %v1718_v11 = vmul.f32 1.442695, %v1685_v9  ;;  %v2618_v25 = vld [vmem:[%s4481_s6 + $0x38] sm:$0xff]  }
 0x248   : > { %v1428_v17 = vmul.f32 %v3479_v44, %v1396_v40  ;;  %v3520_v53 = vpop.f32.mrb[15].mxu0  ;;  %v1397_v48 = vadd.f32 -1.4531521, %v1365_v5  ;;  %v3539_v28 = vand.u32 2147483647, %v3525_v42  ;;  %2551 = vmatprep.subr.bf16.mxu0 %v2618_v25  ;;  %2592 = vmatprep.subr.bf16.mxu1 %v2618_v25  ;;  %v3720_v20 = vadd.f32 %v3511_v6, %v3417_v2 }
 0x249   : > { %v1462_v49 = vadd.f32 1.4214138, %v1430_v23  ;;  %v1431_v16 = vmul.f32 %v3488_v62, %v1399_v33  ;;  %2552 = vmatpush3.bf16.msra.mxu0 %v2618_v25  ;;  %2600 = vmatpush3.bf16.msra.mxu1 %v2618_v25  ;;  %v1656_v25 = vsub.f32 0.0, %v3518_v12  ;;  %v1728_v55 = vmul.f32 1.442695, %v1690_v8 }
 0x24a   : > { %v1460_v63 = vadd.f32 1.4214138, %v1428_v17  ;;  %v1429_v23 = vmul.f32 %v3502_v30, %v1397_v48  ;;  %v3541_v17 = vpop.eup %2691  ;;  %v1278_v48 = vmul.f32 0.3275911, %v3539_v28 }
 0x24b   : > { %v1494_v51 = vmul.f32 %v3472_v58, %v1462_v49  ;;  %v1463_v40 = vadd.f32 1.4214138, %v1431_v16  ;;  %v3544_v49 = vmul.f32 0.3275911, %v3518_v12 }
 0x24c   : > { %v1492_v50 = vmul.f32 %v3479_v44, %v1460_v63  ;;  %v1461_v63 = vadd.f32 1.4214138, %v1429_v23  ;;  %v3562_v35 = vpop.eup %2693  ;;  %v1310_v43 = vadd.f32 1.0, %v1278_v48 }
 0x24d   : > { %v1526_v56 = vadd.f32 -0.28449672, %v1494_v51  ;;  %v1495_v5 = vmul.f32 %v3488_v62, %v1463_v40  ;;  %v1370_v51 = vmul.f32 1.0614054, %v3541_v17  ;;  %v3552_v16 = vpop.f32.mrb[16].mxu0  ;;  %v2696_v27 = vpop.eup %2695 }
 0x24e   : > { %v1524_v9 = vadd.f32 -0.28449672, %v1492_v50  ;;  %v3557_v50 = vand.u32 2147483647, %v3547_v39  ;;  %v3559_v37 = vpop.f32.mrb[17].mxu0  ;;  %v1493_v40 = vmul.f32 %v3502_v30, %v1461_v63  ;;  %2701 = vrcp.f32 %v1310_v43 }
 0x24f   : > { %v1558_v33 = vmul.f32 %v3472_v58, %v1526_v56  ;;  %v1527_v45 = vadd.f32 -0.28449672, %v1495_v5  ;;  %v1402_v23 = vadd.f32 -1.4531521, %v1370_v51  ;;  %v3570_v29 = vpop.f32.mrb[18].mxu0  ;;  %2703 = vpow2.f32 %v1718_v11 }
 0x250   : > { %v1276_v21 = vmul.f32 0.3275911, %v3557_v50  ;;  %v1525_v63 = vadd.f32 -0.28449672, %v1493_v40  ;;  %v3575_v19 = vpop.f32.mrb[19].mxu0  ;;  %v1556_v14 = vmul.f32 %v3479_v44, %v1524_v9 }
 0x251   : > { %v1590_v56 = vadd.f32 0.2548296, %v1558_v33  ;;  %v1559_v5 = vmul.f32 %v3488_v62, %v1527_v45  ;;  %v1434_v51 = vmul.f32 %v3541_v17, %v1402_v23  ;;  %v1371_v48 = vmul.f32 1.0614054, %v3562_v35 }
 0x252   : > { %v3585_v40 = vand.u32 2147483647, %v3529_v46  ;;  %v1308_v9 = vadd.f32 1.0, %v1276_v21 }
 0x253   : > { %v1622_v33 = vmul.f32 %v3472_v58, %v1590_v56  ;;  %v1591_v3 = vadd.f32 0.2548296, %v1559_v5  ;;  %v1466_v7 = vadd.f32 1.4214138, %v1434_v51  ;;  %v1659_v58 = vsub.f32 0.0, %v3466_v32  ;;  %v2698_v5 = vpop.eup %2697 }
 0x254   : > { %v1403_v45 = vadd.f32 -1.4531521, %v1371_v48  ;;  %v1588_v51 = vadd.f32 0.2548296, %v1556_v14  ;;  %2705 = vrcp.f32 %v1308_v9 }
 0x255   : > { %v1782_v13 = vmul.f32 %v2696_v27, %v1622_v33  ;;  %v3581_v56 = vpop.f32.mrb[20].mxu0  ;;  %v1623_v43 = vmul.f32 %v3488_v62, %v1591_v3  ;;  %v1557_v27 = vmul.f32 %v3502_v30, %v1525_v63  ;;  %v1498_v31 = vmul.f32 %v3541_v17, %v1466_v7  ;;  %v2700_v3 = vpop.eup %2699 }
 0x256   : > { %v3587_v23 = vpop.f32.mrb[21].mxu0  ;;  %v1435_v11 = vmul.f32 %v3562_v35, %v1403_v45  ;;  %v1304_v62 = vadd.f32 1.0, %v3544_v49  ;;  %v1688_v7 = vmul.f32 %v1656_v25, %v3518_v12  ;;  %v3601_v63 = vmul.f32 0.5, %v3454_v34 }
 0x257   : > { %v1814_v54 = vsub.f32 1.0, %v1782_v13  ;;  %v3592_v33 = vpop.f32.mrb[22].mxu0  ;;  %v1783_v46 = vmul.f32 %v2698_v5, %v1623_v43  ;;  %v1530_v36 = vadd.f32 -0.28449672, %v1498_v31  ;;  %v1691_v13 = vmul.f32 %v1659_v58, %v3466_v32 }
 0x258   : > { %v3595_v48 = vpop.f32.mrb[23].mxu0  ;;  %v1467_v14 = vadd.f32 1.4214138, %v1435_v11  ;;  %v1589_v9 = vadd.f32 0.2548296, %v1557_v27  ;;  %v1620_v43 = vmul.f32 %v3479_v44, %v1588_v51  ;;  %2707 = vpow2.f32 %v1728_v55  ;;  %v3615_v52 = vpop.eup %2701 }
 0x259   : > { %v1878_v21 = vsub.f32 0.0, %v1814_v54  ;;  %v1815_v45 = vsub.f32 1.0, %v1783_v46  ;;  %v1562_v22 = vmul.f32 %v3541_v17, %v1530_v36  ;;  %v3610_v49 = vadd.f32 %v3468_v18, %v3417_v2  ;;  %v2704_v51 = vpop.eup %2703 }
 0x25a   : > { %v1499_v32 = vmul.f32 %v3562_v35, %v1467_v14  ;;  %v1730_v34 = vmul.f32 1.442695, %v1691_v13  ;;  %v1273_v25 = vmul.f32 0.3275911, %v3585_v40  ;;  %2709 = vrcp.f32 %v1304_v62 }
 0x25b   : > { %v1910_v8 = vsel %vm1846_vm1, %v1814_v54, %v1878_v21  ;;  %v1879_v12 = vsub.f32 0.0, %v1815_v45  ;;  %v1724_v36 = vmul.f32 1.442695, %v1688_v7  ;;  %v1621_v18 = vmul.f32 %v3502_v30, %v1589_v9 }
 0x25c   : > { %v1942_v46 = vadd.f32 1.0, %v1910_v8  ;;  %v1531_v54 = vadd.f32 -0.28449672, %v1499_v32  ;;  %v1594_v27 = vadd.f32 0.2548296, %v1562_v22  ;;  %v1662_v31 = vsub.f32 0.0, %v3539_v28 }
 0x25d   : > { %v3613_v58 = vpop.f32.mrb[24].mxu0  ;;  %v1911_v55 = vsel %vm1847_vm2, %v1815_v45, %v1879_v12  ;;  %v3625_v11 = vmul.f32 %v2700_v3, %v1620_v43  ;;  %v1374_v13 = vmul.f32 1.0614054, %v3615_v52  ;;  %v3629_v62 = vmul.f32 0.70710677, %v3610_v49 }
 0x25e   : > { %v3617_v44 = vpop.f32.mrb[25].mxu0  ;;  %v1943_v21 = vadd.f32 1.0, %v1911_v55  ;;  %v1563_v38 = vmul.f32 %v3562_v35, %v1531_v54  ;;  %2711 = vpow2.f32 %v1730_v34  ;;  %v1305_v30 = vadd.f32 1.0, %v1273_v25  ;;  %v3635_v14 = vpop.eup %2705 }
 0x25f   : > { %v3623_v5 = vpop.f32.mrb[26].mxu0  ;;  %v1657_v22 = vsub.f32 0.0, %v3585_v40  ;;  %v3638_v8 = vmul.f32 %v1942_v46, %v3481_v41  ;;  %v1406_v45 = vadd.f32 -1.4531521, %v1374_v13  ;;  %v3645_v9 = vadd.f32 %v3417_v2, %v3477_v61 }
 0x260   : > { %v3631_v7 = vpop.f32.mrb[27].mxu0  ;;  %v3641_v3 = vmul.f32 %v1943_v21, %v3491_v57  ;;  %v1781_v43 = vmul.f32 %v2704_v51, %v1621_v18  ;;  %v1626_v32 = vmul.f32 %v3541_v17, %v1594_v27  ;;  %v1372_v12 = vmul.f32 1.0614054, %v3635_v14 }
 0x261   : > { %4562 = vst [vmem:[#allocation38_spill] sm:$0xff] %v3638_v8  ;;  %v3650_v34 = vand.u32 2147483647, %v3629_v62  ;;  %v1812_v25 = vsub.f32 1.0, %v3625_v11  ;;  %v1438_v57 = vmul.f32 %v3615_v52, %v1406_v45  ;;  %v1694_v61 = vmul.f32 %v1662_v31, %v3539_v28 }
 0x262   : > { %4563 = vst [vmem:[#allocation39_spill] sm:$0xff] %v3641_v3  ;;  %2713 = vpow2.f32 %v1724_v36  ;;  %v1595_v46 = vadd.f32 0.2548296, %v1563_v38  ;;  %v1404_v54 = vadd.f32 -1.4531521, %v1372_v12  ;;  %v2708_v55 = vpop.eup %2707  ;;  %v1689_v18 = vmul.f32 %v1657_v22, %v3585_v40 }
 0x263   : > { %v1279_v17 = vmul.f32 0.3275911, %v3650_v34  ;;  %v1470_v27 = vadd.f32 1.4214138, %v1438_v57  ;;  %v1660_v51 = vsub.f32 0.0, %v3557_v50  ;;  %v1813_v13 = vsub.f32 1.0, %v1781_v43 }
 0x264   : > { %v3663_v11 = vmul.f32 0.70710677, %v3645_v9  ;;  %v1786_v28 = vmul.f32 %v2708_v55, %v1626_v32  ;;  %v1436_v36 = vmul.f32 %v3635_v14, %v1404_v54  ;;  %v3670_v45 = vpop.eup %2709  ;;  %v1736_v40 = vmul.f32 1.442695, %v1694_v61 }
 0x265   : > { %v3665_v21 = vpop.f32.mrb[28].mxu0  ;;  %v1311_v31 = vadd.f32 1.0, %v1279_v17  ;;  %4566 = vst [vmem:[#allocation42_spill] sm:$0xff] %v3670_v45  ;;  %v1502_v12 = vmul.f32 %v3615_v52, %v1470_v27  ;;  %v3678_v57 = vadd.f32 %v3496_v24, %v3417_v2  ;;  %v1876_v43 = vsub.f32 0.0, %v1812_v25 }
 0x266   : > { %4564 = vst [vmem:[#allocation40_spill] sm:$0xff] %v3665_v21  ;;  %v3668_v38 = vpop.f32.mrb[29].mxu0  ;;  %v3674_v22 = vand.u32 2147483647, %v3663_v11  ;;  %v1627_v32 = vmul.f32 %v3562_v35, %v1595_v46  ;;  %v1468_v54 = vadd.f32 1.4214138, %v1436_v36 }
 0x267   : > { %4565 = vst [vmem:[#allocation41_spill] sm:$0xff] %v3668_v38  ;;  %v3680_v41 = vpop.f32.mrb[30].mxu0  ;;  %2715 = vrcp.f32 %v1311_v31  ;;  %v1534_v61 = vadd.f32 -0.28449672, %v1502_v12  ;;  %v1877_v45 = vsub.f32 0.0, %v1813_v13  ;;  %v1818_v8 = vsub.f32 1.0, %v1786_v28 }
 0x268   : > { %4567 = vst [vmem:[#allocation43_spill] sm:$0xff] %v3680_v41  ;;  %v3683_v17 = vpop.f32.mrb[31].mxu0  ;;  %2717 = vrcp.f32 %v1305_v30  ;;  %v1277_v55 = vmul.f32 0.3275911, %v3674_v22  ;;  %v2712_v27 = vpop.eup %2711  ;;  %v1500_v24 = vmul.f32 %v3635_v14, %v1468_v54  ;;  %v1692_v41 = vmul.f32 %v1660_v51, %v3557_v50 }
 0x269   : > { %4568 = vst [vmem:[#allocation44_spill] sm:$0xff] %v3683_v17  ;;  %v1726_v3 = vmul.f32 1.442695, %v1689_v18  ;;  %2719 = vpow2.f32 %v1736_v40  ;;  %v3690_v46 = vmul.f32 0.70710677, %v3678_v57  ;;  %v1908_v36 = vsel %vm1844_vm3, %v1812_v25, %v1876_v43 }
 0x26a   : > { %v1309_v35 = vadd.f32 1.0, %v1277_v55  ;;  %v1787_v30 = vmul.f32 %v2712_v27, %v1627_v32  ;;  %v1566_v31 = vmul.f32 %v3615_v52, %v1534_v61  ;;  %v3697_v12 = vadd.f32 %v3417_v2, %v3500_v26 }
 0x26b   : > { %v3700_v28 = vmul.f32 0.5, %v3509_v60  ;;  %v1532_v50 = vadd.f32 -0.28449672, %v1500_v24  ;;  %v3703_v18 = vand.u32 2147483647, %v3690_v46  ;;  %v1909_v15 = vsel %vm1845_vm4, %v1813_v13, %v1877_v45 }
 0x26c   : > { %2721 = vrcp.f32 %v1309_v35  ;;  %v3705_v51 = vpop.eup %2713  ;;  %v1882_v25 = vsub.f32 0.0, %v1818_v8  ;;  %v1732_v40 = vmul.f32 1.442695, %v1692_v41  ;;  %v1663_v43 = vsub.f32 0.0, %v3650_v34 }
 0x26d   : > { %4569 = vst [vmem:[#allocation45_spill] sm:$0xff] %v3705_v51  ;;  %v1940_v32 = vadd.f32 1.0, %v1908_v36  ;;  %2723 = vpow2.f32 %v1726_v3  ;;  %v1282_v26 = vmul.f32 0.3275911, %v3703_v18  ;;  %v3713_v60 = vmul.f32 0.70710677, %v3697_v12 }
 0x26e   : > { %v1819_v54 = vsub.f32 1.0, %v1787_v30  ;;  %v1598_v61 = vadd.f32 0.2548296, %v1566_v31  ;;  %v3716_v55 = vmul.f32 0.5, %v3532_v1  ;;  %v1941_v41 = vadd.f32 1.0, %v1909_v15 }
 0x26f   : > { %v1564_v13 = vmul.f32 %v3635_v14, %v1532_v50  ;;  %v1314_v45 = vadd.f32 1.0, %v1282_v26  ;;  %v3724_v3 = vand.u32 2147483647, %v3713_v60  ;;  %v1914_v24 = vsel %vm1850_vm5, %v1818_v8, %v1882_v25 }
 0x270   : > { %2725 = vpow2.f32 %v1732_v40  ;;  %v1695_v1 = vmul.f32 %v1663_v43, %v3650_v34  ;;  %v3732_v35 = vmul.f32 0.70710677, %v3720_v20  ;;  %v3737_v36 = vmul.f32 %v1940_v32, %v3485_v10 }
 0x271   : > { %v3726_v27 = vpop.eup %2715  ;;  %v3740_v30 = vmul.f32 0.5, %v3610_v49  ;;  %2727 = vrcp.f32 %v1314_v45  ;;  %v1883_v50 = vsub.f32 0.0, %v1819_v54  ;;  %v1630_v59 = vmul.f32 %v3615_v52, %v1598_v61 }
 0x272   : > { %v3734_v6 = vpop.eup %2717  ;;  %4571 = vst [vmem:[#allocation47_spill] sm:$0xff] %v3737_v36  ;;  %v1375_v31 = vmul.f32 1.0614054, %v3726_v27  ;;  %v1280_v8 = vmul.f32 0.3275911, %v3724_v3  ;;  %v3749_v25 = vmul.f32 %v1941_v41, %v3515_v0  ;;  %v1946_v10 = vadd.f32 1.0, %v1914_v24 }
 0x273   : > { %4570 = vst [vmem:[#allocation46_spill] sm:$0xff] %v3734_v6  ;;  %v3746_v34 = vand.u32 2147483647, %v3732_v35  ;;  %v2720_v15 = vpop.eup %2719  ;;  %v1596_v40 = vadd.f32 0.2548296, %v1564_v13  ;;  %v3754_v45 = vadd.f32 %v3417_v2, %v3520_v53  ;;  %v3760_v51 = vmul.f32 0.5, %v3645_v9 }
 0x274   : > { %4572 = vst [vmem:[#allocation48_spill] sm:$0xff] %v3749_v25  ;;  %v1407_v43 = vadd.f32 -1.4531521, %v1375_v31  ;;  %v1738_v49 = vmul.f32 1.442695, %v1695_v1  ;;  %v1312_v32 = vadd.f32 1.0, %v1280_v8  ;;  %v1915_v13 = vsel %vm1851_vm6, %v1819_v54, %v1883_v50 }
 0x275   : > { %v1283_v26 = vmul.f32 0.3275911, %v3746_v34  ;;  %v1661_v0 = vsub.f32 0.0, %v3674_v22  ;;  %v1666_v41 = vsub.f32 0.0, %v3703_v18  ;;  %v1790_v24 = vmul.f32 %v2720_v15, %v1630_v59 }
 0x276   : > { %v3756_v52 = vpop.eup %2721  ;;  %v1439_v61 = vmul.f32 %v3726_v27, %v1407_v43  ;;  %2729 = vrcp.f32 %v1312_v32  ;;  %v3770_v31 = vmul.f32 %v1946_v10, %v3566_v4  ;;  %v1628_v8 = vmul.f32 %v3635_v14, %v1596_v40 }
 0x277   : > { %v1373_v1 = vmul.f32 1.0614054, %v3756_v52  ;;  %v3767_v53 = vpop.eup %2723  ;;  %v1315_v43 = vadd.f32 1.0, %v1283_v26  ;;  %2731 = vpow2.f32 %v1738_v49  ;;  %v3774_v17 = vmul.f32 0.5, %v3678_v57 }
 0x278   : > { %4573 = vst [vmem:[#allocation49_spill] sm:$0xff] %v3767_v53  ;;  %4574 = vst [vmem:[#allocation50_spill] sm:$0xff] %v3770_v31  ;;  %v1471_v9 = vadd.f32 1.4214138, %v1439_v61  ;;  %v3777_v47 = vmul.f32 0.70710677, %v3754_v45  ;;  %v1693_v59 = vmul.f32 %v1661_v0, %v3674_v22  ;;  %v1698_v4 = vmul.f32 %v1666_v41, %v3703_v18 }
 0x279   : > { %v1405_v6 = vadd.f32 -1.4531521, %v1373_v1  ;;  %v1947_v54 = vadd.f32 1.0, %v1915_v13  ;;  %v1822_v10 = vsub.f32 1.0, %v1790_v24  ;;  %2733 = vrcp.f32 %v1315_v43 }
 0x27a   : > { %v1503_v50 = vmul.f32 %v3726_v27, %v1471_v9  ;;  %v2726_v15 = vpop.eup %2725  ;;  %v3785_v57 = vand.u32 2147483647, %v3777_v47  ;;  %v1664_v26 = vsub.f32 0.0, %v3724_v3  ;;  %v3792_v22 = vadd.f32 %v3552_v16, %v3417_v2 }
 0x27b   : > { %v1437_v14 = vmul.f32 %v3756_v52, %v1405_v6  ;;  %v3787_v40 = vpop.eup %2727  ;;  %v1788_v49 = vmul.f32 %v2726_v15, %v1628_v8  ;;  %v3798_v6 = vadd.f32 %v3417_v2, %v3559_v37  ;;  %v3801_v41 = vmul.f32 %v1947_v54, %v3601_v63 }
 0x27c   : > { %v1535_v32 = vadd.f32 -0.28449672, %v1503_v50  ;;  %v1378_v61 = vmul.f32 1.0614054, %v3787_v40  ;;  %v1281_v0 = vmul.f32 0.3275911, %v3785_v57  ;;  %v1696_v37 = vmul.f32 %v1664_v26, %v3724_v3 }
 0x27d   : > { %v1469_v18 = vadd.f32 1.4214138, %v1437_v14  ;;  %4575 = vst [vmem:[#allocation51_spill] sm:$0xff] %v3801_v41  ;;  %v1734_v13 = vmul.f32 1.442695, %v1693_v59  ;;  %v3804_v24 = vmul.f32 0.5, %v3697_v12 }
 0x27e   : > { %v3807_v1 = vmul.f32 0.70710677, %v3792_v22  ;;  %v1410_v8 = vadd.f32 -1.4531521, %v1378_v61  ;;  %v1744_v9 = vmul.f32 1.442695, %v1698_v4  ;;  %v1567_v12 = vmul.f32 %v3726_v27, %v1535_v32 }
 0x27f   : > { %v1501_v16 = vmul.f32 %v3756_v52, %v1469_v18  ;;  %v1313_v43 = vadd.f32 1.0, %v1281_v0  ;;  %v1886_v50 = vsub.f32 0.0, %v1822_v10  ;;  %v1820_v15 = vsub.f32 1.0, %v1788_v49 }
 0x280   : > { %v3813_v63 = vand.u32 2147483647, %v3807_v1  ;;  %v3815_v54 = vpop.eup %2729  ;;  %v1442_v59 = vmul.f32 %v3787_v40, %v1410_v8  ;;  %v3820_v14 = vmul.f32 0.70710677, %v3798_v6  ;;  %v3825_v61 = vmul.f32 0.5, %v3720_v20 }
 0x281   : > { %2735 = vrcp.f32 %v1313_v43  ;;  %v1533_v4 = vadd.f32 -0.28449672, %v1501_v16  ;;  %v1376_v49 = vmul.f32 1.0614054, %v3815_v54  ;;  %v2732_v3 = vpop.eup %2731  ;;  %v1667_v0 = vsub.f32 0.0, %v3746_v34 }
 0x282   : > { %2737 = vpow2.f32 %v1734_v13  ;;  %v1286_v18 = vmul.f32 0.3275911, %v3813_v63  ;;  %v1474_v26 = vadd.f32 1.4214138, %v1442_v59  ;;  %v3829_v32 = vand.u32 2147483647, %v3820_v14 }
 0x283   : > { %v1918_v8 = vsel %vm1854_vm7, %v1822_v10, %v1886_v50  ;;  %v1884_v43 = vsub.f32 0.0, %v1820_v15  ;;  %v1408_v16 = vadd.f32 -1.4531521, %v1376_v49  ;;  %v3833_v53 = vpop.eup %2733  ;;  %v1599_v41 = vadd.f32 0.2548296, %v1567_v12 }
 0x284   : > { %v1318_v13 = vadd.f32 1.0, %v1286_v18  ;;  %v1506_v31 = vmul.f32 %v3787_v40, %v1474_v26  ;;  %v1740_v59 = vmul.f32 1.442695, %v1696_v37  ;;  %v1284_v20 = vmul.f32 0.3275911, %v3829_v32 }
 0x285   : > { %v1565_v38 = vmul.f32 %v3756_v52, %v1533_v4  ;;  %v1440_v25 = vmul.f32 %v3815_v54, %v1408_v16  ;;  %v1379_v36 = vmul.f32 1.0614054, %v3833_v53  ;;  %v1699_v10 = vmul.f32 %v1667_v0, %v3746_v34 }
 0x286   : > { %2739 = vrcp.f32 %v1318_v13  ;;  %v1538_v42 = vadd.f32 -0.28449672, %v1506_v31  ;;  %v1665_v50 = vsub.f32 0.0, %v3785_v57  ;;  %v1316_v49 = vadd.f32 1.0, %v1284_v20 }
 0x287   : > { %v1950_v18 = vadd.f32 1.0, %v1918_v8  ;;  %2741 = vpow2.f32 %v1744_v9  ;;  %v1472_v12 = vadd.f32 1.4214138, %v1440_v25  ;;  %v1411_v26 = vadd.f32 -1.4531521, %v1379_v36 }
 0x288   : > { %v1916_v37 = vsel %vm1852_vm8, %v1820_v15, %v1884_v43  ;;  %v1631_v4 = vmul.f32 %v3726_v27, %v1599_v41  ;;  %v1570_v16 = vmul.f32 %v3787_v40, %v1538_v42  ;;  %2743 = vpow2.f32 %v1740_v59 }
 0x289   : > { %v1597_v21 = vadd.f32 0.2548296, %v1565_v38  ;;  %v1504_v31 = vmul.f32 %v3815_v54, %v1472_v12  ;;  %v1443_v34 = vmul.f32 %v3833_v53, %v1411_v26  ;;  %2745 = vrcp.f32 %v1316_v49 }
 0x28a   : > { %v1602_v8 = vadd.f32 0.2548296, %v1570_v16  ;;  %v1746_v9 = vmul.f32 1.442695, %v1699_v10  ;;  %v1697_v36 = vmul.f32 %v1665_v50, %v3785_v57  ;;  %v1670_v39 = vsub.f32 0.0, %v3813_v63 }
 0x28b   : > { %v3848_v0 = vpop.eup %2735  ;;  %v1536_v15 = vadd.f32 -0.28449672, %v1504_v31  ;;  %v1475_v27 = vadd.f32 1.4214138, %v1443_v34  ;;  %v3855_v38 = vadd.f32 %v3570_v29, %v3417_v2  ;;  %v3858_v43 = vmul.f32 %v1950_v18, %v3700_v28 }
 0x28c   : > { %v2738_v25 = vpop.eup %2737  ;;  %v1377_v41 = vmul.f32 1.0614054, %v3848_v0  ;;  %v1948_v13 = vadd.f32 1.0, %v1916_v37  ;;  %v1791_v59 = vmul.f32 %v2732_v3, %v1631_v4  ;;  %v3861_v20 = vmul.f32 0.5, %v3754_v45 }
 0x28d   : > { %v1629_v57 = vmul.f32 %v3756_v52, %v1597_v21  ;;  %v1568_v42 = vmul.f32 %v3815_v54, %v1536_v15  ;;  %v1507_v10 = vmul.f32 %v3833_v53, %v1475_v27  ;;  %2747 = vpow2.f32 %v1746_v9 }
 0x28e   : > { %v1409_v50 = vadd.f32 -1.4531521, %v1377_v41  ;;  %v1742_v49 = vmul.f32 1.442695, %v1697_v36  ;;  %v1702_v29 = vmul.f32 %v1670_v39, %v3813_v63  ;;  %v3868_v12 = vmul.f32 0.70710677, %v3855_v38 }
 0x28f   : > { %vm1855_vm9 = vcmp.ge.f32.partialorder %v3629_v62, 0.0  ;;  %v1634_v45 = vmul.f32 %v3787_v40, %v1602_v8  ;;  %v1600_v3 = vadd.f32 0.2548296, %v1568_v42  ;;  %v1539_v21 = vadd.f32 -0.28449672, %v1507_v10 }
 0x290   : > { %v3870_v28 = vpop.eup %2739  ;;  %v1441_v52 = vmul.f32 %v3848_v0, %v1409_v50  ;;  %v3876_v18 = vmul.f32 %v1948_v13, %v3716_v55  ;;  %v1823_v26 = vsub.f32 1.0, %v1791_v59  ;;  %v1255_v63 = vand.u32 2147483647, %v3868_v12 }
 0x291   : > { %v1382_v37 = vmul.f32 1.0614054, %v3870_v28  ;;  %v2742_v4 = vpop.eup %2741  ;;  %v1789_v16 = vmul.f32 %v2738_v25, %v1629_v57  ;;  %v1632_v31 = vmul.f32 %v3815_v54, %v1600_v3  ;;  %v1571_v34 = vmul.f32 %v3833_v53, %v1539_v21 }
 0x292   : > { %v1473_v9 = vadd.f32 1.4214138, %v1441_v52  ;;  %v2744_v40 = vpop.eup %2743  ;;  %2749 = vpow2.f32 %v1742_v49  ;;  %v1752_v36 = vmul.f32 1.442695, %v1702_v29  ;;  %v1287_v39 = vmul.f32 0.3275911, %v1255_v63 }
 0x293   : > { %v1414_v8 = vadd.f32 -1.4531521, %v1382_v37  ;;  %v3882_v15 = vpop.eup %2745  ;;  %v1794_v55 = vmul.f32 %v2742_v4, %v1634_v45  ;;  %v1603_v27 = vadd.f32 0.2548296, %v1571_v34  ;;  %v1668_v13 = vsub.f32 0.0, %v3829_v32 }
 0x294   : > { %v1505_v41 = vmul.f32 %v3848_v0, %v1473_v9  ;;  %v1887_v59 = vsub.f32 0.0, %v1823_v26  ;;  %vm1853_vm10 = vcmp.ge.f32.partialorder %v3663_v11, 0.0  ;;  %v1380_v25 = vmul.f32 1.0614054, %v3882_v15 }
 0x295   : > { %v1446_v54 = vmul.f32 %v3870_v28, %v1414_v8  ;;  %v1319_v57 = vadd.f32 1.0, %v1287_v39  ;;  %v1821_v42 = vsub.f32 1.0, %v1789_v16  ;;  %v1792_v10 = vmul.f32 %v2744_v40, %v1632_v31 }
 0x296   : > { %v1537_v50 = vadd.f32 -0.28449672, %v1505_v41  ;;  %v3891_v49 = vadd.f32 %v3417_v2, %v3575_v19  ;;  %v1635_v29 = vmul.f32 %v3833_v53, %v1603_v27  ;;  %v1412_v3 = vadd.f32 -1.4531521, %v1380_v25 }
 0x297   : > { %v1478_v45 = vadd.f32 1.4214138, %v1446_v54  ;;  %2751 = vrcp.f32 %v1319_v57  ;;  %v1826_v21 = vsub.f32 1.0, %v1794_v55  ;;  %vm1858_vm11 = vcmp.ge.f32.partialorder %v3690_v46, 0.0  ;;  %v2748_v16 = vpop.eup %2747 }
 0x298   : > { %v1569_v52 = vmul.f32 %v3848_v0, %v1537_v50  ;;  %v3897_v37 = vmul.f32 0.5, %v3792_v22  ;;  %v1700_v4 = vmul.f32 %v1668_v13, %v3829_v32  ;;  %v1919_v19 = vsel %vm1855_vm9, %v1823_v26, %v1887_v59 }
 0x299   : > { %v1510_v31 = vmul.f32 %v3870_v28, %v1478_v45  ;;  %2753 = vpow2.f32 %v1752_v36  ;;  %v1444_v53 = vmul.f32 %v3882_v15, %v1412_v3  ;;  %v1885_v34 = vsub.f32 0.0, %v1821_v42 }
 0x29a   : > { %vm1856_vm12 = vcmp.ge.f32.partialorder %v3713_v60, 0.0  ;;  %v1601_v9 = vadd.f32 0.2548296, %v1569_v52  ;;  %v1671_v40 = vsub.f32 0.0, %v1255_v63  ;;  %v3906_v8 = vmul.f32 0.70710677, %v3891_v49 }
 0x29b   : > { %v1824_v22 = vsub.f32 1.0, %v1792_v10  ;;  %v1795_v39 = vmul.f32 %v2748_v16, %v1635_v29  ;;  %v1542_v32 = vadd.f32 -0.28449672, %v1510_v31  ;;  %v1476_v55 = vadd.f32 1.4214138, %v1444_v53 }
 0x29c   : > { %v1951_v27 = vadd.f32 1.0, %v1919_v19  ;;  %v1890_v62 = vsub.f32 0.0, %v1826_v21  ;;  %v1748_v26 = vmul.f32 1.442695, %v1700_v4  ;;  %v1253_v41 = vand.u32 2147483647, %v3906_v8  ;;  %v2750_v36 = vpop.eup %2749 }
 0x29d   : > { %v1633_v13 = vmul.f32 %v3848_v0, %v1601_v9  ;;  %v1574_v59 = vmul.f32 %v3870_v28, %v1542_v32  ;;  %v1508_v54 = vmul.f32 %v3882_v15, %v1476_v55  ;;  %v1134_v25 = vadd.f32 %v3581_v56, %v3417_v2 }
 0x29e   : > { %v1917_v57 = vsel %vm1853_vm10, %v1821_v42, %v1885_v34  ;;  %vm1859_vm13 = vcmp.ge.f32.partialorder %v3732_v35, 0.0  ;;  %v3918_v10 = vmul.f32 0.5, %v3798_v6  ;;  %v1703_v50 = vmul.f32 %v1671_v40, %v1255_v63 }
 0x29f   : > { %v1285_v29 = vmul.f32 0.3275911, %v1253_v41  ;;  %v1888_v45 = vsub.f32 0.0, %v1824_v22  ;;  %v1827_v3 = vsub.f32 1.0, %v1795_v39  ;;  %v1606_v0 = vadd.f32 0.2548296, %v1574_v59 }
 0x2a0   : > { %v1540_v52 = vadd.f32 -0.28449672, %v1508_v54  ;;  %v3921_v4 = vmul.f32 %v1951_v27, %v3740_v30  ;;  %2755 = vpow2.f32 %v1748_v26  ;;  %v3923_v2 = vmul.f32 0.70710677, %v1134_v25  ;;  %v3935_v30 = vld [vmem:[%s4480_s5] ss:$0 sm:$0xff] }
 0x2a1   : > { %v1317_v16 = vadd.f32 1.0, %v1285_v29  ;;  %v3925_v56 = vpop.eup %2751  ;;  %v1949_v11 = vadd.f32 1.0, %v1917_v57  ;;  %v1922_v6 = vsel %vm1858_vm11, %v1826_v21, %v1890_v62  ;;  %v1793_v42 = vmul.f32 %v2750_v36, %v1633_v13 }
 0x2a2   : > { %v1572_v63 = vmul.f32 %v3882_v15, %v1540_v52  ;;  %v1638_v19 = vmul.f32 %v3870_v28, %v1606_v0  ;;  %v1383_v31 = vmul.f32 1.0614054, %v3925_v56  ;;  %v3939_v53 = vadd.f32 %v3935_v30, %v3587_v23 }
 0x2a3   : > { %2757 = vrcp.f32 %v1317_v16  ;;  %v2754_v34 = vpop.eup %2753  ;;  %v1920_v46 = vsel %vm1856_vm12, %v1824_v22, %v1888_v45  ;;  %v1891_v21 = vsub.f32 0.0, %v1827_v3  ;;  %v1754_v9 = vmul.f32 1.442695, %v1703_v50 }
 0x2a4   : > { %v1258_v28 = vand.u32 2147483647, %v3923_v2  ;;  %vm1857_vm14 = vcmp.ge.f32.partialorder %v3777_v47, 0.0  ;;  %v1604_v40 = vadd.f32 0.2548296, %v1572_v63  ;;  %v3946_v39 = vmul.f32 0.5, %v3855_v38 }
 0x2a5   : > { %v1415_v32 = vadd.f32 -1.4531521, %v1383_v31  ;;  %v1669_v55 = vsub.f32 0.0, %v1253_v41  ;;  %v3949_v27 = vmul.f32 %v1949_v11, %v3760_v51  ;;  %v1954_v23 = vadd.f32 1.0, %v1922_v6 }
 0x2a6   : > { %v1825_v62 = vsub.f32 1.0, %v1793_v42  ;;  %v1290_v26 = vmul.f32 0.3275911, %v1258_v28  ;;  %v1952_v60 = vadd.f32 1.0, %v1920_v46  ;;  %v1798_v22 = vmul.f32 %v2754_v34, %v1638_v19 }
 0x2a7   : > { %v1447_v36 = vmul.f32 %v3925_v56, %v1415_v32  ;;  %v3953_v13 = vmul.f32 0.70710677, %v3939_v53  ;;  %v1923_v59 = vsel %vm1859_vm13, %v1827_v3, %v1891_v21  ;;  %2759 = vpow2.f32 %v1754_v9 }
 0x2a8   : > { %v1322_v38 = vadd.f32 1.0, %v1290_v26  ;;  %v1137_v54 = vadd.f32 %v3935_v30, %v3592_v33  ;;  %v1636_v51 = vmul.f32 %v3882_v15, %v1604_v40  ;;  %v1701_v50 = vmul.f32 %v1669_v55, %v1253_v41 }
 0x2a9   : > { %v1479_v57 = vadd.f32 1.4214138, %v1447_v36  ;;  %v1256_v29 = vand.u32 2147483647, %v3953_v13  ;;  %v3962_v45 = vmul.f32 %v1954_v23, %v3774_v17  ;;  %v1889_v0 = vsub.f32 0.0, %v1825_v62 }
 0x2aa   : > { %vm1862_vm15 = vcmp.ge.f32.partialorder %v3807_v1, 0.0  ;;  %v3966_v35 = vmul.f32 0.5, %v3891_v49  ;;  %2761 = vrcp.f32 %v1322_v38  ;;  %v2756_v3 = vpop.eup %2755  ;;  %v1955_v52 = vadd.f32 1.0, %v1923_v59 }
 0x2ab   : > { %v1830_v16 = vsub.f32 1.0, %v1798_v22  ;;  %v1511_v33 = vmul.f32 %v3925_v56, %v1479_v57  ;;  %v1288_v15 = vmul.f32 0.3275911, %v1256_v29  ;;  %v3970_v41 = vmul.f32 %v1952_v60, %v3804_v24 }
 0x2ac   : > { %v3972_v11 = vmul.f32 0.5, %v1134_v25  ;;  %v1674_v17 = vsub.f32 0.0, %v1258_v28  ;;  %v3974_v6 = vmul.f32 0.70710677, %v1137_v54  ;;  %v1796_v63 = vmul.f32 %v2756_v3, %v1636_v51 }
 0x2ad   : > { %v3976_v42 = vpop.eup %2757  ;;  %v1543_v49 = vadd.f32 -0.28449672, %v1511_v33  ;;  %v1750_v19 = vmul.f32 1.442695, %v1701_v50  ;;  %v1320_v31 = vadd.f32 1.0, %v1288_v15  ;;  %v1921_v34 = vsel %vm1857_vm14, %v1825_v62, %v1889_v0 }
 0x2ae   : > { %v1381_v46 = vmul.f32 1.0614054, %v3976_v42  ;;  %v1259_v21 = vand.u32 2147483647, %v3974_v6  ;;  %v3984_v24 = vadd.f32 %v3935_v30, %v3595_v48  ;;  %v3987_v25 = vmul.f32 %v1955_v52, %v3825_v61 }
 0x2af   : > { %v1894_v9 = vsub.f32 0.0, %v1830_v16  ;;  %v1575_v40 = vmul.f32 %v3925_v56, %v1543_v49  ;;  %2763 = vrcp.f32 %v1320_v31  ;;  %vm1860_vm1 = vcmp.ge.f32.partialorder %v3820_v14, 0.0 }
 0x2b0   : > { %v1413_v32 = vadd.f32 -1.4531521, %v1381_v46  ;;  %v1706_v47 = vmul.f32 %v1674_v17, %v1258_v28  ;;  %v1291_v55 = vmul.f32 0.3275911, %v1259_v21  ;;  %v3993_v23 = vadd.f32 %v3935_v30, %v3613_v58 }
 0x2b1   : > { %v1953_v62 = vadd.f32 1.0, %v1921_v34  ;;  %v1828_v26 = vsub.f32 1.0, %v1796_v63  ;;  %v1607_v48 = vadd.f32 0.2548296, %v1575_v40  ;;  %2765 = vpow2.f32 %v1750_v19  ;;  %v2760_v60 = vpop.eup %2759 }
 0x2b2   : > { %v1445_v61 = vmul.f32 %v3976_v42, %v1413_v32  ;;  %v3997_v22 = vmul.f32 0.5, %v3939_v53  ;;  %v1323_v36 = vadd.f32 1.0, %v1291_v55  ;;  %v4000_v59 = vmul.f32 0.70710677, %v3984_v24 }
 0x2b3   : > { %v1926_v28 = vsel %vm1862_vm15, %v1830_v16, %v1894_v9  ;;  %v1639_v58 = vmul.f32 %v3925_v56, %v1607_v48  ;;  %v1672_v38 = vsub.f32 0.0, %v1256_v29  ;;  %v4006_v51 = vmul.f32 0.70710677, %v3993_v23 }
 0x2b4   : > { %v4008_v57 = vpop.eup %2761  ;;  %v1477_v50 = vadd.f32 1.4214138, %v1445_v61  ;;  %v1760_v0 = vmul.f32 1.442695, %v1706_v47  ;;  %2767 = vrcp.f32 %v1323_v36  ;;  %v1257_v53 = vand.u32 2147483647, %v4000_v59 }
 0x2b5   : > { %v4012_v3 = vmul.f32 %v1953_v62, %v3861_v20  ;;  %v1892_v52 = vsub.f32 0.0, %v1828_v26  ;;  %v1386_v1 = vmul.f32 1.0614054, %v4008_v57  ;;  %v1262_v16 = vand.u32 2147483647, %v4006_v51 }
 0x2b6   : > { %v1799_v56 = vmul.f32 %v2760_v60, %v1639_v58  ;;  %v1509_v33 = vmul.f32 %v3976_v42, %v1477_v50  ;;  %v4017_v15 = vmul.f32 0.5, %v1137_v54  ;;  %v1289_v17 = vmul.f32 0.3275911, %v1257_v53 }
 0x2b7   : > { %v1958_v63 = vadd.f32 1.0, %v1926_v28  ;;  %v1418_v49 = vadd.f32 -1.4531521, %v1386_v1  ;;  %v1704_v19 = vmul.f32 %v1672_v38, %v1256_v29  ;;  %v1294_v31 = vmul.f32 0.3275911, %v1262_v16 }
 0x2b8   : > { %v1541_v34 = vadd.f32 -0.28449672, %v1509_v33  ;;  %2769 = vpow2.f32 %v1760_v0  ;;  %v1675_v46 = vsub.f32 0.0, %v1259_v21  ;;  %v1321_v20 = vadd.f32 1.0, %v1289_v17 }
 0x2b9   : > { %v4019_v9 = vpop.eup %2763  ;;  %v1924_v40 = vsel %vm1860_vm1, %v1828_v26, %v1892_v52  ;;  %vm1863_vm2 = vcmp.ge.f32.partialorder %v3868_v12, 0.0  ;;  %v1450_v32 = vmul.f32 %v4008_v57, %v1418_v49  ;;  %v1326_v54 = vadd.f32 1.0, %v1294_v31 }
 0x2ba   : > { %v4027_v47 = vadd.f32 %v3935_v30, %v3617_v44  ;;  %v1831_v29 = vsub.f32 1.0, %v1799_v56  ;;  %v1573_v55 = vmul.f32 %v3976_v42, %v1541_v34  ;;  %v1384_v62 = vmul.f32 1.0614054, %v4019_v9 }
 0x2bb   : > { %2771 = vrcp.f32 %v1321_v20  ;;  %v2766_v48 = vpop.eup %2765  ;;  %v4032_v60 = vmul.f32 %v1958_v63, %v3897_v37  ;;  %v1482_v14 = vadd.f32 1.4214138, %v1450_v32  ;;  %v1756_v26 = vmul.f32 1.442695, %v1704_v19 }
 0x2bc   : > { %2773 = vrcp.f32 %v1326_v54  ;;  %v1605_v61 = vadd.f32 0.2548296, %v1573_v55  ;;  %v1416_v36 = vadd.f32 -1.4531521, %v1384_v62  ;;  %v1707_v28 = vmul.f32 %v1675_v46, %v1259_v21 }
 0x2bd   : > { %v1673_v58 = vsub.f32 0.0, %v1257_v53  ;;  %v1956_v38 = vadd.f32 1.0, %v1924_v40  ;;  %v1514_v44 = vmul.f32 %v4008_v57, %v1482_v14  ;;  %v4036_v50 = vmul.f32 0.5, %v3984_v24 }
 0x2be   : > { %v4039_v0 = vmul.f32 0.70710677, %v4027_v47  ;;  %v4041_v52 = vpop.eup %2767  ;;  %v1895_v37 = vsub.f32 0.0, %v1831_v29  ;;  %v1448_v1 = vmul.f32 %v4019_v9, %v1416_v36  ;;  %v1678_v56 = vsub.f32 0.0, %v1262_v16 }
 0x2bf   : > { %v4046_v33 = vadd.f32 %v3935_v30, %v3623_v5  ;;  %v1637_v21 = vmul.f32 %v3976_v42, %v1605_v61  ;;  %v1546_v17 = vadd.f32 -0.28449672, %v1514_v44  ;;  %v1387_v63 = vmul.f32 1.0614054, %v4041_v52 }
 0x2c0   : > { %v4051_v24 = vand.u32 2147483647, %v4039_v0  ;;  %v1480_v49 = vadd.f32 1.4214138, %v1448_v1  ;;  %2775 = vpow2.f32 %v1756_v26  ;;  %v1762_v19 = vmul.f32 1.442695, %v1707_v28 }
 0x2c1   : > { %v1705_v31 = vmul.f32 %v1673_v58, %v1257_v53  ;;  %v1578_v34 = vmul.f32 %v4008_v57, %v1546_v17  ;;  %v1419_v46 = vadd.f32 -1.4531521, %v1387_v63  ;;  %v4055_v20 = vmul.f32 0.5, %v3993_v23 }
 0x2c2   : > { %v1292_v5 = vmul.f32 0.3275911, %v4051_v24  ;;  %v2770_v40 = vpop.eup %2769  ;;  %v1927_v42 = vsel %vm1863_vm2, %v1831_v29, %v1895_v37  ;;  %v1512_v32 = vmul.f32 %v4019_v9, %v1480_v49  ;;  %v1710_v54 = vmul.f32 %v1678_v56, %v1262_v16 }
 0x2c3   : > { %v4062_v55 = vmul.f32 0.70710677, %v4046_v33  ;;  %v1797_v62 = vmul.f32 %v2766_v48, %v1637_v21  ;;  %v1610_v53 = vadd.f32 0.2548296, %v1578_v34  ;;  %v1451_v14 = vmul.f32 %v4041_v52, %v1419_v46 }
 0x2c4   : > { %v1324_v26 = vadd.f32 1.0, %v1292_v5  ;;  %v1544_v23 = vadd.f32 -0.28449672, %v1512_v32  ;;  %2777 = vpow2.f32 %v1762_v19  ;;  %v1758_v36 = vmul.f32 1.442695, %v1705_v31 }
 0x2c5   : > { %v4065_v61 = vpop.eup %2771  ;;  %v4068_v28 = vand.u32 2147483647, %v4062_v55  ;;  %v1642_v16 = vmul.f32 %v4008_v57, %v1610_v53  ;;  %v1483_v29 = vadd.f32 1.4214138, %v1451_v14  ;;  %v1959_v48 = vadd.f32 1.0, %v1927_v42 }
 0x2c6   : > { %v4070_v12 = vpop.eup %2773  ;;  %v1385_v58 = vmul.f32 1.0614054, %v4065_v61  ;;  %2779 = vrcp.f32 %v1324_v26  ;;  %v1576_v44 = vmul.f32 %v4019_v9, %v1544_v23  ;;  %v1768_v1 = vmul.f32 1.442695, %v1710_v54 }
 0x2c7   : > { %v1390_v37 = vmul.f32 1.0614054, %v4070_v12  ;;  %v1829_v56 = vsub.f32 1.0, %v1797_v62  ;;  %vm1861_vm3 = vcmp.ge.f32.partialorder %v3906_v8, 0.0  ;;  %v1802_v21 = vmul.f32 %v2770_v40, %v1642_v16 }
 0x2c8   : > { %v1515_v17 = vmul.f32 %v4041_v52, %v1483_v29  ;;  %v1417_v63 = vadd.f32 -1.4531521, %v1385_v58  ;;  %v4079_v49 = vmul.f32 %v1956_v38, %v3918_v10  ;;  %v1608_v57 = vadd.f32 0.2548296, %v1576_v44 }
 0x2c9   : > { %v1422_v19 = vadd.f32 -1.4531521, %v1390_v37  ;;  %v1295_v31 = vmul.f32 0.3275911, %v4068_v28  ;;  %2781 = vpow2.f32 %v1758_v36  ;;  %v4085_v5 = vadd.f32 %v3935_v30, %v3631_v7 }
 0x2ca   : > { %v1547_v34 = vadd.f32 -0.28449672, %v1515_v17  ;;  %v1449_v46 = vmul.f32 %v4065_v61, %v1417_v63  ;;  %v2776_v42 = vpop.eup %2775  ;;  %vm1866_vm4 = vcmp.ge.f32.partialorder %v3923_v2, 0.0  ;;  %v1640_v40 = vmul.f32 %v4019_v9, %v1608_v57 }
 0x2cb   : > { %v1454_v10 = vmul.f32 %v4070_v12, %v1422_v19  ;;  %v1676_v38 = vsub.f32 0.0, %v4051_v24  ;;  %v1327_v32 = vadd.f32 1.0, %v1295_v31  ;;  %v1834_v54 = vsub.f32 1.0, %v1802_v21 }
 0x2cc   : > { %v1579_v62 = vmul.f32 %v4041_v52, %v1547_v34  ;;  %v1481_v53 = vadd.f32 1.4214138, %v1449_v46  ;;  %2783 = vpow2.f32 %v1768_v1  ;;  %v1893_v14 = vsub.f32 0.0, %v1829_v56 }
 0x2cd   : > { %v1486_v26 = vadd.f32 1.4214138, %v1454_v10  ;;  %v4093_v7 = vmul.f32 0.5, %v4027_v47  ;;  %2785 = vrcp.f32 %v1327_v32  ;;  %v1800_v23 = vmul.f32 %v2776_v42, %v1640_v40 }
 0x2ce   : > { %v1611_v36 = vadd.f32 0.2548296, %v1579_v62  ;;  %v1513_v9 = vmul.f32 %v4065_v61, %v1481_v53  ;;  %v4097_v16 = vmul.f32 0.70710677, %v4085_v5  ;;  %v2778_v29 = vpop.eup %2777  ;;  %v4100_v58 = vmul.f32 %v1959_v48, %v3946_v39 }
 0x2cf   : > { %v1518_v44 = vmul.f32 %v4070_v12, %v1486_v26  ;;  %v1708_v37 = vmul.f32 %v1676_v38, %v4051_v24  ;;  %v1679_v1 = vsub.f32 0.0, %v4068_v28  ;;  %v1898_v21 = vsub.f32 0.0, %v1834_v54 }
 0x2d0   : > { %v4105_v47 = vpop.eup %2779  ;;  %v1643_v17 = vmul.f32 %v4041_v52, %v1611_v36  ;;  %v1545_v63 = vadd.f32 -0.28449672, %v1513_v9  ;;  %v1261_v57 = vand.u32 2147483647, %v4097_v16  ;;  %v1925_v19 = vsel %vm1861_vm3, %v1829_v56, %v1893_v14 }
 0x2d1   : > { %vm1864_vm5 = vcmp.ge.f32.partialorder %v3953_v13, 0.0  ;;  %v1550_v39 = vadd.f32 -0.28449672, %v1518_v44  ;;  %v1388_v48 = vmul.f32 1.0614054, %v4105_v47  ;;  %v4114_v24 = vmul.f32 0.5, %v4046_v33 }
 0x2d2   : > { %v1832_v31 = vsub.f32 1.0, %v1800_v23  ;;  %v1803_v34 = vmul.f32 %v2778_v29, %v1643_v17  ;;  %vm1867_vm6 = vcmp.ge.f32.partialorder %v3974_v6, 0.0  ;;  %v1577_v52 = vmul.f32 %v4065_v61, %v1545_v63  ;;  %v4576_v23 = vld [vmem:[#allocation40_spill] sm:$0xff]  ;;  %v4579_v6 = vld [vmem:[#allocation41_spill] sm:$0xff] }
 0x2d3   : > { %v1293_v46 = vmul.f32 0.3275911, %v1261_v57  ;;  %v1582_v42 = vmul.f32 %v4070_v12, %v1550_v39  ;;  %v1420_v40 = vadd.f32 -1.4531521, %v1388_v48  ;;  %v1764_v8 = vmul.f32 1.442695, %v1708_v37  ;;  %v2782_v10 = vpop.eup %2781 }
 0x2d4   : > { %v1711_v56 = vmul.f32 %v1679_v1, %v4068_v28  ;;  %v1930_v38 = vsel %vm1866_vm4, %v1834_v54, %v1898_v21  ;;  %v1835_v32 = vsub.f32 1.0, %v1803_v34  ;;  %v1609_v33 = vadd.f32 0.2548296, %v1577_v52 }
 0x2d5   : > { %v1325_v62 = vadd.f32 1.0, %v1293_v46  ;;  %v1614_v53 = vadd.f32 0.2548296, %v1582_v42  ;;  %v1452_v14 = vmul.f32 %v4105_v47, %v1420_v40  ;;  %v1677_v26 = vsub.f32 0.0, %v1261_v57 }
 0x2d6   : > { %v4125_v36 = vadd.f32 %v3935_v30, %v4576_v23  ;;  %v2784_v9 = vpop.eup %2783  ;;  %v1957_v29 = vadd.f32 1.0, %v1925_v19  ;;  %v1896_v44 = vsub.f32 0.0, %v1832_v31  ;;  %v1641_v28 = vmul.f32 %v4065_v61, %v1609_v33  ;;  %v4578_v33 = vld [vmem:[#allocation48_spill] sm:$0xff] }
 0x2d7   : > { %2787 = vrcp.f32 %v1325_v62  ;;  %v4128_v37 = vpop.eup %2785  ;;  %v1899_v2 = vsub.f32 0.0, %v1835_v32  ;;  %v1646_v54 = vmul.f32 %v4070_v12, %v1614_v53  ;;  %v1484_v1 = vadd.f32 1.4214138, %v1452_v14 }
 0x2d8   : > { %2789 = vpow2.f32 %v1764_v8  ;;  %v1962_v21 = vadd.f32 1.0, %v1930_v38  ;;  %v1801_v17 = vmul.f32 %v2782_v10, %v1641_v28  ;;  %v1391_v63 = vmul.f32 1.0614054, %v4128_v37  ;;  %v4577_v38 = vld [vmem:[#allocation47_spill] sm:$0xff]  ;;  %v4581_v28 = vld [vmem:[#allocation38_spill] sm:$0xff] }
 0x2d9   : > { %v4133_v39 = vmul.f32 0.70710677, %v4125_v36  ;;  %vm1865_vm7 = vcmp.ge.f32.partialorder %v4000_v59, 0.0  ;;  %v1806_v19 = vmul.f32 %v2784_v9, %v1646_v54  ;;  %v1516_v61 = vmul.f32 %v4105_v47, %v1484_v1 }
 0x2da   : > { %v1770_v48 = vmul.f32 1.442695, %v1711_v56  ;;  %v1709_v34 = vmul.f32 %v1677_v26, %v1261_v57  ;;  %v1928_v52 = vsel %vm1864_vm5, %v1832_v31, %v1896_v44  ;;  %v1833_v12 = vsub.f32 1.0, %v1801_v17 }
 0x2db   : > { %vm1870_vm8 = vcmp.ge.f32.partialorder %v4006_v51, 0.0  ;;  %v1423_v46 = vadd.f32 -1.4531521, %v1391_v63  ;;  %v1266_v42 = vand.u32 2147483647, %v4133_v39  ;;  %v1931_v40 = vsel %vm1867_vm6, %v1835_v32, %v1899_v2 }
 0x2dc   : > { %v1838_v8 = vsub.f32 1.0, %v1806_v19  ;;  %v1548_v10 = vadd.f32 -0.28449672, %v1516_v61  ;;  %v2004_v62 = vpack.c.bf16 %v4578_v33, %v4577_v38  ;;  %v4146_v56 = vmul.f32 %v1957_v29, %v3966_v35  ;;  %v4580_v29 = vld [vmem:[#allocation39_spill] sm:$0xff] }
 0x2dd   : > { %v1455_v13 = vmul.f32 %v4128_v37, %v1423_v46  ;;  %v4150_v57 = vmul.f32 0.5, %v4085_v5  ;;  %v1298_v31 = vmul.f32 0.3275911, %v1266_v42  ;;  %v1960_v53 = vadd.f32 1.0, %v1928_v52  ;;  %v4583_v61 = vld [vmem:[#allocation43_spill] sm:$0xff] }
 0x2de   : > { %v1580_v14 = vmul.f32 %v4105_v47, %v1548_v10  ;;  %v1766_v26 = vmul.f32 1.442695, %v1709_v34  ;;  %2553 = vmatprep.mubr.bf16.mxu0 %v2004_v62  ;;  %v4155_v32 = vadd.f32 %v3935_v30, %v4579_v6  ;;  %v1963_v23 = vadd.f32 1.0, %v1931_v40 }
 0x2df   : > { %v1897_v9 = vsub.f32 0.0, %v1833_v12  ;;  %v1487_v44 = vadd.f32 1.4214138, %v1455_v13  ;;  %v1330_v35 = vadd.f32 1.0, %v1298_v31  ;;  %v4582_v2 = vpack.c.bf16 %v4580_v29, %v4581_v28 }
 0x2e0   : > { %v4161_v5 = vmul.f32 %v1962_v21, %v3972_v11  ;;  %v1902_v54 = vsub.f32 0.0, %v1838_v8  ;;  %v1612_v1 = vadd.f32 0.2548296, %v1580_v14  ;;  %2791 = vpow2.f32 %v1770_v48 }
 0x2e1   : > { %2554 = vmatmul.mubr.bf16.vlgmr.msra.gmra.mrb[32].mxu0 %v4582_v2  ;;  %v4163_v17 = vpop.eup %2787  ;;  %vm1868_vm9 = vcmp.ge.f32.partialorder %v4039_v0, 0.0  ;;  %v1519_v63 = vmul.f32 %v4128_v37, %v1487_v44  ;;  %2793 = vrcp.f32 %v1330_v35  ;;  %v1682_v19 = vsub.f32 0.0, %v1266_v42 }
 0x2e2   : > { %v4169_v34 = vadd.f32 %v3935_v30, %v4583_v61  ;;  %v2790_v52 = vpop.eup %2789  ;;  %v4172_v46 = vmul.f32 %v1960_v53, %v3997_v22  ;;  %v1644_v11 = vmul.f32 %v4105_v47, %v1612_v1  ;;  %v1389_v21 = vmul.f32 1.0614054, %v4163_v17 }
 0x2e3   : > { %v4177_v48 = vmul.f32 0.70710677, %v4155_v32  ;;  %v4180_v40 = vmul.f32 %v1963_v23, %v4017_v15  ;;  %v1929_v10 = vsel %vm1865_vm7, %v1833_v12, %v1897_v9  ;;  %v1551_v38 = vadd.f32 -0.28449672, %v1519_v63  ;;  %v4584_v15 = vld [vmem:[#allocation44_spill] sm:$0xff] }
 0x2e4   : > { %2795 = vpow2.f32 %v1766_v26  ;;  %v1934_v33 = vsel %vm1870_vm8, %v1838_v8, %v1902_v54  ;;  %v1804_v22 = vmul.f32 %v2790_v52, %v1644_v11  ;;  %v1421_v62 = vadd.f32 -1.4531521, %v1389_v21 }
 0x2e5   : > { %v1264_v47 = vand.u32 2147483647, %v4177_v48  ;;  %v1583_v13 = vmul.f32 %v4128_v37, %v1551_v38  ;;  %v1714_v31 = vmul.f32 %v1682_v19, %v1266_v42  ;;  %v4189_v53 = vmul.f32 0.70710677, %v4169_v34 }
 0x2e6   : > { %v4193_v14 = vadd.f32 %v3935_v30, %v4584_v15  ;;  %v1836_v59 = vsub.f32 1.0, %v1804_v22  ;;  %v1453_v12 = vmul.f32 %v4163_v17, %v1421_v62  ;;  %v1961_v8 = vadd.f32 1.0, %v1929_v10 }
 0x2e7   : > { %v1296_v26 = vmul.f32 0.3275911, %v1264_v47  ;;  %v1680_v51 = vsub.f32 0.0, %v1264_v47  ;;  %v1966_v6 = vadd.f32 1.0, %v1934_v33  ;;  %v1615_v23 = vadd.f32 0.2548296, %v1583_v13 }
 0x2e8   : > { %v1267_v9 = vand.u32 2147483647, %v4189_v53  ;;  %v1900_v44 = vsub.f32 0.0, %v1836_v59  ;;  %vm1871_vm10 = vcmp.ge.f32.partialorder %v4062_v55, 0.0  ;;  %v1485_v42 = vadd.f32 1.4214138, %v1453_v12 }
 0x2e9   : > { %v1328_v35 = vadd.f32 1.0, %v1296_v26  ;;  %v1712_v29 = vmul.f32 %v1680_v51, %v1264_v47  ;;  %v1647_v28 = vmul.f32 %v4128_v37, %v1615_v23  ;;  %v1776_v30 = vmul.f32 1.442695, %v1714_v31  ;;  %v4585_v31 = vld [vmem:[#allocation42_spill] sm:$0xff] }
 0x2ea   : > { %v1299_v2 = vmul.f32 0.3275911, %v1267_v9  ;;  %v4200_v54 = vmul.f32 0.70710677, %v4193_v14  ;;  %v2792_v1 = vpop.eup %2791  ;;  %v1932_v63 = vsel %vm1868_vm9, %v1836_v59, %v1900_v44  ;;  %v1517_v19 = vmul.f32 %v4163_v17, %v1485_v42 }
 0x2eb   : > { %2797 = vrcp.f32 %v1328_v35  ;;  %v1683_v61 = vsub.f32 0.0, %v1267_v9  ;;  %v4205_v52 = vpop.eup %2793  ;;  %v1964_v11 = vadd.f32 1.0, %v1932_v63  ;;  %v1807_v21 = vmul.f32 %v2792_v1, %v1647_v28 }
 0x2ec   : > { %v1772_v10 = vmul.f32 1.442695, %v1712_v29  ;;  %v1331_v38 = vadd.f32 1.0, %v1299_v2  ;;  %v4208_v37 = vmul.f32 %v1961_v8, %v4036_v50  ;;  %v1549_v33 = vadd.f32 -0.28449672, %v1517_v19  ;;  %v4586_v8 = vld [vmem:[#allocation46_spill] sm:$0xff] }
 0x2ed   : > { %v1394_v22 = vmul.f32 1.0614054, %v4205_v52  ;;  %v4212_v62 = vand.u32 2147483647, %v4200_v54  ;;  %v4215_v47 = vmul.f32 %v1966_v6, %v4055_v20  ;;  %v1839_v13 = vsub.f32 1.0, %v1807_v21  ;;  %v4588_v2 = vld [vmem:[#allocation51_spill] sm:$0xff] }
 0x2ee   : > { %v2796_v0 = vpop.eup %2795  ;;  %2799 = vrcp.f32 %v1331_v38  ;;  %v1368_v15 = vmul.f32 1.0614054, %v4585_v31  ;;  %v1581_v59 = vmul.f32 %v4163_v17, %v1549_v33  ;;  %v1715_v51 = vmul.f32 %v1683_v61, %v1267_v9 }
 0x2ef   : > { %v1426_v12 = vadd.f32 -1.4531521, %v1394_v22  ;;  %2801 = vpow2.f32 %v1776_v30  ;;  %v1297_v50 = vmul.f32 0.3275911, %v4212_v62  ;;  %v1903_v26 = vsub.f32 0.0, %v1839_v13  ;;  %v4587_v30 = vld [vmem:[#allocation50_spill] sm:$0xff] }
 0x2f0   : > { %2803 = vpow2.f32 %v1772_v10  ;;  %v1369_v23 = vmul.f32 1.0614054, %v4586_v8  ;;  %v4222_v44 = vmul.f32 %v1964_v11, %v4093_v7  ;;  %v1613_v20 = vadd.f32 0.2548296, %v1581_v59 }
 0x2f1   : > { %v1458_v6 = vmul.f32 %v4205_v52, %v1426_v12  ;;  %v1329_v42 = vadd.f32 1.0, %v1297_v50  ;;  %v1935_v35 = vsel %vm1871_vm10, %v1839_v13, %v1903_v26  ;;  %vm1869_vm11 = vcmp.ge.f32.partialorder %v4097_v16, 0.0 }
 0x2f2   : > { %v1400_v29 = vadd.f32 -1.4531521, %v1368_v15  ;;  %v1401_v28 = vadd.f32 -1.4531521, %v1369_v23  ;;  %v2007_v1 = vpack.c.bf16 %v4588_v2, %v4587_v30  ;;  %v1967_v9 = vadd.f32 1.0, %v1935_v35 }
 0x2f3   : > { %v1645_v63 = vmul.f32 %v4163_v17, %v1613_v20  ;;  %v1490_v19 = vadd.f32 1.4214138, %v1458_v6  ;;  %2805 = vrcp.f32 %v1329_v42  ;;  %v1778_v7 = vmul.f32 1.442695, %v1715_v51 }
 0x2f4   : > { %v1432_v61 = vmul.f32 %v4585_v31, %v1400_v29  ;;  %v1433_v11 = vmul.f32 %v4586_v8, %v1401_v28  ;;  %v2008_v55 = vpack.c.bf16 %v3949_v27, %v3876_v18  ;;  %v1681_v33 = vsub.f32 0.0, %v4212_v62 }
 0x2f5   : > { %v4235_v21 = vpop.eup %2797  ;;  %v1805_v10 = vmul.f32 %v2796_v0, %v1645_v63  ;;  %v1522_v38 = vmul.f32 %v4205_v52, %v1490_v19  ;;  %v2009_v17 = vpack.c.bf16 %v3921_v4, %v3858_v43  ;;  %v4242_v22 = vmul.f32 %v1967_v9, %v4114_v24 }
 0x2f6   : > { %v1392_v13 = vmul.f32 1.0614054, %v4235_v21  ;;  %v1464_v15 = vadd.f32 1.4214138, %v1432_v61  ;;  %v1465_v59 = vadd.f32 1.4214138, %v1433_v11  ;;  %v2010_v26 = vpack.c.bf16 %v4012_v3, %v3970_v41 }
 0x2f7   : > { %v1837_v12 = vsub.f32 1.0, %v1805_v10  ;;  %v1554_v50 = vadd.f32 -0.28449672, %v1522_v38  ;;  %v1713_v10 = vmul.f32 %v1681_v33, %v4212_v62  ;;  %2807 = vpow2.f32 %v1778_v7  ;;  %v4336_v3 = vld [vmem:[%s4482_s7] ss:$0 sm:$0xff] }
 0x2f8   : > { %v4249_v51 = vpop.eup %2799  ;;  %v1424_v23 = vadd.f32 -1.4531521, %v1392_v13  ;;  %v1496_v20 = vmul.f32 %v4585_v31, %v1464_v15  ;;  %v1497_v24 = vmul.f32 %v4586_v8, %v1465_v59  ;;  %vm1874_vm14 = vcmp.ge.f32.partialorder %v4133_v39, 0.0 }
 0x2f9   : > { %v2802_v42 = vpop.eup %2801  ;;  %v1901_v35 = vsub.f32 0.0, %v1837_v12  ;;  %v1586_v29 = vmul.f32 %v4205_v52, %v1554_v50  ;;  %v1395_v28 = vmul.f32 1.0614054, %v4249_v51  ;;  %vm1875_vm15 = vcmp.ge.f32.partialorder %v4189_v53, 0.0 }
 0x2fa   : > { %v2804_v63 = vpop.eup %2803  ;;  %v1456_v19 = vmul.f32 %v4235_v21, %v1424_v23  ;;  %v1528_v61 = vadd.f32 -0.28449672, %v1496_v20  ;;  %v1529_v11 = vadd.f32 -0.28449672, %v1497_v24  ;;  %vm1872_vm1 = vcmp.ge.f32.partialorder %v4177_v48, 0.0 }
 0x2fb   : > { %v1933_v38 = vsel %vm1869_vm11, %v1837_v12, %v1901_v35  ;;  %v1618_v13 = vadd.f32 0.2548296, %v1586_v29  ;;  %v1427_v15 = vadd.f32 -1.4531521, %v1395_v28  ;;  %vm1873_vm2 = vcmp.ge.f32.partialorder %v4200_v54, 0.0  ;;  %v4604_v54 = vld [vmem:[#allocation5_spill] sm:$0xff] }
 0x2fc   : > { %v1965_v50 = vadd.f32 1.0, %v1933_v38  ;;  %v1488_v6 = vadd.f32 1.4214138, %v1456_v19  ;;  %v1560_v9 = vmul.f32 %v4585_v31, %v1528_v61  ;;  %v1561_v0 = vmul.f32 %v4586_v8, %v1529_v11 }
 0x2fd   : > { %v2806_v23 = vpop.eup %2805  ;;  %v1650_v20 = vmul.f32 %v4205_v52, %v1618_v13  ;;  %v1459_v24 = vmul.f32 %v4249_v51, %v1427_v15  ;;  %v1774_v15 = vmul.f32 1.442695, %v1713_v10  ;;  %v1200_v30 = vmul.f32 0.5, %v4155_v32 }
 0x2fe   : > { %v4274_v12 = vmul.f32 %v1965_v50, %v4150_v57  ;;  %v1520_v35 = vmul.f32 %v4235_v21, %v1488_v6  ;;  %v1393_v29 = vmul.f32 1.0614054, %v2806_v23  ;;  %v1592_v28 = vadd.f32 0.2548296, %v1560_v9  ;;  %v4589_v9 = vld [vmem:[#allocation45_spill] sm:$0xff] }
 0x2ff   : > { %v1491_v19 = vadd.f32 1.4214138, %v1459_v24  ;;  %v1593_v61 = vadd.f32 0.2548296, %v1561_v0  ;;  %v1810_v33 = vmul.f32 %v2802_v42, %v1650_v20  ;;  %v4590_v0 = vld [vmem:[#allocation49_spill] sm:$0xff]  ;;  %2809 = vpow2.f32 %v1774_v15 }
 0x300   : > { %v1552_v11 = vadd.f32 -0.28449672, %v1520_v35  ;;  %v1425_v38 = vadd.f32 -1.4531521, %v1393_v29  ;;  %v1624_v52 = vmul.f32 %v4585_v31, %v1592_v28  ;;  %v1201_v2 = vmul.f32 0.5, %v4193_v14 }
 0x301   : > { %v1523_v13 = vmul.f32 %v4249_v51, %v1491_v19  ;;  %v1625_v57 = vmul.f32 %v4586_v8, %v1593_v61  ;;  %v1842_v28 = vsub.f32 1.0, %v1810_v33  ;;  %v4591_v19 = vld [vmem:[#allocation34_spill] sm:$0xff]  ;;  %v2808_v33 = vpop.eup %2807  ;;  %v4595_v27 = vpack.c.bf16 %v3987_v25, %v3962_v45 }
 0x302   : > { %v1584_v6 = vmul.f32 %v4235_v21, %v1552_v11  ;;  %v1457_v50 = vmul.f32 %v2806_v23, %v1425_v38  ;;  %v1784_v24 = vmul.f32 %v4589_v9, %v1624_v52  ;;  %v1176_v61 = vmul.f32 0.5, %v4591_v19  ;;  %v4592_v11 = vld [vmem:[#allocation35_spill] sm:$0xff] }
 0x303   : > { %v1555_v7 = vadd.f32 -0.28449672, %v1523_v13  ;;  %v1785_v35 = vmul.f32 %v4590_v0, %v1625_v57  ;;  %vm1848_vm12 = vcmp.ge.f32.partialorder %v4592_v11, 0.0  ;;  %v4593_v13 = vld [vmem:[#allocation37_spill] sm:$0xff]  ;;  %v1906_v9 = vsub.f32 0.0, %v1842_v28 }
 0x304   : > { %v1616_v29 = vadd.f32 0.2548296, %v1584_v6  ;;  %v1489_v16 = vadd.f32 1.4214138, %v1457_v50  ;;  %v1816_v31 = vsub.f32 1.0, %v1784_v24  ;;  %vm1849_vm13 = vcmp.ge.f32.partialorder %v4593_v13, 0.0 }
 0x305   : > { %v1587_v62 = vmul.f32 %v4249_v51, %v1555_v7  ;;  %v1817_v42 = vsub.f32 1.0, %v1785_v35  ;;  %v4596_v32 = vpack.c.bf16 %v4146_v56, %v4079_v49  ;;  %v4597_v14 = vpack.c.bf16 %v4100_v58, %v4032_v60  ;;  %v4602_v60 = vld [vmem:[#allocation3_spill] sm:$0xff]  ;;  %v4603_v56 = vld [vmem:[#allocation2_spill] sm:$0xff] }
 0x306   : > { %v1648_v10 = vmul.f32 %v4235_v21, %v1616_v29  ;;  %v1521_v20 = vmul.f32 %v2806_v23, %v1489_v16  ;;  %v1880_v8 = vsub.f32 0.0, %v1816_v31  ;;  %v4594_v21 = vld [vmem:[#allocation36_spill] sm:$0xff]  ;;  %v4598_v43 = vpack.c.bf16 %v4208_v37, %v4172_v46 }
 0x307   : > { %v1619_v38 = vadd.f32 0.2548296, %v1587_v62  ;;  %v1881_v52 = vsub.f32 0.0, %v1817_v42  ;;  %v1177_v16 = vmul.f32 0.5, %v4594_v21  ;;  %v4599_v4 = vpack.c.bf16 %v4180_v40, %v4161_v5 }
 0x308   : > { %v1808_v57 = vmul.f32 %v2804_v63, %v1648_v10  ;;  %v1553_v6 = vadd.f32 -0.28449672, %v1521_v20  ;;  %v1912_v50 = vsel %vm1848_vm12, %v1816_v31, %v1880_v8  ;;  %v1938_v63 = vsel %vm1874_vm14, %v1842_v28, %v1906_v9  ;;  %v4606_v9 = vld [vmem:[#allocation8_spill] sm:$0xff] }
 0x309   : > { %v1651_v15 = vmul.f32 %v4249_v51, %v1619_v38  ;;  %v1913_v24 = vsel %vm1849_vm13, %v1817_v42, %v1881_v52  ;;  %v1944_v7 = vadd.f32 1.0, %v1912_v50  ;;  %v2810_v59 = vpop.eup %2809  ;;  %v1970_v42 = vadd.f32 1.0, %v1938_v63 }
 0x30a   : > { %v1840_v0 = vsub.f32 1.0, %v1808_v57  ;;  %v1585_v35 = vmul.f32 %v2806_v23, %v1553_v6  ;;  %v1945_v29 = vadd.f32 1.0, %v1913_v24  ;;  %v1202_v52 = vmul.f32 0.5, %v4125_v36 }
 0x30b   : > { %v1811_v19 = vmul.f32 %v2808_v33, %v1651_v15  ;;  %v1976_v11 = vmul.f32 %v1944_v7, %v1176_v61  ;;  %v4600_v45 = vpack.c.bf16 %v4274_v12, %v4222_v44  ;;  %v4601_v41 = vpack.c.bf16 %v4242_v22, %v4215_v47  ;;  %v4607_v7 = vld [vmem:[#allocation6_spill] sm:$0xff] }
 0x30c   : > { %v1617_v62 = vadd.f32 0.2548296, %v1585_v35  ;;  %v1977_v13 = vmul.f32 %v1945_v29, %v1177_v16  ;;  %v1904_v31 = vsub.f32 0.0, %v1840_v0  ;;  %v2002_v53 = vmul.f32 %v1970_v42, %v1202_v52  ;;  %v4608_v35 = vld [vmem:[#allocation9_spill] sm:$0xff]  ;;  %v4611_v42 = vld [vmem:[#allocation10_spill] sm:$0xff] }
 0x30d   : > { %v1843_v10 = vsub.f32 1.0, %v1811_v19 }
 0x30e   : > { %v1649_v20 = vmul.f32 %v2806_v23, %v1617_v62  ;;  %v2006_v8 = vpack.c.bf16 %v1977_v13, %v1976_v11  ;;  %v1936_v28 = vsel %vm1872_vm1, %v1840_v0, %v1904_v31  ;;  %v1203_v23 = vmul.f32 0.5, %v4169_v34  ;;  %v4609_v11 = vld [vmem:[#allocation7_spill] sm:$0xff] }
 0x30f   : > { %v1907_v51 = vsub.f32 0.0, %v1843_v10  ;;  %v1968_v36 = vadd.f32 1.0, %v1936_v28  ;;  %v4612_v28 = vld [vmem:[#allocation13_spill] sm:$0xff] }
 0x310   : > { %v1809_v38 = vmul.f32 %v2810_v59, %v1649_v20  ;;  %2557 = vmatprep.mubr.bf16.mxu1 %v2006_v8  ;;  %v4610_v20 = vld [vmem:[#allocation12_spill] sm:$0xff] }
 0x311   : > { %v1939_v39 = vsel %vm1875_vm15, %v1843_v10, %v1907_v51  ;;  %2558 = vmatmul.mubr.bf16.vlgmr.msra.gmra.mrb[0].mxu1 %v2007_v1  ;;  %v2000_v34 = vmul.f32 %v1968_v36, %v1200_v30 }
 0x312   : > { %v1971_v61 = vadd.f32 1.0, %v1939_v39  ;;  %v1841_v57 = vsub.f32 1.0, %v1809_v38  ;;  %2561 = vmatprep.mubr.bf16.mxu1 %v2008_v55  ;;  %v4605_v55 = vld [vmem:[#allocation4_spill] sm:$0xff] }
 0x314   : > { %v2003_v59 = vmul.f32 %v1971_v61, %v1203_v23  ;;  %v1905_v6 = vsub.f32 0.0, %v1841_v57 }
 0x316   : > { %v1937_v48 = vsel %vm1873_vm2, %v1841_v57, %v1905_v6  ;;  %v2019_v50 = vpack.c.bf16 %v2003_v59, %v2002_v53  ;;  %v4613_v53 = vld [vmem:[#allocation11_spill] sm:$0xff] }
 0x317   : > { %v1969_v1 = vadd.f32 1.0, %v1937_v48 }
 0x319   : > { %v2001_v33 = vmul.f32 %v1969_v1, %v1201_v2  ;;  %2562 = vmatmul.mubr.bf16.gmra.mrb[4].mxu1 %v2009_v17  ;;  %v4615_v1 = vld [vmem:[#allocation14_spill] sm:$0xff] }
 0x31a   : > { %2565 = vmatprep.mubr.bf16.mxu1 %v2010_v26 }
 0x31b   : > { %v2018_v18 = vpack.c.bf16 %v2001_v33, %v2000_v34 }
 0x321   : > { %2566 = vmatmul.mubr.bf16.gmra.mrb[8].mxu1 %v4595_v27  ;;  %v4616_v27 = vld [vmem:[#allocation17_spill] sm:$0xff] }
 0x322   : > { %2569 = vmatprep.mubr.bf16.mxu1 %v4596_v32 }
 0x329   : > { %2570 = vmatmul.mubr.bf16.gmra.mrb[12].mxu1 %v4597_v14 }
 0x32a   : > { %2573 = vmatprep.mubr.bf16.mxu1 %v4598_v43 }
 0x331   : > { %2574 = vmatmul.mubr.bf16.gmra.mrb[16].mxu1 %v4599_v4  ;;  %v4617_v4 = vld [vmem:[#allocation15_spill] sm:$0xff] }
 0x332   : > { %2577 = vmatprep.mubr.bf16.mxu1 %v4600_v45 }
 0x339   : > { %2578 = vmatmul.mubr.bf16.gmra.mrb[20].mxu1 %v4601_v41 }
 0x33a   : > { %2581 = vmatprep.mubr.bf16.mxu1 %v2018_v18 }
 0x341   : > { %2582 = vmatmul.mubr.bf16.gmra.mrb[24].mxu1 %v2019_v50  ;;  %v4614_v50 = vld [vmem:[#allocation16_spill] sm:$0xff] }
 0x3b4   : > { %v2555_v25 = vpop.f32.mrb[32].mxu0 }
 0x3b5   : > { %v2247_v49 = vadd.f32 %v2555_v25, %v4602_v60  ;;  %v2118_v58 = vpop.f32.mrb[33].mxu0 }
 0x3b6   : > { %v2245_v5 = vadd.f32 %v2118_v58, %v4603_v56  ;;  %v2556_v46 = vpop.f32.mrb[34].mxu0 }
 0x3b7   : > { %v2286_v40 = vadd.f32 %v4336_v3, %v2247_v49  ;;  %v2248_v37 = vadd.f32 %v2556_v46, %v4604_v54  ;;  %v2121_v47 = vpop.f32.mrb[35].mxu0  ;;  %v4618_v49 = vld [vmem:[#allocation20_spill] sm:$0xff] }
 0x3b8   : > { %v2284_v44 = vadd.f32 %v4336_v3, %v2245_v5  ;;  %v2246_v17 = vadd.f32 %v2121_v47, %v4605_v55  ;;  %v4619_v5 = vld [vmem:[#allocation18_spill] sm:$0xff] }
 0x3b9   : > { %2318 = vst.msk [vmem:[%s4343_s28 + $0x10] sm:$0xff] %vm428_vm0, %v2286_v40  ;;  %v2287_v22 = vadd.f32 %v4336_v3, %v2248_v37  ;;  %v4620_v37 = vld [vmem:[#allocation21_spill] sm:$0xff] }
 0x3ba   : > { %2316 = vst.msk [vmem:[%s4343_s28] sm:$0xff] %vm428_vm0, %v2284_v44  ;;  %v2285_v26 = vadd.f32 %v4336_v3, %v2246_v17  ;;  %v4621_v17 = vld [vmem:[#allocation19_spill] sm:$0xff] }
 0x3bb   : > { %2319 = vst.msk [vmem:[%s4343_s28 + $0x18] sm:$0xff] %vm428_vm0, %v2287_v22 }
 0x3bc   : > { %2317 = vst.msk [vmem:[%s4343_s28 + $0x8] sm:$0xff] %vm428_vm0, %v2285_v26 }
 0x3e4   : > { %v2559_v12 = vpop.f32.mrb[0].mxu1 }
 0x3e5   : > { %v2251_v15 = vadd.f32 %v2559_v12, %v4606_v9  ;;  %v2134_v24 = vpop.f32.mrb[1].mxu1 }
 0x3e6   : > { %v2249_v21 = vadd.f32 %v2134_v24, %v4607_v7  ;;  %v2560_v16 = vpop.f32.mrb[2].mxu1 }
 0x3e7   : > { %v2290_v0 = vadd.f32 %v4336_v3, %v2251_v15  ;;  %v2252_v29 = vadd.f32 %v2560_v16, %v4608_v35  ;;  %v2137_v19 = vpop.f32.mrb[3].mxu1  ;;  %v4622_v15 = vld [vmem:[#allocation24_spill] sm:$0xff] }
 0x3e8   : > { %v2288_v62 = vadd.f32 %v4336_v3, %v2249_v21  ;;  %v2250_v13 = vadd.f32 %v2137_v19, %v4609_v11  ;;  %v4623_v21 = vld [vmem:[#allocation22_spill] sm:$0xff] }
 0x3e9   : > { %2322 = vst.msk [vmem:[%s4343_s28 + $0x30] sm:$0xff] %vm428_vm0, %v2290_v0  ;;  %v2291_v63 = vadd.f32 %v4336_v3, %v2252_v29  ;;  %v4624_v29 = vld [vmem:[#allocation25_spill] sm:$0xff] }
 0x3ea   : > { %2320 = vst.msk [vmem:[%s4343_s28 + $0x20] sm:$0xff] %vm428_vm0, %v2288_v62  ;;  %v2289_v10 = vadd.f32 %v4336_v3, %v2250_v13  ;;  %v4625_v13 = vld [vmem:[#allocation23_spill] sm:$0xff] }
 0x3eb   : > { %2323 = vst.msk [vmem:[%s4343_s28 + $0x38] sm:$0xff] %vm428_vm0, %v2291_v63 }
 0x3ec   : > { %2321 = vst.msk [vmem:[%s4343_s28 + $0x28] sm:$0xff] %vm428_vm0, %v2289_v10  ;;  %v2563_v31 = vpop.f32.mrb[4].mxu1 }
 0x3ed   : > { %v2255_v8 = vadd.f32 %v2563_v31, %v4610_v20  ;;  %v2150_v51 = vpop.f32.mrb[5].mxu1 }
 0x3ee   : > { %v2253_v38 = vadd.f32 %v2150_v51, %v4611_v42  ;;  %v2564_v52 = vpop.f32.mrb[6].mxu1 }
 0x3ef   : > { %v2294_v39 = vadd.f32 %v4336_v3, %v2255_v8  ;;  %v2256_v23 = vadd.f32 %v2564_v52, %v4612_v28  ;;  %v2153_v61 = vpop.f32.mrb[7].mxu1  ;;  %v4626_v8 = vld [vmem:[#allocation28_spill] sm:$0xff] }
 0x3f0   : > { %v2292_v57 = vadd.f32 %v4336_v3, %v2253_v38  ;;  %v2254_v59 = vadd.f32 %v2153_v61, %v4613_v53  ;;  %v4627_v38 = vld [vmem:[#allocation26_spill] sm:$0xff] }
 0x3f1   : > { %2326 = vst.msk [vmem:[%s4343_s28 + $0x50] sm:$0xff] %vm428_vm0, %v2294_v39  ;;  %v2295_v6 = vadd.f32 %v4336_v3, %v2256_v23  ;;  %v4628_v23 = vld [vmem:[#allocation29_spill] sm:$0xff] }
 0x3f2   : > { %2324 = vst.msk [vmem:[%s4343_s28 + $0x40] sm:$0xff] %vm428_vm0, %v2292_v57  ;;  %v2293_v36 = vadd.f32 %v4336_v3, %v2254_v59  ;;  %v4629_v59 = vld [vmem:[#allocation27_spill] sm:$0xff] }
 0x3f3   : > { %2327 = vst.msk [vmem:[%s4343_s28 + $0x58] sm:$0xff] %vm428_vm0, %v2295_v6 }
 0x3f4   : > { %2325 = vst.msk [vmem:[%s4343_s28 + $0x48] sm:$0xff] %vm428_vm0, %v2293_v36  ;;  %v2567_v48 = vpop.f32.mrb[8].mxu1 }
 0x3f5   : > { %v2259_v30 = vadd.f32 %v2567_v48, %v4614_v50  ;;  %v2166_v2 = vpop.f32.mrb[9].mxu1 }
 0x3f6   : > { %v2257_v34 = vadd.f32 %v2166_v2, %v4615_v1  ;;  %v2568_v33 = vpop.f32.mrb[10].mxu1 }
 0x3f7   : > { %v2298_v18 = vadd.f32 %v4336_v3, %v2259_v30  ;;  %v2260_v32 = vadd.f32 %v2568_v33, %v4616_v27  ;;  %v2169_v14 = vpop.f32.mrb[11].mxu1  ;;  %v4630_v30 = vld [vmem:[#allocation32_spill] sm:$0xff] }
 0x3f8   : > { %v2296_v43 = vadd.f32 %v4336_v3, %v2257_v34  ;;  %v2258_v45 = vadd.f32 %v2169_v14, %v4617_v4  ;;  %v4631_v34 = vld [vmem:[#allocation30_spill] sm:$0xff] }
 0x3f9   : > { %2330 = vst.msk [vmem:[%s4343_s28 + $0x70] sm:$0xff] %vm428_vm0, %v2298_v18  ;;  %v2299_v41 = vadd.f32 %v4336_v3, %v2260_v32  ;;  %v4632_v32 = vld [vmem:[#allocation33_spill] sm:$0xff] }
 0x3fa   : > { %2328 = vst.msk [vmem:[%s4343_s28 + $0x60] sm:$0xff] %vm428_vm0, %v2296_v43  ;;  %v2297_v25 = vadd.f32 %v4336_v3, %v2258_v45  ;;  %v4633_v45 = vld [vmem:[#allocation31_spill] sm:$0xff] }
 0x3fb   : > { %2331 = vst.msk [vmem:[%s4343_s28 + $0x78] sm:$0xff] %vm428_vm0, %v2299_v41 }
 0x3fc   : > { %2329 = vst.msk [vmem:[%s4343_s28 + $0x68] sm:$0xff] %vm428_vm0, %v2297_v25  ;;  %v2571_v60 = vpop.f32.mrb[12].mxu1 }
 0x3fd   : > { %v2263_v58 = vadd.f32 %v2571_v60, %v4618_v49  ;;  %v2182_v56 = vpop.f32.mrb[13].mxu1 }
 0x3fe   : > { %v2261_v46 = vadd.f32 %v2182_v56, %v4619_v5  ;;  %v2572_v40 = vpop.f32.mrb[14].mxu1 }
 0x3ff   : > { %v2302_v54 = vadd.f32 %v4336_v3, %v2263_v58  ;;  %v2264_v47 = vadd.f32 %v2572_v40, %v4620_v37  ;;  %v2185_v44 = vpop.f32.mrb[15].mxu1 }
 0x400   : > { %v2300_v55 = vadd.f32 %v4336_v3, %v2261_v46  ;;  %v2262_v22 = vadd.f32 %v2185_v44, %v4621_v17 }
 0x401   : > { %2334 = vst.msk [vmem:[%s4343_s28 + $0x90] sm:$0xff] %vm428_vm0, %v2302_v54  ;;  %v2303_v26 = vadd.f32 %v4336_v3, %v2264_v47 }
 0x402   : > { %2332 = vst.msk [vmem:[%s4343_s28 + $0x80] sm:$0xff] %vm428_vm0, %v2300_v55  ;;  %v2301_v12 = vadd.f32 %v4336_v3, %v2262_v22 }
 0x403   : > { %2335 = vst.msk [vmem:[%s4343_s28 + $0x98] sm:$0xff] %vm428_vm0, %v2303_v26 }
 0x404   : > { %2333 = vst.msk [vmem:[%s4343_s28 + $0x88] sm:$0xff] %vm428_vm0, %v2301_v12  ;;  %v2575_v9 = vpop.f32.mrb[16].mxu1 }
 0x405   : > { %v2267_v24 = vadd.f32 %v2575_v9, %v4622_v15  ;;  %v2198_v7 = vpop.f32.mrb[17].mxu1 }
 0x406   : > { %v2265_v16 = vadd.f32 %v2198_v7, %v4623_v21  ;;  %v2576_v0 = vpop.f32.mrb[18].mxu1 }
 0x407   : > { %v2306_v35 = vadd.f32 %v4336_v3, %v2267_v24  ;;  %v2268_v19 = vadd.f32 %v2576_v0, %v4624_v29  ;;  %v2201_v62 = vpop.f32.mrb[19].mxu1 }
 0x408   : > { %v2304_v11 = vadd.f32 %v4336_v3, %v2265_v16  ;;  %v2266_v63 = vadd.f32 %v2201_v62, %v4625_v13 }
 0x409   : > { %2338 = vst.msk [vmem:[%s4343_s28 + $0xb0] sm:$0xff] %vm428_vm0, %v2306_v35  ;;  %v2307_v10 = vadd.f32 %v4336_v3, %v2268_v19 }
 0x40a   : > { %2336 = vst.msk [vmem:[%s4343_s28 + $0xa0] sm:$0xff] %vm428_vm0, %v2304_v11  ;;  %v2305_v31 = vadd.f32 %v4336_v3, %v2266_v63 }
 0x40b   : > { %2339 = vst.msk [vmem:[%s4343_s28 + $0xb8] sm:$0xff] %vm428_vm0, %v2307_v10 }
 0x40c   : > { %2337 = vst.msk [vmem:[%s4343_s28 + $0xa8] sm:$0xff] %vm428_vm0, %v2305_v31  ;;  %v2579_v20 = vpop.f32.mrb[20].mxu1 }
 0x40d   : > { %v2271_v51 = vadd.f32 %v2579_v20, %v4626_v8  ;;  %v2214_v42 = vpop.f32.mrb[21].mxu1 }
 0x40e   : > { %v2269_v52 = vadd.f32 %v2214_v42, %v4627_v38  ;;  %v2580_v39 = vpop.f32.mrb[22].mxu1 }
 0x40f   : > { %v2310_v28 = vadd.f32 %v4336_v3, %v2271_v51  ;;  %v2272_v61 = vadd.f32 %v2580_v39, %v4628_v23  ;;  %v2217_v57 = vpop.f32.mrb[23].mxu1 }
 0x410   : > { %v2308_v53 = vadd.f32 %v4336_v3, %v2269_v52  ;;  %v2270_v6 = vadd.f32 %v2217_v57, %v4629_v59 }
 0x411   : > { %2342 = vst.msk [vmem:[%s4343_s28 + $0xd0] sm:$0xff] %vm428_vm0, %v2310_v28  ;;  %v2311_v36 = vadd.f32 %v4336_v3, %v2272_v61 }
 0x412   : > { %2340 = vst.msk [vmem:[%s4343_s28 + $0xc0] sm:$0xff] %vm428_vm0, %v2308_v53  ;;  %v2309_v48 = vadd.f32 %v4336_v3, %v2270_v6 }
 0x413   : > { %2343 = vst.msk [vmem:[%s4343_s28 + $0xd8] sm:$0xff] %vm428_vm0, %v2311_v36 }
 0x414   : > { %2341 = vst.msk [vmem:[%s4343_s28 + $0xc8] sm:$0xff] %vm428_vm0, %v2309_v48  ;;  %v2583_v50 = vpop.f32.mrb[24].mxu1 }
 0x415   : > { %v2275_v2 = vadd.f32 %v2583_v50, %v4630_v30  ;;  %v2230_v1 = vpop.f32.mrb[25].mxu1 }
 0x416   : > { %v2273_v33 = vadd.f32 %v2230_v1, %v4631_v34  ;;  %v2584_v18 = vpop.f32.mrb[26].mxu1 }
 0x417   : > { %v2314_v27 = vadd.f32 %v4336_v3, %v2275_v2  ;;  %v2276_v14 = vadd.f32 %v2584_v18, %v4632_v32  ;;  %v2233_v43 = vpop.f32.mrb[27].mxu1 }
 0x418   : > { %v2312_v4 = vadd.f32 %v4336_v3, %v2273_v33  ;;  %v2274_v41 = vadd.f32 %v2233_v43, %v4633_v45 }
 0x419   : > { %2346 = vst.msk [vmem:[%s4343_s28 + $0xf0] sm:$0xff] %vm428_vm0, %v2314_v27  ;;  %v2315_v25 = vadd.f32 %v4336_v3, %v2276_v14 }
 0x41a   : > { %2344 = vst.msk [vmem:[%s4343_s28 + $0xe0] sm:$0xff] %vm428_vm0, %v2312_v4  ;;  %v2313_v60 = vadd.f32 %v4336_v3, %v2274_v41 }
 0x41b   : > { %2347 = vst.msk [vmem:[%s4343_s28 + $0xf8] sm:$0xff] %vm428_vm0, %v2315_v25 }
 0x41c   : > { %2345 = vst.msk [vmem:[%s4343_s28 + $0xe8] sm:$0xff] %vm428_vm0, %v2313_v60 }
 0x41d PF: > { %s18_s27 = sadd.s32 1, %s2818_s27  }
 0x41e   : > { %p15_p4 = scmp.ge.s32.totalorder %s18_s27, 4  }
 0x420   :  { %17 = sbr.rel (!%p15_p4) target bundleno = 1 (0x1), region = 85 }

// kernel: basic_layer_forward.6
= control target key start
LH: loop header
LB: loop body
LE: loop exit
PB: predicated region body
PF: predicated region fallthrough
CT: control target
= control target key end

     0   :  { %s3117_s30 = smov 0   ;;  %s3119_s10 = smov 0   ;;  %s4189_s0 = inlined_call_operand.vmem [shape: f32[2,16,16,32], index: 0, kind: input, shape index: {}]   ;;  %s4190_s1 = inlined_call_operand.vmem [shape: f32[1,32], index: 1, kind: input, shape index: {}]   ;;  %s4191_s2 = inlined_call_operand.vmem [shape: f32[1,32], index: 2, kind: input, shape index: {}]   ;;  %s4192_s3 = inlined_call_operand.vmem [shape: bf16[32,96], index: 3, kind: input, shape index: {}]   ;;  %s4193_s4 = inlined_call_operand.vmem [shape: f32[1,96], index: 4, kind: input, shape index: {}]   ;;  %s4194_s5 = inlined_call_operand.vmem [shape: f32[2,64,64], index: 5, kind: input, shape index: {}]   ;;  %s4195_s6 = inlined_call_operand.vmem [shape: bf16[32,32], index: 6, kind: input, shape index: {}]   ;;  %s4196_s7 = inlined_call_operand.vmem [shape: f32[1,32], index: 7, kind: input, shape index: {}]   ;;  %s4197_s8 = inlined_call_operand.vmem [shape: f32[4,64,64], index: 8, kind: input, shape index: {}]   ;;  %s4198_s9 = inlined_call_operand.vmem [shape: f32[2,16,16,32], index: 9, kind: output, shape index: {}]  }
   0x1   :  { %s3121_s11 = smov 0   ;;  %s3123_s12 = smov 0  }
   0x2   :  { %s3125_s13 = smov 0  }
   0x3 LB: > { %s28_s14 = sadd.s32 1, %s3051_s11  ;;  %s31_s15 = sadd.s32 1, %s3055_s12  ;;  %s3059_s13 = sphi %s3125_s13, %s19_s13   ;;  %s3055_s12 = sphi %s3123_s12, %s4214_s12   ;;  %s3051_s11 = sphi %s3121_s11, %s4213_s11   ;;  %s3047_s10 = sphi %s3119_s10, %s4212_s10   ;;  %s3043_s30 = sphi %s3117_s30, %s4211_s30  }
   0x4   : > { %p29_p0 = scmp.ge.s32.totalorder %s28_s14, 2  ;;  %p2432_p1 = scmp.ge.s32.totalorder %s3059_s13, 1 }
   0x5   : > { %p321_p2 = scmp.lt.s32.totalorder %s3059_s13, 5 }
   0x6   : > { %s4216_s14 = smov (%p29_p0, %s28_s14), 0  ;;  %s4218_s15 = smov (!%p29_p0, %s31_s15), %s3055_s12 }
   0x7   : > { %p322_p3 = pnand %p2432_p1, %p321_p2  ;;  %p33_p4 = scmp.ge.s32.totalorder %s4218_s15, 2 }
   0x9   : > { %s4220_s15 = smov (%p33_p4, %s4218_s15), 0  ;;  %325 = sbr.rel (%p322_p3) target bundleno = 2639 (0xa4f), region = 56 }
  0x10   : > { %s2433_s16 = sshll.u32 %s3043_s30, 3  ;;  %p374_p5 = scmp.lt.s32.totalorder %s3047_s10, 1  ;;  %vm419_vm0 = vcmask 261120   ;;  %vm903_vm1 = vcmask 130048   ;;  %vm1110_vm2 = vcmask 523264  }
  0x11   : > { %p376_p6 = scmp.lt.s32.totalorder %s2433_s16, 15  ;;  %s3061_s21 = smov 96  }
  0x12   : > { %s4222_s10 = smov (!%p374_p5, %s3047_s10), 1  ;;  %s3062_s22 = smov 64  }
  0x13   : > { %s4224_s16 = smov (!%p376_p6, %s2433_s16), 15  ;;  %s2435_s17 = sshll.u32 %s4222_s10, 5 }
  0x14   : > { %s2434_s18 = sshll.u32 %s4224_s16, 1  ;;  %s2437_s24 = sshll.u32 %s3043_s30, 1 }
  0x15   : > { %s3150_s19 = sadd.s32 %s2435_s17, %s2434_s18  ;;  %p385_p7 = scmp.lt.s32.totalorder %s2437_s24, 3 }
  0x16   : > { %s2436_s20 = sshll.u32 %s3150_s19, 3  ;;  %s3064_s30 = smov 112  }
  0x17   : > { %s3158_s23 = scalar_lea.vmem %s4189_s0, %s2436_s20  ;;  %s4226_s24 = smov (!%p385_p7, %s2437_s24), 3 }
  0x18   : > { %v403_v0 = vld [vmem:[%s3158_s23] sm:$0xff]  ;;  %v405_v2 = vld [vmem:[%s3158_s23 + $0x10] sm:$0xff]  ;;  %v3183_v16 = vld [vmem:[%s3158_s23 + $0x8] sm:$0xff]  ;;  %s2502_s25 = sshll.u32 %s4226_s24, 6  ;;  %s3065_s18 = smov 48  }
  0x19   : > { %v407_v1 = vld [vmem:[%s3158_s23 + $0x20] sm:$0xff]  ;;  %v420_v3 = vsel %vm419_vm0, %v403_v0, 0.0  ;;  %v409_v5 = vld [vmem:[%s3158_s23 + $0x30] sm:$0xff]  ;;  %v423_v6 = vsel %vm419_vm0, %v405_v2, 0.0  ;;  %v3186_v17 = vld [vmem:[%s3158_s23 + $0x18] sm:$0xff]  ;;  %v444_v18 = vsel %vm419_vm0, %v3183_v16, 0.0  ;;  %s3526_s28 = scalar_lea.vmem %s4197_s8, %s2502_s25  ;;  %s4140_s17 = scalar_lea.vmem %s4198_s9, %s2436_s20 }
  0x1a   : > { %v426_v4 = vsel %vm419_vm0, %v407_v1, 0.0  ;;  %421 = vadd.xlane.f32.xlu0 %v420_v3  ;;  %v429_v7 = vsel %vm419_vm0, %v409_v5, 0.0  ;;  %v411_v8 = vld [vmem:[%s3158_s23 + $0x40] sm:$0xff]  ;;  %v413_v9 = vld [vmem:[%s3158_s23 + $0x50] sm:$0xff]  ;;  %v447_v19 = vsel %vm419_vm0, %v3186_v17, 0.0  ;;  %v3193_v20 = vld [vmem:[%s3158_s23 + $0x28] sm:$0xff] }
  0x1b   : > { %427 = vadd.xlane.f32.xlu1 %v426_v4  ;;  %v432_v10 = vsel %vm419_vm0, %v411_v8, 0.0  ;;  %v435_v11 = vsel %vm419_vm0, %v413_v9, 0.0  ;;  %v3173_v12 = vld [vmem:[%s3158_s23 + $0x60] sm:$0xff]  ;;  %v3176_v13 = vld [vmem:[%s3158_s23 + $0x70] sm:$0xff]  ;;  %v3196_v21 = vld [vmem:[%s3158_s23 + $0x38] sm:$0xff]  ;;  %v450_v22 = vsel %vm419_vm0, %v3193_v20, 0.0 }
  0x1c   : > { %v438_v14 = vsel %vm419_vm0, %v3173_v12, 0.0  ;;  %v441_v15 = vsel %vm419_vm0, %v3176_v13, 0.0  ;;  %v453_v23 = vsel %vm419_vm0, %v3196_v21, 0.0  ;;  %v3203_v24 = vld [vmem:[%s3158_s23 + $0x48] sm:$0xff]  ;;  %v3206_v25 = vld [vmem:[%s3158_s23 + $0x58] sm:$0xff]  ;;  %s3066_s26 = smov 16  }
  0x1d   : > { %v456_v26 = vsel %vm419_vm0, %v3203_v24, 0.0  ;;  %v459_v27 = vsel %vm419_vm0, %v3206_v25, 0.0  ;;  %v3213_v28 = vld [vmem:[%s3158_s23 + $0x68] sm:$0xff]  ;;  %v3216_v29 = vld [vmem:[%s3158_s23 + $0x78] sm:$0xff]  ;;  %s3063_s23 = smov 80  }
  0x1e   : > { %424 = vadd.xlane.f32.xlu0 %v423_v6  ;;  %v462_v30 = vsel %vm419_vm0, %v3213_v28, 0.0  ;;  %v465_v31 = vsel %vm419_vm0, %v3216_v29, 0.0 }
  0x1f   : > { %430 = vadd.xlane.f32.xlu1 %v429_v7 }
  0x22   : > { %433 = vadd.xlane.f32.xlu0 %v432_v10 }
  0x23   : > { %436 = vadd.xlane.f32.xlu1 %v435_v11 }
  0x26   : > { %439 = vadd.xlane.f32.xlu0 %v438_v14 }
  0x27   : > { %442 = vadd.xlane.f32.xlu1 %v441_v15 }
  0x2a   : > { %445 = vadd.xlane.f32.xlu0 %v444_v18 }
  0x2b   : > { %448 = vadd.xlane.f32.xlu1 %v447_v19 }
  0x2e   : > { %451 = vadd.xlane.f32.xlu0 %v450_v22 }
  0x2f   : > { %454 = vadd.xlane.f32.xlu1 %v453_v23 }
  0x32   : > { %457 = vadd.xlane.f32.xlu0 %v456_v26 }
  0x33   : > { %460 = vadd.xlane.f32.xlu1 %v459_v27 }
  0x36   : > { %463 = vadd.xlane.f32.xlu0 %v462_v30 }
  0x37   : > { %466 = vadd.xlane.f32.xlu1 %v465_v31 }
  0xa7   : > { %v422_v32 = vpop.xlane.xlu0 %421 }
  0xa8   : > { %v428_v33 = vpop.xlane.xlu1 %427  ;;  %v469_v34 = vmul.f32 0.03125, %v422_v32 }
  0xa9   : > { %v471_v35 = vmul.f32 0.03125, %v428_v33 }
  0xaa   : > { %v3222_v36 = vsub.f32 %v403_v0, %v469_v34 }
  0xab   : > { %v3224_v37 = vsub.f32 %v407_v1, %v471_v35  ;;  %v425_v38 = vpop.xlane.xlu0 %424 }
  0xac   : > { %v431_v39 = vpop.xlane.xlu1 %430  ;;  %v470_v40 = vmul.f32 0.03125, %v425_v38  ;;  %v501_v42 = vmul.f32 %v3222_v36, %v3222_v36 }
  0xad   : > { %v472_v41 = vmul.f32 0.03125, %v431_v39  ;;  %v503_v43 = vmul.f32 %v3224_v37, %v3224_v37 }
  0xae   : > { %v3230_v44 = vsub.f32 %v405_v2, %v470_v40  ;;  %v517_v46 = vsel %vm419_vm0, %v501_v42, 0.0 }
  0xaf   : > { %v3232_v45 = vsub.f32 %v409_v5, %v472_v41  ;;  %518 = vadd.xlane.f32.xlu0 %v517_v46  ;;  %v434_v47 = vpop.xlane.xlu0 %433  ;;  %v523_v49 = vsel %vm419_vm0, %v503_v43, 0.0 }
  0xb0   : > { %v437_v48 = vpop.xlane.xlu1 %436  ;;  %v473_v50 = vmul.f32 0.03125, %v434_v47  ;;  %v502_v52 = vmul.f32 %v3230_v44, %v3230_v44 }
  0xb1   : > { %v474_v51 = vmul.f32 0.03125, %v437_v48  ;;  %v504_v53 = vmul.f32 %v3232_v45, %v3232_v45 }
  0xb2   : > { %v3240_v54 = vsub.f32 %v411_v8, %v473_v50  ;;  %v520_v56 = vsel %vm419_vm0, %v502_v52, 0.0 }
  0xb3   : > { %v3242_v55 = vsub.f32 %v413_v9, %v474_v51  ;;  %524 = vadd.xlane.f32.xlu0 %v523_v49  ;;  %521 = vadd.xlane.f32.xlu1 %v520_v56  ;;  %v440_v57 = vpop.xlane.xlu0 %439  ;;  %v526_v59 = vsel %vm419_vm0, %v504_v53, 0.0  ;;  %v2858_v53 = vld [vmem:[%s4192_s3 + $0x8] sm:$0xff]  }
  0xb4   : > { %v443_v58 = vpop.xlane.xlu1 %442  ;;  %v475_v60 = vmul.f32 0.03125, %v440_v57  ;;  %v505_v62 = vmul.f32 %v3240_v54, %v3240_v54 }
  0xb5   : > { %v476_v61 = vmul.f32 0.03125, %v443_v58  ;;  %v506_v63 = vmul.f32 %v3242_v55, %v3242_v55 }
  0xb6   : > { %v3251_v0 = vsub.f32 %v3173_v12, %v475_v60  ;;  %v529_v2 = vsel %vm419_vm0, %v505_v62, 0.0 }
  0xb7   : > { %v3254_v1 = vsub.f32 %v3176_v13, %v476_v61  ;;  %527 = vadd.xlane.f32.xlu1 %v526_v59  ;;  %530 = vadd.xlane.f32.xlu0 %v529_v2  ;;  %v446_v3 = vpop.xlane.xlu0 %445  ;;  %v532_v5 = vsel %vm419_vm0, %v506_v63, 0.0 }
  0xb8   : > { %v449_v4 = vpop.xlane.xlu1 %448  ;;  %v477_v6 = vmul.f32 0.03125, %v446_v3  ;;  %v507_v8 = vmul.f32 %v3251_v0, %v3251_v0 }
  0xb9   : > { %v478_v7 = vmul.f32 0.03125, %v449_v4  ;;  %v508_v9 = vmul.f32 %v3254_v1, %v3254_v1 }
  0xba   : > { %v3263_v10 = vsub.f32 %v3183_v16, %v477_v6  ;;  %v535_v12 = vsel %vm419_vm0, %v507_v8, 0.0 }
  0xbb   : > { %v3266_v11 = vsub.f32 %v3186_v17, %v478_v7  ;;  %533 = vadd.xlane.f32.xlu1 %v532_v5  ;;  %536 = vadd.xlane.f32.xlu0 %v535_v12  ;;  %v452_v13 = vpop.xlane.xlu0 %451  ;;  %v538_v15 = vsel %vm419_vm0, %v508_v9, 0.0 }
  0xbc   : > { %v455_v14 = vpop.xlane.xlu1 %454  ;;  %v479_v18 = vmul.f32 0.03125, %v452_v13  ;;  %v509_v22 = vmul.f32 %v3263_v10, %v3263_v10 }
  0xbd   : > { %v480_v19 = vmul.f32 0.03125, %v455_v14  ;;  %v510_v16 = vmul.f32 %v3266_v11, %v3266_v11 }
  0xbe   : > { %v3275_v23 = vsub.f32 %v3193_v20, %v479_v18  ;;  %v541_v26 = vsel %vm419_vm0, %v509_v22, 0.0 }
  0xbf   : > { %v3278_v17 = vsub.f32 %v3196_v21, %v480_v19  ;;  %539 = vadd.xlane.f32.xlu1 %v538_v15  ;;  %542 = vadd.xlane.f32.xlu0 %v541_v26  ;;  %v458_v27 = vpop.xlane.xlu0 %457  ;;  %v544_v31 = vsel %vm419_vm0, %v510_v16, 0.0 }
  0xc0   : > { %v461_v30 = vpop.xlane.xlu1 %460  ;;  %v481_v32 = vmul.f32 0.03125, %v458_v27  ;;  %v511_v34 = vmul.f32 %v3275_v23, %v3275_v23 }
  0xc1   : > { %v482_v33 = vmul.f32 0.03125, %v461_v30  ;;  %v512_v20 = vmul.f32 %v3278_v17, %v3278_v17 }
  0xc2   : > { %v3287_v35 = vsub.f32 %v3203_v24, %v481_v32  ;;  %v547_v38 = vsel %vm419_vm0, %v511_v34, 0.0 }
  0xc3   : > { %v3290_v21 = vsub.f32 %v3206_v25, %v482_v33  ;;  %545 = vadd.xlane.f32.xlu1 %v544_v31  ;;  %548 = vadd.xlane.f32.xlu0 %v547_v38  ;;  %v464_v39 = vpop.xlane.xlu0 %463  ;;  %v550_v41 = vsel %vm419_vm0, %v512_v20, 0.0  ;;  %v3322_v31 = vld [vmem:[%s4190_s1] ss:$0 sm:$0xff] }
  0xc4   : > { %v467_v40 = vpop.xlane.xlu1 %466  ;;  %v483_v42 = vmul.f32 0.03125, %v464_v39  ;;  %v513_v46 = vmul.f32 %v3287_v35, %v3287_v35 }
  0xc5   : > { %v484_v43 = vmul.f32 0.03125, %v467_v40  ;;  %v514_v24 = vmul.f32 %v3290_v21, %v3290_v21 }
  0xc6   : > { %v3299_v47 = vsub.f32 %v3213_v28, %v483_v42  ;;  %v553_v48 = vsel %vm419_vm0, %v513_v46, 0.0 }
  0xc7   : > { %v3302_v25 = vsub.f32 %v3216_v29, %v484_v43  ;;  %551 = vadd.xlane.f32.xlu1 %v550_v41  ;;  %554 = vadd.xlane.f32.xlu0 %v553_v48  ;;  %v556_v49 = vsel %vm419_vm0, %v514_v24, 0.0  ;;  %v2857_v29 = vld [vmem:[%s4192_s3] sm:$0xff]  }
  0xc8   : > { %v515_v50 = vmul.f32 %v3299_v47, %v3299_v47  ;;  %2587 = vmatprep.subr.bf16.mxu0 %v2857_v29  ;;  %v3329_v43 = vld [vmem:[%s4191_s2] ss:$0 sm:$0xff] }
  0xc9   : > { %v516_v51 = vmul.f32 %v3302_v25, %v3302_v25  ;;  %2588 = vmatpush3.bf16.msra.mxu0 %v2857_v29 }
  0xca   : > { %v559_v52 = vsel %vm419_vm0, %v515_v50, 0.0  ;;  %2589 = vmatprep.subr.bf16.mxu0 %v2858_v53 }
  0xcb   : > { %557 = vadd.xlane.f32.xlu1 %v556_v49  ;;  %560 = vadd.xlane.f32.xlu0 %v559_v52  ;;  %v562_v28 = vsel %vm419_vm0, %v516_v51, 0.0 }
  0xcd   : > { %2590 = vmatpush3.bf16.msra.mxu0 %v2858_v53 }
  0xcf   : > { %563 = vadd.xlane.f32.xlu1 %v562_v28 }
 0x13c   : > { %v519_v56 = vpop.xlane.xlu0 %518 }
 0x13d   : > { %v565_v57 = vmul.f32 0.03125, %v519_v56 }
 0x13f   : > { %v581_v58 = vadd.f32 1e-05, %v565_v57 }
 0x140   : > { %v522_v59 = vpop.xlane.xlu1 %521  ;;  %v525_v60 = vpop.xlane.xlu0 %524 }
 0x141   : > { %2861 = vrsqrt.f32 %v581_v58  ;;  %v566_v61 = vmul.f32 0.03125, %v522_v59  ;;  %v567_v62 = vmul.f32 0.03125, %v525_v60 }
 0x143   : > { %v582_v63 = vadd.f32 1e-05, %v566_v61  ;;  %v583_v2 = vadd.f32 1e-05, %v567_v62 }
 0x144   : > { %v528_v3 = vpop.xlane.xlu1 %527  ;;  %v531_v4 = vpop.xlane.xlu0 %530 }
 0x145   : > { %2863 = vrsqrt.f32 %v582_v63  ;;  %v568_v5 = vmul.f32 0.03125, %v528_v3  ;;  %v569_v6 = vmul.f32 0.03125, %v531_v4 }
 0x146   : > { %2865 = vrsqrt.f32 %v583_v2 }
 0x147   : > { %v584_v7 = vadd.f32 1e-05, %v568_v5  ;;  %v585_v8 = vadd.f32 1e-05, %v569_v6 }
 0x148   : > { %v534_v9 = vpop.xlane.xlu1 %533  ;;  %v537_v12 = vpop.xlane.xlu0 %536 }
 0x149   : > { %2867 = vrsqrt.f32 %v584_v7  ;;  %v570_v13 = vmul.f32 0.03125, %v534_v9  ;;  %v571_v14 = vmul.f32 0.03125, %v537_v12 }
 0x14a   : > { %2869 = vrsqrt.f32 %v585_v8 }
 0x14b   : > { %v2862_v15 = vpop.eup %2861  ;;  %v586_v18 = vadd.f32 1e-05, %v570_v13  ;;  %v587_v19 = vadd.f32 1e-05, %v571_v14 }
 0x14c   : > { %v540_v22 = vpop.xlane.xlu1 %539  ;;  %v543_v16 = vpop.xlane.xlu0 %542  ;;  %v613_v26 = vmul.f32 %v2862_v15, %v3222_v36 }
 0x14d   : > { %2871 = vrsqrt.f32 %v586_v18  ;;  %v572_v27 = vmul.f32 0.03125, %v540_v22  ;;  %v573_v30 = vmul.f32 0.03125, %v543_v16 }
 0x14e   : > { %2873 = vrsqrt.f32 %v587_v19  ;;  %v636_v41 = vmul.f32 %v3322_v31, %v613_v26 }
 0x14f   : > { %v2864_v32 = vpop.eup %2863  ;;  %v588_v33 = vadd.f32 1e-05, %v572_v27  ;;  %v589_v34 = vadd.f32 1e-05, %v573_v30 }
 0x150   : > { %v2866_v20 = vpop.eup %2865  ;;  %v546_v38 = vpop.xlane.xlu1 %545  ;;  %v614_v40 = vmul.f32 %v2864_v32, %v3230_v44  ;;  %v659_v28 = vadd.f32 %v3329_v43, %v636_v41 }
 0x151   : > { %v549_v39 = vpop.xlane.xlu0 %548  ;;  %2875 = vrsqrt.f32 %v588_v33  ;;  %v574_v36 = vmul.f32 0.03125, %v546_v38  ;;  %v615_v46 = vmul.f32 %v2866_v20, %v3224_v37 }
 0x152   : > { %v575_v42 = vmul.f32 0.03125, %v549_v39  ;;  %2877 = vrsqrt.f32 %v589_v34  ;;  %v637_v24 = vmul.f32 %v3322_v31, %v614_v40 }
 0x153   : > { %v2868_v48 = vpop.eup %2867  ;;  %v590_v49 = vadd.f32 1e-05, %v574_v36  ;;  %v638_v56 = vmul.f32 %v3322_v31, %v615_v46 }
 0x154   : > { %v591_v50 = vadd.f32 1e-05, %v575_v42  ;;  %v2870_v51 = vpop.eup %2869  ;;  %v552_v44 = vpop.xlane.xlu1 %551  ;;  %v660_v29 = vadd.f32 %v3329_v43, %v637_v24  ;;  %v616_v53 = vmul.f32 %v2868_v48, %v3232_v45 }
 0x155   : > { %v555_v52 = vpop.xlane.xlu0 %554  ;;  %2879 = vrsqrt.f32 %v590_v49  ;;  %v576_v57 = vmul.f32 0.03125, %v552_v44  ;;  %v617_v60 = vmul.f32 %v2870_v51, %v3240_v54  ;;  %v661_v45 = vadd.f32 %v3329_v43, %v638_v56 }
 0x156   : > { %v577_v37 = vmul.f32 0.03125, %v555_v52  ;;  %2881 = vrsqrt.f32 %v591_v50  ;;  %v675_v58 = vpack.c.bf16 %v660_v29, %v659_v28  ;;  %v639_v59 = vmul.f32 %v3322_v31, %v616_v53 }
 0x157   : > { %v2872_v61 = vpop.eup %2871  ;;  %v592_v62 = vadd.f32 1e-05, %v576_v57  ;;  %v640_v7 = vmul.f32 %v3322_v31, %v617_v60 }
 0x158   : > { %v593_v63 = vadd.f32 1e-05, %v577_v37  ;;  %v2874_v2 = vpop.eup %2873  ;;  %v558_v3 = vpop.xlane.xlu1 %557  ;;  %2591 = vmatprep.mubr.msk.bf16.mxu0 %vm419_vm0, %v675_v58  ;;  %v662_v5 = vadd.f32 %v3329_v43, %v639_v59  ;;  %v618_v6 = vmul.f32 %v2872_v61, %v3242_v55 }
 0x159   : > { %v561_v4 = vpop.xlane.xlu0 %560  ;;  %2883 = vrsqrt.f32 %v592_v62  ;;  %v578_v8 = vmul.f32 0.03125, %v558_v3  ;;  %v619_v54 = vmul.f32 %v2874_v2, %v3251_v0  ;;  %v663_v55 = vadd.f32 %v3329_v43, %v640_v7 }
 0x15a   : > { %v579_v9 = vmul.f32 0.03125, %v561_v4  ;;  %2885 = vrsqrt.f32 %v593_v63  ;;  %v676_v12 = vpack.c.bf16 %v662_v5, %v661_v45  ;;  %v641_v13 = vmul.f32 %v3322_v31, %v618_v6  ;;  %v3387_v4 = vld [vmem:[%s4193_s4] ss:$0 sm:$0xff] }
 0x15b   : > { %v2876_v14 = vpop.eup %2875  ;;  %v594_v15 = vadd.f32 1e-05, %v578_v8  ;;  %v642_v27 = vmul.f32 %v3322_v31, %v619_v54 }
 0x15c   : > { %v595_v18 = vadd.f32 1e-05, %v579_v9  ;;  %v2878_v19 = vpop.eup %2877  ;;  %v564_v22 = vpop.xlane.xlu1 %563  ;;  %2592 = vmatmul.mubr.msk.bf16.vlgmr.msra.gmra.mrb[0].mxu0 %vm419_vm0, %v676_v12  ;;  %v664_v16 = vadd.f32 %v3329_v43, %v641_v13  ;;  %v620_v26 = vmul.f32 %v2876_v14, %v3254_v1 }
 0x15d   : > { %2887 = vrsqrt.f32 %v594_v15  ;;  %v580_v0 = vmul.f32 0.03125, %v564_v22  ;;  %v621_v30 = vmul.f32 %v2878_v19, %v3263_v10  ;;  %v665_v39 = vadd.f32 %v3329_v43, %v642_v27 }
 0x15e   : > { %2889 = vrsqrt.f32 %v595_v18  ;;  %v677_v32 = vpack.c.bf16 %v664_v16, %v663_v55  ;;  %v643_v33 = vmul.f32 %v3322_v31, %v620_v26 }
 0x15f   : > { %v2880_v34 = vpop.eup %2879  ;;  %v596_v20 = vadd.f32 1e-05, %v580_v0  ;;  %v644_v41 = vmul.f32 %v3322_v31, %v621_v30 }
 0x160   : > { %v2882_v38 = vpop.eup %2881  ;;  %2595 = vmatprep.mubr.msk.bf16.mxu0 %vm419_vm0, %v677_v32  ;;  %v666_v40 = vadd.f32 %v3329_v43, %v643_v33  ;;  %v622_v1 = vmul.f32 %v2880_v34, %v3266_v11 }
 0x161   : > { %2891 = vrsqrt.f32 %v596_v20  ;;  %v623_v10 = vmul.f32 %v2882_v38, %v3275_v23  ;;  %v667_v48 = vadd.f32 %v3329_v43, %v644_v41 }
 0x162   : > { %v678_v36 = vpack.c.bf16 %v666_v40, %v665_v39  ;;  %v645_v42 = vmul.f32 %v3322_v31, %v622_v1 }
 0x163   : > { %v2884_v46 = vpop.eup %2883  ;;  %v646_v11 = vmul.f32 %v3322_v31, %v623_v10 }
 0x164   : > { %v2886_v24 = vpop.eup %2885  ;;  %2596 = vmatmul.mubr.msk.bf16.gmra.mrb[4].mxu0 %vm419_vm0, %v678_v36  ;;  %v668_v49 = vadd.f32 %v3329_v43, %v645_v42  ;;  %v624_v50 = vmul.f32 %v2884_v46, %v3278_v17 }
 0x165   : > { %v625_v51 = vmul.f32 %v2886_v24, %v3287_v35  ;;  %v669_v29 = vadd.f32 %v3329_v43, %v646_v11 }
 0x166   : > { %v679_v44 = vpack.c.bf16 %v668_v49, %v667_v48  ;;  %v647_v23 = vmul.f32 %v3322_v31, %v624_v50 }
 0x167   : > { %v2888_v52 = vpop.eup %2887  ;;  %v648_v57 = vmul.f32 %v3322_v31, %v625_v51 }
 0x168   : > { %v2890_v28 = vpop.eup %2889  ;;  %2599 = vmatprep.mubr.msk.bf16.mxu0 %vm419_vm0, %v679_v44  ;;  %v670_v53 = vadd.f32 %v3329_v43, %v647_v23  ;;  %v626_v56 = vmul.f32 %v2888_v52, %v3290_v21 }
 0x169   : > { %v627_v17 = vmul.f32 %v2890_v28, %v3299_v47  ;;  %v671_v59 = vadd.f32 %v3329_v43, %v648_v57 }
 0x16a   : > { %v680_v37 = vpack.c.bf16 %v670_v53, %v669_v29  ;;  %v649_v35 = vmul.f32 %v3322_v31, %v626_v56 }
 0x16b   : > { %v2892_v58 = vpop.eup %2891  ;;  %v650_v62 = vmul.f32 %v3322_v31, %v627_v17 }
 0x16c   : > { %2600 = vmatmul.mubr.msk.bf16.gmra.mrb[8].mxu0 %vm419_vm0, %v680_v37  ;;  %v672_v60 = vadd.f32 %v3329_v43, %v649_v35  ;;  %v628_v61 = vmul.f32 %v2892_v58, %v3302_v25 }
 0x16d   : > { %v673_v47 = vadd.f32 %v3329_v43, %v650_v62 }
 0x16e   : > { %v681_v63 = vpack.c.bf16 %v672_v60, %v671_v59  ;;  %v651_v21 = vmul.f32 %v3322_v31, %v628_v61 }
 0x170   : > { %2603 = vmatprep.mubr.msk.bf16.mxu0 %vm419_vm0, %v681_v63  ;;  %v674_v2 = vadd.f32 %v3329_v43, %v651_v21 }
 0x172   : > { %v682_v3 = vpack.c.bf16 %v674_v2, %v673_v47 }
 0x174   : > { %2604 = vmatmul.mubr.msk.bf16.gmra.mrb[12].mxu0 %vm419_vm0, %v682_v3 }
 0x22f   : > { %v2593_v25 = vpop.f32.mrb[0].mxu0 }
 0x230   : > { %v773_v45 = vadd.f32 %v2593_v25, %v3387_v4  ;;  %v764_v5 = vpop.f32.mrb[1].mxu0 }
 0x231   : > { %v765_v31 = vadd.f32 %v3387_v4, %v764_v5  ;;  %v2594_v6 = vpop.f32.mrb[2].mxu0 }
 0x232   : > { %v776_v7 = vadd.f32 %v2594_v6, %v3387_v4  ;;  %v767_v8 = vpop.f32.mrb[3].mxu0  ;;  %v861_v9 = vmul.f32 0.25, %v773_v45 }
 0x233   : > { %v768_v43 = vadd.f32 %v3387_v4, %v767_v8  ;;  %v859_v13 = vmul.f32 0.25, %v765_v31 }
 0x234   : > { %v862_v54 = vmul.f32 0.25, %v776_v7  ;;  %v3393_v12 = vpack.c.bf16 %v776_v7, %v773_v45 }
 0x235   : > { %v860_v14 = vmul.f32 0.25, %v768_v43  ;;  %v3395_v15 = vpack.c.bf16 %v768_v43, %v765_v31 }
 0x236   : > { %v3397_v18 = vpack.c.bf16 %v862_v54, %v861_v9  ;;  %897 = vrot.lane.b32.xlu1 %v3393_v12, %s3061_s21 }
 0x237   : > { %895 = vrot.lane.b32.xlu0 %v3395_v15, %s3061_s21  ;;  %v2597_v19 = vpop.f32.mrb[4].mxu0  ;;  %v3403_v22 = vpack.c.bf16 %v860_v14, %v859_v13 }
 0x238   : > { %v789_v55 = vadd.f32 %v2597_v19, %v3387_v4  ;;  %v780_v16 = vpop.f32.mrb[5].mxu0 }
 0x239   : > { %v781_v26 = vadd.f32 %v3387_v4, %v780_v16  ;;  %v2598_v27 = vpop.f32.mrb[6].mxu0  ;;  %2615 = vmatprep.mubr.msk.bf16.mxu1 %vm903_vm1, %v3403_v22 }
 0x23a   : > { %v792_v0 = vadd.f32 %v2598_v27, %v3387_v4  ;;  %v783_v30 = vpop.f32.mrb[7].mxu0  ;;  %v865_v33 = vmul.f32 0.25, %v789_v55 }
 0x23b   : > { %v784_v32 = vadd.f32 %v3387_v4, %v783_v30  ;;  %v863_v38 = vmul.f32 0.25, %v781_v26 }
 0x23c   : > { %v866_v34 = vmul.f32 0.25, %v792_v0  ;;  %v3411_v20 = vpack.c.bf16 %v792_v0, %v789_v55 }
 0x23d   : > { %v864_v39 = vmul.f32 0.25, %v784_v32  ;;  %v3413_v40 = vpack.c.bf16 %v784_v32, %v781_v26 }
 0x23e   : > { %v3415_v1 = vpack.c.bf16 %v866_v34, %v865_v33  ;;  %901 = vrot.lane.b32.xlu0 %v3411_v20, %s3061_s21 }
 0x23f   : > { %v3419_v41 = vpack.c.bf16 %v864_v39, %v863_v38  ;;  %899 = vrot.lane.b32.xlu1 %v3413_v40, %s3061_s21  ;;  %v2601_v10 = vpop.f32.mrb[8].mxu0 }
 0x240   : > { %v805_v36 = vadd.f32 %v2601_v10, %v3387_v4  ;;  %v796_v42 = vpop.f32.mrb[9].mxu0 }
 0x241   : > { %v797_v46 = vadd.f32 %v3387_v4, %v796_v42  ;;  %v2602_v24 = vpop.f32.mrb[10].mxu0 }
 0x242   : > { %v808_v48 = vadd.f32 %v2602_v24, %v3387_v4  ;;  %v799_v49 = vpop.f32.mrb[11].mxu0  ;;  %v869_v11 = vmul.f32 0.25, %v805_v36 }
 0x243   : > { %v800_v50 = vadd.f32 %v3387_v4, %v799_v49  ;;  %v867_v23 = vmul.f32 0.25, %v797_v46 }
 0x244   : > { %v870_v51 = vmul.f32 0.25, %v808_v48  ;;  %v3427_v44 = vpack.c.bf16 %v808_v48, %v805_v36 }
 0x245   : > { %v868_v52 = vmul.f32 0.25, %v800_v50  ;;  %v3429_v28 = vpack.c.bf16 %v800_v50, %v797_v46 }
 0x246   : > { %4201 = vst [vmem:[#allocation2_spill] sm:$0xff] %v3427_v44  ;;  %v3431_v29 = vpack.c.bf16 %v870_v51, %v869_v11  ;;  %v829_v11 = vld [vmem:[%s4194_s5 + $0x10] sm:$0xff]  ;;  %v3534_v51 = vld [vmem:[%s4194_s5] sm:$0xff] }
 0x247   : > { %4202 = vst [vmem:[#allocation3_spill] sm:$0xff] %v3429_v28  ;;  %v3433_v53 = vpack.c.bf16 %v868_v52, %v867_v23  ;;  %997 = vrot.lane.b32.xlu1 %v3429_v28, %s3061_s21  ;;  %v2605_v56 = vpop.f32.mrb[12].mxu0  ;;  %v3537_v52 = vld [vmem:[%s3526_s28 + $0x10] sm:$0xff] }
 0x248   : > { %v821_v57 = vadd.f32 %v2605_v56, %v3387_v4  ;;  %v812_v17 = vpop.f32.mrb[13].mxu0 }
 0x249   : > { %v813_v37 = vadd.f32 %v3387_v4, %v812_v17  ;;  %v2606_v35 = vpop.f32.mrb[14].mxu0  ;;  %2631 = vmatprep.mubr.msk.bf16.mxu0 %vm903_vm1, %v3433_v53  ;;  %v828_v17 = vld [vmem:[%s4194_s5 + $0x8] sm:$0xff] }
 0x24a   : > { %v824_v58 = vadd.f32 %v2606_v35, %v3387_v4  ;;  %v815_v59 = vpop.f32.mrb[15].mxu0  ;;  %v873_v61 = vmul.f32 0.25, %v821_v57  ;;  %v830_v35 = vld [vmem:[%s4194_s5 + $0x18] sm:$0xff] }
 0x24b   : > { %v816_v60 = vadd.f32 %v3387_v4, %v815_v59  ;;  %999 = vrot.lane.b32.xlu1 %v3427_v44, %s3061_s21  ;;  %v871_v21 = vmul.f32 0.25, %v813_v37  ;;  %v3547_v59 = vld [vmem:[%s3526_s28] sm:$0xff] }
 0x24c   : > { %v874_v62 = vmul.f32 0.25, %v824_v58  ;;  %v3445_v63 = vpack.c.bf16 %v824_v58, %v821_v57 }
 0x24d   : > { %v872_v47 = vmul.f32 0.25, %v816_v60  ;;  %v3447_v2 = vpack.c.bf16 %v816_v60, %v813_v37 }
 0x24e   : > { %v3449_v3 = vpack.c.bf16 %v874_v62, %v873_v61  ;;  %v3553_v62 = vld [vmem:[%s3526_s28 + $0x8] sm:$0xff] }
 0x24f   : > { %v3451_v25 = vpack.c.bf16 %v872_v47, %v871_v21  ;;  %1003 = vrot.lane.b32.xlu1 %v3445_v63, %s3061_s21  ;;  %1001 = vrot.lane.b32.xlu0 %v3447_v2, %s3061_s21 }
 0x253   : > { %1297 = vrot.lane.b32.xlu1 %v3393_v12, %s3062_s22  ;;  %1295 = vrot.lane.b32.xlu0 %v3395_v15, %s3062_s22 }
 0x257   : > { %1301 = vrot.lane.b32.xlu1 %v3411_v20, %s3062_s22  ;;  %1299 = vrot.lane.b32.xlu0 %v3413_v40, %s3062_s22 }
 0x25b   : > { %1487 = vrot.lane.b32.xlu1 %v3393_v12, %s3063_s23  ;;  %1384 = vrot.lane.b32.xlu0 %v3429_v28, %s3062_s22 }
 0x25f   : > { %1594 = vrot.lane.b32.xlu1 %v3429_v28, %s3063_s23  ;;  %1386 = vrot.lane.b32.xlu0 %v3427_v44, %s3062_s22 }
 0x263   : > { %1491 = vrot.lane.b32.xlu1 %v3411_v20, %s3063_s23  ;;  %1485 = vrot.lane.b32.xlu0 %v3395_v15, %s3063_s23 }
 0x267   : > { %1596 = vrot.lane.b32.xlu1 %v3427_v44, %s3063_s23  ;;  %1390 = vrot.lane.b32.xlu0 %v3445_v63, %s3062_s22 }
 0x26b   : > { %1388 = vrot.lane.b32.xlu1 %v3447_v2, %s3062_s22  ;;  %1489 = vrot.lane.b32.xlu0 %v3413_v40, %s3063_s23 }
 0x2a8   : > { %v898_v5 = vpop.permute.xlu1 %897 }
 0x2a9   : > { %v896_v4 = vpop.permute.xlu0 %895  ;;  %v920_v31 = vsel %vm903_vm1, %v898_v5, 0 }
 0x2aa   : > { %2755 = vmatprep.subr.msk.bf16.mxu1 %vm903_vm1, %v896_v4  ;;  %v917_v45 = vsel %vm903_vm1, %v896_v4, 0 }
 0x2ab   : > { %2608 = vmatpush3.bf16.xpose.msra.mxu1 %v917_v45 }
 0x2ac   : > { %2756 = vmatprep.subr.msk.bf16.mxu1 %vm903_vm1, %v898_v5  ;;  %v833_v5 = vld [vmem:[%s4194_s5 + $0x30] sm:$0xff] }
 0x2b0   : > { %v902_v9 = vpop.permute.xlu0 %901 }
 0x2b1   : > { %v900_v6 = vpop.permute.xlu1 %899  ;;  %v926_v14 = vsel %vm903_vm1, %v902_v9, 0 }
 0x2b2   : > { %v923_v8 = vsel %vm903_vm1, %v900_v6, 0 }
 0x2b3   : > { %2610 = vmatpush3.bf16.xpose.msra.mxu1 %v920_v31 }
 0x2b4   : > { %2757 = vmatprep.subr.msk.bf16.mxu1 %vm903_vm1, %v900_v6  ;;  %v3567_v6 = vld [vmem:[%s3526_s28 + $0x18] sm:$0xff] }
 0x2b9   : > { %v998_v7 = vpop.permute.xlu1 %997 }
 0x2ba   : > { %2759 = vmatprep.subr.msk.bf16.mxu0 %vm903_vm1, %v998_v7  ;;  %v1018_v43 = vsel %vm903_vm1, %v998_v7, 0 }
 0x2bb   : > { %2612 = vmatpush3.bf16.xpose.msra.mxu1 %v923_v8  ;;  %2624 = vmatpush3.bf16.xpose.msra.mxu0 %v1018_v43  ;;  %v834_v43 = vld [vmem:[%s4194_s5 + $0x38] sm:$0xff] }
 0x2bc   : > { %2758 = vmatprep.subr.msk.bf16.mxu1 %vm903_vm1, %v902_v9 }
 0x2bd   : > { %v1000_v54 = vpop.permute.xlu1 %999 }
 0x2be   : > { %2760 = vmatprep.subr.msk.bf16.mxu0 %vm903_vm1, %v1000_v54  ;;  %v1021_v19 = vsel %vm903_vm1, %v1000_v54, 0 }
 0x2c1   : > { %v1002_v13 = vpop.permute.xlu0 %1001  ;;  %v1004_v55 = vpop.permute.xlu1 %1003 }
 0x2c2   : > { %v1024_v27 = vsel %vm903_vm1, %v1002_v13, 0  ;;  %v1027_v34 = vsel %vm903_vm1, %v1004_v55, 0 }
 0x2c3   : > { %2614 = vmatpush3.bf16.xpose.msra.mxu1 %v926_v14  ;;  %2626 = vmatpush3.bf16.xpose.msra.mxu0 %v1021_v19  ;;  %v832_v14 = vld [vmem:[%s4194_s5 + $0x28] sm:$0xff] }
 0x2c4   : > { %2761 = vmatprep.subr.msk.bf16.mxu0 %vm903_vm1, %v1002_v13 }
 0x2c5   : > { %v1296_v16 = vpop.permute.xlu0 %1295  ;;  %v1298_v0 = vpop.permute.xlu1 %1297 }
 0x2c9   : > { %v1300_v26 = vpop.permute.xlu0 %1299  ;;  %v1302_v32 = vpop.permute.xlu1 %1301 }
 0x2ca   : > { %2616 = vmatmul.mubr.msk.bf16.vlgmr.msra.gmra.mrb[0].mxu1 %vm903_vm1, %v3397_v18 }
 0x2cb   : > { %2619 = vmatprep.mubr.msk.bf16.mxu1 %vm903_vm1, %v3419_v41  ;;  %2628 = vmatpush3.bf16.xpose.msra.mxu0 %v1024_v27  ;;  %v3589_v27 = vld [vmem:[%s3526_s28 + $0x30] sm:$0xff] }
 0x2cc   : > { %2762 = vmatprep.subr.msk.bf16.mxu0 %vm903_vm1, %v1004_v55  ;;  %v831_v55 = vld [vmem:[%s4194_s5 + $0x20] sm:$0xff] }
 0x2cd   : > { %v3496_v30 = vpop.permute.xlu0 %1384  ;;  %v1488_v10 = vpop.permute.xlu1 %1487 }
 0x2ce   : > { %v1509_v42 = vsel %vm903_vm1, %v1488_v10, 0 }
 0x2d1   : > { %v3498_v33 = vpop.permute.xlu0 %1386  ;;  %v3514_v24 = vpop.permute.xlu1 %1594 }
 0x2d2   : > { %2620 = vmatmul.mubr.msk.bf16.gmra.mrb[4].mxu1 %vm903_vm1, %v3415_v1 }
 0x2d3   : > { %2630 = vmatpush3.bf16.xpose.msra.mxu0 %v1027_v34 }
 0x2d4   : > { %2639 = vmatprep.subr.bf16.mxu0 %v1296_v16 }
 0x2d5   : > { %v1486_v38 = vpop.permute.xlu0 %1485  ;;  %v1492_v49 = vpop.permute.xlu1 %1491 }
 0x2d6   : > { %v1506_v39 = vsel %vm903_vm1, %v1486_v38, 0  ;;  %2763 = vmatprep.subr.msk.bf16.mxu1 %vm903_vm1, %v1486_v38  ;;  %v1515_v50 = vsel %vm903_vm1, %v1492_v49, 0  ;;  %v3592_v38 = vld [vmem:[%s3526_s28 + $0x28] sm:$0xff] }
 0x2d7   : > { %2672 = vmatpush3.bf16.xpose.msra.mxu1 %v1506_v39 }
 0x2d8   : > { %2764 = vmatprep.subr.msk.bf16.mxu1 %vm903_vm1, %v1488_v10 }
 0x2d9   : > { %v3506_v36 = vpop.permute.xlu0 %1390 }
 0x2da   : > { %2632 = vmatmul.mubr.msk.bf16.vlgmr.msra.gmra.mrb[16].mxu0 %vm903_vm1, %v3431_v29 }
 0x2db   : > { %2635 = vmatprep.mubr.msk.bf16.mxu0 %vm903_vm1, %v3451_v25  ;;  %2640 = vmatpush3.bf16.msra.mxu0 %v1296_v16 }
 0x2dc   : > { %2641 = vmatprep.subr.bf16.mxu0 %v1298_v0 }
 0x2dd   : > { %v1490_v46 = vpop.permute.xlu0 %1489 }
 0x2de   : > { %v1512_v48 = vsel %vm903_vm1, %v1490_v46, 0 }
 0x2df   : > { %2642 = vmatpush3.bf16.msra.mxu0 %v1298_v0  ;;  %2674 = vmatpush3.bf16.xpose.msra.mxu1 %v1509_v42 }
 0x2e0   : > { %2643 = vmatprep.subr.bf16.mxu0 %v1300_v26  ;;  %2765 = vmatprep.subr.msk.bf16.mxu1 %vm903_vm1, %v1490_v46 }
 0x2e2   : > { %2636 = vmatmul.mubr.msk.bf16.gmra.mrb[20].mxu0 %vm903_vm1, %v3449_v3 }
 0x2e3   : > { %2644 = vmatpush3.bf16.msra.mxu0 %v1300_v26  ;;  %v3586_v26 = vld [vmem:[%s3526_s28 + $0x38] sm:$0xff] }
 0x2e4   : > { %2645 = vmatprep.subr.bf16.mxu0 %v1302_v32 }
 0x2e7   : > { %2646 = vmatpush3.bf16.msra.mxu0 %v1302_v32  ;;  %2676 = vmatpush3.bf16.xpose.msra.mxu1 %v1512_v48  ;;  %v3603_v48 = vld [vmem:[%s3526_s28 + $0x20] sm:$0xff] }
 0x2e8   : > { %2655 = vmatprep.subr.bf16.mxu0 %v3496_v30  ;;  %2766 = vmatprep.subr.msk.bf16.mxu1 %vm903_vm1, %v1492_v49 }
 0x2ef   : > { %2678 = vmatpush3.bf16.xpose.msra.mxu1 %v1515_v50 }
 0x39d   : > { %v2617_v23 = vpop.f32.mrb[0].mxu1 }
 0x39e   : > { %v971_v56 = vadd.f32 %v2617_v23, %v829_v11  ;;  %v962_v57 = vpop.f32.mrb[1].mxu1 }
 0x39f   : > { %v963_v37 = vadd.f32 %v962_v57, %v3534_v51  ;;  %v2618_v58 = vpop.f32.mrb[2].mxu1 }
 0x3a0   : > { %v965_v60 = vpop.f32.mrb[3].mxu1  ;;  %v3550_v61 = vadd.f32 %v971_v56, %v3537_v52  ;;  %v974_v47 = vadd.f32 %v2618_v58, %v830_v35 }
 0x3a1   : > { %v966_v21 = vadd.f32 %v965_v60, %v828_v17  ;;  %v3558_v45 = vadd.f32 %v963_v37, %v3547_v59 }
 0x3a2   : > { %v1117_v4 = vsel %vm1110_vm2, %v3550_v61, -inf  ;;  %v3580_v19 = vadd.f32 %v974_v47, %v3567_v6  ;;  %v3619_v47 = vld [vmem:[%s3526_s28 + $0x50] sm:$0xff] }
 0x3a3   : > { %1118 = vmax.xlane.f32.xlu0 %v1117_v4  ;;  %v3564_v31 = vadd.f32 %v966_v21, %v3553_v62  ;;  %v1111_v13 = vsel %vm1110_vm2, %v3558_v45, -inf  ;;  %v3616_v21 = vld [vmem:[%s3526_s28 + $0x58] sm:$0xff] }
 0x3a4   : > { %v1120_v10 = vsel %vm1110_vm2, %v3580_v19, -inf }
 0x3a5   : > { %v2621_v7 = vpop.f32.mrb[4].mxu1  ;;  %v1114_v8 = vsel %vm1110_vm2, %v3564_v31, -inf }
 0x3a6   : > { %v987_v9 = vadd.f32 %v2621_v7, %v833_v5  ;;  %v978_v54 = vpop.f32.mrb[5].mxu1  ;;  %1115 = vmax.xlane.f32.xlu1 %v1114_v8 }
 0x3a7   : > { %v2622_v16 = vpop.f32.mrb[6].mxu1  ;;  %1112 = vmax.xlane.f32.xlu0 %v1111_v13  ;;  %v979_v39 = vadd.f32 %v978_v54, %v831_v55 }
 0x3a8   : > { %v990_v0 = vadd.f32 %v2622_v16, %v834_v43  ;;  %v981_v32 = vpop.f32.mrb[7].mxu1  ;;  %v3600_v46 = vadd.f32 %v987_v9, %v3589_v27  ;;  %v3624_v9 = vld [vmem:[%s3526_s28 + $0x48] sm:$0xff] }
 0x3a9   : > { %v982_v34 = vadd.f32 %v981_v32, %v832_v14  ;;  %v3613_v58 = vadd.f32 %v979_v39, %v3603_v48 }
 0x3aa   : > { %v3597_v42 = vadd.f32 %v990_v0, %v3586_v26  ;;  %v1129_v37 = vsel %vm1110_vm2, %v3600_v46, -inf }
 0x3ab   : > { %1121 = vmax.xlane.f32.xlu0 %v1120_v10  ;;  %v3608_v50 = vadd.f32 %v982_v34, %v3592_v38  ;;  %v1123_v13 = vsel %vm1110_vm2, %v3613_v58, -inf }
 0x3ac   : > { %v1132_v49 = vsel %vm1110_vm2, %v3597_v42, -inf }
 0x3ad   : > { %1133 = vmax.xlane.f32.xlu1 %v1132_v49  ;;  %v2633_v23 = vpop.f32.mrb[16].mxu0  ;;  %v1126_v8 = vsel %vm1110_vm2, %v3608_v50, -inf }
 0x3ae   : > { %v1072_v56 = vadd.f32 %v2633_v23, %v829_v11  ;;  %v1063_v57 = vpop.f32.mrb[17].mxu0 }
 0x3af   : > { %1130 = vmax.xlane.f32.xlu0 %v1129_v37  ;;  %v2634_v60 = vpop.f32.mrb[18].mxu0  ;;  %v1064_v54 = vadd.f32 %v1063_v57, %v3534_v51 }
 0x3b0   : > { %v1075_v4 = vadd.f32 %v2634_v60, %v830_v35  ;;  %v1066_v7 = vpop.f32.mrb[19].mxu0  ;;  %v3633_v0 = vadd.f32 %v1072_v56, %v3619_v47  ;;  %v3636_v35 = vld [vmem:[%s3526_s28 + $0x40] sm:$0xff]  ;;  %v3649_v56 = vld [vmem:[%s3526_s28 + $0x70] sm:$0xff] }
 0x3b1   : > { %v1067_v11 = vadd.f32 %v1066_v7, %v828_v17  ;;  %1127 = vmax.xlane.f32.xlu1 %v1126_v8  ;;  %v3646_v49 = vadd.f32 %v1064_v54, %v3636_v35 }
 0x3b2   : > { %v3630_v16 = vadd.f32 %v1075_v4, %v3616_v21  ;;  %v1141_v10 = vsel %vm1110_vm2, %v3633_v0, -inf }
 0x3b3   : > { %1124 = vmax.xlane.f32.xlu0 %v1123_v13  ;;  %v3641_v32 = vadd.f32 %v1067_v11, %v3624_v9  ;;  %v1135_v7 = vsel %vm1110_vm2, %v3646_v49, -inf  ;;  %v3659_v11 = vld [vmem:[%s3526_s28 + $0x60] sm:$0xff] }
 0x3b4   : > { %v1144_v17 = vsel %vm1110_vm2, %v3630_v16, -inf }
 0x3b5   : > { %1145 = vmax.xlane.f32.xlu1 %v1144_v17  ;;  %v2637_v51 = vpop.f32.mrb[20].mxu0  ;;  %v1138_v60 = vsel %vm1110_vm2, %v3641_v32, -inf  ;;  %v3679_v17 = vld [vmem:[%s3526_s28 + $0x68] sm:$0xff] }
 0x3b6   : > { %v1088_v34 = vadd.f32 %v2637_v51, %v833_v5  ;;  %v1079_v39 = vpop.f32.mrb[21].mxu0 }
 0x3b7   : > { %1142 = vmax.xlane.f32.xlu0 %v1141_v10  ;;  %v2638_v23 = vpop.f32.mrb[22].mxu0  ;;  %v1080_v5 = vadd.f32 %v1079_v39, %v831_v55  ;;  %v3673_v55 = vld [vmem:[%s3526_s28 + $0x78] sm:$0xff]  ;;  %v3688_v39 = vpop.permute.xlu1 %1596 }
 0x3b8   : > { %v1091_v57 = vadd.f32 %v2638_v23, %v834_v43  ;;  %v1082_v37 = vpop.f32.mrb[23].mxu0  ;;  %v3656_v8 = vadd.f32 %v1088_v34, %v3649_v56 }
 0x3b9   : > { %v1083_v4 = vadd.f32 %v1082_v37, %v832_v14  ;;  %1139 = vmax.xlane.f32.xlu1 %v1138_v60  ;;  %v3664_v54 = vadd.f32 %v1080_v5, %v3659_v11 }
 0x3ba   : > { %v1153_v43 = vsel %vm1110_vm2, %v3656_v8, -inf  ;;  %v3676_v13 = vadd.f32 %v1091_v57, %v3673_v55 }
 0x3bb   : > { %1136 = vmax.xlane.f32.xlu0 %v1135_v7  ;;  %v1147_v14 = vsel %vm1110_vm2, %v3664_v54, -inf  ;;  %v3684_v34 = vadd.f32 %v1083_v4, %v3679_v17 }
 0x3bc   : > { %v1156_v51 = vsel %vm1110_vm2, %v3676_v13, -inf }
 0x3bf   : > { %1154 = vmax.xlane.f32.xlu0 %v1153_v43 }
 0x3c3   : > { %1148 = vmax.xlane.f32.xlu0 %v1147_v14 }
 0x3ca   : > { %1479 = vrot.lane.b32.xlu1 %v3397_v18, %s3064_s30  ;;  %v1150_v18 = vsel %vm1110_vm2, %v3684_v34, -inf }
 0x3d9   : > { %1477 = vrot.lane.b32.xlu0 %v3403_v22, %s3064_s30  ;;  %v3690_v22 = vpop.permute.xlu1 %1388 }
 0x3ee   : > { %1157 = vmax.xlane.f32.xlu1 %v1156_v51 }
 0x3f2   : > { %1151 = vmax.xlane.f32.xlu1 %v1150_v18 }
 0x430   : > { %v1119_v10 = vpop.xlane.xlu0 %1118 }
 0x431   : > { %v1161_v23 = vsub.f32 %v3550_v61, %v1119_v10 }
 0x433   : > { %v1179_v57 = vmul.f32 1.442695, %v1161_v23  ;;  %v1116_v37 = vpop.xlane.xlu1 %1115 }
 0x434   : > { %v1113_v60 = vpop.xlane.xlu0 %1112  ;;  %v1160_v4 = vsub.f32 %v3564_v31, %v1116_v37 }
 0x435   : > { %2893 = vpow2.f32 %v1179_v57  ;;  %v1159_v5 = vsub.f32 %v3558_v45, %v1113_v60 }
 0x436   : > { %v1177_v18 = vmul.f32 1.442695, %v1160_v4 }
 0x437   : > { %v1175_v7 = vmul.f32 1.442695, %v1159_v5 }
 0x438   : > { %v1122_v43 = vpop.xlane.xlu0 %1121 }
 0x439   : > { %2895 = vpow2.f32 %v1175_v7  ;;  %v1162_v14 = vsub.f32 %v3580_v19, %v1122_v43 }
 0x43a   : > { %v1134_v51 = vpop.xlane.xlu1 %1133 }
 0x43b   : > { %v1181_v44 = vmul.f32 1.442695, %v1162_v14  ;;  %v1166_v23 = vsub.f32 %v3597_v42, %v1134_v51 }
 0x43c   : > { %v1131_v28 = vpop.xlane.xlu0 %1130 }
 0x43d   : > { %2897 = vpow2.f32 %v1181_v44  ;;  %v1165_v61 = vsub.f32 %v3600_v46, %v1131_v28  ;;  %v1189_v5 = vmul.f32 1.442695, %v1166_v23 }
 0x43e   : > { %2899 = vpow2.f32 %v1177_v18  ;;  %v1128_v57 = vpop.xlane.xlu1 %1127 }
 0x43f   : > { %v3697_v10 = vpop.eup %2893  ;;  %v1187_v45 = vmul.f32 1.442695, %v1165_v61  ;;  %v1164_v44 = vsub.f32 %v3608_v50, %v1128_v57 }
 0x440   : > { %v1125_v31 = vpop.xlane.xlu0 %1124  ;;  %v1213_v37 = vsel %vm1110_vm2, %v3697_v10, 0.0 }
 0x441   : > { %v1163_v19 = vsub.f32 %v3613_v58, %v1125_v31  ;;  %1214 = vadd.xlane.f32.xlu0 %v1213_v37  ;;  %2901 = vpow2.f32 %v1187_v45  ;;  %v1185_v43 = vmul.f32 1.442695, %v1164_v44 }
 0x442   : > { %v1146_v4 = vpop.xlane.xlu1 %1145 }
 0x443   : > { %v3703_v60 = vpop.eup %2895  ;;  %v1183_v28 = vmul.f32 1.442695, %v1163_v19  ;;  %v1170_v61 = vsub.f32 %v3630_v16, %v1146_v4 }
 0x444   : > { %v1143_v46 = vpop.xlane.xlu0 %1142  ;;  %v1207_v42 = vsel %vm1110_vm2, %v3703_v60, 0.0 }
 0x445   : > { %2903 = vpow2.f32 %v1183_v28  ;;  %1208 = vadd.xlane.f32.xlu0 %v1207_v42  ;;  %v1169_v58 = vsub.f32 %v3633_v0, %v1143_v46 }
 0x446   : > { %2905 = vpow2.f32 %v1189_v5  ;;  %v1140_v57 = vpop.xlane.xlu1 %1139  ;;  %v1197_v5 = vmul.f32 1.442695, %v1170_v61 }
 0x447   : > { %v3708_v7 = vpop.eup %2897  ;;  %2907 = vpow2.f32 %v1185_v43  ;;  %v1195_v23 = vmul.f32 1.442695, %v1169_v58 }
 0x448   : > { %v1137_v14 = vpop.xlane.xlu0 %1136  ;;  %v1216_v51 = vsel %vm1110_vm2, %v3708_v7, 0.0  ;;  %v3713_v18 = vpop.eup %2899 }
 0x449   : > { %v1167_v50 = vsub.f32 %v3646_v49, %v1137_v14  ;;  %1217 = vadd.xlane.f32.xlu1 %v1216_v51  ;;  %v1210_v37 = vsel %vm1110_vm2, %v3713_v18, 0.0  ;;  %v1168_v49 = vsub.f32 %v3641_v32, %v1140_v57 }
 0x44a   : > { %v1480_v32 = vpop.permute.xlu1 %1479 }
 0x44b   : > { %v1191_v45 = vmul.f32 1.442695, %v1167_v50  ;;  %v3719_v0 = vpop.eup %2901  ;;  %v1193_v42 = vmul.f32 1.442695, %v1168_v49 }
 0x44c   : > { %v1155_v31 = vpop.xlane.xlu0 %1154  ;;  %v1225_v16 = vsel %vm1110_vm2, %v3719_v0, 0.0 }
 0x44d   : > { %2909 = vpow2.f32 %v1191_v45  ;;  %1211 = vadd.xlane.f32.xlu1 %v1210_v37  ;;  %v1173_v49 = vsub.f32 %v3656_v8, %v1155_v31 }
 0x44e   : > { %2911 = vpow2.f32 %v1195_v23 }
 0x44f   : > { %v3721_v19 = vpop.eup %2903  ;;  %2913 = vpow2.f32 %v1197_v5 }
 0x450   : > { %v1149_v44 = vpop.xlane.xlu0 %1148  ;;  %v1219_v28 = vsel %vm1110_vm2, %v3721_v19, 0.0  ;;  %v3728_v46 = vpop.eup %2905  ;;  %2915 = vpow2.f32 %v1193_v42 }
 0x451   : > { %1226 = vadd.xlane.f32.xlu1 %v1225_v16  ;;  %1220 = vadd.xlane.f32.xlu0 %v1219_v28  ;;  %v1228_v43 = vsel %vm1110_vm2, %v3728_v46, 0.0  ;;  %v3732_v58 = vpop.eup %2907  ;;  %v1203_v28 = vmul.f32 1.442695, %v1173_v49  ;;  %v1171_v42 = vsub.f32 %v3664_v54, %v1149_v44 }
 0x452   : > { %v1222_v51 = vsel %vm1110_vm2, %v3732_v58, 0.0 }
 0x453   : > { %2917 = vpow2.f32 %v1203_v28 }
 0x454   : > { %v1478_v4 = vpop.permute.xlu0 %1477 }
 0x455   : > { %1229 = vadd.xlane.f32.xlu1 %v1228_v43  ;;  %2679 = vmatprep.mubr.msk.bf16.mxu1 %vm903_vm1, %v1478_v4  ;;  %v1199_v4 = vmul.f32 1.442695, %v1171_v42 }
 0x456   : > { %2680 = vmatmul.mubr.msk.bf16.vlgmr.msra.gmra.mrb[8].mxu1 %vm903_vm1, %v1480_v32 }
 0x457   : > { %v3736_v14 = vpop.eup %2909  ;;  %2919 = vpow2.f32 %v1199_v4 }
 0x458   : > { %v1231_v50 = vsel %vm1110_vm2, %v3736_v14, 0.0  ;;  %v3742_v61 = vpop.eup %2911 }
 0x459   : > { %1223 = vadd.xlane.f32.xlu1 %v1222_v51  ;;  %1232 = vadd.xlane.f32.xlu0 %v1231_v50  ;;  %v1237_v23 = vsel %vm1110_vm2, %v3742_v61, 0.0  ;;  %v3746_v45 = vpop.eup %2913 }
 0x45a   : > { %v1240_v57 = vsel %vm1110_vm2, %v3746_v45, 0.0  ;;  %v3750_v37 = vpop.eup %2915 }
 0x45b   : > { %v1234_v5 = vsel %vm1110_vm2, %v3750_v37, 0.0 }
 0x45d   : > { %1238 = vadd.xlane.f32.xlu1 %v1237_v23 }
 0x461   : > { %1241 = vadd.xlane.f32.xlu1 %v1240_v57  ;;  %v3762_v57 = vpop.eup %2917 }
 0x462   : > { %v3766_v8 = vpop.eup %2919 }
 0x463   : > { %v1243_v54 = vsel %vm1110_vm2, %v3766_v8, 0.0 }
 0x465   : > { %1235 = vadd.xlane.f32.xlu1 %v1234_v5 }
 0x46f   : > { %1598 = vrot.lane.b32.xlu0 %v3447_v2, %s3063_s23 }
 0x476   : > { %1481 = vrot.lane.b32.xlu1 %v3419_v41, %s3064_s30  ;;  %v1249_v41 = vsel %vm1110_vm2, %v3762_v57, 0.0 }
 0x47b   : > { %v1158_v16 = vpop.xlane.xlu1 %1157 }
 0x47c   : > { %v1174_v43 = vsub.f32 %v3676_v13, %v1158_v16 }
 0x47e   : > { %v1205_v51 = vmul.f32 1.442695, %v1174_v43 }
 0x47f   : > { %v1152_v32 = vpop.xlane.xlu1 %1151 }
 0x480   : > { %v1172_v50 = vsub.f32 %v3684_v34, %v1152_v32  ;;  %2921 = vpow2.f32 %v1205_v51 }
 0x482   : > { %v1201_v23 = vmul.f32 1.442695, %v1172_v50 }
 0x484   : > { %2923 = vpow2.f32 %v1201_v23 }
 0x48a   : > { %v3770_v13 = vpop.eup %2921 }
 0x48b   : > { %v1252_v34 = vsel %vm1110_vm2, %v3770_v13, 0.0 }
 0x48e   : > { %1250 = vadd.xlane.f32.xlu0 %v1249_v41  ;;  %v3774_v31 = vpop.eup %2923 }
 0x48f   : > { %v1246_v44 = vsel %vm1110_vm2, %v3774_v31, 0.0 }
 0x492   : > { %1244 = vadd.xlane.f32.xlu0 %v1243_v54 }
 0x496   : > { %1253 = vadd.xlane.f32.xlu0 %v1252_v34 }
 0x49a   : > { %1247 = vadd.xlane.f32.xlu1 %v1246_v44 }
 0x4ab   : > { %1600 = vrot.lane.b32.xlu1 %v3445_v63, %s3063_s23 }
 0x4ac   : > { %1483 = vrot.lane.b32.xlu0 %v3415_v1, %s3064_s30 }
 0x4af   : > { %1588 = vrot.lane.b32.xlu1 %v3431_v29, %s3064_s30 }
 0x4b0   : > { %1586 = vrot.lane.b32.xlu0 %v3433_v53, %s3064_s30 }
 0x4b3   : > { %1592 = vrot.lane.b32.xlu1 %v3449_v3, %s3064_s30 }
 0x4b4   : > { %1590 = vrot.lane.b32.xlu0 %v3451_v25, %s3064_s30 }
 0x4ce   : > { %v1215_v5 = vpop.xlane.xlu0 %1214 }
 0x4d2   : > { %v1209_v49 = vpop.xlane.xlu0 %1208 }
 0x4d6   : > { %v1218_v16 = vpop.xlane.xlu1 %1217 }
 0x4d7   : > { %2925 = vrcp.f32 %v1218_v16 }
 0x4d8   : > { %2927 = vrcp.f32 %v1209_v49 }
 0x4d9   : > { %2929 = vrcp.f32 %v1215_v5 }
 0x4da   : > { %v1212_v28 = vpop.xlane.xlu1 %1211 }
 0x4db   : > { %2931 = vrcp.f32 %v1212_v28 }
 0x4de   : > { %v1227_v1 = vpop.xlane.xlu1 %1226  ;;  %v1221_v29 = vpop.xlane.xlu0 %1220 }
 0x4e1   : > { %v2926_v42 = vpop.eup %2925 }
 0x4e2   : > { %v1230_v4 = vpop.xlane.xlu1 %1229  ;;  %v2928_v43 = vpop.eup %2927  ;;  %v1274_v3 = vmul.f32 %v2926_v42, %v3708_v7 }
 0x4e3   : > { %v2930_v53 = vpop.eup %2929  ;;  %2933 = vrcp.f32 %v1230_v4  ;;  %v1271_v51 = vmul.f32 %v2928_v43, %v3703_v60 }
 0x4e4   : > { %2935 = vrcp.f32 %v1221_v29  ;;  %v1273_v23 = vmul.f32 %v2930_v53, %v3697_v10 }
 0x4e5   : > { %v2932_v32 = vpop.eup %2931  ;;  %2937 = vrcp.f32 %v1227_v1 }
 0x4e6   : > { %v1224_v25 = vpop.xlane.xlu1 %1223  ;;  %v1272_v50 = vmul.f32 %v2932_v32, %v3713_v18  ;;  %v1288_v54 = vpack.c.bf16 %v1274_v3, %v1273_v23  ;;  %v1233_v44 = vpop.xlane.xlu0 %1232  ;;  %v3835_v23 = vld [vmem:[%s4194_s5 + $0x40] sm:$0xff] }
 0x4e7   : > { %2939 = vrcp.f32 %v1224_v25 }
 0x4e8   : > { %v1287_v41 = vpack.c.bf16 %v1272_v50, %v1271_v51 }
 0x4ea   : > { %v1239_v34 = vpop.xlane.xlu1 %1238  ;;  %2647 = vmatprep.mubr.msk.bf16.mxu0 %vm1110_vm2, %v1287_v41 }
 0x4eb   : > { %2648 = vmatmul.mubr.msk.bf16.vlgmr.msra.gmra.mrb[24].mxu0 %vm1110_vm2, %v1288_v54 }
 0x4ec   : > { %2656 = vmatpush3.bf16.msra.mxu0 %v3496_v30 }
 0x4ed   : > { %2657 = vmatprep.subr.bf16.mxu0 %v3498_v33  ;;  %v2934_v7 = vpop.eup %2933 }
 0x4ee   : > { %v1242_v5 = vpop.xlane.xlu1 %1241  ;;  %v2936_v60 = vpop.eup %2935  ;;  %v1278_v18 = vmul.f32 %v2934_v7, %v3728_v46 }
 0x4ef   : > { %v2938_v49 = vpop.eup %2937  ;;  %2941 = vrcp.f32 %v1242_v5  ;;  %v1275_v30 = vmul.f32 %v2936_v60, %v3721_v19 }
 0x4f0   : > { %2658 = vmatpush3.bf16.msra.mxu0 %v3498_v33  ;;  %2943 = vrcp.f32 %v1233_v44  ;;  %v1277_v1 = vmul.f32 %v2938_v49, %v3719_v0 }
 0x4f1   : > { %v2940_v10 = vpop.eup %2939  ;;  %2659 = vmatprep.subr.bf16.mxu0 %v3690_v22  ;;  %2945 = vrcp.f32 %v1239_v34  ;;  %v3840_v34 = vld [vmem:[%s4194_s5 + $0x48] sm:$0xff] }
 0x4f2   : > { %v1236_v16 = vpop.xlane.xlu1 %1235  ;;  %v1276_v28 = vmul.f32 %v2940_v10, %v3732_v58  ;;  %v1290_v33 = vpack.c.bf16 %v1278_v18, %v1277_v1  ;;  %v3848_v10 = vld [vmem:[%s4194_s5 + $0x58] sm:$0xff] }
 0x4f3   : > { %2947 = vrcp.f32 %v1236_v16 }
 0x4f4   : > { %2660 = vmatpush3.bf16.msra.mxu0 %v3690_v22  ;;  %v1289_v42 = vpack.c.bf16 %v1276_v28, %v1275_v30 }
 0x4f5   : > { %2661 = vmatprep.subr.bf16.mxu0 %v3506_v36 }
 0x4f6   : > { %v1482_v29 = vpop.permute.xlu1 %1481  ;;  %2651 = vmatprep.mubr.msk.bf16.mxu0 %vm1110_vm2, %v1289_v42 }
 0x4f7   : > { %2652 = vmatmul.mubr.msk.bf16.gmra.mrb[28].mxu0 %vm1110_vm2, %v1290_v33  ;;  %2683 = vmatprep.mubr.msk.bf16.mxu1 %vm903_vm1, %v1482_v29 }
 0x4f8   : > { %2662 = vmatpush3.bf16.msra.mxu0 %v3506_v36  ;;  %v1615_v36 = vsel %vm903_vm1, %v3514_v24, 0 }
 0x4f9   : > { %2767 = vmatprep.subr.msk.bf16.mxu0 %vm903_vm1, %v3514_v24  ;;  %v2942_v19 = vpop.eup %2941 }
 0x4fa   : > { %v2944_v0 = vpop.eup %2943  ;;  %v1282_v58 = vmul.f32 %v2942_v19, %v3746_v45  ;;  %v1599_v45 = vpop.permute.xlu0 %1598 }
 0x4fb   : > { %v2946_v46 = vpop.eup %2945  ;;  %v1279_v4 = vmul.f32 %v2944_v0, %v3736_v14  ;;  %v1618_v14 = vsel %vm903_vm1, %v3688_v39, 0 }
 0x4fc   : > { %v1281_v53 = vmul.f32 %v2946_v46, %v3742_v61  ;;  %v1621_v61 = vsel %vm903_vm1, %v1599_v45, 0 }
 0x4fd   : > { %v2948_v22 = vpop.eup %2947 }
 0x4fe   : > { %v1280_v43 = vmul.f32 %v2948_v22, %v3750_v37  ;;  %v1292_v3 = vpack.c.bf16 %v1282_v58, %v1281_v53 }
 0x500   : > { %v1291_v32 = vpack.c.bf16 %v1280_v43, %v1279_v4 }
 0x502   : > { %2663 = vmatprep.mubr.msk.bf16.mxu0 %vm1110_vm2, %v1291_v32 }
 0x503   : > { %2664 = vmatmul.mubr.msk.bf16.vlgmr.msra.gmra.mrb[32].mxu0 %vm1110_vm2, %v1292_v3 }
 0x504   : > { %2688 = vmatpush3.bf16.xpose.msra.mxu0 %v1615_v36 }
 0x505   : > { %2768 = vmatprep.subr.msk.bf16.mxu0 %vm903_vm1, %v3688_v39  ;;  %v3830_v39 = vld [vmem:[%s4194_s5 + $0x50] sm:$0xff] }
 0x50c   : > { %2690 = vmatpush3.bf16.xpose.msra.mxu0 %v1618_v14 }
 0x50d   : > { %2769 = vmatprep.subr.msk.bf16.mxu0 %vm903_vm1, %v1599_v45 }
 0x514   : > { %2692 = vmatpush3.bf16.xpose.msra.mxu0 %v1621_v61 }
 0x51b   : > { %v1251_v37 = vpop.xlane.xlu0 %1250 }
 0x51f   : > { %v1245_v25 = vpop.xlane.xlu0 %1244 }
 0x523   : > { %v1254_v51 = vpop.xlane.xlu0 %1253 }
 0x524   : > { %2949 = vrcp.f32 %v1254_v51 }
 0x525   : > { %2951 = vrcp.f32 %v1245_v25 }
 0x526   : > { %2953 = vrcp.f32 %v1251_v37 }
 0x527   : > { %v1248_v24 = vpop.xlane.xlu1 %1247  ;;  %v1484_v50 = vpop.permute.xlu0 %1483 }
 0x528   : > { %2955 = vrcp.f32 %v1248_v24  ;;  %2684 = vmatmul.mubr.msk.bf16.gmra.mrb[12].mxu1 %vm903_vm1, %v1484_v50 }
 0x529   : > { %v2681_v41 = vpop.f32.mrb[8].mxu1 }
 0x52a   : > { %v1551_v54 = vpop.f32.mrb[9].mxu1  ;;  %v1560_v7 = vadd.f32 %v2681_v41, %v3830_v39 }
 0x52b   : > { %v1552_v44 = vadd.f32 %v1551_v54, %v3835_v23  ;;  %v1601_v5 = vpop.permute.xlu1 %1600  ;;  %v2682_v60 = vpop.f32.mrb[10].mxu1 }
 0x52c   : > { %v1624_v49 = vsel %vm903_vm1, %v1601_v5, 0  ;;  %v1554_v18 = vpop.f32.mrb[11].mxu1  ;;  %2770 = vmatprep.subr.msk.bf16.mxu0 %vm903_vm1, %v1601_v5  ;;  %v1563_v1 = vadd.f32 %v2682_v60, %v3848_v10  ;;  %v1693_v29 = vadd.f32 %v1560_v7, %v3537_v52  ;;  %v1587_v36 = vpop.permute.xlu0 %1586 }
 0x52d   : > { %v1555_v16 = vadd.f32 %v1554_v18, %v3840_v34  ;;  %2694 = vmatpush3.bf16.xpose.msra.mxu0 %v1624_v49  ;;  %v1691_v30 = vadd.f32 %v1552_v44, %v3547_v59 }
 0x52e   : > { %v2950_v28 = vpop.eup %2949  ;;  %v1694_v58 = vadd.f32 %v1563_v1, %v3567_v6  ;;  %v1713_v4 = vsel %vm1110_vm2, %v1693_v29, -inf }
 0x52f   : > { %v3855_v42 = vadd.f32 %v1555_v16, %v3553_v62  ;;  %v1707_v33 = vsel %vm1110_vm2, %v1691_v30, -inf  ;;  %v2952_v19 = vpop.eup %2951  ;;  %v1286_v59 = vmul.f32 %v2950_v28, %v3770_v13  ;;  %v1589_v6 = vpop.permute.xlu1 %1588 }
 0x530   : > { %1708 = vmax.xlane.f32.xlu0 %v1707_v33  ;;  %v2954_v0 = vpop.eup %2953  ;;  %v1283_v62 = vmul.f32 %v2952_v19, %v3766_v8  ;;  %v1716_v3 = vsel %vm1110_vm2, %v1694_v58, -inf  ;;  %v1591_v13 = vpop.permute.xlu0 %1590  ;;  %v841_v19 = vld [vmem:[%s4194_s5 + $0x70] sm:$0xff] }
 0x531   : > { %v1710_v46 = vsel %vm1110_vm2, %v3855_v42, -inf  ;;  %v1285_v52 = vmul.f32 %v2954_v0, %v3762_v57  ;;  %v839_v0 = vld [vmem:[%s4194_s5 + $0x60] sm:$0xff] }
 0x532   : > { %v2956_v22 = vpop.eup %2955  ;;  %1711 = vmax.xlane.f32.xlu1 %v1710_v46 }
 0x533   : > { %v1284_v43 = vmul.f32 %v2956_v22, %v3774_v31  ;;  %v1294_v32 = vpack.c.bf16 %v1286_v59, %v1285_v52  ;;  %v1593_v8 = vpop.permute.xlu1 %1592 }
 0x534   : > { %1714 = vmax.xlane.f32.xlu0 %v1713_v4 }
 0x535   : > { %v1293_v53 = vpack.c.bf16 %v1284_v43, %v1283_v62 }
 0x537   : > { %2667 = vmatprep.mubr.msk.bf16.mxu0 %vm1110_vm2, %v1293_v53 }
 0x538   : > { %1717 = vmax.xlane.f32.xlu0 %v1716_v3  ;;  %2668 = vmatmul.mubr.msk.bf16.gmra.mrb[36].mxu0 %vm1110_vm2, %v1294_v32 }
 0x539   : > { %2695 = vmatprep.mubr.msk.bf16.mxu0 %vm903_vm1, %v1587_v36 }
 0x540   : > { %2696 = vmatmul.mubr.msk.bf16.vlgmr.msra.gmra.mrb[40].mxu0 %vm903_vm1, %v1589_v6 }
 0x541   : > { %2699 = vmatprep.mubr.msk.bf16.mxu0 %vm903_vm1, %v1591_v13 }
 0x548   : > { %2700 = vmatmul.mubr.msk.bf16.gmra.mrb[44].mxu0 %vm903_vm1, %v1593_v8 }
 0x5bd   : > { %v1709_v7 = vpop.xlane.xlu0 %1708 }
 0x5be   : > { %v3874_v57 = vpop.f32.mrb[24].mxu0  ;;  %v1755_v16 = vsub.f32 %v1691_v30, %v1709_v7  ;;  %v842_v30 = vld [vmem:[%s4194_s5 + $0x78] sm:$0xff] }
 0x5bf   : > { %v3876_v31 = vpop.f32.mrb[25].mxu0  ;;  %v1712_v18 = vpop.xlane.xlu1 %1711 }
 0x5c0   : > { %v3878_v14 = vpop.f32.mrb[26].mxu0  ;;  %v1756_v1 = vsub.f32 %v3855_v42, %v1712_v18  ;;  %v1771_v22 = vmul.f32 1.442695, %v1755_v16  ;;  %v840_v42 = vld [vmem:[%s4194_s5 + $0x68] sm:$0xff] }
 0x5c1   : > { %v3880_v45 = vpop.f32.mrb[27].mxu0  ;;  %v1715_v44 = vpop.xlane.xlu0 %1714 }
 0x5c2   : > { %v1757_v60 = vsub.f32 %v1693_v29, %v1715_v44  ;;  %v1773_v62 = vmul.f32 1.442695, %v1756_v1 }
 0x5c4   : > { %v1775_v28 = vmul.f32 1.442695, %v1757_v60 }
 0x5c5   : > { %v1718_v5 = vpop.xlane.xlu0 %1717 }
 0x5c6   : > { %v1758_v49 = vsub.f32 %v1694_v58, %v1718_v5  ;;  %2957 = vpow2.f32 %v1775_v28 }
 0x5c8   : > { %v1777_v33 = vmul.f32 1.442695, %v1758_v49 }
 0x5ca   : > { %v3882_v61 = vpop.f32.mrb[28].mxu0  ;;  %2959 = vpow2.f32 %v1777_v33 }
 0x5cb   : > { %v3884_v37 = vpop.f32.mrb[29].mxu0  ;;  %2961 = vpow2.f32 %v1771_v22 }
 0x5cc   : > { %v3886_v25 = vpop.f32.mrb[30].mxu0  ;;  %2963 = vpow2.f32 %v1773_v62 }
 0x5cd   : > { %v3888_v51 = vpop.f32.mrb[31].mxu0 }
 0x5d0   : > { %v3921_v7 = vpop.eup %2957 }
 0x5d4   : > { %v3924_v44 = vpop.eup %2959 }
 0x5d5   : > { %v3928_v5 = vpop.eup %2961  ;;  %v1812_v60 = vsel %vm1110_vm2, %v3924_v44, 0.0 }
 0x5d6   : > { %v3890_v24 = vpop.f32.mrb[32].mxu0  ;;  %v3934_v49 = vpop.eup %2963  ;;  %v1803_v28 = vsel %vm1110_vm2, %v3928_v5, 0.0 }
 0x5d7   : > { %v3892_v50 = vpop.f32.mrb[33].mxu0  ;;  %v1806_v33 = vsel %vm1110_vm2, %v3934_v49, 0.0 }
 0x5d8   : > { %v3894_v41 = vpop.f32.mrb[34].mxu0 }
 0x5d9   : > { %v3896_v54 = vpop.f32.mrb[35].mxu0 }
 0x5fb   : > { %v2685_v46 = vpop.f32.mrb[12].mxu1 }
 0x5fc   : > { %v1567_v59 = vpop.f32.mrb[13].mxu1  ;;  %v1576_v29 = vadd.f32 %v2685_v46, %v841_v19 }
 0x5fd   : > { %v1568_v58 = vadd.f32 %v1567_v59, %v839_v0  ;;  %v2686_v4 = vpop.f32.mrb[14].mxu1 }
 0x5fe   : > { %v1570_v43 = vpop.f32.mrb[15].mxu1  ;;  %v1579_v53 = vadd.f32 %v2686_v4, %v842_v30  ;;  %v3913_v3 = vadd.f32 %v1576_v29, %v3589_v27 }
 0x5ff   : > { %v1695_v52 = vadd.f32 %v1568_v58, %v3603_v48  ;;  %v1571_v32 = vadd.f32 %v1570_v43, %v840_v42 }
 0x600   : > { %v1698_v13 = vadd.f32 %v1579_v53, %v3586_v26  ;;  %v1725_v48 = vsel %vm1110_vm2, %v3913_v3, -inf }
 0x601   : > { %v1696_v36 = vadd.f32 %v1571_v32, %v3592_v38  ;;  %v1719_v6 = vsel %vm1110_vm2, %v1695_v52, -inf  ;;  %v1809_v38 = vsel %vm1110_vm2, %v3921_v7, 0.0 }
 0x602   : > { %1720 = vmax.xlane.f32.xlu0 %v1719_v6  ;;  %v1728_v27 = vsel %vm1110_vm2, %v1698_v13, -inf }
 0x603   : > { %v1722_v8 = vsel %vm1110_vm2, %v1696_v36, -inf }
 0x604   : > { %1723 = vmax.xlane.f32.xlu1 %v1722_v8 }
 0x606   : > { %1726 = vmax.xlane.f32.xlu0 %v1725_v48 }
 0x608   : > { %1729 = vmax.xlane.f32.xlu1 %v1728_v27 }
 0x60a   : > { %1810 = vadd.xlane.f32.xlu0 %v1809_v38 }
 0x60b   : > { %v3930_v26 = vpop.f32.mrb[36].mxu0 }
 0x60c   : > { %4203 = vst [vmem:[#allocation4_spill] sm:$0xff] %v3930_v26  ;;  %v3936_v18 = vpop.f32.mrb[37].mxu0  ;;  %1813 = vadd.xlane.f32.xlu1 %v1812_v60 }
 0x60d   : > { %4204 = vst [vmem:[#allocation5_spill] sm:$0xff] %v3936_v18  ;;  %v3938_v16 = vpop.f32.mrb[38].mxu0 }
 0x60e   : > { %v3942_v1 = vpop.f32.mrb[39].mxu0  ;;  %1804 = vadd.xlane.f32.xlu0 %v1803_v28 }
 0x60f   : > { %4205 = vst [vmem:[#allocation6_spill] sm:$0xff] %v3942_v1 }
 0x610   : > { %1807 = vadd.xlane.f32.xlu1 %v1806_v33 }
 0x613   : > { %v2697_v46 = vpop.f32.mrb[40].mxu0 }
 0x614   : > { %v1660_v22 = vpop.f32.mrb[41].mxu0 }
 0x615   : > { %v2698_v59 = vpop.f32.mrb[42].mxu0 }
 0x616   : > { %v1663_v29 = vpop.f32.mrb[43].mxu0 }
 0x61b   : > { %v2701_v58 = vpop.f32.mrb[44].mxu0 }
 0x61c   : > { %v1685_v4 = vadd.f32 %v2701_v58, %v841_v19  ;;  %v1676_v62 = vpop.f32.mrb[45].mxu0 }
 0x61d   : > { %v1677_v43 = vadd.f32 %v1676_v62, %v839_v0  ;;  %v2702_v53 = vpop.f32.mrb[46].mxu0 }
 0x61e   : > { %v3946_v32 = vadd.f32 %v2702_v53, %v842_v30  ;;  %v1679_v6 = vpop.f32.mrb[47].mxu0  ;;  %v1669_v30 = vadd.f32 %v2697_v46, %v3830_v39 }
 0x61f   : > { %v3948_v8 = vadd.f32 %v1679_v6, %v840_v42 }
 0x68f   : > { %v1721_v48 = vpop.xlane.xlu0 %1720 }
 0x690   : > { %v1759_v27 = vsub.f32 %v1695_v52, %v1721_v48  ;;  %v1672_v52 = vadd.f32 %v2698_v59, %v3848_v10 }
 0x691   : > { %v1724_v38 = vpop.xlane.xlu1 %1723 }
 0x692   : > { %v1779_v60 = vmul.f32 1.442695, %v1759_v27  ;;  %v1760_v28 = vsub.f32 %v1696_v36, %v1724_v38  ;;  %v3964_v10 = vadd.f32 %v1672_v52, %v3616_v21 }
 0x693   : > { %v1727_v33 = vpop.xlane.xlu0 %1726 }
 0x694   : > { %2965 = vpow2.f32 %v1779_v60  ;;  %v1781_v18 = vmul.f32 1.442695, %v1760_v28  ;;  %v1761_v36 = vsub.f32 %v3913_v3, %v1727_v33  ;;  %v1740_v21 = vsel %vm1110_vm2, %v3964_v10, -inf }
 0x695   : > { %v1730_v1 = vpop.xlane.xlu1 %1729 }
 0x696   : > { %2967 = vpow2.f32 %v1781_v18  ;;  %v1762_v19 = vsub.f32 %v1698_v13, %v1730_v1  ;;  %v3956_v18 = vadd.f32 %v1669_v30, %v3619_v47  ;;  %v1661_v13 = vadd.f32 %v1660_v22, %v3835_v23 }
 0x697   : > { %v1811_v26 = vpop.xlane.xlu0 %1810  ;;  %v1664_v1 = vadd.f32 %v1663_v29, %v3840_v34  ;;  %v1783_v46 = vmul.f32 1.442695, %v1761_v36 }
 0x698   : > { %2969 = vrcp.f32 %v1811_v26  ;;  %v1785_v42 = vmul.f32 1.442695, %v1762_v19  ;;  %v1699_v23 = vadd.f32 %v1661_v13, %v3636_v35  ;;  %v1737_v22 = vsel %vm1110_vm2, %v3956_v18, -inf }
 0x699   : > { %v1814_v0 = vpop.xlane.xlu1 %1813  ;;  %v1700_v6 = vadd.f32 %v1664_v1, %v3624_v9  ;;  %v1705_v35 = vadd.f32 %v1685_v4, %v3649_v56 }
 0x69a   : > { %2971 = vrcp.f32 %v1814_v0  ;;  %v1731_v27 = vsel %vm1110_vm2, %v1699_v23, -inf }
 0x69b   : > { %v1805_v58 = vpop.xlane.xlu0 %1804  ;;  %v1734_v60 = vsel %vm1110_vm2, %v1700_v6, -inf  ;;  %v1749_v56 = vsel %vm1110_vm2, %v1705_v35, -inf }
 0x69c   : > { %2973 = vrcp.f32 %v1805_v58 }
 0x69d   : > { %v1808_v62 = vpop.xlane.xlu1 %1807 }
 0x69e   : > { %v3952_v53 = vpop.eup %2965  ;;  %2975 = vrcp.f32 %v1808_v62 }
 0x69f   : > { %v1815_v39 = vsel %vm1110_vm2, %v3952_v53, 0.0  ;;  %2977 = vpow2.f32 %v1785_v42 }
 0x6a0   : > { %v3961_v26 = vpop.eup %2967  ;;  %1816 = vadd.xlane.f32.xlu0 %v1815_v39  ;;  %2979 = vpow2.f32 %v1783_v46 }
 0x6a1   : > { %v1818_v3 = vsel %vm1110_vm2, %v3961_v26, 0.0 }
 0x6a2   : > { %1819 = vadd.xlane.f32.xlu1 %v1818_v3  ;;  %v2970_v47 = vpop.eup %2969 }
 0x6a3   : > { %v3976_v34 = vmul.f32 %v2970_v47, %v3921_v7 }
 0x6a4   : > { %1738 = vmax.xlane.f32.xlu0 %v1737_v22  ;;  %v2972_v59 = vpop.eup %2971 }
 0x6a5   : > { %v3979_v29 = vmul.f32 %v2972_v59, %v3924_v44  ;;  %v1703_v44 = vadd.f32 %v1677_v43, %v3659_v11  ;;  %v4010_v11 = vadd.f32 %v3946_v32, %v3673_v55  ;;  %v4014_v43 = vadd.f32 %v3948_v8, %v3679_v17 }
 0x6a6   : > { %v2974_v48 = vpop.eup %2973  ;;  %1741 = vmax.xlane.f32.xlu1 %v1740_v21 }
 0x6a7   : > { %v1884_v9 = vpack.c.bf16 %v3979_v29, %v3976_v34  ;;  %v1867_v28 = vmul.f32 %v2974_v48, %v3928_v5  ;;  %v1743_v0 = vsel %vm1110_vm2, %v1703_v44, -inf }
 0x6a8   : > { %v2976_v38 = vpop.eup %2975  ;;  %1732 = vmax.xlane.f32.xlu0 %v1731_v27 }
 0x6a9   : > { %v1868_v7 = vmul.f32 %v2976_v38, %v3934_v49  ;;  %v3988_v33 = vpop.eup %2977 }
 0x6aa   : > { %1735 = vmax.xlane.f32.xlu1 %v1734_v60  ;;  %v1824_v19 = vsel %vm1110_vm2, %v3988_v33, 0.0  ;;  %v3996_v5 = vpop.eup %2979 }
 0x6ab   : > { %v1883_v4 = vpack.c.bf16 %v1868_v7, %v1867_v28  ;;  %v1821_v49 = vsel %vm1110_vm2, %v3996_v5, 0.0 }
 0x6ac   : > { %1750 = vmax.xlane.f32.xlu0 %v1749_v56 }
 0x6ad   : > { %2711 = vmatprep.mubr.msk.bf16.mxu1 %vm1110_vm2, %v1883_v4 }
 0x6ae   : > { %1825 = vadd.xlane.f32.xlu1 %v1824_v19 }
 0x6b0   : > { %1744 = vmax.xlane.f32.xlu0 %v1743_v0 }
 0x6b4   : > { %1822 = vadd.xlane.f32.xlu0 %v1821_v49 }
 0x6bf   : > { %1893 = vrot.lane.b32.xlu1 %v3393_v12, %s3065_s18  ;;  %v1752_v12 = vsel %vm1110_vm2, %v4010_v11, -inf }
 0x6ca   : > { %1891 = vrot.lane.b32.xlu0 %v3395_v15, %s3065_s18  ;;  %v1746_v15 = vsel %vm1110_vm2, %v4014_v43, -inf }
 0x6ce   : > { %1895 = vrot.lane.b32.xlu0 %v3413_v40, %s3065_s18  ;;  %v4206_v40 = vld [vmem:[#allocation3_spill] sm:$0xff] }
 0x6d2   : > { %1897 = vrot.lane.b32.xlu0 %v3411_v20, %s3065_s18  ;;  %v4207_v20 = vld [vmem:[#allocation2_spill] sm:$0xff] }
 0x6e3   : > { %1753 = vmax.xlane.f32.xlu1 %v1752_v12 }
 0x6e7   : > { %1747 = vmax.xlane.f32.xlu1 %v1746_v15 }
 0x6f8   : > { %1980 = vrot.lane.b32.xlu1 %v4206_v40, %s3065_s18 }
 0x6fc   : > { %1982 = vrot.lane.b32.xlu1 %v4207_v20, %s3065_s18 }
 0x72d   : > { %v1817_v55 = vpop.xlane.xlu0 %1816 }
 0x72f   : > { %v1820_v32 = vpop.xlane.xlu1 %1819 }
 0x731   : > { %v1739_v30 = vpop.xlane.xlu0 %1738 }
 0x732   : > { %v1765_v17 = vsub.f32 %v3956_v18, %v1739_v30 }
 0x733   : > { %v1742_v8 = vpop.xlane.xlu1 %1741 }
 0x734   : > { %v1791_v58 = vmul.f32 1.442695, %v1765_v17  ;;  %v1766_v42 = vsub.f32 %v3964_v10, %v1742_v8 }
 0x735   : > { %v1733_v52 = vpop.xlane.xlu0 %1732 }
 0x736   : > { %2981 = vpow2.f32 %v1791_v58  ;;  %v1763_v62 = vsub.f32 %v1699_v23, %v1733_v52  ;;  %v1793_v13 = vmul.f32 1.442695, %v1766_v42 }
 0x737   : > { %v1736_v36 = vpop.xlane.xlu1 %1735 }
 0x738   : > { %v1787_v39 = vmul.f32 1.442695, %v1763_v62  ;;  %v1764_v1 = vsub.f32 %v1700_v6, %v1736_v36 }
 0x739   : > { %v1751_v3 = vpop.xlane.xlu0 %1750 }
 0x73a   : > { %2983 = vpow2.f32 %v1787_v39  ;;  %v1769_v46 = vsub.f32 %v1705_v35, %v1751_v3  ;;  %v1789_v47 = vmul.f32 1.442695, %v1764_v1 }
 0x73b   : > { %2985 = vpow2.f32 %v1793_v13  ;;  %v1826_v48 = vpop.xlane.xlu1 %1825 }
 0x73c   : > { %v1799_v22 = vmul.f32 1.442695, %v1769_v46 }
 0x73d   : > { %v1745_v59 = vpop.xlane.xlu0 %1744 }
 0x73e   : > { %2987 = vpow2.f32 %v1799_v22  ;;  %v1767_v18 = vsub.f32 %v1703_v44, %v1745_v59 }
 0x73f   : > { %2989 = vpow2.f32 %v1789_v47  ;;  %v1894_v28 = vpop.permute.xlu1 %1893 }
 0x740   : > { %v4026_v21 = vpop.eup %2981  ;;  %v1795_v10 = vmul.f32 1.442695, %v1767_v18 }
 0x741   : > { %v1823_v27 = vpop.xlane.xlu0 %1822  ;;  %v1833_v23 = vsel %vm1110_vm2, %v4026_v21, 0.0 }
 0x742   : > { %2991 = vpow2.f32 %v1795_v10  ;;  %1834 = vadd.xlane.f32.xlu1 %v1833_v23 }
 0x743   : > { %2993 = vrcp.f32 %v1820_v32 }
 0x744   : > { %v4030_v6 = vpop.eup %2983  ;;  %2995 = vrcp.f32 %v1817_v55 }
 0x745   : > { %v1892_v35 = vpop.permute.xlu0 %1891  ;;  %v1827_v38 = vsel %vm1110_vm2, %v4030_v6, 0.0  ;;  %v4034_v60 = vpop.eup %2985  ;;  %2997 = vrcp.f32 %v1823_v27 }
 0x746   : > { %1828 = vadd.xlane.f32.xlu1 %v1827_v38  ;;  %2703 = vmatprep.subr.bf16.mxu1 %v1892_v35  ;;  %v1836_v56 = vsel %vm1110_vm2, %v4034_v60, 0.0  ;;  %2999 = vrcp.f32 %v1826_v48 }
 0x747   : > { %2704 = vmatpush3.bf16.msra.mxu1 %v1892_v35 }
 0x748   : > { %v4036_v7 = vpop.eup %2987  ;;  %2705 = vmatprep.subr.bf16.mxu1 %v1894_v28 }
 0x749   : > { %v1896_v44 = vpop.permute.xlu0 %1895  ;;  %v1845_v4 = vsel %vm1110_vm2, %v4036_v7, 0.0  ;;  %v4042_v19 = vpop.eup %2989 }
 0x74a   : > { %1837 = vadd.xlane.f32.xlu1 %v1836_v56  ;;  %1846 = vadd.xlane.f32.xlu0 %v1845_v4  ;;  %v1830_v49 = vsel %vm1110_vm2, %v4042_v19, 0.0 }
 0x74b   : > { %2706 = vmatpush3.bf16.msra.mxu1 %v1894_v28 }
 0x74c   : > { %v4044_v0 = vpop.eup %2991  ;;  %2707 = vmatprep.subr.bf16.mxu1 %v1896_v44 }
 0x74d   : > { %v1839_v12 = vsel %vm1110_vm2, %v4044_v0, 0.0  ;;  %v2994_v15 = vpop.eup %2993  ;;  %v1898_v40 = vpop.permute.xlu0 %1897 }
 0x74e   : > { %1831 = vadd.xlane.f32.xlu1 %v1830_v49  ;;  %1840 = vadd.xlane.f32.xlu0 %v1839_v12  ;;  %v2996_v20 = vpop.eup %2995  ;;  %v1872_v55 = vmul.f32 %v2994_v15, %v3961_v26 }
 0x74f   : > { %2708 = vmatpush3.bf16.msra.mxu1 %v1896_v44  ;;  %v1871_v32 = vmul.f32 %v2996_v20, %v3952_v53  ;;  %v2998_v30 = vpop.eup %2997 }
 0x750   : > { %2709 = vmatprep.subr.bf16.mxu1 %v1898_v40  ;;  %v3000_v8 = vpop.eup %2999  ;;  %v1873_v58 = vmul.f32 %v2998_v30, %v3996_v5 }
 0x751   : > { %v1885_v17 = vpack.c.bf16 %v1872_v55, %v1871_v32  ;;  %v1874_v42 = vmul.f32 %v3000_v8, %v3988_v33 }
 0x753   : > { %2710 = vmatpush3.bf16.msra.mxu1 %v1898_v40  ;;  %v1886_v52 = vpack.c.bf16 %v1874_v42, %v1873_v58 }
 0x756   : > { %2712 = vmatmul.mubr.msk.bf16.vlgmr.msra.gmra.mrb[16].mxu1 %vm1110_vm2, %v1884_v9 }
 0x757   : > { %2715 = vmatprep.mubr.msk.bf16.mxu1 %vm1110_vm2, %v1885_v17 }
 0x75e   : > { %2716 = vmatmul.mubr.msk.bf16.gmra.mrb[20].mxu1 %vm1110_vm2, %v1886_v52 }
 0x770   : > { %v1754_v26 = vpop.xlane.xlu1 %1753 }
 0x771   : > { %v1770_v53 = vsub.f32 %v4010_v11, %v1754_v26 }
 0x773   : > { %v1801_v62 = vmul.f32 1.442695, %v1770_v53 }
 0x774   : > { %v1748_v36 = vpop.xlane.xlu1 %1747 }
 0x775   : > { %3001 = vpow2.f32 %v1801_v62  ;;  %v1768_v34 = vsub.f32 %v4014_v43, %v1748_v36  ;;  %v2859_v43 = vld [vmem:[%s4195_s6] sm:$0xff]  }
 0x776   : > { %2735 = vmatprep.subr.bf16.mxu1 %v2859_v43 }
 0x777   : > { %v1797_v29 = vmul.f32 1.442695, %v1768_v34  ;;  %2736 = vmatpush3.bf16.msra.mxu1 %v2859_v43 }
 0x778   : > { %v1981_v9 = vpop.permute.xlu1 %1980 }
 0x779   : > { %3003 = vpow2.f32 %v1797_v29  ;;  %2719 = vmatprep.subr.bf16.mxu0 %v1981_v9 }
 0x77a   : > { %2720 = vmatpush3.bf16.msra.mxu0 %v1981_v9 }
 0x77c   : > { %v1983_v13 = vpop.permute.xlu1 %1982 }
 0x77d   : > { %2721 = vmatprep.subr.bf16.mxu0 %v1983_v13 }
 0x77e   : > { %2722 = vmatpush3.bf16.msra.mxu0 %v1983_v13 }
 0x77f   : > { %v3002_v33 = vpop.eup %3001 }
 0x780   : > { %v1848_v5 = vsel %vm1110_vm2, %v3002_v33, 0.0 }
 0x781   : > { %1849 = vadd.xlane.f32.xlu0 %v1848_v5 }
 0x783   : > { %v3004_v39 = vpop.eup %3003 }
 0x784   : > { %v1842_v11 = vsel %vm1110_vm2, %v3004_v39, 0.0 }
 0x785   : > { %1843 = vadd.xlane.f32.xlu1 %v1842_v11 }
 0x796   : > { %1986 = vrot.lane.b32.xlu1 %v3445_v63, %s3065_s18 }
 0x797   : > { %1984 = vrot.lane.b32.xlu0 %v3447_v2, %s3065_s18 }
 0x7cf   : > { %v1835_v1 = vpop.xlane.xlu1 %1834 }
 0x7d3   : > { %v1829_v3 = vpop.xlane.xlu1 %1828 }
 0x7d4   : > { %3005 = vrcp.f32 %v1829_v3 }
 0x7d7   : > { %v1838_v46 = vpop.xlane.xlu1 %1837  ;;  %v1847_v2 = vpop.xlane.xlu0 %1846 }
 0x7db   : > { %v1832_v47 = vpop.xlane.xlu1 %1831  ;;  %v1841_v48 = vpop.xlane.xlu0 %1840 }
 0x7dc   : > { %3007 = vrcp.f32 %v1832_v47 }
 0x7dd   : > { %3009 = vrcp.f32 %v1838_v46 }
 0x7de   : > { %v3006_v22 = vpop.eup %3005  ;;  %3011 = vrcp.f32 %v1835_v1 }
 0x7df   : > { %v1875_v18 = vmul.f32 %v3006_v22, %v4030_v6 }
 0x7e6   : > { %v3008_v59 = vpop.eup %3007 }
 0x7e7   : > { %v1876_v63 = vmul.f32 %v3008_v59, %v4042_v19  ;;  %v3010_v23 = vpop.eup %3009 }
 0x7e8   : > { %v3012_v28 = vpop.eup %3011  ;;  %v1878_v6 = vmul.f32 %v3010_v23, %v4034_v60 }
 0x7e9   : > { %v1887_v10 = vpack.c.bf16 %v1876_v63, %v1875_v18  ;;  %v1877_v56 = vmul.f32 %v3012_v28, %v4026_v21  ;;  %v2860_v21 = vld [vmem:[%s4195_s6 + $0x8] sm:$0xff]  }
 0x7ea   : > { %2737 = vmatprep.subr.bf16.mxu1 %v2860_v21 }
 0x7eb   : > { %2727 = vmatprep.mubr.msk.bf16.mxu0 %vm1110_vm2, %v1887_v10  ;;  %v1888_v4 = vpack.c.bf16 %v1878_v6, %v1877_v56  ;;  %2738 = vmatpush3.bf16.msra.mxu1 %v2860_v21 }
 0x80e   : > { %v1850_v27 = vpop.xlane.xlu0 %1849 }
 0x80f   : > { %3013 = vrcp.f32 %v1850_v27 }
 0x810   : > { %3015 = vrcp.f32 %v1841_v48 }
 0x811   : > { %3017 = vrcp.f32 %v1847_v2 }
 0x812   : > { %v1844_v35 = vpop.xlane.xlu1 %1843  ;;  %v1985_v38 = vpop.permute.xlu0 %1984 }
 0x813   : > { %3019 = vrcp.f32 %v1844_v35  ;;  %2723 = vmatprep.subr.bf16.mxu0 %v1985_v38 }
 0x814   : > { %2724 = vmatpush3.bf16.msra.mxu0 %v1985_v38 }
 0x816   : > { %v1987_v44 = vpop.permute.xlu1 %1986 }
 0x817   : > { %2725 = vmatprep.subr.bf16.mxu0 %v1987_v44 }
 0x818   : > { %2726 = vmatpush3.bf16.msra.mxu0 %v1987_v44 }
 0x819   : > { %v3014_v19 = vpop.eup %3013 }
 0x81a   : > { %v3016_v49 = vpop.eup %3015  ;;  %v1882_v40 = vmul.f32 %v3014_v19, %v3002_v33 }
 0x81b   : > { %2728 = vmatmul.mubr.msk.bf16.vlgmr.msra.gmra.mrb[48].mxu0 %vm1110_vm2, %v1888_v4  ;;  %v3018_v12 = vpop.eup %3017  ;;  %v1879_v20 = vmul.f32 %v3016_v49, %v4044_v0 }
 0x81c   : > { %v1881_v32 = vmul.f32 %v3018_v12, %v4036_v7 }
 0x81d   : > { %v3020_v15 = vpop.eup %3019 }
 0x81e   : > { %v1880_v55 = vmul.f32 %v3020_v15, %v3004_v39  ;;  %v1890_v60 = vpack.c.bf16 %v1882_v40, %v1881_v32 }
 0x820   : > { %v1889_v30 = vpack.c.bf16 %v1880_v55, %v1879_v20 }
 0x822   : > { %2731 = vmatprep.mubr.msk.bf16.mxu0 %vm1110_vm2, %v1889_v30 }
 0x823   : > { %2732 = vmatmul.mubr.msk.bf16.gmra.mrb[52].mxu0 %vm1110_vm2, %v1890_v60 }
 0x829   : > { %v2713_v17 = vpop.f32.mrb[16].mxu1 }
 0x82a   : > { %v1949_v8 = vpop.f32.mrb[17].mxu1 }
 0x82b   : > { %v2714_v58 = vpop.f32.mrb[18].mxu1 }
 0x82c   : > { %v2822_v42 = vpack.i.bf16 %v2714_v58, %v2713_v17  ;;  %v1952_v0 = vpop.f32.mrb[19].mxu1 }
 0x82d   : > { %v2817_v52 = vpack.i.bf16 %v1952_v0, %v1949_v8 }
 0x82e   : > { %2823 = vrot.lane.b32.xlu1 %v2822_v42, %s3066_s26 }
 0x82f   : > { %2818 = vrot.lane.b32.xlu0 %v2817_v52, %s3066_s26 }
 0x831   : > { %v2717_v7 = vpop.f32.mrb[20].mxu1 }
 0x832   : > { %v1965_v26 = vpop.f32.mrb[21].mxu1 }
 0x833   : > { %v2718_v53 = vpop.f32.mrb[22].mxu1 }
 0x834   : > { %v2832_v62 = vpack.i.bf16 %v2718_v53, %v2717_v7  ;;  %v1968_v36 = vpop.f32.mrb[23].mxu1  ;;  %v4208_v7 = vld [vmem:[#allocation4_spill] sm:$0xff] }
 0x835   : > { %v2827_v34 = vpack.i.bf16 %v1968_v36, %v1965_v26 }
 0x836   : > { %2833 = vrot.lane.b32.xlu1 %v2832_v62, %s3066_s26  ;;  %v4210_v62 = vld [vmem:[#allocation5_spill] sm:$0xff] }
 0x837   : > { %2828 = vrot.lane.b32.xlu0 %v2827_v34, %s3066_s26 }
 0x8a0   : > { %v2824_v29 = vpop.permute.xlu1 %2823 }
 0x8a1   : > { %v2826_v9 = vunpack.i.h.bf16 %v2824_v29  ;;  %v2825_v13 = vunpack.i.l.bf16 %v2824_v29  ;;  %v2819_v33 = vpop.permute.xlu0 %2818  ;;  %v2489_v29 = vld [vmem:[%s4196_s7] ss:$0 sm:$0xff] }
 0x8a2   : > { %v2821_v5 = vunpack.i.h.bf16 %v2819_v33  ;;  %v2820_v39 = vunpack.i.l.bf16 %v2819_v33 }
 0x8a3   : > { %v2136_v11 = vsel %vm903_vm1, %v3878_v14, %v2826_v9  ;;  %v2135_v43 = vsel %vm903_vm1, %v3874_v57, %v2825_v13 }
 0x8a4   : > { %v2150_v1 = vpack.c.bf16 %v2136_v11, %v2135_v43  ;;  %v2134_v3 = vsel %vm903_vm1, %v3880_v45, %v2821_v5  ;;  %v2133_v46 = vsel %vm903_vm1, %v3876_v31, %v2820_v39 }
 0x8a5   : > { %v2149_v47 = vpack.c.bf16 %v2134_v3, %v2133_v46 }
 0x8a7   : > { %2739 = vmatprep.mubr.msk.bf16.mxu1 %vm419_vm0, %v2149_v47 }
 0x8a8   : > { %v2834_v22 = vpop.permute.xlu1 %2833  ;;  %2740 = vmatmul.mubr.msk.bf16.vlgmr.msra.gmra.mrb[24].mxu1 %vm419_vm0, %v2150_v1 }
 0x8a9   : > { %v2836_v59 = vunpack.i.h.bf16 %v2834_v22  ;;  %v2835_v18 = vunpack.i.l.bf16 %v2834_v22  ;;  %v2829_v63 = vpop.permute.xlu0 %2828 }
 0x8aa   : > { %v2831_v14 = vunpack.i.h.bf16 %v2829_v63  ;;  %v2830_v10 = vunpack.i.l.bf16 %v2829_v63 }
 0x8ab   : > { %v2140_v57 = vsel %vm903_vm1, %v3886_v25, %v2836_v59  ;;  %v2139_v45 = vsel %vm903_vm1, %v3882_v61, %v2835_v18 }
 0x8ac   : > { %v2152_v2 = vpack.c.bf16 %v2140_v57, %v2139_v45  ;;  %v2138_v31 = vsel %vm903_vm1, %v3888_v51, %v2831_v14  ;;  %v2137_v48 = vsel %vm903_vm1, %v3884_v37, %v2830_v10 }
 0x8ad   : > { %v2151_v27 = vpack.c.bf16 %v2138_v31, %v2137_v48 }
 0x8af   : > { %2743 = vmatprep.mubr.msk.bf16.mxu1 %vm419_vm0, %v2151_v27 }
 0x8b0   : > { %2744 = vmatmul.mubr.msk.bf16.gmra.mrb[28].mxu1 %vm419_vm0, %v2152_v2 }
 0x8ee   : > { %v2729_v23 = vpop.f32.mrb[48].mxu0 }
 0x8ef   : > { %v2038_v35 = vpop.f32.mrb[49].mxu0 }
 0x8f0   : > { %v2730_v38 = vpop.f32.mrb[50].mxu0 }
 0x8f1   : > { %v2842_v28 = vpack.i.bf16 %v2730_v38, %v2729_v23  ;;  %v2041_v25 = vpop.f32.mrb[51].mxu0 }
 0x8f2   : > { %v2837_v6 = vpack.i.bf16 %v2041_v25, %v2038_v35 }
 0x8f3   : > { %2843 = vrot.lane.b32.xlu1 %v2842_v28, %s3066_s26 }
 0x8f4   : > { %2838 = vrot.lane.b32.xlu0 %v2837_v6, %s3066_s26 }
 0x8f6   : > { %v2733_v61 = vpop.f32.mrb[52].mxu0 }
 0x8f7   : > { %v2054_v51 = vpop.f32.mrb[53].mxu0 }
 0x8f8   : > { %v2734_v44 = vpop.f32.mrb[54].mxu0 }
 0x8f9   : > { %v2852_v56 = vpack.i.bf16 %v2734_v44, %v2733_v61  ;;  %v2057_v37 = vpop.f32.mrb[55].mxu0 }
 0x8fa   : > { %v2847_v4 = vpack.i.bf16 %v2057_v37, %v2054_v51 }
 0x8fb   : > { %2853 = vrot.lane.b32.xlu1 %v2852_v56, %s3066_s26 }
 0x8fc   : > { %2848 = vrot.lane.b32.xlu0 %v2847_v4, %s3066_s26 }
 0x965   : > { %v2844_v19 = vpop.permute.xlu1 %2843 }
 0x966   : > { %v2846_v49 = vunpack.i.h.bf16 %v2844_v19  ;;  %v2845_v12 = vunpack.i.l.bf16 %v2844_v19  ;;  %v2839_v15 = vpop.permute.xlu0 %2838 }
 0x967   : > { %v2841_v40 = vunpack.i.h.bf16 %v2839_v15  ;;  %v2840_v20 = vunpack.i.l.bf16 %v2839_v15 }
 0x968   : > { %v2144_v55 = vsel %vm903_vm1, %v3894_v41, %v2846_v49  ;;  %v2143_v32 = vsel %vm903_vm1, %v3890_v24, %v2845_v12 }
 0x969   : > { %v2154_v30 = vpack.c.bf16 %v2144_v55, %v2143_v32  ;;  %v2142_v60 = vsel %vm903_vm1, %v3896_v54, %v2841_v40  ;;  %v2141_v21 = vsel %vm903_vm1, %v3892_v50, %v2840_v20  ;;  %v4209_v50 = vld [vmem:[#allocation6_spill] sm:$0xff] }
 0x96a   : > { %v2153_v17 = vpack.c.bf16 %v2142_v60, %v2141_v21 }
 0x96c   : > { %2747 = vmatprep.mubr.msk.bf16.mxu1 %vm419_vm0, %v2153_v17 }
 0x96d   : > { %v2854_v8 = vpop.permute.xlu1 %2853  ;;  %2748 = vmatmul.mubr.msk.bf16.gmra.mrb[32].mxu1 %vm419_vm0, %v2154_v30 }
 0x96e   : > { %v2856_v58 = vunpack.i.h.bf16 %v2854_v8  ;;  %v2855_v42 = vunpack.i.l.bf16 %v2854_v8  ;;  %v2849_v41 = vpop.permute.xlu0 %2848 }
 0x96f   : > { %v2851_v0 = vunpack.i.h.bf16 %v2849_v41  ;;  %v2850_v52 = vunpack.i.l.bf16 %v2849_v41 }
 0x970   : > { %v2148_v24 = vsel %vm903_vm1, %v3938_v16, %v2856_v58  ;;  %v2147_v54 = vsel %vm903_vm1, %v4208_v7, %v2855_v42 }
 0x971   : > { %v2156_v26 = vpack.c.bf16 %v2148_v24, %v2147_v54  ;;  %v2146_v53 = vsel %vm903_vm1, %v4209_v50, %v2851_v0  ;;  %v2145_v36 = vsel %vm903_vm1, %v4210_v62, %v2850_v52 }
 0x972   : > { %v2155_v34 = vpack.c.bf16 %v2146_v53, %v2145_v36 }
 0x974   : > { %2751 = vmatprep.mubr.msk.bf16.mxu1 %vm419_vm0, %v2155_v34 }
 0x975   : > { %2752 = vmatmul.mubr.msk.bf16.gmra.mrb[36].mxu1 %vm419_vm0, %v2156_v26 }
 0x97b   : > { %v2741_v16 = vpop.f32.mrb[24].mxu1 }
 0x97c   : > { %v2247_v9 = vadd.f32 %v2741_v16, %v2489_v29  ;;  %v2238_v13 = vpop.f32.mrb[25].mxu1 }
 0x97d   : > { %v2239_v33 = vadd.f32 %v2489_v29, %v2238_v13  ;;  %v2742_v5 = vpop.f32.mrb[26].mxu1 }
 0x97e   : > { %2305 = vst.msk [vmem:[%s4140_s17 + $0x20] sm:$0xff] %vm419_vm0, %v2247_v9  ;;  %v2250_v39 = vadd.f32 %v2742_v5, %v2489_v29  ;;  %v2241_v11 = vpop.f32.mrb[27].mxu1 }
 0x97f   : > { %2301 = vst.msk [vmem:[%s4140_s17] sm:$0xff] %vm419_vm0, %v2239_v33  ;;  %v2242_v43 = vadd.f32 %v2489_v29, %v2241_v11 }
 0x980   : > { %2307 = vst.msk [vmem:[%s4140_s17 + $0x30] sm:$0xff] %vm419_vm0, %v2250_v39 }
 0x981   : > { %2303 = vst.msk [vmem:[%s4140_s17 + $0x10] sm:$0xff] %vm419_vm0, %v2242_v43 }
 0x983   : > { %v2745_v1 = vpop.f32.mrb[28].mxu1 }
 0x984   : > { %v2263_v3 = vadd.f32 %v2745_v1, %v2489_v29  ;;  %v2254_v46 = vpop.f32.mrb[29].mxu1 }
 0x985   : > { %v2255_v47 = vadd.f32 %v2489_v29, %v2254_v46  ;;  %v2746_v22 = vpop.f32.mrb[30].mxu1 }
 0x986   : > { %2313 = vst.msk [vmem:[%s4140_s17 + $0x60] sm:$0xff] %vm419_vm0, %v2263_v3  ;;  %v2266_v59 = vadd.f32 %v2746_v22, %v2489_v29  ;;  %v2257_v18 = vpop.f32.mrb[31].mxu1 }
 0x987   : > { %2309 = vst.msk [vmem:[%s4140_s17 + $0x40] sm:$0xff] %vm419_vm0, %v2255_v47  ;;  %v2258_v63 = vadd.f32 %v2489_v29, %v2257_v18 }
 0x988   : > { %2315 = vst.msk [vmem:[%s4140_s17 + $0x70] sm:$0xff] %vm419_vm0, %v2266_v59 }
 0x989   : > { %2311 = vst.msk [vmem:[%s4140_s17 + $0x50] sm:$0xff] %vm419_vm0, %v2258_v63 }
 0xa40   : > { %v2749_v14 = vpop.f32.mrb[32].mxu1 }
 0xa41   : > { %v2279_v10 = vadd.f32 %v2749_v14, %v2489_v29  ;;  %v2270_v57 = vpop.f32.mrb[33].mxu1 }
 0xa42   : > { %v2271_v45 = vadd.f32 %v2489_v29, %v2270_v57  ;;  %v2750_v2 = vpop.f32.mrb[34].mxu1 }
 0xa43   : > { %2306 = vst.msk [vmem:[%s4140_s17 + $0x28] sm:$0xff] %vm419_vm0, %v2279_v10  ;;  %v2282_v31 = vadd.f32 %v2750_v2, %v2489_v29  ;;  %v2273_v48 = vpop.f32.mrb[35].mxu1 }
 0xa44   : > { %2302 = vst.msk [vmem:[%s4140_s17 + $0x8] sm:$0xff] %vm419_vm0, %v2271_v45  ;;  %v2274_v27 = vadd.f32 %v2489_v29, %v2273_v48 }
 0xa45   : > { %2308 = vst.msk [vmem:[%s4140_s17 + $0x38] sm:$0xff] %vm419_vm0, %v2282_v31 }
 0xa46   : > { %2304 = vst.msk [vmem:[%s4140_s17 + $0x18] sm:$0xff] %vm419_vm0, %v2274_v27 }
 0xa48   : > { %v2753_v23 = vpop.f32.mrb[36].mxu1 }
 0xa49   : > { %v2295_v35 = vadd.f32 %v2753_v23, %v2489_v29  ;;  %v2286_v38 = vpop.f32.mrb[37].mxu1 }
 0xa4a   : > { %v2287_v28 = vadd.f32 %v2489_v29, %v2286_v38  ;;  %v2754_v25 = vpop.f32.mrb[38].mxu1 }
 0xa4b   : > { %2314 = vst.msk [vmem:[%s4140_s17 + $0x68] sm:$0xff] %vm419_vm0, %v2295_v35  ;;  %v2298_v6 = vadd.f32 %v2754_v25, %v2489_v29  ;;  %v2289_v61 = vpop.f32.mrb[39].mxu1 }
 0xa4c   : > { %2310 = vst.msk [vmem:[%s4140_s17 + $0x48] sm:$0xff] %vm419_vm0, %v2287_v28  ;;  %v2290_v51 = vadd.f32 %v2489_v29, %v2289_v61 }
 0xa4d   : > { %2316 = vst.msk [vmem:[%s4140_s17 + $0x78] sm:$0xff] %vm419_vm0, %v2298_v6 }
 0xa4e   : > { %2312 = vst.msk [vmem:[%s4140_s17 + $0x58] sm:$0xff] %vm419_vm0, %v2290_v51 }
 0xa4f PF: > { %s19_s13 = sadd.s32 1, %s3059_s13   ;;  %s4211_s30 = smov %s3051_s11 }
 0xa50   : > { %p16_p8 = scmp.ge.s32.totalorder %s19_s13, 6   ;;  %s4212_s10 = smov %s3055_s12 }
 0xa51   : > { %s4213_s11 = smov %s4216_s14  ;;  %s4214_s12 = smov %s4220_s15 }
 0xa52   :  { %18 = sbr.rel (!%p16_p8) target bundleno = 3 (0x3), region = 89 }

</bundles_post_ra>
